<compile_context>
chip_gen: v6e
topology: v6e:2x2x1
jax: 0.10.0
libtpu: 0.0.40
codegen_flags: <defaults>
</compile_context>

<pallas_src>
import jax
import jax.numpy as jnp
from jax.experimental import pallas as pl
from jax.experimental.pallas import tpu as pltpu


def _mock_module_kernel(x_ref, o_ref):
    v = x_ref[...]
    # for _ in range(10): x = torch.sin(x)
    for _ in range(10):
        v = jnp.sin(v)
    # torch._foobar(x) returns its input unchanged (identity test op): no-op.
    # for _ in range(10): x = torch.cos(x)
    for _ in range(10):
        v = jnp.cos(v)
    o_ref[...] = v


def mock_module_forward(x, *, lane=512, max_block_rows=1024):
    """Pallas implementation of MockModule.forward for an arbitrary-shape input."""
    orig_shape = x.shape
    orig_dtype = x.dtype
    n = x.size
    itemsize = jnp.dtype(orig_dtype).itemsize
    # dtype-specific sublane multiple: f32 -> 8, bf16 -> 16, int8/fp8 -> 32
    sub = {4: 8, 2: 16, 1: 32}.get(itemsize, 8)

    # Rows of a lane-dense (rows, lane) slab, rounded up to the sublane multiple.
    rows = pl.cdiv(n, lane)
    rows = ((rows + sub - 1) // sub) * sub

    # Row-tile size: large for pipelining, but bounded; keep it a multiple of `sub`
    # and make the padded row count divide evenly into tiles.
    tr = min(max_block_rows, rows)
    tr = ((tr + sub - 1) // sub) * sub
    rows = ((rows + tr - 1) // tr) * tr
    pad_to = rows * lane

    x_flat = jnp.ravel(x)
    if pad_to != n:
        x_flat = jnp.pad(x_flat, (0, pad_to - n))
    x2d = x_flat.reshape(rows, lane)

    grid = (rows // tr,)
    out2d = pl.pallas_call(
        _mock_module_kernel,
        out_shape=jax.ShapeDtypeStruct((rows, lane), orig_dtype),
        grid=grid,
        in_specs=[pl.BlockSpec((tr, lane), lambda i: (i, 0))],
        out_specs=pl.BlockSpec((tr, lane), lambda i: (i, 0)),
        compiler_params=pltpu.CompilerParams(
            dimension_semantics=("parallel",),
        ),
        cost_estimate=pl.CostEstimate(
            flops=20 * n,
            transcendentals=20 * n,
            bytes_accessed=2 * n * itemsize,
        ),
    )(x2d)

    out_flat = out2d.reshape(-1)
    if pad_to != n:
        out_flat = out_flat[:n]
    return out_flat.reshape(orig_shape)


if __name__ == "__main__":
    key = jax.random.PRNGKey(0)
    # Small NCHW input consistent with a generic module forward.
    x = jax.random.normal(key, (2, 4, 16, 16), dtype=jnp.float32)

    out = mock_module_forward(x)
    jax.block_until_ready(out)

    # Reference check in plain JAX.
    ref = x
    for _ in range(10):
        ref = jnp.sin(ref)
    for _ in range(10):
        ref = jnp.cos(ref)
    assert out.shape == x.shape and out.dtype == x.dtype
    # 20 chained transcendentals: allow a slightly looser tolerance for
    # Mosaic-vs-XLA polynomial differences.
    assert jnp.allclose(out, ref, atol=1e-5, rtol=1e-5)

    print("KERNEL_OK")
</pallas_src>

<mosaic_0001>
module attributes {stable_mosaic.version = 11 : i64} {
  func.func @_mock_module_kernel(%arg0: i32, %arg1: memref<8x512xf32, #tpu.memory_space<vmem>>, %arg2: memref<8x512xf32, #tpu.memory_space<vmem>>) attributes {dimension_semantics = [#tpu.dimension_semantics<parallel>], iteration_bounds = array<i64: 1>, scalar_prefetch = 0 : i64, scratch_operands = 0 : i64, tpu.core_type = #tpu.core_type<tc>, window_params = [{transform_indices = @transform_0, window_bounds = array<i64: 8, 512>}, {transform_indices = @transform_1, window_bounds = array<i64: 8, 512>}]} {
    %c0 = arith.constant 0 : index
    %c0_0 = arith.constant 0 : index
    %0 = vector.load %arg1[%c0, %c0_0] : memref<8x512xf32, #tpu.memory_space<vmem>>, vector<8x512xf32>
    %1 = math.sin %0 : vector<8x512xf32>
    %2 = math.sin %1 : vector<8x512xf32>
    %3 = math.sin %2 : vector<8x512xf32>
    %4 = math.sin %3 : vector<8x512xf32>
    %5 = math.sin %4 : vector<8x512xf32>
    %6 = math.sin %5 : vector<8x512xf32>
    %7 = math.sin %6 : vector<8x512xf32>
    %8 = math.sin %7 : vector<8x512xf32>
    %9 = math.sin %8 : vector<8x512xf32>
    %10 = math.sin %9 : vector<8x512xf32>
    %11 = math.cos %10 : vector<8x512xf32>
    %12 = math.cos %11 : vector<8x512xf32>
    %13 = math.cos %12 : vector<8x512xf32>
    %14 = math.cos %13 : vector<8x512xf32>
    %15 = math.cos %14 : vector<8x512xf32>
    %16 = math.cos %15 : vector<8x512xf32>
    %17 = math.cos %16 : vector<8x512xf32>
    %18 = math.cos %17 : vector<8x512xf32>
    %19 = math.cos %18 : vector<8x512xf32>
    %20 = math.cos %19 : vector<8x512xf32>
    %c0_1 = arith.constant 0 : index
    %c0_2 = arith.constant 0 : index
    %21 = vector.load %arg2[%c0_1, %c0_2] : memref<8x512xf32, #tpu.memory_space<vmem>>, vector<8x512xf32>
    tpu.vector_store %arg2[%c0_1, %c0_2], %20 {strides = array<i32>} : memref<8x512xf32, #tpu.memory_space<vmem>>, vector<8x512xf32>,
    return
  }
  func.func @transform_0(%arg0: i32) -> (i32, i32) {
    %c0_i32 = arith.constant 0 : i32
    %c0_i32_0 = arith.constant 0 : i32
    return %arg0, %c0_i32 : i32, i32
  }
  func.func @transform_1(%arg0: i32) -> (i32, i32) {
    %c0_i32 = arith.constant 0 : i32
    %c0_i32_0 = arith.constant 0 : i32
    return %arg0, %c0_i32 : i32, i32
  }
}

</mosaic_0001>

<bundles_post_ra>
// kernel: tpu_custom_call.1
= control target key start
LH: loop header
LB: loop body
LE: loop exit
PB: predicated region body
PF: predicated region fallthrough
CT: control target
= control target key end

     0   :  { %6 = vsyncpa [#allocation3], 0  ;;  %s14677_s0 = inlined_call_operand.hbm [shape: f32[8,512], index: 0, kind: input, shape index: {}]   ;;  %s14678_s1 = inlined_call_operand.hbm [shape: f32[8,512], index: 1, kind: output, shape index: {}]  }
   0x1   :  { %7 = vsyncpa [#allocation4], 0  ;;  %s9336_s6 = smov [#allocation2]  }
   0x2   :  { %s14_s7 = sshll.u32 %s9336_s6, 4  ;;  %s15_s7 = int_to_ptr.vmem [resolvable:$true] %s14_s7 }
   0x3   :  { %s9300_s8 = scalar_lea.vmem %s15_s7, 512  ;;  %p9305_p1 = scmp.lt.s32.totalorder %s15_s7, %s15_s7 }
   0x4   :  { %p9301_p0 = scmp.ne.s32.totalorder %s15_s7, %s9300_s8  ;;  %p9306_p2 = scmp.lt.s32.totalorder %s9300_s8, %s9300_s8 }
   0x6   :  { %p9307_p3 = por %p9306_p2, %p9305_p1 }
   0x8   :  { %p9308_p4 = pnand %p9307_p3, %p9301_p0 }
   0xa   :  { %9311 = shalt.err (!%p9308_p4)
}
   0xb   :  { %17 = dma.hbm_to_vmem [thread:$0]  %s14677_s0, 512, %s15_s7, [#allocation3]  }
   0xc   :  { %9332 = dma.done.wait [#allocation3], 512  }
   0xd   :  { %9333 = vsyncadd [#allocation3], 4294966784  ;;  %v9357_v0 = vld [vmem:[#allocation2] sm:$0xff]  ;;  %v9359_v1 = vld [vmem:[#allocation2 + $0x8] sm:$0xff]  ;;  %v9337_v30 = vmov 683565275  }
   0xe   :  { %v9361_v2 = vld [vmem:[#allocation2 + $0x10] sm:$0xff]  ;;  %v25_v3 = vand.u32 2147483647, %v9357_v0  ;;  %v28_v4 = vand.u32 2139095040, %v9357_v0  ;;  %v129_v5 = vand.u32 2147483647, %v9359_v1 }
   0xf   :  { %v132_v6 = vand.u32 2139095040, %v9359_v1  ;;  %v236_v11 = vand.u32 2139095040, %v9361_v2  ;;  %v233_v24 = vand.u32 2147483647, %v9361_v2  ;;  %v9338_v32 = vmov 2475754826  }
  0x10   :  { %v29_v7 = vshrl.u32 %v28_v4, 23  ;;  %v32_v8 = vand.u32 8388607, %v25_v3  ;;  %v136_v10 = vand.u32 8388607, %v129_v5  ;;  %vm27_vm14 = vcmp.lt.s32.totalorder %v9357_v0, 0 }
  0x11   :  { %v133_v9 = vshrl.u32 %v132_v6, 23  ;;  %v237_v14 = vshrl.u32 %v236_v11, 23  ;;  %v9339_v34 = vmov 2131351028   ;;  %v9340_v36 = vmov 2102212464  }
  0x12   :  { %v8324_v12 = vadd.s32 4294967169, %v29_v7  ;;  %v33_v16 = vor.u32 8388608, %v32_v8  ;;  %v137_v17 = vor.u32 8388608, %v136_v10  ;;  %v9341_v38 = vmov 920167782   ;;  %s9343_s0 = smov [#allocation5]  }
  0x13   :  { %v8328_v13 = vadd.s32 4294967169, %v133_v9  ;;  %v8332_v19 = vadd.s32 4294967169, %v237_v14  ;;  %v9342_v46 = vmov 1326507024   ;;  %s8315_s11 = sshll.u32 %s9343_s0, 4  ;;  %s8316_s11 = int_to_ptr.vmem [resolvable:$true] %s8315_s11 }
  0x14   :  { %v35_v15 = vadd.s32 1, %v8324_v12  ;;  %v9373_v25 = vshll.u32 %v33_v16, 8  ;;  %v9375_v27 = vshll.u32 %v137_v17, 8  ;;  %s9312_s12 = scalar_lea.vmem %s8316_s11, 512  ;;  %p9317_p6 = scmp.lt.s32.totalorder %s8316_s11, %s8316_s11 }
  0x15   :  { %v139_v18 = vadd.s32 1, %v8328_v13  ;;  %v9377_v28 = vadd.s32 1, %v8332_v19  ;;  %p9313_p5 = scmp.ne.s32.totalorder %s8316_s11, %s9312_s12  ;;  %p9318_p7 = scmp.lt.s32.totalorder %s9312_s12, %s9312_s12 }
  0x16   :  { %vm36_vm0 = vcmp.gt.s32.totalorder %v35_v15, 0 }
  0x17   :  { %v37_v20 = vsel %vm36_vm0, %v35_v15, 0  ;;  %vm140_vm1 = vcmp.gt.s32.totalorder %v139_v18, 0  ;;  %vm244_vm6 = vcmp.gt.s32.totalorder %v9377_v28, 0  ;;  %p9319_p8 = por %p9318_p7, %p9317_p6 }
  0x18   :  { %v38_v21 = vshrl.u32 %v37_v20, 5  ;;  %v39_v22 = vand.u32 31, %v37_v20  ;;  %v141_v23 = vsel %vm140_vm1, %v139_v18, 0 }
  0x19   :  { %v143_v26 = vand.u32 31, %v141_v23  ;;  %v9384_v40 = vshrl.u32 %v141_v23, 5  ;;  %p9320_p9 = pnand %p9319_p8, %p9313_p5 }
  0x1a   :  { %v40_v29 = vsub.s32 32, %v39_v22  ;;  %v42_v31 = vshll.u32 %v9337_v30, %v39_v22  ;;  %v45_v33 = vshll.u32 %v9338_v32, %v39_v22  ;;  %v48_v35 = vshll.u32 %v9339_v34, %v39_v22 }
  0x1b   :  { %v51_v37 = vshll.u32 %v9340_v36, %v39_v22  ;;  %v54_v39 = vshll.u32 %v9341_v38, %v39_v22  ;;  %vm57_vm2 = vcmp.lt.s32.totalorder %v38_v21, 1  ;;  %vm58_vm3 = vcmp.lt.s32.totalorder %v38_v21, 2 }
  0x1c   :  { %v41_v41 = vshrl.u32 %v9337_v30, %v40_v29  ;;  %v43_v42 = vshrl.u32 %v9338_v32, %v40_v29  ;;  %v46_v43 = vshrl.u32 %v9339_v34, %v40_v29  ;;  %v49_v44 = vshrl.u32 %v9340_v36, %v40_v29 }
  0x1d   :  { %v52_v45 = vshrl.u32 %v9341_v38, %v40_v29  ;;  %v55_v47 = vshrl.u32 %v9342_v46, %v40_v29  ;;  %vm60_vm4 = vcmp.lt.s32.totalorder %v38_v21, 4  ;;  %v144_v51 = vsub.s32 32, %v143_v26 }
  0x1e   :  { %v44_v48 = vor.u32 %v43_v42, %v42_v31  ;;  %v47_v49 = vor.u32 %v46_v43, %v45_v33  ;;  %v50_v50 = vor.u32 %v49_v44, %v48_v35  ;;  %vm59_vm5 = vcmp.lt.s32.totalorder %v38_v21, 3 }
  0x1f   :  { %v53_v52 = vor.u32 %v52_v45, %v51_v37  ;;  %v56_v53 = vor.u32 %v55_v47, %v54_v39  ;;  %v146_v54 = vshll.u32 %v9337_v30, %v143_v26  ;;  %v149_v62 = vshll.u32 %v9338_v32, %v143_v26 }
  0x20   :  { %v61_v55 = vsel %vm57_vm2, %v41_v41, %v44_v48  ;;  %v62_v56 = vsel %vm60_vm4, %v50_v50, 2102212464  ;;  %v65_v57 = vsel %vm57_vm2, %v44_v48, %v47_v49  ;;  %v69_v58 = vsel %vm57_vm2, %v47_v49, %v50_v50 }
  0x21   :  { %v63_v59 = vsel %vm59_vm5, %v47_v49, %v62_v56  ;;  %v66_v60 = vsel %vm60_vm4, %v53_v52, 920167782  ;;  %v70_v61 = vsel %vm60_vm4, %v56_v53, 1326507024  ;;  %v145_v6 = vshrl.u32 %v9337_v30, %v144_v51 }
  0x22   :  { %v67_v63 = vsel %vm59_vm5, %v50_v50, %v66_v60  ;;  %v71_v4 = vsel %vm59_vm5, %v53_v52, %v70_v61  ;;  %v147_v7 = vshrl.u32 %v9338_v32, %v144_v51  ;;  %v64_v8 = vsel %vm58_vm3, %v61_v55, %v63_v59  ;;  %v9448_v60 = vld [vmem:[#allocation2 + $0x18] sm:$0xff] }
  0x23   :  { %v68_v9 = vsel %vm58_vm3, %v65_v57, %v67_v63  ;;  %v72_v10 = vsel %vm58_vm3, %v69_v58, %v71_v4  ;;  %v150_v11 = vshrl.u32 %v9339_v34, %v144_v51  ;;  %v152_v18 = vshll.u32 %v9339_v34, %v143_v26 }
  0x24   :  { %v9405_v12 = vmul.u32.u64.low %v9373_v25, %v72_v10  ;;  %v9406_v13 = vmul.u32.u64.high %v9373_v25, %v72_v10, %v9405_v12  ;;  %v9409_v14 = vmul.u32.u64.low %v9373_v25, %v68_v9  ;;  %v9410_v15 = vmul.u32.u64.high %v9373_v25, %v68_v9, %v9409_v14 }
  0x25   :  { %v148_v16 = vor.u32 %v147_v7, %v146_v54  ;;  %v151_v17 = vor.u32 %v150_v11, %v149_v62  ;;  %v153_v19 = vshrl.u32 %v9340_v36, %v144_v51  ;;  %v155_v20 = vshll.u32 %v9340_v36, %v143_v26 }
  0x26   :  { %v156_v21 = vshrl.u32 %v9341_v38, %v144_v51  ;;  %v158_v22 = vshll.u32 %v9341_v38, %v143_v26  ;;  %v159_v23 = vshrl.u32 %v9342_v46, %v144_v51  ;;  %v80_v29 = vmul.u32 %v9373_v25, %v64_v8 }
  0x27   :  { %v154_v31 = vor.u32 %v153_v19, %v152_v18  ;;  %vm161_vm7 = vcmp.lt.s32.totalorder %v9384_v40, 1  ;;  %vm162_vm8 = vcmp.lt.s32.totalorder %v9384_v40, 2  ;;  %vm82_vm9 = vc.u32 %v9406_v13, %v9409_v14 }
  0x28   :  { %v83_v33 = vadd.s32 1, %v9410_v15  ;;  %v157_v35 = vor.u32 %v156_v21, %v155_v20  ;;  %vm163_vm10 = vcmp.lt.s32.totalorder %v9384_v40, 3  ;;  %v160_v37 = vor.u32 %v159_v23, %v158_v22 }
  0x29   :  { %vm164_vm11 = vcmp.lt.s32.totalorder %v9384_v40, 4  ;;  %v165_v26 = vsel %vm161_vm7, %v145_v6, %v148_v16  ;;  %v169_v39 = vsel %vm161_vm7, %v148_v16, %v151_v17  ;;  %v173_v43 = vsel %vm161_vm7, %v151_v17, %v154_v31 }
  0x2a   :  { %v84_v25 = vsel %vm82_vm9, %v83_v33, %v9410_v15  ;;  %v166_v41 = vsel %vm164_vm11, %v154_v31, 2102212464  ;;  %v170_v42 = vsel %vm164_vm11, %v157_v35, 920167782  ;;  %v174_v48 = vsel %vm164_vm11, %v160_v37, 1326507024 }
  0x2b   :  { %v85_v44 = vadd.s32 %v84_v25, %v80_v29  ;;  %v167_v45 = vsel %vm163_vm10, %v151_v17, %v166_v41  ;;  %v171_v47 = vsel %vm163_vm10, %v154_v31, %v170_v42  ;;  %v175_v51 = vsel %vm163_vm10, %v157_v35, %v174_v48 }
  0x2c   :  { %v168_v49 = vsel %vm162_vm8, %v165_v26, %v167_v45  ;;  %v172_v50 = vsel %vm162_vm8, %v169_v39, %v171_v47  ;;  %v245_v52 = vsel %vm244_vm6, %v9377_v28, 0  ;;  %v176_v54 = vsel %vm162_vm8, %v173_v43, %v175_v51 }
  0x2d   :  { %v86_v53 = vadd.s32 536870912, %v85_v44  ;;  %v9438_v55 = vmul.u32.u64.low %v9375_v27, %v172_v50  ;;  %v9439_v56 = vmul.u32.u64.high %v9375_v27, %v172_v50, %v9438_v55  ;;  %v240_v59 = vand.u32 8388607, %v233_v24 }
  0x2e   :  { %v9443_v57 = vmul.u32.u64.low %v9375_v27, %v176_v54  ;;  %v9444_v58 = vmul.u32.u64.high %v9375_v27, %v176_v54, %v9443_v57  ;;  %v247_v28 = vand.u32 31, %v245_v52  ;;  %v184_v40 = vmul.u32 %v9375_v27, %v168_v49 }
  0x2f   :  { %v9450_v61 = vshrl.u32 %v86_v53, 30  ;;  %v187_v63 = vadd.s32 1, %v9439_v56  ;;  %v241_v6 = vor.u32 8388608, %v240_v59  ;;  %v340_v7 = vand.u32 2139095040, %v9448_v60 }
  0x30   :  { %v248_v4 = vsub.s32 32, %v247_v28  ;;  %vm186_vm12 = vc.u32 %v9444_v58, %v9438_v55  ;;  %v9461_v10 = vshrl.u32 %v245_v52, 5  ;;  %v337_v11 = vand.u32 2147483647, %v9448_v60 }
  0x31   :  { %v88_v62 = vshll.u32 %v9450_v61, 30  ;;  %v188_v9 = vsel %vm186_vm12, %v187_v63, %v9439_v56  ;;  %v250_v12 = vshll.u32 %v9337_v30, %v247_v28  ;;  %v253_v16 = vshll.u32 %v9338_v32, %v247_v28 }
  0x32   :  { %v189_v27 = vadd.s32 %v188_v9, %v184_v40  ;;  %v251_v15 = vshrl.u32 %v9338_v32, %v248_v4  ;;  %v254_v18 = vshrl.u32 %v9339_v34, %v248_v4  ;;  %v256_v19 = vshll.u32 %v9339_v34, %v247_v28 }
  0x33   :  { %v9458_v8 = vsub.s32 %v85_v44, %v88_v62  ;;  %v257_v20 = vshrl.u32 %v9340_v36, %v248_v4  ;;  %v259_v22 = vshll.u32 %v9340_v36, %v247_v28  ;;  %v9472_v23 = vshll.u32 %v241_v6, 8 }
  0x34   :  { %v190_v21 = vadd.s32 536870912, %v189_v27  ;;  %v341_v29 = vshrl.u32 %v340_v7, 23  ;;  %v81_v31 = vadd.s32 %v9409_v14, %v9406_v13  ;;  %v260_v35 = vshrl.u32 %v9341_v38, %v248_v4 }
  0x35   :  { %v91_v17 = vsub.s32 0, %v9458_v8  ;;  %vm268_vm13 = vcmp.lt.s32.totalorder %v9461_v10, 4  ;;  %v249_v26 = vshrl.u32 %v9337_v30, %v248_v4  ;;  %v262_v39 = vshll.u32 %v9341_v38, %v247_v28 }
  0x36   :  { %v9479_v37 = vshrl.u32 %v190_v21, 30  ;;  %v263_v25 = vshrl.u32 %v9342_v46, %v248_v4  ;;  %v252_v42 = vor.u32 %v251_v15, %v250_v12  ;;  %v255_v43 = vor.u32 %v254_v18, %v253_v16 }
  0x37   :  { %v8325_v33 = vmin.u32 %v91_v17, %v9458_v8  ;;  %v258_v13 = vor.u32 %v257_v20, %v256_v19  ;;  %v261_v44 = vor.u32 %v260_v35, %v259_v22  ;;  %vm265_vm15 = vcmp.lt.s32.totalorder %v9461_v10, 1 }
  0x38   :  { %v192_v14 = vshll.u32 %v9479_v37, 30  ;;  %vm267_vm0 = vcmp.lt.s32.totalorder %v9461_v10, 3  ;;  %v264_v47 = vor.u32 %v263_v25, %v262_v39  ;;  %v8336_v49 = vadd.s32 4294967169, %v341_v29 }
  0x39   :  { %v93_v41 = vclz %v8325_v33  ;;  %v270_v48 = vsel %vm268_vm13, %v258_v13, 2102212464  ;;  %v111_v50 = vsub.s32 4, %v9450_v61  ;;  %vm266_vm1 = vcmp.lt.s32.totalorder %v9461_v10, 2 }
  0x3a   :  { %v9491_v51 = vsub.s32 %v189_v27, %v192_v14  ;;  %v274_v52 = vsel %vm268_vm13, %v261_v44, 920167782  ;;  %v269_v53 = vsel %vm265_vm15, %v249_v26, %v252_v42  ;;  %v273_v54 = vsel %vm265_vm15, %v252_v42, %v255_v43 }
  0x3b   :  { %v8326_v45 = vadd.s32 4294967294, %v93_v41  ;;  %v275_v56 = vsel %vm267_vm0, %v258_v13, %v274_v52  ;;  %v271_v28 = vsel %vm267_vm0, %v255_v43, %v270_v48  ;;  %v277_v40 = vsel %vm265_vm15, %v255_v43, %v258_v13 }
  0x3c   :  { %v195_v59 = vsub.s32 0, %v9491_v51  ;;  %v278_v6 = vsel %vm268_vm13, %v264_v47, 1326507024  ;;  %v276_v9 = vsel %vm266_vm1, %v273_v54, %v275_v56  ;;  %v9517_v12 = vand.u32 8388607, %v337_v11 }
  0x3d   :  { %vm8327_vm2 = vcmp.lt.s32.totalorder %v8326_v45, 0  ;;  %v279_v27 = vsel %vm267_vm0, %v261_v44, %v278_v6  ;;  %v347_v17 = vadd.s32 1, %v8336_v49  ;;  %vm9523_vm3 = vcmp.le.f32.partialorder %v25_v3, 0.7853982 }
  0x3e   :  { %v96_v57 = vsel %vm8327_vm2, 0, %v8326_v45  ;;  %v8329_v7 = vmin.u32 %v195_v59, %v9491_v51  ;;  %v112_v19 = vsel %vm27_vm14, %v111_v50, %v9450_v61  ;;  %v272_v21 = vsel %vm266_vm1, %v269_v53, %v271_v28 }
  0x3f   :  { %v97_v62 = vsub.s32 32, %v96_v57  ;;  %v98_v63 = vshll.u32 %v9458_v8, %v96_v57  ;;  %v101_v4 = vsub.s32 4294967266, %v96_v57  ;;  %v280_v8 = vsel %vm266_vm1, %v277_v40, %v279_v27 }
  0x40   :  { %v197_v20 = vclz %v8329_v7  ;;  %v9537_v3 = vmul.u32.u64.low %v9472_v23, %v276_v9  ;;  %v9538_v26 = vmul.u32.u64.high %v9472_v23, %v276_v9, %v9537_v3  ;;  %vm348_vm4 = vcmp.gt.s32.totalorder %v347_v17, 0 }
  0x41   :  { %v99_v15 = vshrl.u32 %v81_v31, %v97_v62  ;;  %v102_v16 = vadd.s32 127, %v101_v4  ;;  %v9533_v31 = vmul.u32.u64.low %v9472_v23, %v280_v8  ;;  %v9534_v33 = vmul.u32.u64.high %v9472_v23, %v280_v8, %v9533_v31 }
  0x42   :  { %v8330_v35 = vadd.s32 4294967294, %v197_v20  ;;  %v345_v61 = vor.u32 8388608, %v9517_v12  ;;  %v349_v41 = vsel %vm348_vm4, %v347_v17, 0  ;;  %v114_v10 = vsel %vm9523_vm3, 0, %v112_v19 }
  0x43   :  { %v100_v22 = vor.u32 %v99_v15, %v98_v63  ;;  %v103_v29 = vshll.u32 %v102_v16, 23  ;;  %v185_v42 = vadd.s32 %v9438_v55, %v9444_v58  ;;  %v351_v43 = vand.u32 31, %v349_v41 }
  0x44   :  { %vm8331_vm5 = vcmp.lt.s32.totalorder %v8330_v35, 0  ;;  %v288_v44 = vmul.u32 %v9472_v23, %v272_v21  ;;  %vm290_vm6 = vc.u32 %v9534_v33, %v9537_v3  ;;  %v291_v49 = vadd.s32 1, %v9538_v26 }
  0x45   :  { %v104_v39 = vor.u32 4788187, %v103_v29  ;;  %v107_v25 = vcvt.s32.f32 %v100_v22  ;;  %v200_v14 = vsel %vm8331_vm5, 0, %v8330_v35  ;;  %v118_v52 = vadd.s32 3, %v114_v10 }
  0x46   :  { %v201_v45 = vsub.s32 32, %v200_v14  ;;  %v202_v47 = vshll.u32 %v9491_v51, %v200_v14  ;;  %v205_v48 = vsub.s32 4294967266, %v200_v14  ;;  %v9551_v53 = vshrl.u32 %v349_v41, 5 }
  0x47   :  { %v105_v13 = vand.u32 2147483647, %v104_v39  ;;  %v352_v55 = vsub.s32 32, %v351_v43  ;;  %v292_v56 = vsel %vm290_vm6, %v291_v49, %v9538_v26  ;;  %v354_v23 = vshll.u32 %v9337_v30, %v351_v43 }
  0x48   :  { %v203_v58 = vshrl.u32 %v185_v42, %v201_v45  ;;  %v206_v54 = vadd.s32 127, %v205_v48  ;;  %vm131_vm7 = vcmp.lt.s32.totalorder %v9359_v1, 0  ;;  %v293_v59 = vadd.s32 %v292_v56, %v288_v44 }
  0x49   :  { %v108_v50 = vmul.f32 %v107_v25, %v105_v13  ;;  %v355_v51 = vshrl.u32 %v9338_v32, %v352_v55  ;;  %v357_v28 = vshll.u32 %v9338_v32, %v351_v43  ;;  %vm9560_vm8 = vcmp.le.f32.partialorder %v129_v5, 0.7853982 }
  0x4a   :  { %v204_v62 = vor.u32 %v203_v58, %v202_v47  ;;  %v207_v63 = vshll.u32 %v206_v54, 23  ;;  %v358_v4 = vshrl.u32 %v9339_v34, %v352_v55  ;;  %v360_v6 = vshll.u32 %v9339_v34, %v351_v43 }
  0x4b   :  { %v109_v57 = vxor.u32 2147483648, %v108_v50  ;;  %v294_v9 = vadd.s32 536870912, %v293_v59  ;;  %v361_v27 = vshrl.u32 %v9340_v36, %v352_v55  ;;  %v363_v12 = vshll.u32 %v9340_v36, %v351_v43 }
  0x4c   :  { %v208_v15 = vor.u32 4788187, %v207_v63  ;;  %v211_v16 = vcvt.s32.f32 %v204_v62  ;;  %v356_v8 = vor.u32 %v355_v51, %v354_v23  ;;  %v359_v19 = vor.u32 %v358_v4, %v357_v28 }
  0x4d   :  { %v110_v7 = vsel %vm27_vm14, %v109_v57, %v108_v50  ;;  %v9573_v17 = vshrl.u32 %v294_v9, 30  ;;  %v364_v20 = vshrl.u32 %v9341_v38, %v352_v55  ;;  %v366_v22 = vshll.u32 %v9341_v38, %v351_v43 }
  0x4e   :  { %v113_v5 = vsel %vm9523_vm3, %v9357_v0, %v110_v7  ;;  %v209_v21 = vand.u32 2147483647, %v208_v15  ;;  %v367_v29 = vshrl.u32 %v9342_v46, %v352_v55  ;;  %v215_v31 = vsub.s32 4, %v9479_v37 }
  0x4f   :  { %8972 = vcosq.f32 %v113_v5  ;;  %v296_v18 = vshll.u32 %v9573_v17, 30  ;;  %v365_v35 = vor.u32 %v364_v20, %v363_v12  ;;  %vm369_vm9 = vcmp.lt.s32.totalorder %v9551_v53, 1 }
  0x50   :  { %8974 = vsinq.f32 %v113_v5  ;;  %v212_v26 = vmul.f32 %v211_v16, %v209_v21  ;;  %v353_v39 = vshrl.u32 %v9337_v30, %v352_v55  ;;  %v362_v25 = vor.u32 %v361_v27, %v360_v6 }
  0x51   :  { %v385_v41 = vshll.u32 %v345_v61, 8  ;;  %v297_v10 = vsub.s32 %v293_v59, %v296_v18  ;;  %v368_v42 = vor.u32 %v367_v29, %v366_v22  ;;  %vm371_vm10 = vcmp.lt.s32.totalorder %v9551_v53, 3 }
  0x52   :  { %vm372_vm11 = vcmp.lt.s32.totalorder %v9551_v53, 4  ;;  %v213_v43 = vxor.u32 2147483648, %v212_v26  ;;  %vm370_vm12 = vcmp.lt.s32.totalorder %v9551_v53, 2  ;;  %v377_v14 = vsel %vm369_vm9, %v356_v8, %v359_v19 }
  0x53   :  { %v374_v13 = vsel %vm372_vm11, %v362_v25, 2102212464  ;;  %v119_v44 = vand.u32 3, %v118_v52  ;;  %v216_v61 = vsel %vm131_vm7, %v215_v31, %v9479_v37  ;;  %v299_v45 = vsub.s32 0, %v297_v10 }
  0x54   :  { %v378_v47 = vsel %vm372_vm11, %v365_v35, 920167782  ;;  %v214_v48 = vsel %vm131_vm7, %v213_v43, %v212_v26  ;;  %v373_v49 = vsel %vm369_vm9, %v353_v39, %v356_v8  ;;  %v375_v50 = vsel %vm371_vm10, %v359_v19, %v374_v13 }
  0x55   :  { %v379_v52 = vsel %vm371_vm10, %v362_v25, %v378_v47  ;;  %v217_v37 = vsel %vm9560_vm8, %v9359_v1, %v214_v48  ;;  %v8333_v55 = vmin.u32 %v299_v45, %v297_v10  ;;  %v381_v54 = vsel %vm369_vm9, %v359_v19, %v362_v25 }
  0x56   :  { %v380_v58 = vsel %vm370_vm12, %v377_v14, %v379_v52  ;;  %8976 = vcosq.f32 %v217_v37  ;;  %v382_v56 = vsel %vm372_vm11, %v368_v42, 1326507024  ;;  %v218_v59 = vsel %vm9560_vm8, 0, %v216_v61 }
  0x57   :  { %v9611_v23 = vmul.u32.u64.low %v385_v41, %v380_v58  ;;  %v9612_v57 = vmul.u32.u64.high %v385_v41, %v380_v58, %v9611_v23  ;;  %8978 = vsinq.f32 %v217_v37  ;;  %v301_v51 = vclz %v8333_v55 }
  0x58   :  { %vm117_vm13 = vweird.f32 %v9357_v0  ;;  %v383_v28 = vsel %vm371_vm10, %v365_v35, %v382_v56  ;;  %vm121_vm14 = vcmp.eq.s32.totalorder %v119_v44, 0  ;;  %v376_v63 = vsel %vm370_vm12, %v373_v49, %v375_v50 }
  0x59   :  { %v8334_v62 = vadd.s32 4294967294, %v301_v51  ;;  %v384_v4 = vsel %vm370_vm12, %v381_v54, %v383_v28  ;;  %vm124_vm15 = vcmp.eq.s32.totalorder %v119_v44, 2  ;;  %v222_v7 = vadd.s32 3, %v218_v59 }
  0x5a   :  { %v9624_v40 = vmul.u32.u64.low %v385_v41, %v384_v4  ;;  %v9625_v9 = vmul.u32.u64.high %v385_v41, %v384_v4, %v9624_v40  ;;  %v289_v5 = vadd.s32 %v9537_v3, %v9534_v33  ;;  %v395_v15 = vadd.s32 1, %v9612_v57 }
  0x5b   :  { %vm8335_vm0 = vcmp.lt.s32.totalorder %v8334_v62, 0  ;;  %vm120_vm1 = vcmp.lt.s32.totalorder %v119_v44, 2  ;;  %v392_v19 = vmul.u32 %v385_v41, %v376_v63  ;;  %v223_v31 = vand.u32 3, %v222_v7 }
  0x5c   :  { %v8973_v6 = vpop.eup %8972  ;;  %v304_v8 = vsel %vm8335_vm0, 0, %v8334_v62  ;;  %v319_v18 = vsub.s32 4, %v9573_v17  ;;  %vm394_vm2 = vc.u32 %v9625_v9, %v9611_v23  ;;  %vm9642_vm3 = vcmp.le.f32.partialorder %v233_v24, 0.7853982 }
  0x5d   :  { %v8975_v27 = vpop.eup %8974  ;;  %v125_v12 = vxor.u32 2147483648, %v8973_v6  ;;  %v305_v20 = vsub.s32 32, %v304_v8  ;;  %v306_v21 = vshll.u32 %v297_v10, %v304_v8  ;;  %v309_v22 = vsub.s32 4294967266, %v304_v8 }
  0x5e   :  { %v122_v16 = vxor.u32 2147483648, %v8975_v27  ;;  %v396_v26 = vsel %vm394_vm2, %v395_v15, %v9612_v57  ;;  %vm235_vm4 = vcmp.lt.s32.totalorder %v9361_v2, 0  ;;  %vm228_vm5 = vcmp.eq.s32.totalorder %v223_v31, 2 }
  0x5f   :  { %v126_v53 = vsel %vm124_vm15, %v125_v12, %v8975_v27  ;;  %v307_v3 = vshrl.u32 %v289_v5, %v305_v20  ;;  %v310_v35 = vadd.s32 127, %v309_v22  ;;  %v397_v25 = vadd.s32 %v396_v26, %v392_v19 }
  0x60   :  { %v123_v29 = vsel %vm121_vm14, %v8973_v6, %v122_v16  ;;  %v320_v45 = vsel %vm235_vm4, %v319_v18, %v9573_v17  ;;  %vm225_vm6 = vcmp.eq.s32.totalorder %v223_v31, 0  ;;  %vm224_vm7 = vcmp.lt.s32.totalorder %v223_v31, 2 }
  0x61   :  { %v127_v33 = vsel %vm120_vm1, %v123_v29, %v126_v53  ;;  %v308_v41 = vor.u32 %v307_v3, %v306_v21  ;;  %v311_v10 = vshll.u32 %v310_v35, 23  ;;  %v398_v13 = vadd.s32 536870912, %v397_v25 }
  0x62   :  { %v9637_v39 = vsel %vm117_vm13, nan, %v127_v33  ;;  %v322_v58 = vsel %vm9642_vm3, 0, %v320_v45  ;;  %vm221_vm8 = vweird.f32 %v9359_v1  ;;  %v393_v15 = vadd.s32 %v9611_v23, %v9625_v9 }
  0x63   :  { %v441_v42 = vand.u32 2147483647, %v9637_v39  ;;  %v444_v14 = vand.u32 2139095040, %v9637_v39  ;;  %v8977_v44 = vpop.eup %8976  ;;  %v312_v0 = vor.u32 4788187, %v311_v10  ;;  %v315_v61 = vcvt.s32.f32 %v308_v41 }
  0x64   :  { %v8979_v47 = vpop.eup %8978  ;;  %v229_v48 = vxor.u32 2147483648, %v8977_v44  ;;  %v9651_v24 = vshrl.u32 %v398_v13, 30  ;;  %v326_v63 = vadd.s32 3, %v322_v58  ;;  %vm339_vm0 = vcmp.lt.s32.totalorder %v9448_v60, 0 }
  0x65   :  { %v445_v49 = vshrl.u32 %v444_v14, 23  ;;  %v226_v50 = vxor.u32 2147483648, %v8979_v47  ;;  %v313_v52 = vand.u32 2147483647, %v312_v0  ;;  %v448_v37 = vand.u32 8388607, %v441_v42 }
  0x66   :  { %v230_v55 = vsel %vm228_vm5, %v229_v48, %v8979_v47  ;;  %v400_v54 = vshll.u32 %v9651_v24, 30  ;;  %v9666_v1 = vand.u32 3, %v326_v63  ;;  %vm325_vm1 = vweird.f32 %v9361_v2 }
  0x67   :  { %v8340_v56 = vadd.s32 4294967169, %v445_v49  ;;  %v227_v17 = vsel %vm225_vm6, %v8977_v44, %v226_v50  ;;  %v316_v57 = vmul.f32 %v315_v61, %v313_v52  ;;  %v449_v4 = vor.u32 8388608, %v448_v37 }
  0x68   :  { %v231_v59 = vsel %vm224_vm7, %v227_v17, %v230_v55  ;;  %v401_v51 = vsub.s32 %v397_v25, %v400_v54  ;;  %vm332_vm15 = vcmp.eq.s32.totalorder %v9666_v1, 2  ;;  %vm328_vm6 = vcmp.lt.s32.totalorder %v9666_v1, 2 }
  0x69   :  { %v451_v28 = vadd.s32 1, %v8340_v56  ;;  %v317_v62 = vxor.u32 2147483648, %v316_v57  ;;  %v9659_v7 = vsel %vm221_vm8, nan, %v231_v59  ;;  %v9670_v8 = vshll.u32 %v449_v4, 8 }
  0x6a   :  { %v403_v6 = vsub.s32 0, %v401_v51  ;;  %v548_v20 = vand.u32 2139095040, %v9659_v7 }
  0x6b   :  { %vm452_vm9 = vcmp.gt.s32.totalorder %v451_v28, 0  ;;  %v318_v40 = vsel %vm235_vm4, %v317_v62, %v316_v57  ;;  %vm9720_vm4 = vcmp.le.f32.partialorder %v337_v11, 0.7853982 }
  0x6c   :  { %v453_v27 = vsel %vm452_vm9, %v451_v28, 0  ;;  %v321_v12 = vsel %vm9642_vm3, %v9361_v2, %v318_v40  ;;  %v8337_v5 = vmin.u32 %v403_v6, %v401_v51  ;;  %v549_v48 = vshrl.u32 %v548_v20, 23 }
  0x6d   :  { %v455_v16 = vand.u32 31, %v453_v27  ;;  %8980 = vcosq.f32 %v321_v12  ;;  %v454_v53 = vshrl.u32 %v453_v27, 5  ;;  %v545_v27 = vand.u32 2147483647, %v9659_v7 }
  0x6e   :  { %v405_v19 = vclz %v8337_v5  ;;  %8982 = vsinq.f32 %v321_v12  ;;  %v8344_v63 = vadd.s32 4294967169, %v549_v48  ;;  %vm329_vm3 = vcmp.eq.s32.totalorder %v9666_v1, 0 }
  0x6f   :  { %v456_v21 = vsub.s32 32, %v455_v16  ;;  %v458_v22 = vshll.u32 %v9337_v30, %v455_v16  ;;  %v461_v29 = vshll.u32 %v9338_v32, %v455_v16  ;;  %v464_v18 = vshll.u32 %v9339_v34, %v455_v16 }
  0x70   :  { %v8338_v31 = vadd.s32 4294967294, %v405_v19  ;;  %v467_v33 = vshll.u32 %v9340_v36, %v455_v16  ;;  %v470_v23 = vshll.u32 %v9341_v38, %v455_v16  ;;  %vm473_vm11 = vcmp.lt.s32.totalorder %v454_v53, 1 }
  0x71   :  { %v457_v9 = vshrl.u32 %v9337_v30, %v456_v21  ;;  %v459_v3 = vshrl.u32 %v9338_v32, %v456_v21  ;;  %v462_v35 = vshrl.u32 %v9339_v34, %v456_v21  ;;  %v465_v26 = vshrl.u32 %v9340_v36, %v456_v21 }
  0x72   :  { %vm8339_vm10 = vcmp.lt.s32.totalorder %v8338_v31, 0  ;;  %v468_v25 = vshrl.u32 %v9341_v38, %v456_v21  ;;  %v471_v41 = vshrl.u32 %v9342_v46, %v456_v21  ;;  %vm475_vm12 = vcmp.lt.s32.totalorder %v454_v53, 3 }
  0x73   :  { %v408_v10 = vsel %vm8339_vm10, 0, %v8338_v31  ;;  %v460_v43 = vor.u32 %v459_v3, %v458_v22  ;;  %v463_v13 = vor.u32 %v462_v35, %v461_v29  ;;  %v466_v14 = vor.u32 %v465_v26, %v464_v18 }
  0x74   :  { %v409_v44 = vsub.s32 32, %v408_v10  ;;  %v410_v0 = vshll.u32 %v401_v51, %v408_v10  ;;  %v413_v61 = vsub.s32 4294967266, %v408_v10  ;;  %v469_v45 = vor.u32 %v468_v25, %v467_v33 }
  0x75   :  { %v472_v47 = vor.u32 %v471_v41, %v470_v23  ;;  %vm476_vm13 = vcmp.lt.s32.totalorder %v454_v53, 4  ;;  %vm474_vm14 = vcmp.lt.s32.totalorder %v454_v53, 2  ;;  %v477_v37 = vsel %vm473_vm11, %v457_v9, %v460_v43 }
  0x76   :  { %v411_v49 = vshrl.u32 %v393_v15, %v409_v44  ;;  %v414_v50 = vadd.s32 127, %v413_v61  ;;  %v478_v52 = vsel %vm476_vm13, %v466_v14, 2102212464  ;;  %v481_v58 = vsel %vm473_vm11, %v460_v43, %v463_v13 }
  0x77   :  { %v479_v55 = vsel %vm475_vm12, %v463_v13, %v478_v52  ;;  %v482_v54 = vsel %vm476_vm13, %v469_v45, 920167782  ;;  %v485_v59 = vsel %vm473_vm11, %v463_v13, %v466_v14  ;;  %v423_v51 = vsub.s32 4, %v9651_v24 }
  0x78   :  { %v412_v56 = vor.u32 %v411_v49, %v410_v0  ;;  %v415_v17 = vshll.u32 %v414_v50, 23  ;;  %v483_v57 = vsel %vm475_vm12, %v466_v14, %v482_v54  ;;  %v486_v62 = vsel %vm476_vm13, %v472_v47, 1326507024 }
  0x79   :  { %v484_v28 = vsel %vm474_vm14, %v481_v58, %v483_v57  ;;  %v487_v40 = vsel %vm475_vm12, %v469_v45, %v486_v62  ;;  %v480_v5 = vsel %vm474_vm14, %v477_v37, %v479_v55  ;;  %v555_v31 = vadd.s32 1, %v8344_v63 }
  0x7a   :  { %v416_v4 = vor.u32 4788187, %v415_v17  ;;  %v419_v6 = vcvt.s32.f32 %v412_v56  ;;  %v8981_v12 = vpop.eup %8980  ;;  %v488_v15 = vsel %vm474_vm14, %v485_v59, %v487_v40  ;;  %v424_v53 = vsel %vm339_vm0, %v423_v51, %v9651_v24 }
  0x7b   :  { %v9699_v16 = vmul.u32.u64.low %v9670_v8, %v484_v28  ;;  %v9700_v19 = vmul.u32.u64.high %v9670_v8, %v484_v28, %v9699_v16  ;;  %v8983_v20 = vpop.eup %8982  ;;  %v9704_v22 = vmul.u32.u64.low %v9670_v8, %v488_v15  ;;  %v9705_v29 = vmul.u32.u64.high %v9670_v8, %v488_v15, %v9704_v22 }
  0x7c   :  { %v417_v21 = vand.u32 2147483647, %v416_v4  ;;  %v333_v18 = vxor.u32 2147483648, %v8981_v12  ;;  %v496_v23 = vmul.u32 %v9670_v8, %v480_v5  ;;  %v330_v9 = vxor.u32 2147483648, %v8983_v20 }
  0x7d   :  { %v499_v3 = vadd.s32 1, %v9700_v19  ;;  %v552_v35 = vand.u32 8388607, %v545_v27  ;;  %vm556_vm2 = vcmp.gt.s32.totalorder %v555_v31, 0  ;;  %vm498_vm5 = vc.u32 %v9705_v29, %v9699_v16 }
  0x7e   :  { %v420_v33 = vmul.f32 %v419_v6, %v417_v21  ;;  %v426_v8 = vsel %vm9720_vm4, 0, %v424_v53  ;;  %v557_v41 = vsel %vm556_vm2, %v555_v31, 0  ;;  %v334_v10 = vsel %vm332_vm15, %v333_v18, %v8983_v20 }
  0x7f   :  { %v500_v25 = vsel %vm498_vm5, %v499_v3, %v9700_v19  ;;  %v559_v13 = vand.u32 31, %v557_v41  ;;  %v331_v14 = vsel %vm329_vm3, %v8981_v12, %v330_v9  ;;  %v553_v0 = vor.u32 8388608, %v552_v35 }
  0x80   :  { %v421_v24 = vxor.u32 2147483648, %v420_v33  ;;  %v501_v43 = vadd.s32 %v500_v25, %v496_v23  ;;  %v558_v61 = vshrl.u32 %v557_v41, 5  ;;  %v335_v37 = vsel %vm328_vm6, %v331_v14, %v334_v10 }
  0x81   :  { %v560_v47 = vsub.s32 32, %v559_v13  ;;  %v562_v48 = vshll.u32 %v9337_v30, %v559_v13  ;;  %v565_v49 = vshll.u32 %v9338_v32, %v559_v13  ;;  %v568_v50 = vshll.u32 %v9339_v34, %v559_v13 }
  0x82   :  { %v422_v11 = vsel %vm339_vm0, %v421_v24, %v420_v33  ;;  %v502_v45 = vadd.s32 536870912, %v501_v43  ;;  %v571_v52 = vshll.u32 %v9340_v36, %v559_v13  ;;  %v574_v57 = vshll.u32 %v9341_v38, %v559_v13 }
  0x83   :  { %v425_v44 = vsel %vm9720_vm4, %v9448_v60, %v422_v11  ;;  %v563_v58 = vshrl.u32 %v9338_v32, %v560_v47  ;;  %v566_v54 = vshrl.u32 %v9339_v34, %v560_v47  ;;  %v569_v56 = vshrl.u32 %v9340_v36, %v560_v47 }
  0x84   :  { %8984 = vcosq.f32 %v425_v44  ;;  %v9743_v55 = vshrl.u32 %v502_v45, 30  ;;  %v572_v17 = vshrl.u32 %v9341_v38, %v560_v47  ;;  %v575_v59 = vshrl.u32 %v9342_v46, %v560_v47 }
  0x85   :  { %8986 = vsinq.f32 %v425_v44  ;;  %v430_v51 = vadd.s32 3, %v426_v8  ;;  %v564_v62 = vor.u32 %v563_v58, %v562_v48  ;;  %v567_v1 = vor.u32 %v566_v54, %v565_v49 }
  0x86   :  { %v504_v28 = vshll.u32 %v9743_v55, 30  ;;  %v570_v63 = vor.u32 %v569_v56, %v568_v50  ;;  %v573_v4 = vor.u32 %v572_v17, %v571_v52  ;;  %v576_v6 = vor.u32 %v575_v59, %v574_v57 }
  0x87   :  { %vm577_vm7 = vcmp.lt.s32.totalorder %v558_v61, 1  ;;  %v9754_v40 = vsel %vm325_vm1, nan, %v335_v37  ;;  %v561_v5 = vshrl.u32 %v9337_v30, %v560_v47  ;;  %vm579_vm8 = vcmp.lt.s32.totalorder %v558_v61, 3 }
  0x88   :  { %v505_v12 = vsub.s32 %v501_v43, %v504_v28  ;;  %vm578_vm9 = vcmp.lt.s32.totalorder %v558_v61, 2  ;;  %vm580_vm10 = vcmp.lt.s32.totalorder %v558_v61, 4  ;;  %v585_v15 = vsel %vm577_vm7, %v564_v62, %v567_v1 }
  0x89   :  { %v593_v19 = vshll.u32 %v553_v0, 8  ;;  %v582_v21 = vsel %vm580_vm10, %v570_v63, 2102212464  ;;  %v586_v22 = vsel %vm580_vm10, %v573_v4, 920167782  ;;  %v431_v31 = vand.u32 3, %v430_v51 }
  0x8a   :  { %v507_v20 = vsub.s32 0, %v505_v12  ;;  %v587_v18 = vsel %vm579_vm8, %v570_v63, %v586_v22  ;;  %v590_v33 = vsel %vm580_vm10, %v576_v6, 1326507024  ;;  %v652_v2 = vand.u32 2139095040, %v9754_v40 }
  0x8b   :  { %v581_v23 = vsel %vm577_vm7, %v561_v5, %v564_v62  ;;  %v588_v9 = vsel %vm578_vm9, %v585_v15, %v587_v18  ;;  %v589_v3 = vsel %vm577_vm7, %v567_v1, %v570_v63  ;;  %v583_v35 = vsel %vm579_vm8, %v567_v1, %v582_v21 }
  0x8c   :  { %v8341_v53 = vmin.u32 %v507_v20, %v505_v12  ;;  %v591_v26 = vsel %vm579_vm8, %v573_v4, %v590_v33  ;;  %v9765_v24 = vmul.u32.u64.low %v593_v19, %v588_v9  ;;  %v9766_v8 = vmul.u32.u64.high %v593_v19, %v588_v9, %v9765_v24 }
  0x8d   :  { %v592_v10 = vsel %vm578_vm9, %v589_v3, %v591_v26  ;;  %v649_v11 = vand.u32 2147483647, %v9754_v40  ;;  %v653_v43 = vshrl.u32 %v652_v2, 23  ;;  %v584_v44 = vsel %vm578_vm9, %v581_v23, %v583_v35 }
  0x8e   :  { %v509_v25 = vclz %v8341_v53  ;;  %v9772_v0 = vmul.u32.u64.low %v593_v19, %v592_v10  ;;  %v9773_v45 = vmul.u32.u64.high %v593_v19, %v592_v10, %v9772_v0  ;;  %vm433_vm11 = vcmp.eq.s32.totalorder %v431_v31, 0 }
  0x8f   :  { %v8348_v49 = vadd.s32 4294967169, %v653_v43  ;;  %vm436_vm12 = vcmp.eq.s32.totalorder %v431_v31, 2  ;;  %v497_v50 = vadd.s32 %v9699_v16, %v9705_v29  ;;  %v603_v52 = vadd.s32 1, %v9766_v8 }
  0x90   :  { %v8342_v14 = vadd.s32 4294967294, %v509_v25  ;;  %vm432_vm14 = vcmp.lt.s32.totalorder %v431_v31, 2  ;;  %v600_v58 = vmul.u32 %v593_v19, %v584_v44  ;;  %v656_v57 = vand.u32 8388607, %v649_v11 }
  0x91   :  { %v8985_v41 = vpop.eup %8984  ;;  %v659_v54 = vadd.s32 1, %v8348_v49  ;;  %vm602_vm15 = vc.u32 %v9773_v45, %v9765_v24  ;;  %vm429_vm1 = vweird.f32 %v9448_v60  ;;  %vm443_vm2 = vcmp.lt.s32.totalorder %v9637_v39, 0 }
  0x92   :  { %v8987_v13 = vpop.eup %8986  ;;  %v437_v48 = vxor.u32 2147483648, %v8985_v41  ;;  %vm8343_vm13 = vcmp.lt.s32.totalorder %v8342_v14, 0  ;;  %v604_v28 = vsel %vm602_vm15, %v603_v52, %v9766_v8  ;;  %vm9788_vm3 = vcmp.le.f32.partialorder %v441_v42, 0.7853982 }
  0x93   :  { %v434_v47 = vxor.u32 2147483648, %v8987_v13  ;;  %v512_v37 = vsel %vm8343_vm13, 0, %v8342_v14  ;;  %vm660_vm0 = vcmp.gt.s32.totalorder %v659_v54, 0  ;;  %v605_v1 = vadd.s32 %v604_v28, %v600_v58 }
  0x94   :  { %v513_v61 = vsub.s32 32, %v512_v37  ;;  %v514_v56 = vshll.u32 %v505_v12, %v512_v37  ;;  %v517_v17 = vsub.s32 4294967266, %v512_v37  ;;  %v438_v51 = vsel %vm436_vm12, %v437_v48, %v8987_v13 }
  0x95   :  { %v435_v59 = vsel %vm433_vm11, %v8985_v41, %v434_v47  ;;  %v661_v62 = vsel %vm660_vm0, %v659_v54, 0  ;;  %v527_v5 = vsub.s32 4, %v9743_v55  ;;  %v657_v15 = vor.u32 8388608, %v656_v57 }
  0x96   :  { %v515_v16 = vshrl.u32 %v497_v50, %v513_v61  ;;  %v518_v29 = vadd.s32 127, %v517_v17  ;;  %v663_v63 = vand.u32 31, %v661_v62  ;;  %v439_v19 = vsel %vm432_vm14, %v435_v59, %v438_v51 }
  0x97   :  { %v606_v20 = vadd.s32 536870912, %v605_v1  ;;  %v662_v21 = vshrl.u32 %v661_v62, 5  ;;  %v528_v25 = vsel %vm443_vm2, %v527_v5, %v9743_v55  ;;  %v9809_v43 = vshll.u32 %v657_v15, 8 }
  0x98   :  { %v516_v6 = vor.u32 %v515_v16, %v514_v56  ;;  %v519_v12 = vshll.u32 %v518_v29, 23  ;;  %v664_v22 = vsub.s32 32, %v663_v63  ;;  %v666_v2 = vshll.u32 %v9337_v30, %v663_v63 }
  0x99   :  { %v675_v53 = vshll.u32 %v9340_v36, %v663_v63  ;;  %v9796_v42 = vshrl.u32 %v606_v20, 30  ;;  %v669_v9 = vshll.u32 %v9338_v32, %v663_v63  ;;  %v672_v31 = vshll.u32 %v9339_v34, %v663_v63 }
  0x9a   :  { %v520_v18 = vor.u32 4788187, %v519_v12  ;;  %v523_v33 = vcvt.s32.f32 %v516_v6  ;;  %v667_v23 = vshrl.u32 %v9338_v32, %v664_v22  ;;  %v670_v3 = vshrl.u32 %v9339_v34, %v664_v22 }
  0x9b   :  { %v673_v26 = vshrl.u32 %v9340_v36, %v664_v22  ;;  %v676_v8 = vshrl.u32 %v9341_v38, %v664_v22  ;;  %v608_v41 = vshll.u32 %v9796_v42, 30  ;;  %v678_v10 = vshll.u32 %v9341_v38, %v663_v63 }
  0x9c   :  { %v521_v35 = vand.u32 2147483647, %v520_v18  ;;  %v665_v14 = vshrl.u32 %v9337_v30, %v664_v22  ;;  %v679_v0 = vshrl.u32 %v9342_v46, %v664_v22  ;;  %v9815_v47 = vsel %vm429_vm1, nan, %v439_v19 }
  0x9d   :  { %v677_v44 = vor.u32 %v676_v8, %v675_v53  ;;  %v609_v48 = vsub.s32 %v605_v1, %v608_v41  ;;  %v668_v49 = vor.u32 %v667_v23, %v666_v2  ;;  %v671_v50 = vor.u32 %v670_v3, %v669_v9 }
  0x9e   :  { %v524_v13 = vmul.f32 %v523_v33, %v521_v35  ;;  %v674_v52 = vor.u32 %v673_v26, %v672_v31  ;;  %vm681_vm4 = vcmp.lt.s32.totalorder %v662_v21, 1  ;;  %vm682_vm5 = vcmp.lt.s32.totalorder %v662_v21, 2 }
  0x9f   :  { %v611_v37 = vsub.s32 0, %v609_v48  ;;  %v680_v58 = vor.u32 %v679_v0, %v678_v10  ;;  %vm683_vm6 = vcmp.lt.s32.totalorder %v662_v21, 3  ;;  %vm684_vm7 = vcmp.lt.s32.totalorder %v662_v21, 4 }
  0xa0   :  { %v525_v55 = vxor.u32 2147483648, %v524_v13  ;;  %v685_v61 = vsel %vm681_vm4, %v665_v14, %v668_v49  ;;  %v686_v60 = vsel %vm684_vm7, %v674_v52, 2102212464  ;;  %v690_v56 = vsel %vm684_vm7, %v677_v44, 920167782 }
  0xa1   :  { %v8345_v57 = vmin.u32 %v611_v37, %v609_v48  ;;  %v687_v59 = vsel %vm683_vm6, %v671_v50, %v686_v60  ;;  %v689_v51 = vsel %vm681_vm4, %v668_v49, %v671_v50  ;;  %v691_v16 = vsel %vm683_vm6, %v674_v52, %v690_v56 }
  0xa2   :  { %v526_v54 = vsel %vm443_vm2, %v525_v55, %v524_v13  ;;  %v756_v29 = vand.u32 2139095040, %v9815_v47  ;;  %v530_v28 = vsel %vm9788_vm3, 0, %v528_v25  ;;  %v693_v1 = vsel %vm681_vm4, %v671_v50, %v674_v52 }
  0xa3   :  { %v529_v17 = vsel %vm9788_vm3, %v9637_v39, %v526_v54  ;;  %v613_v62 = vclz %v8345_v57  ;;  %v688_v63 = vsel %vm682_vm5, %v685_v61, %v687_v59  ;;  %v692_v6 = vsel %vm682_vm5, %v689_v51, %v691_v16 }
  0xa4   :  { %8988 = vcosq.f32 %v529_v17  ;;  %v694_v12 = vsel %vm684_vm7, %v680_v58, 1326507024  ;;  %v9837_v19 = vmul.u32.u64.low %v9809_v43, %v692_v6  ;;  %v9838_v20 = vmul.u32.u64.high %v9809_v43, %v692_v6, %v9837_v19 }
  0xa5   :  { %8990 = vsinq.f32 %v529_v17  ;;  %v8346_v5 = vadd.s32 4294967294, %v613_v62  ;;  %v695_v15 = vsel %vm683_vm6, %v677_v44, %v694_v12  ;;  %v534_v4 = vadd.s32 3, %v530_v28 }
  0xa6   :  { %v696_v22 = vsel %vm682_vm5, %v693_v1, %v695_v15  ;;  %v757_v18 = vshrl.u32 %v756_v29, 23  ;;  %v601_v33 = vadd.s32 %v9765_v24, %v9773_v45  ;;  %v704_v9 = vmul.u32 %v9809_v43, %v688_v63 }
  0xa7   :  { %vm8347_vm8 = vcmp.lt.s32.totalorder %v8346_v5, 0  ;;  %v9845_v2 = vmul.u32.u64.low %v9809_v43, %v696_v22  ;;  %v9846_v53 = vmul.u32.u64.high %v9809_v43, %v696_v22, %v9845_v2  ;;  %v707_v8 = vadd.s32 1, %v9838_v20 }
  0xa8   :  { %v616_v23 = vsel %vm8347_vm8, 0, %v8346_v5  ;;  %v8352_v3 = vadd.s32 4294967169, %v757_v18  ;;  %v535_v25 = vand.u32 3, %v534_v4  ;;  %v753_v45 = vand.u32 2147483647, %v9815_v47 }
  0xa9   :  { %v617_v35 = vsub.s32 32, %v616_v23  ;;  %v618_v31 = vshll.u32 %v609_v48, %v616_v23  ;;  %v621_v26 = vsub.s32 4294967266, %v616_v23  ;;  %vm706_vm9 = vc.u32 %v9846_v53, %v9837_v19 }
  0xaa   :  { %v763_v21 = vadd.s32 1, %v8352_v3  ;;  %v708_v24 = vsel %vm706_vm9, %v707_v8, %v9838_v20  ;;  %vm547_vm11 = vcmp.lt.s32.totalorder %v9659_v7, 0  ;;  %v631_v0 = vsub.s32 4, %v9796_v42 }
  0xab   :  { %v619_v41 = vshrl.u32 %v601_v33, %v617_v35  ;;  %v622_v10 = vadd.s32 127, %v621_v26  ;;  %v709_v14 = vadd.s32 %v708_v24, %v704_v9  ;;  %vm540_vm12 = vcmp.eq.s32.totalorder %v535_v25, 2 }
  0xac   :  { %vm764_vm10 = vcmp.gt.s32.totalorder %v763_v21, 0  ;;  %vm537_vm13 = vcmp.eq.s32.totalorder %v535_v25, 0  ;;  %v760_v54 = vand.u32 8388607, %v753_v45  ;;  %vm9860_vm14 = vcmp.le.f32.partialorder %v545_v27, 0.7853982 }
  0xad   :  { %v620_v13 = vor.u32 %v619_v41, %v618_v31  ;;  %v623_v43 = vshll.u32 %v622_v10, 23  ;;  %v765_v44 = vsel %vm764_vm10, %v763_v21, 0  ;;  %v710_v52 = vadd.s32 536870912, %v709_v14 }
  0xae   :  { %v767_v48 = vand.u32 31, %v765_v44  ;;  %vm533_vm15 = vweird.f32 %v9637_v39  ;;  %vm536_vm0 = vcmp.lt.s32.totalorder %v535_v25, 2  ;;  %v632_v51 = vsel %vm547_vm11, %v631_v0, %v9796_v42 }
  0xaf   :  { %v624_v50 = vor.u32 4788187, %v623_v43  ;;  %v627_v55 = vcvt.s32.f32 %v620_v13  ;;  %v9864_v57 = vshrl.u32 %v710_v52, 30  ;;  %v761_v1 = vor.u32 8388608, %v760_v54 }
  0xb0   :  { %v768_v61 = vsub.s32 32, %v767_v48  ;;  %v770_v16 = vshll.u32 %v9337_v30, %v767_v48  ;;  %v766_v63 = vshrl.u32 %v765_v44, 5  ;;  %v773_v6 = vshll.u32 %v9338_v32, %v767_v48 }
  0xb1   :  { %v8989_v49 = vpop.eup %8988  ;;  %v625_v17 = vand.u32 2147483647, %v624_v50  ;;  %v712_v27 = vshll.u32 %v9864_v57, 30  ;;  %v776_v20 = vshll.u32 %v9339_v34, %v767_v48  ;;  %v779_v18 = vshll.u32 %v9340_v36, %v767_v48 }
  0xb2   :  { %v8991_v37 = vpop.eup %8990  ;;  %v541_v58 = vxor.u32 2147483648, %v8989_v49  ;;  %v771_v62 = vshrl.u32 %v9338_v32, %v768_v61  ;;  %v774_v12 = vshrl.u32 %v9339_v34, %v768_v61  ;;  %v777_v42 = vshrl.u32 %v9340_v36, %v768_v61 }
  0xb3   :  { %v538_v60 = vxor.u32 2147483648, %v8991_v37  ;;  %v628_v28 = vmul.f32 %v627_v55, %v625_v17  ;;  %v713_v15 = vsub.s32 %v709_v14, %v712_v27  ;;  %v769_v22 = vshrl.u32 %v9337_v30, %v768_v61 }
  0xb4   :  { %v542_v59 = vsel %vm540_vm12, %v541_v58, %v8991_v37  ;;  %v780_v33 = vshrl.u32 %v9341_v38, %v768_v61  ;;  %v772_v9 = vor.u32 %v771_v62, %v770_v16  ;;  %v782_v3 = vshll.u32 %v9341_v38, %v767_v48 }
  0xb5   :  { %v539_v29 = vsel %vm537_vm13, %v8989_v49, %v538_v60  ;;  %v629_v5 = vxor.u32 2147483648, %v628_v28  ;;  %v715_v23 = vsub.s32 0, %v713_v15  ;;  %v775_v31 = vor.u32 %v774_v12, %v773_v6 }
  0xb6   :  { %v543_v4 = vsel %vm536_vm0, %v539_v29, %v542_v59  ;;  %v781_v26 = vor.u32 %v780_v33, %v779_v18  ;;  %v783_v8 = vshrl.u32 %v9342_v46, %v768_v61  ;;  %v778_v25 = vor.u32 %v777_v42, %v776_v20 }
  0xb7   :  { %v630_v2 = vsel %vm547_vm11, %v629_v5, %v628_v28  ;;  %v8349_v21 = vmin.u32 %v715_v23, %v713_v15  ;;  %vm785_vm1 = vcmp.lt.s32.totalorder %v766_v63, 1  ;;  %vm787_vm2 = vcmp.lt.s32.totalorder %v766_v63, 3 }
  0xb8   :  { %v633_v35 = vsel %vm9860_vm14, %v9659_v7, %v630_v2  ;;  %v784_v41 = vor.u32 %v783_v8, %v782_v3  ;;  %vm788_vm3 = vcmp.lt.s32.totalorder %v766_v63, 4  ;;  %v634_v10 = vsel %vm9860_vm14, 0, %v632_v51 }
  0xb9   :  { %8992 = vcosq.f32 %v633_v35  ;;  %v717_v24 = vclz %v8349_v21  ;;  %vm786_vm4 = vcmp.lt.s32.totalorder %v766_v63, 2  ;;  %v801_v13 = vshll.u32 %v761_v1, 8 }
  0xba   :  { %8994 = vsinq.f32 %v633_v35  ;;  %v705_v43 = vadd.s32 %v9837_v19, %v9846_v53  ;;  %v790_v14 = vsel %vm788_vm3, %v778_v25, 2102212464  ;;  %v793_v44 = vsel %vm785_vm1, %v772_v9, %v775_v31 }
  0xbb   :  { %v794_v0 = vsel %vm788_vm3, %v781_v26, 920167782  ;;  %v9897_v48 = vsel %vm533_vm15, nan, %v543_v4  ;;  %v8350_v49 = vadd.s32 4294967294, %v717_v24  ;;  %v797_v55 = vsel %vm785_vm1, %v775_v31, %v778_v25 }
  0xbc   :  { %v795_v50 = vsel %vm787_vm2, %v778_v25, %v794_v0  ;;  %v789_v52 = vsel %vm785_vm1, %v769_v22, %v772_v9  ;;  %v791_v37 = vsel %vm787_vm2, %v775_v31, %v790_v14  ;;  %v798_v53 = vsel %vm788_vm3, %v784_v41, 1326507024 }
  0xbd   :  { %v796_v19 = vsel %vm786_vm4, %v793_v44, %v795_v50  ;;  %vm8351_vm5 = vcmp.lt.s32.totalorder %v8350_v49, 0  ;;  %v799_v58 = vsel %vm787_vm2, %v781_v26, %v798_v53  ;;  %v638_v61 = vadd.s32 3, %v634_v10 }
  0xbe   :  { %v9906_v54 = vmul.u32.u64.low %v801_v13, %v796_v19  ;;  %v9907_v39 = vmul.u32.u64.high %v801_v13, %v796_v19, %v9906_v54  ;;  %v720_v60 = vsel %vm8351_vm5, 0, %v8350_v49  ;;  %v800_v56 = vsel %vm786_vm4, %v797_v55, %v799_v58 }
  0xbf   :  { %v721_v17 = vsub.s32 32, %v720_v60  ;;  %v722_v59 = vshll.u32 %v713_v15, %v720_v60  ;;  %v725_v51 = vsub.s32 4294967266, %v720_v60  ;;  %v792_v16 = vsel %vm786_vm4, %v789_v52, %v791_v37 }
  0xc0   :  { %v9912_v29 = vmul.u32.u64.low %v801_v13, %v800_v56  ;;  %v9913_v28 = vmul.u32.u64.high %v801_v13, %v800_v56, %v9912_v29  ;;  %v860_v27 = vand.u32 2139095040, %v9897_v48  ;;  %v811_v6 = vadd.s32 1, %v9907_v39 }
  0xc1   :  { %v723_v62 = vshrl.u32 %v705_v43, %v721_v17  ;;  %v726_v1 = vadd.s32 127, %v725_v51  ;;  %v808_v12 = vmul.u32 %v801_v13, %v792_v16  ;;  %v639_v20 = vand.u32 3, %v638_v61 }
  0xc2   :  { %v861_v5 = vshrl.u32 %v860_v27, 23  ;;  %vm810_vm6 = vc.u32 %v9913_v28, %v9906_v54  ;;  %v857_v63 = vand.u32 2147483647, %v9897_v48  ;;  %v735_v23 = vsub.s32 4, %v9864_v57 }
  0xc3   :  { %v724_v42 = vor.u32 %v723_v62, %v722_v59  ;;  %v727_v4 = vshll.u32 %v726_v1, 23  ;;  %v812_v9 = vsel %vm810_vm6, %v811_v6, %v9907_v39  ;;  %vm641_vm7 = vcmp.eq.s32.totalorder %v639_v20, 0 }
  0xc4   :  { %v8356_v15 = vadd.s32 4294967169, %v861_v5  ;;  %v813_v31 = vadd.s32 %v812_v9, %v808_v12  ;;  %vm644_vm8 = vcmp.eq.s32.totalorder %v639_v20, 2  ;;  %vm651_vm9 = vcmp.lt.s32.totalorder %v9754_v40, 0 }
  0xc5   :  { %v728_v33 = vor.u32 4788187, %v727_v4  ;;  %v731_v2 = vcvt.s32.f32 %v724_v42  ;;  %v864_v25 = vand.u32 8388607, %v857_v63  ;;  %vm640_vm11 = vcmp.lt.s32.totalorder %v639_v20, 2 }
  0xc6   :  { %v8993_v22 = vpop.eup %8992  ;;  %v867_v26 = vadd.s32 1, %v8356_v15  ;;  %v814_v21 = vadd.s32 536870912, %v813_v31  ;;  %v736_v10 = vsel %vm651_vm9, %v735_v23, %v9864_v57  ;;  %vm637_vm12 = vweird.f32 %v9659_v7 }
  0xc7   :  { %v8995_v18 = vpop.eup %8994  ;;  %v645_v35 = vxor.u32 2147483648, %v8993_v22  ;;  %v729_v8 = vand.u32 2147483647, %v728_v33  ;;  %vm9933_vm13 = vcmp.le.f32.partialorder %v649_v11, 0.7853982  ;;  %v865_v55 = vor.u32 8388608, %v864_v25 }
  0xc8   :  { %v642_v3 = vxor.u32 2147483648, %v8995_v18  ;;  %vm868_vm10 = vcmp.gt.s32.totalorder %v867_v26, 0  ;;  %v9928_v14 = vshrl.u32 %v814_v21, 30  ;;  %v738_v50 = vsel %vm9933_vm13, 0, %v736_v10 }
  0xc9   :  { %v732_v41 = vmul.f32 %v731_v2, %v729_v8  ;;  %v869_v24 = vsel %vm868_vm10, %v867_v26, 0  ;;  %v646_v43 = vsel %vm644_vm8, %v645_v35, %v8995_v18  ;;  %v742_v42 = vadd.s32 3, %v738_v50 }
  0xca   :  { %v643_v13 = vsel %vm641_vm7, %v8993_v22, %v642_v3  ;;  %v871_v44 = vand.u32 31, %v869_v24  ;;  %v816_v57 = vshll.u32 %v9928_v14, 30  ;;  %v870_v61 = vshrl.u32 %v869_v24, 5 }
  0xcb   :  { %v733_v49 = vxor.u32 2147483648, %v732_v41  ;;  %v647_v37 = vsel %vm640_vm11, %v643_v13, %v646_v43  ;;  %v905_v15 = vshll.u32 %v865_v55, 8  ;;  %v809_v25 = vadd.s32 %v9906_v54, %v9913_v28 }
  0xcc   :  { %v872_v52 = vsub.s32 32, %v871_v44  ;;  %v874_v53 = vshll.u32 %v9337_v30, %v871_v44  ;;  %v877_v58 = vshll.u32 %v9338_v32, %v871_v44  ;;  %v9947_v39 = vsub.s32 %v813_v31, %v816_v57 }
  0xcd   :  { %v734_v19 = vsel %vm651_vm9, %v733_v49, %v732_v41  ;;  %v880_v60 = vshll.u32 %v9339_v34, %v871_v44  ;;  %v883_v59 = vshll.u32 %v9340_v36, %v871_v44  ;;  %v9955_v51 = vsel %vm637_vm12, nan, %v647_v37 }
  0xce   :  { %v737_v11 = vsel %vm9933_vm13, %v9754_v40, %v734_v19  ;;  %v875_v56 = vshrl.u32 %v9338_v32, %v872_v52  ;;  %v878_v17 = vshrl.u32 %v9339_v34, %v872_v52  ;;  %v819_v16 = vsub.s32 0, %v9947_v39 }
  0xcf   :  { %8996 = vcosq.f32 %v737_v11  ;;  %v881_v29 = vshrl.u32 %v9340_v36, %v872_v52  ;;  %v884_v1 = vshrl.u32 %v9341_v38, %v872_v52  ;;  %v886_v6 = vshll.u32 %v9341_v38, %v871_v44 }
  0xd0   :  { %8998 = vsinq.f32 %v737_v11  ;;  %v876_v27 = vor.u32 %v875_v56, %v874_v53  ;;  %v879_v62 = vor.u32 %v878_v17, %v877_v58  ;;  %v8353_v12 = vmin.u32 %v819_v16, %v9947_v39 }
  0xd1   :  { %v882_v5 = vor.u32 %v881_v29, %v880_v60  ;;  %v887_v20 = vshrl.u32 %v9342_v46, %v872_v52  ;;  %v873_v7 = vshrl.u32 %v9337_v30, %v872_v52  ;;  %v885_v4 = vor.u32 %v884_v1, %v883_v59 }
  0xd2   :  { %vm889_vm14 = vcmp.lt.s32.totalorder %v870_v61, 1  ;;  %v821_v22 = vclz %v8353_v12  ;;  %vm891_vm15 = vcmp.lt.s32.totalorder %v870_v61, 3  ;;  %v964_v18 = vand.u32 2139095040, %v9955_v51 }
  0xd3   :  { %v888_v33 = vor.u32 %v887_v20, %v886_v6  ;;  %vm890_vm0 = vcmp.lt.s32.totalorder %v870_v61, 2  ;;  %vm892_vm1 = vcmp.lt.s32.totalorder %v870_v61, 4  ;;  %v897_v2 = vsel %vm889_vm14, %v876_v27, %v879_v62 }
  0xd4   :  { %v8354_v23 = vadd.s32 4294967294, %v821_v22  ;;  %v894_v9 = vsel %vm892_vm1, %v882_v5, 2102212464  ;;  %v898_v3 = vsel %vm892_vm1, %v885_v4, 920167782  ;;  %v901_v35 = vsel %vm889_vm14, %v879_v62, %v882_v5 }
  0xd5   :  { %v893_v31 = vsel %vm889_vm14, %v873_v7, %v876_v27  ;;  %v895_v26 = vsel %vm891_vm15, %v879_v62, %v894_v9  ;;  %v899_v8 = vsel %vm891_vm15, %v882_v5, %v898_v3  ;;  %v902_v21 = vsel %vm892_vm1, %v888_v33, 1326507024 }
  0xd6   :  { %vm8355_vm2 = vcmp.lt.s32.totalorder %v8354_v23, 0  ;;  %v900_v41 = vsel %vm890_vm0, %v897_v2, %v899_v8  ;;  %v903_v10 = vsel %vm891_vm15, %v885_v4, %v902_v21  ;;  %v896_v57 = vsel %vm890_vm0, %v893_v31, %v895_v26 }
  0xd7   :  { %v824_v24 = vsel %vm8355_vm2, 0, %v8354_v23  ;;  %v904_v13 = vsel %vm890_vm0, %v901_v35, %v903_v10  ;;  %v9972_v43 = vmul.u32.u64.low %v905_v15, %v900_v41  ;;  %v9973_v44 = vmul.u32.u64.high %v905_v15, %v900_v41, %v9972_v43 }
  0xd8   :  { %v825_v0 = vsub.s32 32, %v824_v24  ;;  %v826_v49 = vshll.u32 %v9947_v39, %v824_v24  ;;  %v829_v50 = vsub.s32 4294967266, %v824_v24  ;;  %v743_v55 = vand.u32 3, %v742_v42 }
  0xd9   :  { %v9978_v54 = vmul.u32.u64.low %v905_v15, %v904_v13  ;;  %v9979_v28 = vmul.u32.u64.high %v905_v15, %v904_v13, %v9978_v54  ;;  %v965_v52 = vshrl.u32 %v964_v18, 23  ;;  %v912_v11 = vmul.u32 %v905_v15, %v896_v57 }
  0xda   :  { %v827_v19 = vshrl.u32 %v809_v25, %v825_v0  ;;  %v830_v53 = vadd.s32 127, %v829_v50  ;;  %v915_v60 = vadd.s32 1, %v9973_v44  ;;  %v961_v56 = vand.u32 2147483647, %v9955_v51 }
  0xdb   :  { %v8360_v17 = vadd.s32 4294967169, %v965_v52  ;;  %vm745_vm3 = vcmp.eq.s32.totalorder %v743_v55, 0  ;;  %vm748_vm4 = vcmp.eq.s32.totalorder %v743_v55, 2  ;;  %vm914_vm5 = vc.u32 %v9979_v28, %v9972_v43 }
  0xdc   :  { %v8997_v37 = vpop.eup %8996  ;;  %v828_v16 = vor.u32 %v827_v19, %v826_v49  ;;  %v831_v61 = vshll.u32 %v830_v53, 23  ;;  %v916_v1 = vsel %vm914_vm5, %v915_v60, %v9973_v44  ;;  %vm744_vm6 = vcmp.lt.s32.totalorder %v743_v55, 2 }
  0xdd   :  { %v8999_v58 = vpop.eup %8998  ;;  %v749_v39 = vxor.u32 2147483648, %v8997_v37  ;;  %v971_v29 = vadd.s32 1, %v8360_v17  ;;  %v917_v6 = vadd.s32 %v916_v1, %v912_v11  ;;  %v968_v12 = vand.u32 8388607, %v961_v56 }
  0xde   :  { %v746_v59 = vxor.u32 2147483648, %v8999_v58  ;;  %v832_v27 = vor.u32 4788187, %v831_v61  ;;  %v835_v62 = vcvt.s32.f32 %v828_v16  ;;  %vm741_vm8 = vweird.f32 %v9754_v40 }
  0xdf   :  { %vm972_vm7 = vcmp.gt.s32.totalorder %v971_v29, 0  ;;  %v750_v20 = vsel %vm748_vm4, %v749_v39, %v8999_v58  ;;  %v918_v4 = vadd.s32 536870912, %v917_v6  ;;  %vm9991_vm9 = vcmp.le.f32.partialorder %v753_v45, 0.7853982 }
  0xe0   :  { %v747_v5 = vsel %vm745_vm3, %v8997_v37, %v746_v59  ;;  %v833_v42 = vand.u32 2147483647, %v832_v27  ;;  %v973_v7 = vsel %vm972_vm7, %v971_v29, 0  ;;  %vm755_vm10 = vcmp.lt.s32.totalorder %v9815_v47, 0 }
  0xe1   :  { %v975_v22 = vand.u32 31, %v973_v7  ;;  %v839_v33 = vsub.s32 4, %v9928_v14  ;;  %v751_v2 = vsel %vm744_vm6, %v747_v5, %v750_v20  ;;  %v9997_v23 = vshrl.u32 %v918_v4, 30 }
  0xe2   :  { %v836_v18 = vmul.f32 %v835_v62, %v833_v42  ;;  %v969_v9 = vor.u32 8388608, %v968_v12  ;;  %v974_v31 = vshrl.u32 %v973_v7, 5  ;;  %v10018_v55 = vsel %vm741_vm8, nan, %v751_v2 }
  0xe3   :  { %v976_v3 = vsub.s32 32, %v975_v22  ;;  %v978_v26 = vshll.u32 %v9337_v30, %v975_v22  ;;  %v981_v8 = vshll.u32 %v9338_v32, %v975_v22  ;;  %v920_v45 = vshll.u32 %v9997_v23, 30 }
  0xe4   :  { %v837_v35 = vxor.u32 2147483648, %v836_v18  ;;  %v984_v25 = vshll.u32 %v9339_v34, %v975_v22  ;;  %v987_v41 = vshll.u32 %v9340_v36, %v975_v22  ;;  %v840_v0 = vsel %vm755_vm10, %v839_v33, %v9928_v14 }
  0xe5   :  { %v979_v21 = vshrl.u32 %v9338_v32, %v976_v3  ;;  %v982_v24 = vshrl.u32 %v9339_v34, %v976_v3  ;;  %v985_v13 = vshrl.u32 %v9340_v36, %v976_v3  ;;  %v988_v44 = vshrl.u32 %v9341_v38, %v976_v3 }
  0xe6   :  { %v838_v10 = vsel %vm755_vm10, %v837_v35, %v836_v18  ;;  %v921_v50 = vsub.s32 %v917_v6, %v920_v45  ;;  %v1009_v57 = vshll.u32 %v969_v9, 8  ;;  %v990_v37 = vshll.u32 %v9341_v38, %v975_v22 }
  0xe7   :  { %v841_v49 = vsel %vm9991_vm9, %v9815_v47, %v838_v10  ;;  %v980_v54 = vor.u32 %v979_v21, %v978_v26  ;;  %v983_v52 = vor.u32 %v982_v24, %v981_v8  ;;  %v977_v53 = vshrl.u32 %v9337_v30, %v976_v3 }
  0xe8   :  { %9000 = vcosq.f32 %v841_v49  ;;  %v923_v19 = vsub.s32 0, %v921_v50  ;;  %v989_v58 = vor.u32 %v988_v44, %v987_v41  ;;  %v986_v14 = vor.u32 %v985_v13, %v984_v25 }
  0xe9   :  { %9002 = vsinq.f32 %v841_v49  ;;  %v991_v11 = vshrl.u32 %v9342_v46, %v976_v3  ;;  %vm993_vm11 = vcmp.lt.s32.totalorder %v974_v31, 1  ;;  %vm994_vm12 = vcmp.lt.s32.totalorder %v974_v31, 2 }
  0xea   :  { %v8357_v60 = vmin.u32 %v923_v19, %v921_v50  ;;  %vm995_vm13 = vcmp.lt.s32.totalorder %v974_v31, 3  ;;  %vm996_vm14 = vcmp.lt.s32.totalorder %v974_v31, 4  ;;  %v1001_v59 = vsel %vm993_vm11, %v980_v54, %v983_v52 }
  0xeb   :  { %v992_v40 = vor.u32 %v991_v11, %v990_v37  ;;  %v998_v17 = vsel %vm996_vm14, %v986_v14, 2102212464  ;;  %v1002_v39 = vsel %vm996_vm14, %v989_v58, 920167782  ;;  %v997_v61 = vsel %vm993_vm11, %v977_v53, %v980_v54 }
  0xec   :  { %v925_v16 = vclz %v8357_v60  ;;  %v1068_v29 = vand.u32 2139095040, %v10018_v55  ;;  %v999_v27 = vsel %vm995_vm13, %v983_v52, %v998_v17  ;;  %v1003_v62 = vsel %vm995_vm13, %v986_v14, %v1002_v39 }
  0xed   :  { %v1005_v1 = vsel %vm993_vm11, %v983_v52, %v986_v14  ;;  %v1006_v6 = vsel %vm996_vm14, %v992_v40, 1326507024  ;;  %v842_v12 = vsel %vm9991_vm9, 0, %v840_v0  ;;  %v1004_v20 = vsel %vm994_vm12, %v1001_v59, %v1003_v62 }
  0xee   :  { %v8358_v5 = vadd.s32 4294967294, %v925_v16  ;;  %v1007_v42 = vsel %vm995_vm13, %v989_v58, %v1006_v6  ;;  %v1000_v7 = vsel %vm994_vm12, %v997_v61, %v999_v27  ;;  %v913_v33 = vadd.s32 %v9972_v43, %v9979_v28 }
  0xef   :  { %v1008_v4 = vsel %vm994_vm12, %v1005_v1, %v1007_v42  ;;  %v10032_v22 = vmul.u32.u64.low %v1009_v57, %v1004_v20  ;;  %v10033_v18 = vmul.u32.u64.high %v1009_v57, %v1004_v20, %v10032_v22  ;;  %v846_v15 = vadd.s32 3, %v842_v12 }
  0xf0   :  { %vm8359_vm15 = vcmp.lt.s32.totalorder %v8358_v5, 0  ;;  %v10037_v2 = vmul.u32.u64.low %v1009_v57, %v1008_v4  ;;  %v10038_v9 = vmul.u32.u64.high %v1009_v57, %v1008_v4, %v10037_v2  ;;  %v1069_v35 = vshrl.u32 %v1068_v29, 23 }
  0xf1   :  { %v928_v3 = vsel %vm8359_vm15, 0, %v8358_v5  ;;  %v1016_v21 = vmul.u32 %v1009_v57, %v1000_v7  ;;  %v1019_v31 = vadd.s32 1, %v10033_v18  ;;  %v1065_v43 = vand.u32 2147483647, %v10018_v55 }
  0xf2   :  { %v929_v26 = vsub.s32 32, %v928_v3  ;;  %v930_v8 = vshll.u32 %v921_v50, %v928_v3  ;;  %v933_v45 = vsub.s32 4294967266, %v928_v3  ;;  %v8364_v25 = vadd.s32 4294967169, %v1069_v35 }
  0xf3   :  { %vm1018_vm0 = vc.u32 %v10038_v9, %v10032_v22  ;;  %v847_v0 = vand.u32 3, %v846_v15  ;;  %v943_v57 = vsub.s32 4, %v9997_v23  ;;  %v1072_v53 = vand.u32 8388607, %v1065_v43 }
  0xf4   :  { %v931_v41 = vshrl.u32 %v913_v33, %v929_v26  ;;  %v934_v10 = vadd.s32 127, %v933_v45  ;;  %v1020_v24 = vsel %vm1018_vm0, %v1019_v31, %v10033_v18  ;;  %v1075_v13 = vadd.s32 1, %v8364_v25 }
  0xf5   :  { %v9001_v28 = vpop.eup %9000  ;;  %v1021_v50 = vadd.s32 %v1020_v24, %v1016_v21  ;;  %vm845_vm2 = vweird.f32 %v9815_v47  ;;  %vm859_vm3 = vcmp.lt.s32.totalorder %v9897_v48, 0  ;;  %vm849_vm4 = vcmp.eq.s32.totalorder %v847_v0, 0 }
  0xf6   :  { %v9003_v44 = vpop.eup %9002  ;;  %v932_v49 = vor.u32 %v931_v41, %v930_v8  ;;  %v935_v54 = vshll.u32 %v934_v10, 23  ;;  %vm1076_vm1 = vcmp.gt.s32.totalorder %v1075_v13, 0  ;;  %v853_v14 = vxor.u32 2147483648, %v9001_v28 }
  0xf7   :  { %v1022_v19 = vadd.s32 536870912, %v1021_v50  ;;  %v850_v58 = vxor.u32 2147483648, %v9003_v44  ;;  %v1077_v11 = vsel %vm1076_vm1, %v1075_v13, 0  ;;  %vm852_vm5 = vcmp.eq.s32.totalorder %v847_v0, 2 }
  0xf8   :  { %v936_v52 = vor.u32 4788187, %v935_v54  ;;  %v939_v37 = vcvt.s32.f32 %v932_v49  ;;  %vm848_vm6 = vcmp.lt.s32.totalorder %v847_v0, 2  ;;  %vm10053_vm7 = vcmp.le.f32.partialorder %v857_v63, 0.7853982 }
  0xf9   :  { %v10049_v40 = vshrl.u32 %v1022_v19, 30  ;;  %v10060_v59 = vsel %vm859_vm3, %v943_v57, %v9997_v23  ;;  %v1079_v39 = vand.u32 31, %v1077_v11  ;;  %v1017_v61 = vadd.s32 %v10032_v22, %v10038_v9 }
  0xfa   :  { %v937_v60 = vand.u32 2147483647, %v936_v52  ;;  %v1073_v27 = vor.u32 8388608, %v1072_v53  ;;  %v851_v62 = vsel %vm849_vm4, %v9001_v28, %v850_v58  ;;  %v854_v1 = vsel %vm852_vm5, %v853_v14, %v9003_v44 }
  0xfb   :  { %v1024_v29 = vshll.u32 %v10049_v40, 30  ;;  %v1078_v6 = vshrl.u32 %v1077_v11, 5  ;;  %v1080_v12 = vsub.s32 32, %v1079_v39  ;;  %v1082_v20 = vshll.u32 %v9337_v30, %v1079_v39 }
  0xfc   :  { %v940_v16 = vmul.f32 %v939_v37, %v937_v60  ;;  %v1085_v42 = vshll.u32 %v9338_v32, %v1079_v39  ;;  %v1088_v4 = vshll.u32 %v9339_v34, %v1079_v39  ;;  %v1091_v22 = vshll.u32 %v9340_v36, %v1079_v39 }
  0xfd   :  { %v1025_v5 = vsub.s32 %v1021_v50, %v1024_v29  ;;  %v1083_v23 = vshrl.u32 %v9338_v32, %v1080_v12  ;;  %v1086_v7 = vshrl.u32 %v9339_v34, %v1080_v12  ;;  %v855_v18 = vsel %vm848_vm6, %v851_v62, %v854_v1 }
  0xfe   :  { %v941_v63 = vxor.u32 2147483648, %v940_v16  ;;  %v1089_v9 = vshrl.u32 %v9340_v36, %v1080_v12  ;;  %v1081_v3 = vshrl.u32 %v9337_v30, %v1080_v12  ;;  %v1092_v35 = vshrl.u32 %v9341_v38, %v1080_v12 }
  0xff   :  { %v1027_v2 = vsub.s32 0, %v1025_v5  ;;  %vm1097_vm8 = vcmp.lt.s32.totalorder %v1078_v6, 1  ;;  %v1084_v8 = vor.u32 %v1083_v23, %v1082_v20  ;;  %v1087_v45 = vor.u32 %v1086_v7, %v1085_v42 }
 0x100   :  { %v942_v33 = vsel %vm859_vm3, %v941_v63, %v940_v16  ;;  %v1090_v21 = vor.u32 %v1089_v9, %v1088_v4  ;;  %v1093_v31 = vor.u32 %v1092_v35, %v1091_v22  ;;  %v1094_v25 = vshll.u32 %v9341_v38, %v1079_v39 }
 0x101   :  { %v945_v15 = vsel %vm10053_vm7, %v9897_v48, %v942_v33  ;;  %v8361_v26 = vmin.u32 %v1027_v2, %v1025_v5  ;;  %v1095_v41 = vshrl.u32 %v9342_v46, %v1080_v12  ;;  %v10083_v10 = vsel %vm845_vm2, nan, %v855_v18 }
 0x102   :  { %9004 = vcosq.f32 %v945_v15  ;;  %v1113_v24 = vshll.u32 %v1073_v27, 8  ;;  %vm1098_vm9 = vcmp.lt.s32.totalorder %v1078_v6, 2  ;;  %vm1099_vm10 = vcmp.lt.s32.totalorder %v1078_v6, 3 }
 0x103   :  { %9006 = vsinq.f32 %v945_v15  ;;  %v1029_v28 = vclz %v8361_v26  ;;  %v1096_v13 = vor.u32 %v1095_v41, %v1094_v25  ;;  %vm1100_vm11 = vcmp.lt.s32.totalorder %v1078_v6, 4 }
 0x104   :  { %v1101_v0 = vsel %vm1097_vm8, %v1081_v3, %v1084_v8  ;;  %v1102_v49 = vsel %vm1100_vm11, %v1090_v21, 2102212464  ;;  %v1105_v54 = vsel %vm1097_vm8, %v1084_v8, %v1087_v45  ;;  %v1106_v57 = vsel %vm1100_vm11, %v1093_v31, 920167782 }
 0x105   :  { %v8362_v44 = vadd.s32 4294967294, %v1029_v28  ;;  %v1103_v50 = vsel %vm1099_vm10, %v1087_v45, %v1102_v49  ;;  %v1109_v52 = vsel %vm1097_vm8, %v1087_v45, %v1090_v21  ;;  %v1110_v47 = vsel %vm1100_vm11, %v1096_v13, 1326507024 }
 0x106   :  { %v1107_v37 = vsel %vm1099_vm10, %v1090_v21, %v1106_v57  ;;  %v1111_v19 = vsel %vm1099_vm10, %v1093_v31, %v1110_v47  ;;  %v1172_v53 = vand.u32 2139095040, %v10083_v10  ;;  %v946_v58 = vsel %vm10053_vm7, 0, %v10060_v59 }
 0x107   :  { %vm8363_vm12 = vcmp.lt.s32.totalorder %v8362_v44, 0  ;;  %v1108_v11 = vsel %vm1098_vm9, %v1105_v54, %v1107_v37  ;;  %v1112_v60 = vsel %vm1098_vm9, %v1109_v52, %v1111_v19  ;;  %v1104_v27 = vsel %vm1098_vm9, %v1101_v0, %v1103_v50 }
 0x108   :  { %v1032_v14 = vsel %vm8363_vm12, 0, %v8362_v44  ;;  %v10095_v62 = vmul.u32.u64.low %v1113_v24, %v1112_v60  ;;  %v10096_v1 = vmul.u32.u64.high %v1113_v24, %v1112_v60, %v10095_v62  ;;  %v1047_v59 = vsub.s32 4, %v10049_v40 }
 0x109   :  { %v1033_v39 = vsub.s32 32, %v1032_v14  ;;  %v1034_v16 = vshll.u32 %v1025_v5, %v1032_v14  ;;  %v1037_v29 = vsub.s32 4294967266, %v1032_v14  ;;  %v1173_v42 = vshrl.u32 %v1172_v53, 23 }
 0x10a   :  { %v10098_v12 = vmul.u32.u64.low %v1113_v24, %v1108_v11  ;;  %v10099_v63 = vmul.u32.u64.high %v1113_v24, %v1108_v11, %v10098_v12  ;;  %v950_v23 = vadd.s32 3, %v946_v58  ;;  %v1169_v7 = vand.u32 2147483647, %v10083_v10 }
 0x10b   :  { %v1035_v20 = vshrl.u32 %v1017_v61, %v1033_v39  ;;  %v1038_v17 = vadd.s32 127, %v1037_v29  ;;  %v1120_v22 = vmul.u32 %v1113_v24, %v1104_v27  ;;  %v8368_v6 = vadd.s32 4294967169, %v1173_v42 }
 0x10c   :  { %vm963_vm13 = vcmp.lt.s32.totalorder %v9955_v51, 0  ;;  %vm1122_vm14 = vc.u32 %v10096_v1, %v10098_v12  ;;  %v1123_v33 = vadd.s32 1, %v10099_v63  ;;  %v951_v35 = vand.u32 3, %v950_v23 }
 0x10d   :  { %v1036_v4 = vor.u32 %v1035_v20, %v1034_v16  ;;  %v1039_v5 = vshll.u32 %v1038_v17, 23  ;;  %v1048_v9 = vsel %vm963_vm13, %v1047_v59, %v10049_v40  ;;  %v1179_v15 = vadd.s32 1, %v8368_v6 }
 0x10e   :  { %vm10113_vm15 = vcmp.le.f32.partialorder %v961_v56, 0.7853982  ;;  %v1124_v8 = vsel %vm1122_vm14, %v1123_v33, %v10099_v63  ;;  %v1176_v31 = vand.u32 8388607, %v1169_v7  ;;  %vm952_vm1 = vcmp.lt.s32.totalorder %v951_v35, 2 }
 0x10f   :  { %v9005_v18 = vpop.eup %9004  ;;  %v1040_v61 = vor.u32 4788187, %v1039_v5  ;;  %v1043_v2 = vcvt.s32.f32 %v1036_v4  ;;  %v1125_v21 = vadd.s32 %v1124_v8, %v1120_v22  ;;  %vm1180_vm0 = vcmp.gt.s32.totalorder %v1179_v15, 0 }
 0x110   :  { %v9007_v3 = vpop.eup %9006  ;;  %v1050_v40 = vsel %vm10113_vm15, 0, %v1048_v9  ;;  %v1181_v25 = vsel %vm1180_vm0, %v1179_v15, 0  ;;  %vm953_vm2 = vcmp.eq.s32.totalorder %v951_v35, 0  ;;  %vm956_vm3 = vcmp.eq.s32.totalorder %v951_v35, 2 }
 0x111   :  { %v1041_v45 = vand.u32 2147483647, %v1040_v61  ;;  %v1126_v28 = vadd.s32 536870912, %v1125_v21  ;;  %v1183_v56 = vand.u32 31, %v1181_v25  ;;  %v1054_v13 = vadd.s32 3, %v1050_v40 }
 0x112   :  { %v1177_v0 = vor.u32 8388608, %v1176_v31  ;;  %vm949_vm4 = vweird.f32 %v9897_v48  ;;  %v954_v49 = vxor.u32 2147483648, %v9007_v3  ;;  %v957_v54 = vxor.u32 2147483648, %v9005_v18 }
 0x113   :  { %v1044_v41 = vmul.f32 %v1043_v2, %v1041_v45  ;;  %v10122_v44 = vshrl.u32 %v1126_v28, 30  ;;  %v1184_v50 = vsub.s32 32, %v1183_v56  ;;  %v1186_v57 = vshll.u32 %v9337_v30, %v1183_v56 }
 0x114   :  { %v1189_v37 = vshll.u32 %v9338_v32, %v1183_v56  ;;  %v1192_v19 = vshll.u32 %v9339_v34, %v1183_v56  ;;  %v1182_v58 = vshrl.u32 %v1181_v25, 5  ;;  %v1195_v16 = vshll.u32 %v9340_v36, %v1183_v56 }
 0x115   :  { %v1045_v24 = vxor.u32 2147483648, %v1044_v41  ;;  %v1128_v47 = vshll.u32 %v10122_v44, 30  ;;  %v1187_v14 = vshrl.u32 %v9338_v32, %v1184_v50  ;;  %v1190_v11 = vshrl.u32 %v9339_v34, %v1184_v50 }
 0x116   :  { %v1193_v39 = vshrl.u32 %v9340_v36, %v1184_v50  ;;  %v955_v29 = vsel %vm953_vm2, %v9005_v18, %v954_v49  ;;  %v958_v27 = vsel %vm956_vm3, %v957_v54, %v9007_v3  ;;  %v1196_v59 = vshrl.u32 %v9341_v38, %v1184_v50 }
 0x117   :  { %v1046_v52 = vsel %vm963_vm13, %v1045_v24, %v1044_v41  ;;  %v10136_v60 = vsub.s32 %v1125_v21, %v1128_v47  ;;  %v1188_v62 = vor.u32 %v1187_v14, %v1186_v57  ;;  %v1191_v20 = vor.u32 %v1190_v11, %v1189_v37 }
 0x118   :  { %v1049_v53 = vsel %vm10113_vm15, %v9955_v51, %v1046_v52  ;;  %v1194_v17 = vor.u32 %v1193_v39, %v1192_v19  ;;  %v1185_v42 = vshrl.u32 %v9337_v30, %v1184_v50  ;;  %v1198_v23 = vshll.u32 %v9341_v38, %v1183_v56 }
 0x119   :  { %9008 = vcosq.f32 %v1049_v53  ;;  %v1131_v63 = vsub.s32 0, %v10136_v60  ;;  %v1199_v4 = vshrl.u32 %v9342_v46, %v1184_v50  ;;  %vm1201_vm5 = vcmp.lt.s32.totalorder %v1182_v58, 1 }
 0x11a   :  { %9010 = vsinq.f32 %v1049_v53  ;;  %v1197_v22 = vor.u32 %v1196_v59, %v1195_v16  ;;  %vm1204_vm6 = vcmp.lt.s32.totalorder %v1182_v58, 4  ;;  %v1217_v6 = vshll.u32 %v1177_v0, 8 }
 0x11b   :  { %v8365_v5 = vmin.u32 %v1131_v63, %v10136_v60  ;;  %v959_v18 = vsel %vm952_vm1, %v955_v29, %v958_v27  ;;  %v1200_v33 = vor.u32 %v1199_v4, %v1198_v23  ;;  %vm1203_vm7 = vcmp.lt.s32.totalorder %v1182_v58, 3 }
 0x11c   :  { %v1206_v61 = vsel %vm1204_vm6, %v1194_v17, 2102212464  ;;  %vm1202_vm8 = vcmp.lt.s32.totalorder %v1182_v58, 2  ;;  %v1209_v9 = vsel %vm1201_vm5, %v1188_v62, %v1191_v20  ;;  %v1213_v15 = vsel %vm1201_vm5, %v1191_v20, %v1194_v17 }
 0x11d   :  { %v1133_v2 = vclz %v8365_v5  ;;  %v1205_v3 = vsel %vm1201_vm5, %v1185_v42, %v1188_v62  ;;  %v1207_v26 = vsel %vm1203_vm7, %v1191_v20, %v1206_v61  ;;  %v1210_v8 = vsel %vm1204_vm6, %v1197_v22, 920167782 }
 0x11e   :  { %v1214_v45 = vsel %vm1204_vm6, %v1200_v33, 1326507024  ;;  %v10151_v21 = vsel %vm949_vm4, nan, %v959_v18  ;;  %v1211_v40 = vsel %vm1203_vm7, %v1194_v17, %v1210_v8  ;;  %v1121_v35 = vadd.s32 %v10098_v12, %v10096_v1 }
 0x11f   :  { %v8366_v31 = vadd.s32 4294967294, %v1133_v2  ;;  %v1215_v25 = vsel %vm1203_vm7, %v1197_v22, %v1214_v45  ;;  %v1212_v41 = vsel %vm1202_vm8, %v1209_v9, %v1211_v40  ;;  %v1208_v56 = vsel %vm1202_vm8, %v1205_v3, %v1207_v26 }
 0x120   :  { %v1216_v28 = vsel %vm1202_vm8, %v1213_v15, %v1215_v25  ;;  %v10158_v54 = vmul.u32.u64.low %v1217_v6, %v1212_v41  ;;  %v10159_v50 = vmul.u32.u64.high %v1217_v6, %v1212_v41, %v10158_v54  ;;  %v1276_v48 = vand.u32 2139095040, %v10151_v21 }
 0x121   :  { %vm8367_vm9 = vcmp.lt.s32.totalorder %v8366_v31, 0  ;;  %v10155_v24 = vmul.u32.u64.low %v1217_v6, %v1216_v28  ;;  %v10156_v0 = vmul.u32.u64.high %v1217_v6, %v1216_v28, %v10155_v24  ;;  %v1055_v57 = vand.u32 3, %v1054_v13 }
 0x122   :  { %v1136_v49 = vsel %vm8367_vm9, 0, %v8366_v31  ;;  %v1277_v12 = vshrl.u32 %v1276_v48, 23  ;;  %v1151_v14 = vsub.s32 4, %v10122_v44  ;;  %v1224_v11 = vmul.u32 %v1217_v6, %v1208_v56 }
 0x123   :  { %v1137_v52 = vsub.s32 32, %v1136_v49  ;;  %v1138_v47 = vshll.u32 %v10136_v60, %v1136_v49  ;;  %v1141_v37 = vsub.s32 4294967266, %v1136_v49  ;;  %vm1226_vm10 = vc.u32 %v10156_v0, %v10158_v54 }
 0x124   :  { %v1227_v16 = vadd.s32 1, %v10159_v50  ;;  %v8372_v29 = vadd.s32 4294967169, %v1277_v12  ;;  %vm1060_vm11 = vcmp.eq.s32.totalorder %v1055_v57, 2  ;;  %vm1057_vm12 = vcmp.eq.s32.totalorder %v1055_v57, 0 }
 0x125   :  { %v1139_v53 = vshrl.u32 %v1121_v35, %v1137_v52  ;;  %v1142_v58 = vadd.s32 127, %v1141_v37  ;;  %vm1067_vm13 = vcmp.lt.s32.totalorder %v10018_v55, 0  ;;  %vm1056_vm14 = vcmp.lt.s32.totalorder %v1055_v57, 2 }
 0x126   :  { %v9009_v1 = vpop.eup %9008  ;;  %v1228_v62 = vsel %vm1226_vm10, %v1227_v16, %v10159_v50  ;;  %v1283_v63 = vadd.s32 1, %v8372_v29  ;;  %v10173_v23 = vsel %vm1067_vm13, %v1151_v14, %v10122_v44  ;;  %v1273_v4 = vand.u32 2147483647, %v10151_v21 }
 0x127   :  { %v9011_v19 = vpop.eup %9010  ;;  %v1061_v39 = vxor.u32 2147483648, %v9009_v1  ;;  %v1140_v27 = vor.u32 %v1139_v53, %v1138_v47  ;;  %v1143_v60 = vshll.u32 %v1142_v58, 23  ;;  %v1229_v59 = vadd.s32 %v1228_v62, %v1224_v11 }
 0x128   :  { %v1058_v13 = vxor.u32 2147483648, %v9011_v19  ;;  %vm1284_vm15 = vcmp.gt.s32.totalorder %v1283_v63, 0  ;;  %vm10178_vm0 = vcmp.le.f32.partialorder %v1065_v43, 0.7853982  ;;  %vm1053_vm1 = vweird.f32 %v9955_v51 }
 0x129   :  { %v1144_v20 = vor.u32 4788187, %v1143_v60  ;;  %v1147_v17 = vcvt.s32.f32 %v1140_v27  ;;  %v1062_v42 = vsel %vm1060_vm11, %v1061_v39, %v9011_v19  ;;  %v1230_v6 = vadd.s32 536870912, %v1229_v59 }
 0x12a   :  { %v1059_v5 = vsel %vm1057_vm12, %v9009_v1, %v1058_v13  ;;  %v1285_v18 = vsel %vm1284_vm15, %v1283_v63, 0  ;;  %v1154_v44 = vsel %vm10178_vm0, 0, %v10173_v23  ;;  %v1280_v3 = vand.u32 8388607, %v1273_v4 }
 0x12b   :  { %v1145_v22 = vand.u32 2147483647, %v1144_v20  ;;  %v1287_v61 = vand.u32 31, %v1285_v18  ;;  %v10186_v9 = vshrl.u32 %v1230_v6, 30  ;;  %v1063_v15 = vsel %vm1056_vm14, %v1059_v5, %v1062_v42 }
 0x12c   :  { %v1286_v49 = vshrl.u32 %v1285_v18, 5  ;;  %v10204_v48 = vsel %vm1053_vm1, nan, %v1063_v15  ;;  %v1225_v52 = vadd.s32 %v10158_v54, %v10156_v0  ;;  %v1281_v47 = vor.u32 8388608, %v1280_v3 }
 0x12d   :  { %v1148_v2 = vmul.f32 %v1147_v17, %v1145_v22  ;;  %v1288_v26 = vsub.s32 32, %v1287_v61  ;;  %v1290_v43 = vshll.u32 %v9337_v30, %v1287_v61  ;;  %v1232_v45 = vshll.u32 %v10186_v9, 30 }
 0x12e   :  { %v1293_v31 = vshll.u32 %v9338_v32, %v1287_v61  ;;  %v1296_v40 = vshll.u32 %v9339_v34, %v1287_v61  ;;  %v1299_v28 = vshll.u32 %v9340_v36, %v1287_v61  ;;  %v1302_v14 = vshll.u32 %v9341_v38, %v1287_v61 }
 0x12f   :  { %v1149_v8 = vxor.u32 2147483648, %v1148_v2  ;;  %v1291_v25 = vshrl.u32 %v9338_v32, %v1288_v26  ;;  %v1294_v35 = vshrl.u32 %v9339_v34, %v1288_v26  ;;  %v1297_v41 = vshrl.u32 %v9340_v36, %v1288_v26 }
 0x130   :  { %v1233_v24 = vsub.s32 %v1229_v59, %v1232_v45  ;;  %v1300_v50 = vshrl.u32 %v9341_v38, %v1288_v26  ;;  %v1289_v1 = vshrl.u32 %v9337_v30, %v1288_v26  ;;  %v1303_v51 = vshrl.u32 %v9342_v46, %v1288_v26 }
 0x131   :  { %v1150_v56 = vsel %vm1067_vm13, %v1149_v8, %v1148_v2  ;;  %v1292_v12 = vor.u32 %v1291_v25, %v1290_v43  ;;  %v1295_v19 = vor.u32 %v1294_v35, %v1293_v31  ;;  %v1298_v53 = vor.u32 %v1297_v41, %v1296_v40 }
 0x132   :  { %v1153_v57 = vsel %vm10178_vm0, %v10018_v55, %v1150_v56  ;;  %v1235_v37 = vsub.s32 0, %v1233_v24  ;;  %v1301_v58 = vor.u32 %v1300_v50, %v1299_v28  ;;  %vm1305_vm2 = vcmp.lt.s32.totalorder %v1286_v49, 1 }
 0x133   :  { %9012 = vcosq.f32 %v1153_v57  ;;  %v1380_v39 = vand.u32 2139095040, %v10204_v48  ;;  %v1304_v16 = vor.u32 %v1303_v51, %v1302_v14  ;;  %vm1307_vm3 = vcmp.lt.s32.totalorder %v1286_v49, 3 }
 0x134   :  { %v8369_v11 = vmin.u32 %v1235_v37, %v1233_v24  ;;  %9014 = vsinq.f32 %v1153_v57  ;;  %vm1308_vm4 = vcmp.lt.s32.totalorder %v1286_v49, 4  ;;  %vm1306_vm5 = vcmp.lt.s32.totalorder %v1286_v49, 2 }
 0x135   :  { %v1309_v54 = vsel %vm1305_vm2, %v1289_v1, %v1292_v12  ;;  %v1321_v29 = vshll.u32 %v1281_v47, 8  ;;  %v1310_v13 = vsel %vm1308_vm4, %v1298_v53, 2102212464  ;;  %v1313_v27 = vsel %vm1305_vm2, %v1292_v12, %v1295_v19 }
 0x136   :  { %v1237_v0 = vclz %v8369_v11  ;;  %v1314_v60 = vsel %vm1308_vm4, %v1301_v58, 920167782  ;;  %v1317_v62 = vsel %vm1305_vm2, %v1295_v19, %v1298_v53  ;;  %v1311_v20 = vsel %vm1307_vm3, %v1295_v19, %v1310_v13 }
 0x137   :  { %v1315_v17 = vsel %vm1307_vm3, %v1298_v53, %v1314_v60  ;;  %v1318_v59 = vsel %vm1308_vm4, %v1304_v16, 1326507024  ;;  %v1312_v42 = vsel %vm1306_vm5, %v1309_v54, %v1311_v20  ;;  %v1381_v22 = vshrl.u32 %v1380_v39, 23 }
 0x138   :  { %v8370_v63 = vadd.s32 4294967294, %v1237_v0  ;;  %v1316_v23 = vsel %vm1306_vm5, %v1313_v27, %v1315_v17  ;;  %v1319_v5 = vsel %vm1307_vm3, %v1301_v58, %v1318_v59  ;;  %v1158_v61 = vadd.s32 3, %v1154_v44 }
 0x139   :  { %v1320_v6 = vsel %vm1306_vm5, %v1317_v62, %v1319_v5  ;;  %v10221_v18 = vmul.u32.u64.low %v1321_v29, %v1316_v23  ;;  %v10222_v33 = vmul.u32.u64.high %v1321_v29, %v1316_v23, %v10221_v18  ;;  %v8376_v45 = vadd.s32 4294967169, %v1381_v22 }
 0x13a   :  { %vm8371_vm6 = vcmp.lt.s32.totalorder %v8370_v63, 0  ;;  %v10225_v15 = vmul.u32.u64.low %v1321_v29, %v1320_v6  ;;  %v10226_v3 = vmul.u32.u64.high %v1321_v29, %v1320_v6, %v10225_v15  ;;  %v1328_v31 = vmul.u32 %v1321_v29, %v1312_v42 }
 0x13b   :  { %v1240_v2 = vsel %vm8371_vm6, 0, %v8370_v63  ;;  %v1331_v35 = vadd.s32 1, %v10222_v33  ;;  %v1387_v41 = vadd.s32 1, %v8376_v45  ;;  %v1159_v28 = vand.u32 3, %v1158_v61 }
 0x13c   :  { %v1241_v26 = vsub.s32 32, %v1240_v2  ;;  %v1242_v43 = vshll.u32 %v1233_v24, %v1240_v2  ;;  %v1245_v8 = vsub.s32 4294967266, %v1240_v2  ;;  %vm1330_vm7 = vc.u32 %v10226_v3, %v10221_v18 }
 0x13d   :  { %v1332_v49 = vsel %vm1330_vm7, %v1331_v35, %v10222_v33  ;;  %v1377_v50 = vand.u32 2147483647, %v10204_v48  ;;  %vm1171_vm8 = vcmp.lt.s32.totalorder %v10083_v10, 0  ;;  %vm1388_vm9 = vcmp.gt.s32.totalorder %v1387_v41, 0 }
 0x13e   :  { %v1243_v40 = vshrl.u32 %v1225_v52, %v1241_v26  ;;  %v1246_v25 = vadd.s32 127, %v1245_v8  ;;  %v1333_v24 = vadd.s32 %v1332_v49, %v1328_v31  ;;  %vm10236_vm10 = vcmp.le.f32.partialorder %v1169_v7, 0.7853982 }
 0x13f   :  { %v1389_v12 = vsel %vm1388_vm9, %v1387_v41, 0  ;;  %vm1160_vm11 = vcmp.lt.s32.totalorder %v1159_v28, 2  ;;  %vm1161_vm12 = vcmp.eq.s32.totalorder %v1159_v28, 0  ;;  %vm1164_vm13 = vcmp.eq.s32.totalorder %v1159_v28, 2 }
 0x140   :  { %v1244_v56 = vor.u32 %v1243_v40, %v1242_v43  ;;  %v1247_v44 = vshll.u32 %v1246_v25, 23  ;;  %v9013_v57 = vpop.eup %9012  ;;  %v1334_v19 = vadd.s32 536870912, %v1333_v24  ;;  %v1391_v53 = vand.u32 31, %v1389_v12 }
 0x141   :  { %v9015_v52 = vpop.eup %9014  ;;  %v1255_v14 = vsub.s32 4, %v10186_v9  ;;  %v1384_v51 = vand.u32 8388607, %v1377_v50  ;;  %v1165_v39 = vxor.u32 2147483648, %v9013_v57  ;;  %v1390_v54 = vshrl.u32 %v1389_v12, 5 }
 0x142   :  { %v1248_v37 = vor.u32 4788187, %v1247_v44  ;;  %v1251_v1 = vcvt.s32.f32 %v1244_v56  ;;  %v1162_v11 = vxor.u32 2147483648, %v9015_v52  ;;  %v10243_v7 = vshrl.u32 %v1334_v19, 30 }
 0x143   :  { %v1392_v16 = vsub.s32 32, %v1391_v53  ;;  %v1394_v29 = vshll.u32 %v9337_v30, %v1391_v53  ;;  %v1397_v13 = vshll.u32 %v9338_v32, %v1391_v53  ;;  %v1400_v62 = vshll.u32 %v9339_v34, %v1391_v53 }
 0x144   :  { %v1249_v58 = vand.u32 2147483647, %v1248_v37  ;;  %v1336_v27 = vshll.u32 %v10243_v7, 30  ;;  %v1403_v63 = vshll.u32 %v9340_v36, %v1391_v53  ;;  %vm1157_vm14 = vweird.f32 %v10018_v55 }
 0x145   :  { %v1395_v60 = vshrl.u32 %v9338_v32, %v1392_v16  ;;  %v1398_v17 = vshrl.u32 %v9339_v34, %v1392_v16  ;;  %v1401_v59 = vshrl.u32 %v9340_v36, %v1392_v16  ;;  %v1404_v42 = vshrl.u32 %v9341_v38, %v1392_v16 }
 0x146   :  { %v1252_v0 = vmul.f32 %v1251_v1, %v1249_v58  ;;  %v1166_v23 = vsel %vm1164_vm13, %v1165_v39, %v9015_v52  ;;  %v1256_v5 = vsel %vm1171_vm8, %v1255_v14, %v10186_v9  ;;  %v1337_v22 = vsub.s32 %v1333_v24, %v1336_v27 }
 0x147   :  { %v1385_v6 = vor.u32 8388608, %v1384_v51  ;;  %v1163_v33 = vsel %vm1161_vm12, %v9013_v57, %v1162_v11  ;;  %v1393_v2 = vshrl.u32 %v9337_v30, %v1392_v16  ;;  %v1406_v15 = vshll.u32 %v9341_v38, %v1391_v53 }
 0x148   :  { %v1253_v20 = vxor.u32 2147483648, %v1252_v0  ;;  %v1339_v43 = vsub.s32 0, %v1337_v22  ;;  %v1396_v8 = vor.u32 %v1395_v60, %v1394_v29  ;;  %v1399_v45 = vor.u32 %v1398_v17, %v1397_v13 }
 0x149   :  { %v1402_v31 = vor.u32 %v1401_v59, %v1400_v62  ;;  %v1405_v9 = vor.u32 %v1404_v42, %v1403_v63  ;;  %v1407_v40 = vshrl.u32 %v9342_v46, %v1392_v16  ;;  %vm1409_vm15 = vcmp.lt.s32.totalorder %v1390_v54, 1 }
 0x14a   :  { %v1254_v61 = vsel %vm1171_vm8, %v1253_v20, %v1252_v0  ;;  %v1167_v25 = vsel %vm1160_vm11, %v1163_v33, %v1166_v23  ;;  %v8373_v35 = vmin.u32 %v1339_v43, %v1337_v22  ;;  %v1425_v41 = vshll.u32 %v1385_v6, 8 }
 0x14b   :  { %v1257_v26 = vsel %vm10236_vm10, %v10083_v10, %v1254_v61  ;;  %v1408_v56 = vor.u32 %v1407_v40, %v1406_v15  ;;  %vm1411_vm0 = vcmp.lt.s32.totalorder %v1390_v54, 3  ;;  %vm1412_vm1 = vcmp.lt.s32.totalorder %v1390_v54, 4 }
 0x14c   :  { %9016 = vcosq.f32 %v1257_v26  ;;  %v1341_v44 = vclz %v8373_v35  ;;  %vm1410_vm2 = vcmp.lt.s32.totalorder %v1390_v54, 2  ;;  %v1413_v49 = vsel %vm1409_vm15, %v1393_v2, %v1396_v8 }
 0x14d   :  { %9018 = vsinq.f32 %v1257_v26  ;;  %v1417_v57 = vsel %vm1409_vm15, %v1396_v8, %v1399_v45  ;;  %v1414_v24 = vsel %vm1412_vm1, %v1402_v31, 2102212464  ;;  %v1418_v52 = vsel %vm1412_vm1, %v1405_v9, 920167782 }
 0x14e   :  { %v1421_v37 = vsel %vm1409_vm15, %v1399_v45, %v1402_v31  ;;  %v1422_v1 = vsel %vm1412_vm1, %v1408_v56, 1326507024  ;;  %v8374_v12 = vadd.s32 4294967294, %v1341_v44  ;;  %v1415_v19 = vsel %vm1411_vm0, %v1399_v45, %v1414_v24 }
 0x14f   :  { %v1419_v53 = vsel %vm1411_vm0, %v1402_v31, %v1418_v52  ;;  %v1423_v28 = vsel %vm1411_vm0, %v1405_v9, %v1422_v1  ;;  %v1258_v58 = vsel %vm10236_vm10, 0, %v1256_v5  ;;  %v1329_v14 = vadd.s32 %v10221_v18, %v10226_v3 }
 0x150   :  { %v1420_v51 = vsel %vm1410_vm2, %v1417_v57, %v1419_v53  ;;  %v1424_v11 = vsel %vm1410_vm2, %v1421_v37, %v1423_v28  ;;  %v10277_v39 = vsel %vm1157_vm14, nan, %v1167_v25  ;;  %vm8375_vm3 = vcmp.lt.s32.totalorder %v8374_v12, 0 }
 0x151   :  { %v10279_v16 = vmul.u32.u64.low %v1425_v41, %v1424_v11  ;;  %v10280_v0 = vmul.u32.u64.high %v1425_v41, %v1424_v11, %v10279_v16  ;;  %v1344_v29 = vsel %vm8375_vm3, 0, %v8374_v12  ;;  %v1416_v13 = vsel %vm1410_vm2, %v1413_v49, %v1415_v19 }
 0x152   :  { %v10283_v47 = vmul.u32.u64.low %v1425_v41, %v1420_v51  ;;  %v10284_v27 = vmul.u32.u64.high %v1425_v41, %v1420_v51, %v10283_v47  ;;  %v1262_v18 = vadd.s32 3, %v1258_v58  ;;  %v1345_v3 = vsub.s32 32, %v1344_v29 }
 0x153   :  { %v1346_v60 = vshll.u32 %v1337_v22, %v1344_v29  ;;  %v1349_v62 = vsub.s32 4294967266, %v1344_v29  ;;  %v1359_v63 = vsub.s32 4, %v10243_v7  ;;  %v1484_v55 = vand.u32 2139095040, %v10277_v39 }
 0x154   :  { %v1347_v20 = vshrl.u32 %v1329_v14, %v1345_v3  ;;  %v1432_v59 = vmul.u32 %v1425_v41, %v1416_v13  ;;  %vm1434_vm4 = vc.u32 %v10280_v0, %v10283_v47  ;;  %v1435_v54 = vadd.s32 1, %v10284_v27 }
 0x155   :  { %v1350_v17 = vadd.s32 127, %v1349_v62  ;;  %v1485_v42 = vshrl.u32 %v1484_v55, 23  ;;  %v1263_v23 = vand.u32 3, %v1262_v18  ;;  %v1481_v33 = vand.u32 2147483647, %v10277_v39 }
 0x156   :  { %v1348_v5 = vor.u32 %v1347_v20, %v1346_v60  ;;  %vm1275_vm5 = vcmp.lt.s32.totalorder %v10151_v21, 0  ;;  %v1436_v61 = vsel %vm1434_vm4, %v1435_v54, %v10284_v27  ;;  %vm10300_vm6 = vcmp.le.f32.partialorder %v1273_v4, 0.7853982 }
 0x157   :  { %v1351_v6 = vshll.u32 %v1350_v17, 23  ;;  %v8380_v2 = vadd.s32 4294967169, %v1485_v42  ;;  %v1360_v8 = vsel %vm1275_vm5, %v1359_v63, %v10243_v7  ;;  %v1437_v45 = vadd.s32 %v1436_v61, %v1432_v59 }
 0x158   :  { %v1355_v43 = vcvt.s32.f32 %v1348_v5  ;;  %vm1265_vm7 = vcmp.eq.s32.totalorder %v1263_v23, 0  ;;  %v1488_v35 = vand.u32 8388607, %v1481_v33  ;;  %v1362_v44 = vsel %vm10300_vm6, 0, %v1360_v8 }
 0x159   :  { %v9017_v22 = vpop.eup %9016  ;;  %v1352_v26 = vor.u32 4788187, %v1351_v6  ;;  %v1491_v9 = vadd.s32 1, %v8380_v2  ;;  %v1438_v25 = vadd.s32 536870912, %v1437_v45  ;;  %vm1268_vm9 = vcmp.eq.s32.totalorder %v1263_v23, 2 }
 0x15a   :  { %v9019_v15 = vpop.eup %9018  ;;  %v1269_v56 = vxor.u32 2147483648, %v9017_v22  ;;  %vm1261_vm10 = vweird.f32 %v10083_v10  ;;  %vm1264_vm11 = vcmp.lt.s32.totalorder %v1263_v23, 2  ;;  %v1366_v52 = vadd.s32 3, %v1362_v44 }
 0x15b   :  { %v1353_v40 = vand.u32 2147483647, %v1352_v26  ;;  %v1266_v41 = vxor.u32 2147483648, %v9019_v15  ;;  %vm1492_vm8 = vcmp.gt.s32.totalorder %v1491_v9, 0  ;;  %v10308_v49 = vshrl.u32 %v1438_v25, 30 }
 0x15c   :  { %v1493_v4 = vsel %vm1492_vm8, %v1491_v9, 0  ;;  %v1489_v1 = vor.u32 8388608, %v1488_v35  ;;  %v1270_v19 = vsel %vm1268_vm9, %v1269_v56, %v9019_v15  ;;  %vm10359_vm8 = vcmp.le.f32.partialorder %v1377_v50, 0.7853982 }
 0x15d   :  { %v1356_v7 = vmul.f32 %v1355_v43, %v1353_v40  ;;  %v1495_v57 = vand.u32 31, %v1493_v4  ;;  %v1440_v37 = vshll.u32 %v10308_v49, 30  ;;  %v1267_v12 = vsel %vm1265_vm7, %v9017_v22, %v1266_v41 }
 0x15e   :  { %v1494_v53 = vshrl.u32 %v1493_v4, 5  ;;  %v1271_v18 = vsel %vm1264_vm11, %v1267_v12, %v1270_v19  ;;  %v1433_v22 = vadd.s32 %v10283_v47, %v10280_v0  ;;  %v1529_v2 = vshll.u32 %v1489_v1, 8 }
 0x15f   :  { %v1357_v24 = vxor.u32 2147483648, %v1356_v7  ;;  %v1496_v28 = vsub.s32 32, %v1495_v57  ;;  %v1441_v14 = vsub.s32 %v1437_v45, %v1440_v37  ;;  %v1498_v51 = vshll.u32 %v9337_v30, %v1495_v57 }
 0x160   :  { %v1501_v11 = vshll.u32 %v9338_v32, %v1495_v57  ;;  %v1504_v13 = vshll.u32 %v9339_v34, %v1495_v57  ;;  %v1507_v27 = vshll.u32 %v9340_v36, %v1495_v57  ;;  %v1510_v54 = vshll.u32 %v9341_v38, %v1495_v57 }
 0x161   :  { %v1358_v58 = vsel %vm1275_vm5, %v1357_v24, %v1356_v7  ;;  %v1499_v29 = vshrl.u32 %v9338_v32, %v1496_v28  ;;  %v1443_v3 = vsub.s32 0, %v1441_v14  ;;  %v1502_v60 = vshrl.u32 %v9339_v34, %v1496_v28 }
 0x162   :  { %v1361_v16 = vsel %vm10300_vm6, %v10151_v21, %v1358_v58  ;;  %v1497_v62 = vshrl.u32 %v9337_v30, %v1496_v28  ;;  %v1505_v63 = vshrl.u32 %v9340_v36, %v1496_v28  ;;  %v1508_v55 = vshrl.u32 %v9341_v38, %v1496_v28 }
 0x163   :  { %9020 = vcosq.f32 %v1361_v16  ;;  %v8377_v20 = vmin.u32 %v1443_v3, %v1441_v14  ;;  %v1500_v17 = vor.u32 %v1499_v29, %v1498_v51  ;;  %v1503_v59 = vor.u32 %v1502_v60, %v1501_v11 }
 0x164   :  { %9022 = vsinq.f32 %v1361_v16  ;;  %v1506_v42 = vor.u32 %v1505_v63, %v1504_v13  ;;  %v1509_v5 = vor.u32 %v1508_v55, %v1507_v27  ;;  %v1511_v23 = vshrl.u32 %v9342_v46, %v1496_v28 }
 0x165   :  { %vm1513_vm12 = vcmp.lt.s32.totalorder %v1494_v53, 1  ;;  %v10332_v6 = vsel %vm1261_vm10, nan, %v1271_v18  ;;  %v1445_v61 = vclz %v8377_v20  ;;  %vm1514_vm13 = vcmp.lt.s32.totalorder %v1494_v53, 2 }
 0x166   :  { %v1512_v15 = vor.u32 %v1511_v23, %v1510_v54  ;;  %vm1515_vm14 = vcmp.lt.s32.totalorder %v1494_v53, 3  ;;  %vm1516_vm15 = vcmp.lt.s32.totalorder %v1494_v53, 4  ;;  %v1517_v43 = vsel %vm1513_vm12, %v1497_v62, %v1500_v17 }
 0x167   :  { %v8378_v26 = vadd.s32 4294967294, %v1445_v61  ;;  %v1518_v8 = vsel %vm1516_vm15, %v1506_v42, 2102212464  ;;  %v1521_v45 = vsel %vm1513_vm12, %v1500_v17, %v1503_v59  ;;  %v1522_v9 = vsel %vm1516_vm15, %v1509_v5, 920167782 }
 0x168   :  { %v1519_v31 = vsel %vm1515_vm14, %v1503_v59, %v1518_v8  ;;  %v1525_v40 = vsel %vm1513_vm12, %v1503_v59, %v1506_v42  ;;  %v1526_v25 = vsel %vm1516_vm15, %v1512_v15, 1326507024  ;;  %v1523_v10 = vsel %vm1515_vm14, %v1506_v42, %v1522_v9 }
 0x169   :  { %vm8379_vm0 = vcmp.lt.s32.totalorder %v8378_v26, 0  ;;  %v1527_v35 = vsel %vm1515_vm14, %v1509_v5, %v1526_v25  ;;  %v1588_v41 = vand.u32 2139095040, %v10332_v6  ;;  %v1524_v47 = vsel %vm1514_vm13, %v1521_v45, %v1523_v10 }
 0x16a   :  { %v1448_v0 = vsel %vm8379_vm0, 0, %v8378_v26  ;;  %v1528_v56 = vsel %vm1514_vm13, %v1525_v40, %v1527_v35  ;;  %v1520_v57 = vsel %vm1514_vm13, %v1517_v43, %v1519_v31  ;;  %v1367_v19 = vand.u32 3, %v1366_v52 }
 0x16b   :  { %v1449_v44 = vsub.s32 32, %v1448_v0  ;;  %v1450_v7 = vshll.u32 %v1441_v14, %v1448_v0  ;;  %v1453_v4 = vsub.s32 4294967266, %v1448_v0  ;;  %v1589_v51 = vshrl.u32 %v1588_v41, 23 }
 0x16c   :  { %v10340_v24 = vmul.u32.u64.low %v1529_v2, %v1528_v56  ;;  %v10341_v37 = vmul.u32.u64.high %v1529_v2, %v1528_v56, %v10340_v24  ;;  %v10343_v1 = vmul.u32.u64.low %v1529_v2, %v1524_v47  ;;  %v10344_v12 = vmul.u32.u64.high %v1529_v2, %v1524_v47, %v10343_v1 }
 0x16d   :  { %v1451_v28 = vshrl.u32 %v1433_v22, %v1449_v44  ;;  %v1454_v58 = vadd.s32 127, %v1453_v4  ;;  %v1536_v27 = vmul.u32 %v1529_v2, %v1520_v57  ;;  %v8384_v14 = vadd.s32 4294967169, %v1589_v51 }
 0x16e   :  { %vm1538_vm1 = vc.u32 %v10341_v37, %v10343_v1  ;;  %v1539_v53 = vadd.s32 1, %v10344_v12  ;;  %v1585_v3 = vand.u32 2147483647, %v10332_v6  ;;  %vm1372_vm2 = vcmp.eq.s32.totalorder %v1367_v19, 2 }
 0x16f   :  { %v1452_v29 = vor.u32 %v1451_v28, %v1450_v7  ;;  %v1455_v13 = vshll.u32 %v1454_v58, 23  ;;  %vm1369_vm3 = vcmp.eq.s32.totalorder %v1367_v19, 0  ;;  %v1595_v55 = vadd.s32 1, %v8384_v14 }
 0x170   :  { %v9021_v11 = vpop.eup %9020  ;;  %v1540_v63 = vsel %vm1538_vm1, %v1539_v53, %v10344_v12  ;;  %v1463_v17 = vsub.s32 4, %v10308_v49  ;;  %vm1368_vm4 = vcmp.lt.s32.totalorder %v1367_v19, 2  ;;  %v1592_v42 = vand.u32 8388607, %v1585_v3 }
 0x171   :  { %v9023_v16 = vpop.eup %9022  ;;  %v1373_v18 = vxor.u32 2147483648, %v9021_v11  ;;  %v1456_v52 = vor.u32 4788187, %v1455_v13  ;;  %v1459_v62 = vcvt.s32.f32 %v1452_v29  ;;  %v1541_v59 = vadd.s32 %v1540_v63, %v1536_v27 }
 0x172   :  { %v1370_v60 = vxor.u32 2147483648, %v9023_v16  ;;  %vm1596_vm5 = vcmp.gt.s32.totalorder %v1595_v55, 0  ;;  %vm1365_vm6 = vweird.f32 %v10151_v21  ;;  %vm1379_vm7 = vcmp.lt.s32.totalorder %v10204_v48, 0 }
 0x173   :  { %v1457_v20 = vand.u32 2147483647, %v1456_v52  ;;  %v1374_v54 = vsel %vm1372_vm2, %v1373_v18, %v9023_v16  ;;  %v1542_v22 = vadd.s32 536870912, %v1541_v59  ;;  %v1597_v61 = vsel %vm1596_vm5, %v1595_v55, 0 }
 0x174   :  { %v1371_v5 = vsel %vm1369_vm3, %v9021_v11, %v1370_v60  ;;  %v1599_v2 = vand.u32 31, %v1597_v61  ;;  %v1464_v43 = vsel %vm1379_vm7, %v1463_v17, %v10308_v49  ;;  %v1593_v31 = vor.u32 8388608, %v1592_v42 }
 0x175   :  { %v1460_v23 = vmul.f32 %v1459_v62, %v1457_v20  ;;  %v10364_v8 = vshrl.u32 %v1542_v22, 30  ;;  %v1375_v45 = vsel %vm1368_vm4, %v1371_v5, %v1374_v54  ;;  %v1598_v9 = vshrl.u32 %v1597_v61, 5 }
 0x176   :  { %v1600_v40 = vsub.s32 32, %v1599_v2  ;;  %v1602_v35 = vshll.u32 %v9337_v30, %v1599_v2  ;;  %v1605_v41 = vshll.u32 %v9338_v32, %v1599_v2  ;;  %v1608_v47 = vshll.u32 %v9339_v34, %v1599_v2 }
 0x177   :  { %v1461_v26 = vxor.u32 2147483648, %v1460_v23  ;;  %v1544_v10 = vshll.u32 %v10364_v8, 30  ;;  %v1611_v7 = vshll.u32 %v9340_v36, %v1599_v2  ;;  %v10381_v4 = vsel %vm1365_vm6, nan, %v1375_v45 }
 0x178   :  { %v1603_v0 = vshrl.u32 %v9338_v32, %v1600_v40  ;;  %v1606_v49 = vshrl.u32 %v9339_v34, %v1600_v40  ;;  %v1609_v44 = vshrl.u32 %v9340_v36, %v1600_v40  ;;  %v1466_v57 = vsel %vm10359_vm8, 0, %v1464_v43 }
 0x179   :  { %v1462_v25 = vsel %vm1379_vm7, %v1461_v26, %v1460_v23  ;;  %v10375_v56 = vsub.s32 %v1541_v59, %v1544_v10  ;;  %v1601_v24 = vshrl.u32 %v9337_v30, %v1600_v40  ;;  %v1612_v58 = vshrl.u32 %v9341_v38, %v1600_v40 }
 0x17a   :  { %v1465_v50 = vsel %vm10359_vm8, %v10204_v48, %v1462_v25  ;;  %v1604_v19 = vor.u32 %v1603_v0, %v1602_v35  ;;  %v1607_v28 = vor.u32 %v1606_v49, %v1605_v41  ;;  %v1610_v51 = vor.u32 %v1609_v44, %v1608_v47 }
 0x17b   :  { %9024 = vcosq.f32 %v1465_v50  ;;  %v1547_v12 = vsub.s32 0, %v10375_v56  ;;  %v1614_v11 = vshll.u32 %v9341_v38, %v1599_v2  ;;  %v1615_v16 = vshrl.u32 %v9342_v46, %v1600_v40 }
 0x17c   :  { %9026 = vsinq.f32 %v1465_v50  ;;  %vm1617_vm9 = vcmp.lt.s32.totalorder %v1598_v9, 1  ;;  %v1470_v21 = vadd.s32 3, %v1466_v57  ;;  %v1613_v13 = vor.u32 %v1612_v58, %v1611_v7 }
 0x17d   :  { %v8381_v29 = vmin.u32 %v1547_v12, %v10375_v56  ;;  %v1633_v27 = vshll.u32 %v1593_v31, 8  ;;  %v1616_v14 = vor.u32 %v1615_v16, %v1614_v11  ;;  %vm1619_vm10 = vcmp.lt.s32.totalorder %v1598_v9, 3 }
 0x17e   :  { %vm1620_vm11 = vcmp.lt.s32.totalorder %v1598_v9, 4  ;;  %v1692_v18 = vand.u32 2139095040, %v10381_v4  ;;  %vm1618_vm12 = vcmp.lt.s32.totalorder %v1598_v9, 2  ;;  %v1621_v60 = vsel %vm1617_vm9, %v1601_v24, %v1604_v19 }
 0x17f   :  { %v1549_v53 = vclz %v8381_v29  ;;  %v1625_v52 = vsel %vm1617_vm9, %v1604_v19, %v1607_v28  ;;  %v1622_v62 = vsel %vm1620_vm11, %v1610_v51, 2102212464  ;;  %v1626_v63 = vsel %vm1620_vm11, %v1613_v13, 920167782 }
 0x180   :  { %v1629_v55 = vsel %vm1617_vm9, %v1607_v28, %v1610_v51  ;;  %v1630_v20 = vsel %vm1620_vm11, %v1616_v14, 1326507024  ;;  %v1623_v59 = vsel %vm1619_vm10, %v1607_v28, %v1622_v62  ;;  %v1627_v54 = vsel %vm1619_vm10, %v1610_v51, %v1626_v63 }
 0x181   :  { %v8382_v17 = vadd.s32 4294967294, %v1549_v53  ;;  %v1631_v42 = vsel %vm1619_vm10, %v1613_v13, %v1630_v20  ;;  %v1537_v5 = vadd.s32 %v10343_v1, %v10341_v37  ;;  %v1628_v23 = vsel %vm1618_vm12, %v1625_v52, %v1627_v54 }
 0x182   :  { %v1632_v22 = vsel %vm1618_vm12, %v1629_v55, %v1631_v42  ;;  %v1693_v61 = vshrl.u32 %v1692_v18, 23  ;;  %v1624_v2 = vsel %vm1618_vm12, %v1621_v60, %v1623_v59  ;;  %v10404_v25 = vand.u32 3, %v1470_v21 }
 0x183   :  { %vm8383_vm13 = vcmp.lt.s32.totalorder %v8382_v17, 0  ;;  %v10397_v15 = vmul.u32.u64.low %v1633_v27, %v1632_v22  ;;  %v10398_v26 = vmul.u32.u64.high %v1633_v27, %v1632_v22, %v10397_v15  ;;  %v1689_v41 = vand.u32 2147483647, %v10381_v4 }
 0x184   :  { %v1552_v43 = vsel %vm8383_vm13, 0, %v8382_v17  ;;  %v10400_v45 = vmul.u32.u64.low %v1633_v27, %v1628_v23  ;;  %v10401_v31 = vmul.u32.u64.high %v1633_v27, %v1628_v23, %v10400_v45  ;;  %v8388_v40 = vadd.s32 4294967169, %v1693_v61 }
 0x185   :  { %v1553_v37 = vsub.s32 32, %v1552_v43  ;;  %v1554_v1 = vshll.u32 %v10375_v56, %v1552_v43  ;;  %v1557_v10 = vsub.s32 4294967266, %v1552_v43  ;;  %v1640_v47 = vmul.u32 %v1633_v27, %v1624_v2 }
 0x186   :  { %v1699_v9 = vadd.s32 1, %v8388_v40  ;;  %vm1483_vm14 = vcmp.lt.s32.totalorder %v10277_v39, 0  ;;  %vm1642_vm15 = vc.u32 %v10398_v26, %v10400_v45  ;;  %v1643_v44 = vadd.s32 1, %v10401_v31 }
 0x187   :  { %v1555_v0 = vshrl.u32 %v1537_v5, %v1553_v37  ;;  %v1558_v49 = vadd.s32 127, %v1557_v10  ;;  %vm1473_vm1 = vcmp.eq.s32.totalorder %v10404_v25, 0  ;;  %vm10415_vm2 = vcmp.le.f32.partialorder %v1481_v33, 0.7853982 }
 0x188   :  { %v9025_v35 = vpop.eup %9024  ;;  %vm1700_vm0 = vcmp.gt.s32.totalorder %v1699_v9, 0  ;;  %vm1472_vm3 = vcmp.lt.s32.totalorder %v10404_v25, 2  ;;  %vm1476_vm4 = vcmp.eq.s32.totalorder %v10404_v25, 2  ;;  %v1644_v12 = vsel %vm1642_vm15, %v1643_v44, %v10401_v31 }
 0x189   :  { %v9027_v50 = vpop.eup %9026  ;;  %v1556_v7 = vor.u32 %v1555_v0, %v1554_v1  ;;  %v1559_v57 = vshll.u32 %v1558_v49, 23  ;;  %v1701_v24 = vsel %vm1700_vm0, %v1699_v9, 0  ;;  %v1696_v19 = vand.u32 8388607, %v1689_v41 }
 0x18a   :  { %v1703_v28 = vand.u32 31, %v1701_v24  ;;  %v1567_v33 = vsub.s32 4, %v10364_v8  ;;  %v1645_v11 = vadd.s32 %v1644_v12, %v1640_v47  ;;  %v1474_v16 = vxor.u32 2147483648, %v9027_v50 }
 0x18b   :  { %v1560_v58 = vor.u32 4788187, %v1559_v57  ;;  %v1563_v51 = vcvt.s32.f32 %v1556_v7  ;;  %v1477_v21 = vxor.u32 2147483648, %v9025_v35  ;;  %vm1469_vm5 = vweird.f32 %v10204_v48 }
 0x18c   :  { %v1704_v29 = vsub.s32 32, %v1703_v28  ;;  %v1706_v13 = vshll.u32 %v9337_v30, %v1703_v28  ;;  %v1646_v14 = vadd.s32 536870912, %v1645_v11  ;;  %v1709_v18 = vshll.u32 %v9338_v32, %v1703_v28 }
 0x18d   :  { %v1561_v27 = vand.u32 2147483647, %v1560_v58  ;;  %v1712_v53 = vshll.u32 %v9339_v34, %v1703_v28  ;;  %v1715_v63 = vshll.u32 %v9340_v36, %v1703_v28  ;;  %v1702_v17 = vshrl.u32 %v1701_v24, 5 }
 0x18e   :  { %v1707_v60 = vshrl.u32 %v9338_v32, %v1704_v29  ;;  %v1710_v52 = vshrl.u32 %v9339_v34, %v1704_v29  ;;  %v1713_v62 = vshrl.u32 %v9340_v36, %v1704_v29  ;;  %v10433_v20 = vshrl.u32 %v1646_v14, 30 }
 0x18f   :  { %v1564_v55 = vmul.f32 %v1563_v51, %v1561_v27  ;;  %v1716_v59 = vshrl.u32 %v9341_v38, %v1704_v29  ;;  %v1478_v54 = vsel %vm1476_vm4, %v1477_v21, %v9027_v50  ;;  %v1697_v42 = vor.u32 8388608, %v1696_v19 }
 0x190   :  { %v1718_v5 = vshll.u32 %v9341_v38, %v1703_v28  ;;  %v1719_v23 = vshrl.u32 %v9342_v46, %v1704_v29  ;;  %v1475_v22 = vsel %vm1473_vm1, %v9025_v35, %v1474_v16  ;;  %v1648_v2 = vshll.u32 %v10433_v20, 30 }
 0x191   :  { %v1565_v61 = vxor.u32 2147483648, %v1564_v55  ;;  %v1705_v15 = vshrl.u32 %v9337_v30, %v1704_v29  ;;  %v1708_v43 = vor.u32 %v1707_v60, %v1706_v13  ;;  %v1711_v31 = vor.u32 %v1710_v52, %v1709_v18 }
 0x192   :  { %v1714_v40 = vor.u32 %v1713_v62, %v1712_v53  ;;  %v1717_v37 = vor.u32 %v1716_v59, %v1715_v63  ;;  %v1649_v10 = vsub.s32 %v1645_v11, %v1648_v2  ;;  %vm1721_vm6 = vcmp.lt.s32.totalorder %v1702_v17, 1 }
 0x193   :  { %v1566_v1 = vsel %vm1483_vm14, %v1565_v61, %v1564_v55  ;;  %vm1724_vm7 = vcmp.lt.s32.totalorder %v1702_v17, 4  ;;  %v1720_v35 = vor.u32 %v1719_v23, %v1718_v5  ;;  %vm1723_vm8 = vcmp.lt.s32.totalorder %v1702_v17, 3 }
 0x194   :  { %v1569_v9 = vsel %vm10415_vm2, %v10277_v39, %v1566_v1  ;;  %v1726_v50 = vsel %vm1724_vm7, %v1714_v40, 2102212464  ;;  %v1479_v0 = vsel %vm1472_vm3, %v1475_v22, %v1478_v54  ;;  %v1568_v49 = vsel %vm1483_vm14, %v1567_v33, %v10364_v8 }
 0x195   :  { %v1651_v47 = vsub.s32 0, %v1649_v10  ;;  %vm1722_vm9 = vcmp.lt.s32.totalorder %v1702_v17, 2  ;;  %9028 = vcosq.f32 %v1569_v9  ;;  %v1725_v44 = vsel %vm1721_vm6, %v1705_v15, %v1708_v43 }
 0x196   :  { %v1729_v7 = vsel %vm1721_vm6, %v1708_v43, %v1711_v31  ;;  %v1730_v57 = vsel %vm1724_vm7, %v1717_v37, 920167782  ;;  %9030 = vsinq.f32 %v1569_v9  ;;  %v1727_v12 = vsel %vm1723_vm8, %v1711_v31, %v1726_v50 }
 0x197   :  { %v8385_v24 = vmin.u32 %v1651_v47, %v1649_v10  ;;  %v1731_v25 = vsel %vm1723_vm8, %v1714_v40, %v1730_v57  ;;  %v1733_v28 = vsel %vm1721_vm6, %v1711_v31, %v1714_v40  ;;  %v1734_v8 = vsel %vm1724_vm7, %v1720_v35, 1326507024 }
 0x198   :  { %v1732_v19 = vsel %vm1722_vm9, %v1729_v7, %v1731_v25  ;;  %v1737_v58 = vshll.u32 %v1697_v42, 8  ;;  %v10465_v51 = vsel %vm1469_vm5, nan, %v1479_v0  ;;  %v1735_v11 = vsel %vm1723_vm8, %v1717_v37, %v1734_v8 }
 0x199   :  { %v1653_v33 = vclz %v8385_v24  ;;  %v1570_v29 = vsel %vm10415_vm2, 0, %v1568_v49  ;;  %v1728_v27 = vsel %vm1722_vm9, %v1725_v44, %v1727_v12  ;;  %v1736_v14 = vsel %vm1722_vm9, %v1733_v28, %v1735_v11 }
 0x19a   :  { %v10468_v16 = vmul.u32.u64.low %v1737_v58, %v1732_v19  ;;  %v10469_v21 = vmul.u32.u64.high %v1737_v58, %v1732_v19, %v10468_v16  ;;  %v1671_v18 = vsub.s32 4, %v10433_v20  ;;  %v1796_v60 = vand.u32 2139095040, %v10465_v51 }
 0x19b   :  { %v8386_v13 = vadd.s32 4294967294, %v1653_v33  ;;  %v10477_v48 = vmul.u32.u64.low %v1737_v58, %v1736_v14  ;;  %v10478_v53 = vmul.u32.u64.high %v1737_v58, %v1736_v14, %v10477_v48  ;;  %vm1587_vm10 = vcmp.lt.s32.totalorder %v10332_v6, 0 }
 0x19c   :  { %v1641_v52 = vadd.s32 %v10400_v45, %v10398_v26  ;;  %v1744_v62 = vmul.u32 %v1737_v58, %v1728_v27  ;;  %v1747_v63 = vadd.s32 1, %v10469_v21  ;;  %v1797_v55 = vshrl.u32 %v1796_v60, 23 }
 0x19d   :  { %vm8387_vm11 = vcmp.lt.s32.totalorder %v8386_v13, 0  ;;  %v1574_v17 = vadd.s32 3, %v1570_v29  ;;  %v1672_v5 = vsel %vm1587_vm10, %v1671_v18, %v10433_v20  ;;  %vm1746_vm12 = vc.u32 %v10478_v53, %v10468_v16 }
 0x19e   :  { %v1656_v56 = vsel %vm8387_vm11, 0, %v8386_v13  ;;  %v8392_v23 = vadd.s32 4294967169, %v1797_v55  ;;  %v1748_v45 = vsel %vm1746_vm12, %v1747_v63, %v10469_v21  ;;  %v1793_v61 = vand.u32 2147483647, %v10465_v51 }
 0x19f   :  { %v1657_v59 = vsub.s32 32, %v1656_v56  ;;  %v1658_v54 = vshll.u32 %v1649_v10, %v1656_v56  ;;  %v1661_v42 = vsub.s32 4294967266, %v1656_v56  ;;  %v1749_v2 = vadd.s32 %v1748_v45, %v1744_v62 }
 0x1a0   :  { %v1803_v15 = vadd.s32 1, %v8392_v23  ;;  %v1575_v31 = vand.u32 3, %v1574_v17  ;;  %vm10494_vm13 = vcmp.le.f32.partialorder %v1585_v3, 0.7853982  ;;  %v1800_v0 = vand.u32 8388607, %v1793_v61 }
 0x1a1   :  { %v1659_v22 = vshrl.u32 %v1641_v52, %v1657_v59  ;;  %v1662_v26 = vadd.s32 127, %v1661_v42  ;;  %v1674_v10 = vsel %vm10494_vm13, 0, %v1672_v5  ;;  %v1750_v9 = vadd.s32 536870912, %v1749_v2 }
 0x1a2   :  { %v9029_v43 = vpop.eup %9028  ;;  %vm1804_vm14 = vcmp.gt.s32.totalorder %v1803_v15, 0  ;;  %vm1576_vm15 = vcmp.lt.s32.totalorder %v1575_v31, 2  ;;  %vm1577_vm0 = vcmp.eq.s32.totalorder %v1575_v31, 0  ;;  %vm1580_vm1 = vcmp.eq.s32.totalorder %v1575_v31, 2 }
 0x1a3   :  { %v1660_v20 = vor.u32 %v1659_v22, %v1658_v54  ;;  %v1663_v37 = vshll.u32 %v1662_v26, 23  ;;  %v9031_v1 = vpop.eup %9030  ;;  %v1805_v49 = vsel %vm1804_vm14, %v1803_v15, 0  ;;  %v1581_v47 = vxor.u32 2147483648, %v9029_v43 }
 0x1a4   :  { %v10502_v44 = vshrl.u32 %v1750_v9, 30  ;;  %v1807_v3 = vand.u32 31, %v1805_v49  ;;  %v1578_v57 = vxor.u32 2147483648, %v9031_v1  ;;  %v10504_v24 = vadd.s32 3, %v1674_v10 }
 0x1a5   :  { %v1664_v35 = vor.u32 4788187, %v1663_v37  ;;  %v1667_v50 = vcvt.s32.f32 %v1660_v20  ;;  %v1801_v28 = vor.u32 8388608, %v1800_v0  ;;  %vm1573_vm2 = vweird.f32 %v10277_v39 }
 0x1a6   :  { %v1752_v12 = vshll.u32 %v10502_v44, 30  ;;  %v1808_v25 = vsub.s32 32, %v1807_v3  ;;  %v1810_v8 = vshll.u32 %v9337_v30, %v1807_v3  ;;  %v1813_v58 = vshll.u32 %v9338_v32, %v1807_v3 }
 0x1a7   :  { %v1665_v7 = vand.u32 2147483647, %v1664_v35  ;;  %v1582_v33 = vsel %vm1580_vm1, %v1581_v47, %v9031_v1  ;;  %v1816_v29 = vshll.u32 %v9339_v34, %v1807_v3  ;;  %v1806_v27 = vshrl.u32 %v1805_v49, 5 }
 0x1a8   :  { %v1753_v11 = vsub.s32 %v1749_v2, %v1752_v12  ;;  %v1811_v21 = vshrl.u32 %v9338_v32, %v1808_v25  ;;  %v1814_v14 = vshrl.u32 %v9339_v34, %v1808_v25  ;;  %v1817_v18 = vshrl.u32 %v9340_v36, %v1808_v25 }
 0x1a9   :  { %v1668_v19 = vmul.f32 %v1667_v50, %v1665_v7  ;;  %v1579_v48 = vsel %vm1577_vm0, %v9029_v43, %v1578_v57  ;;  %v1809_v52 = vshrl.u32 %v9337_v30, %v1808_v25  ;;  %v1819_v56 = vshll.u32 %v9340_v36, %v1807_v3 }
 0x1aa   :  { %v1755_v60 = vsub.s32 0, %v1753_v11  ;;  %v1812_v63 = vor.u32 %v1811_v21, %v1810_v8  ;;  %v1815_v55 = vor.u32 %v1814_v14, %v1813_v58  ;;  %v1820_v17 = vshrl.u32 %v9341_v38, %v1808_v25 }
 0x1ab   :  { %v1669_v13 = vxor.u32 2147483648, %v1668_v19  ;;  %v1818_v42 = vor.u32 %v1817_v18, %v1816_v29  ;;  %v1822_v5 = vshll.u32 %v9341_v38, %v1807_v3  ;;  %v1823_v22 = vshrl.u32 %v9342_v46, %v1808_v25 }
 0x1ac   :  { %v8389_v54 = vmin.u32 %v1755_v60, %v1753_v11  ;;  %v1821_v23 = vor.u32 %v1820_v17, %v1819_v56  ;;  %vm1825_vm3 = vcmp.lt.s32.totalorder %v1806_v27, 1  ;;  %v1745_v26 = vadd.s32 %v10468_v16, %v10478_v53 }
 0x1ad   :  { %v1670_v62 = vsel %vm1587_vm10, %v1669_v13, %v1668_v19  ;;  %v1841_v2 = vshll.u32 %v1801_v28, 8  ;;  %v1583_v15 = vsel %vm1576_vm15, %v1579_v48, %v1582_v33  ;;  %v1824_v43 = vor.u32 %v1823_v22, %v1822_v5 }
 0x1ae   :  { %v1673_v59 = vsel %vm10494_vm13, %v10332_v6, %v1670_v62  ;;  %v1757_v45 = vclz %v8389_v54  ;;  %vm1826_vm4 = vcmp.lt.s32.totalorder %v1806_v27, 2  ;;  %vm1827_vm5 = vcmp.lt.s32.totalorder %v1806_v27, 3 }
 0x1af   :  { %9032 = vcosq.f32 %v1673_v59  ;;  %vm1828_vm6 = vcmp.lt.s32.totalorder %v1806_v27, 4  ;;  %v1829_v20 = vsel %vm1825_vm3, %v1809_v52, %v1812_v63  ;;  %v1833_v37 = vsel %vm1825_vm3, %v1812_v63, %v1815_v55 }
 0x1b0   :  { %9034 = vsinq.f32 %v1673_v59  ;;  %v8390_v40 = vadd.s32 4294967294, %v1757_v45  ;;  %v1830_v1 = vsel %vm1828_vm6, %v1818_v42, 2102212464  ;;  %v1834_v10 = vsel %vm1828_vm6, %v1821_v23, 920167782 }
 0x1b1   :  { %v1837_v9 = vsel %vm1825_vm3, %v1815_v55, %v1818_v42  ;;  %v1838_v35 = vsel %vm1828_vm6, %v1824_v43, 1326507024  ;;  %v1831_v50 = vsel %vm1827_vm5, %v1815_v55, %v1830_v1  ;;  %v1835_v0 = vsel %vm1827_vm5, %v1818_v42, %v1834_v10 }
 0x1b2   :  { %vm8391_vm7 = vcmp.lt.s32.totalorder %v8390_v40, 0  ;;  %v1839_v49 = vsel %vm1827_vm5, %v1821_v23, %v1838_v35  ;;  %v10530_v16 = vsel %vm1573_vm2, nan, %v1583_v15  ;;  %v1836_v31 = vsel %vm1826_vm4, %v1833_v37, %v1835_v0 }
 0x1b3   :  { %v1760_v53 = vsel %vm8391_vm7, 0, %v8390_v40  ;;  %v1840_v47 = vsel %vm1826_vm4, %v1837_v9, %v1839_v49  ;;  %v1832_v12 = vsel %vm1826_vm4, %v1829_v20, %v1831_v50  ;;  %v1900_v33 = vand.u32 2139095040, %v10530_v16 }
 0x1b4   :  { %v1761_v3 = vsub.s32 32, %v1760_v53  ;;  %v1762_v7 = vshll.u32 %v1753_v11, %v1760_v53  ;;  %v1765_v57 = vsub.s32 4294967266, %v1760_v53  ;;  %v1679_v21 = vand.u32 3, %v10504_v24 }
 0x1b5   :  { %v10535_v25 = vmul.u32.u64.low %v1841_v2, %v1840_v47  ;;  %v10536_v19 = vmul.u32.u64.high %v1841_v2, %v1840_v47, %v10535_v25  ;;  %v10538_v28 = vmul.u32.u64.low %v1841_v2, %v1836_v31  ;;  %v10539_v8 = vmul.u32.u64.high %v1841_v2, %v1836_v31, %v10538_v28 }
 0x1b6   :  { %v1763_v39 = vshrl.u32 %v1745_v26, %v1761_v3  ;;  %v1766_v58 = vadd.s32 127, %v1765_v57  ;;  %v1848_v14 = vmul.u32 %v1841_v2, %v1832_v12  ;;  %v1901_v27 = vshrl.u32 %v1900_v33, 23 }
 0x1b7   :  { %vm1850_vm8 = vc.u32 %v10536_v19, %v10538_v28  ;;  %v1851_v11 = vadd.s32 1, %v10539_v8  ;;  %v1775_v52 = vsub.s32 4, %v10502_v44  ;;  %v1897_v24 = vand.u32 2147483647, %v10530_v16 }
 0x1b8   :  { %v1764_v29 = vor.u32 %v1763_v39, %v1762_v7  ;;  %v1767_v13 = vshll.u32 %v1766_v58, 23  ;;  %v8396_v55 = vadd.s32 4294967169, %v1901_v27  ;;  %vm1684_vm9 = vcmp.eq.s32.totalorder %v1679_v21, 2 }
 0x1b9   :  { %v1852_v63 = vsel %vm1850_vm8, %v1851_v11, %v10539_v8  ;;  %vm1681_vm10 = vcmp.eq.s32.totalorder %v1679_v21, 0  ;;  %vm1691_vm11 = vcmp.lt.s32.totalorder %v10381_v4, 0  ;;  %vm1680_vm12 = vcmp.lt.s32.totalorder %v1679_v21, 2 }
 0x1ba   :  { %v1768_v48 = vor.u32 4788187, %v1767_v13  ;;  %v1771_v60 = vcvt.s32.f32 %v1764_v29  ;;  %v1853_v54 = vadd.s32 %v1852_v63, %v1848_v14  ;;  %v1907_v42 = vadd.s32 1, %v8396_v55 }
 0x1bb   :  { %vm10553_vm13 = vcmp.le.f32.partialorder %v1689_v41, 0.7853982  ;;  %v1776_v45 = vsel %vm1691_vm11, %v1775_v52, %v10502_v44  ;;  %v1904_v2 = vand.u32 8388607, %v1897_v24  ;;  %vm1677_vm15 = vweird.f32 %v10332_v6 }
 0x1bc   :  { %v9033_v18 = vpop.eup %9032  ;;  %v1769_v59 = vand.u32 2147483647, %v1768_v48  ;;  %v1854_v22 = vadd.s32 536870912, %v1853_v54  ;;  %vm1908_vm14 = vcmp.gt.s32.totalorder %v1907_v42, 0  ;;  %v1778_v1 = vsel %vm10553_vm13, 0, %v1776_v45 }
 0x1bd   :  { %v9035_v56 = vpop.eup %9034  ;;  %v1685_v62 = vxor.u32 2147483648, %v9033_v18  ;;  %v1909_v20 = vsel %vm1908_vm14, %v1907_v42, 0  ;;  %v1905_v35 = vor.u32 8388608, %v1904_v2  ;;  %v1782_v21 = vadd.s32 3, %v1778_v1 }
 0x1be   :  { %v1682_v17 = vxor.u32 2147483648, %v9035_v56  ;;  %v1772_v23 = vmul.f32 %v1771_v60, %v1769_v59  ;;  %v10562_v40 = vshrl.u32 %v1854_v22, 30  ;;  %v1911_v41 = vand.u32 31, %v1909_v20 }
 0x1bf   :  { %v1686_v26 = vsel %vm1684_vm9, %v1685_v62, %v9035_v56  ;;  %v1910_v31 = vshrl.u32 %v1909_v20, 5  ;;  %v1945_v48 = vshll.u32 %v1905_v35, 8 }
 0x1c0   :  { %v1683_v15 = vsel %vm1681_vm10, %v9033_v18, %v1682_v17  ;;  %v1773_v43 = vxor.u32 2147483648, %v1772_v23  ;;  %v1856_v44 = vshll.u32 %v10562_v40, 30  ;;  %v1912_v50 = vsub.s32 32, %v1911_v41 }
 0x1c1   :  { %v1687_v10 = vsel %vm1680_vm12, %v1683_v15, %v1686_v26  ;;  %v1914_v49 = vshll.u32 %v9337_v30, %v1911_v41  ;;  %v1917_v53 = vshll.u32 %v9338_v32, %v1911_v41  ;;  %v1920_v3 = vshll.u32 %v9339_v34, %v1911_v41 }
 0x1c2   :  { %v1774_v37 = vsel %vm1691_vm11, %v1773_v43, %v1772_v23  ;;  %v10574_v0 = vsub.s32 %v1853_v54, %v1856_v44  ;;  %v1915_v47 = vshrl.u32 %v9338_v32, %v1912_v50  ;;  %v10582_v7 = vsel %vm1677_vm15, nan, %v1687_v10 }
 0x1c3   :  { %v1777_v9 = vsel %vm10553_vm13, %v10381_v4, %v1774_v37  ;;  %v1918_v12 = vshrl.u32 %v9339_v34, %v1912_v50  ;;  %v1921_v25 = vshrl.u32 %v9340_v36, %v1912_v50  ;;  %v1913_v8 = vshrl.u32 %v9337_v30, %v1912_v50 }
 0x1c4   :  { %9036 = vcosq.f32 %v1777_v9  ;;  %v1859_v57 = vsub.s32 0, %v10574_v0  ;;  %v1923_v39 = vshll.u32 %v9340_v36, %v1911_v41  ;;  %v1924_v58 = vshrl.u32 %v9341_v38, %v1912_v50 }
 0x1c5   :  { %9038 = vsinq.f32 %v1777_v9  ;;  %v1926_v33 = vshll.u32 %v9341_v38, %v1911_v41  ;;  %v1916_v6 = vor.u32 %v1915_v47, %v1914_v49  ;;  %v1919_v13 = vor.u32 %v1918_v12, %v1917_v53 }
 0x1c6   :  { %v8393_v29 = vmin.u32 %v1859_v57, %v10574_v0  ;;  %v1922_v14 = vor.u32 %v1921_v25, %v1920_v3  ;;  %v1925_v11 = vor.u32 %v1924_v58, %v1923_v39  ;;  %v1927_v27 = vshrl.u32 %v9342_v46, %v1912_v50 }
 0x1c7   :  { %vm1929_vm0 = vcmp.lt.s32.totalorder %v1910_v31, 1  ;;  %vm1930_vm1 = vcmp.lt.s32.totalorder %v1910_v31, 2  ;;  %v2004_v60 = vand.u32 2139095040, %v10582_v7  ;;  %vm1931_vm2 = vcmp.lt.s32.totalorder %v1910_v31, 3 }
 0x1c8   :  { %v1861_v18 = vclz %v8393_v29  ;;  %v1928_v52 = vor.u32 %v1927_v27, %v1926_v33  ;;  %vm1932_vm3 = vcmp.lt.s32.totalorder %v1910_v31, 4  ;;  %v1933_v56 = vsel %vm1929_vm0, %v1913_v8, %v1916_v6 }
 0x1c9   :  { %v1934_v63 = vsel %vm1932_vm3, %v1922_v14, 2102212464  ;;  %v1937_v55 = vsel %vm1929_vm0, %v1916_v6, %v1919_v13  ;;  %v1938_v17 = vsel %vm1932_vm3, %v1925_v11, 920167782  ;;  %v1941_v42 = vsel %vm1929_vm0, %v1919_v13, %v1922_v14 }
 0x1ca   :  { %v8394_v62 = vadd.s32 4294967294, %v1861_v18  ;;  %v1935_v59 = vsel %vm1931_vm2, %v1919_v13, %v1934_v63  ;;  %v1939_v54 = vsel %vm1931_vm2, %v1922_v14, %v1938_v17  ;;  %v1942_v5 = vsel %vm1932_vm3, %v1928_v52, 1326507024 }
 0x1cb   :  { %v1849_v23 = vadd.s32 %v10538_v28, %v10536_v19  ;;  %v1940_v22 = vsel %vm1930_vm1, %v1937_v55, %v1939_v54  ;;  %v1943_v26 = vsel %vm1931_vm2, %v1925_v11, %v1942_v5  ;;  %v1936_v1 = vsel %vm1930_vm1, %v1933_v56, %v1935_v59 }
 0x1cc   :  { %vm8395_vm4 = vcmp.lt.s32.totalorder %v8394_v62, 0  ;;  %v1944_v2 = vsel %vm1930_vm1, %v1941_v42, %v1943_v26  ;;  %v10598_v15 = vmul.u32.u64.low %v1945_v48, %v1940_v22  ;;  %v10599_v43 = vmul.u32.u64.high %v1945_v48, %v1940_v22, %v10598_v15 }
 0x1cd   :  { %v1864_v45 = vsel %vm8395_vm4, 0, %v8394_v62  ;;  %v1783_v10 = vand.u32 3, %v1782_v21  ;;  %v10604_v19 = vmul.u32.u64.low %v1945_v48, %v1944_v2  ;;  %v10605_v28 = vmul.u32.u64.high %v1945_v48, %v1944_v2, %v10604_v19 }
 0x1ce   :  { %v1865_v20 = vsub.s32 32, %v1864_v45  ;;  %v1866_v41 = vshll.u32 %v10574_v0, %v1864_v45  ;;  %v1869_v37 = vsub.s32 4294967266, %v1864_v45  ;;  %v2005_v9 = vshrl.u32 %v2004_v60, 23 }
 0x1cf   :  { %v1952_v53 = vmul.u32 %v1945_v48, %v1936_v1  ;;  %v1955_v47 = vadd.s32 1, %v10599_v43  ;;  %v2001_v3 = vand.u32 2147483647, %v10582_v7  ;;  %vm1785_vm5 = vcmp.eq.s32.totalorder %v1783_v10, 0 }
 0x1d0   :  { %v1867_v50 = vshrl.u32 %v1849_v23, %v1865_v20  ;;  %v1870_v49 = vadd.s32 127, %v1869_v37  ;;  %v8400_v57 = vadd.s32 4294967169, %v2005_v9  ;;  %vm1788_vm6 = vcmp.eq.s32.totalorder %v1783_v10, 2 }
 0x1d1   :  { %v9037_v44 = vpop.eup %9036  ;;  %vm1954_vm7 = vc.u32 %v10605_v28, %v10598_v15  ;;  %v1879_v33 = vsub.s32 4, %v10562_v40  ;;  %vm1784_vm8 = vcmp.lt.s32.totalorder %v1783_v10, 2  ;;  %v2008_v6 = vand.u32 8388607, %v2001_v3 }
 0x1d2   :  { %v9039_v35 = vpop.eup %9038  ;;  %v1789_v0 = vxor.u32 2147483648, %v9037_v44  ;;  %v1868_v25 = vor.u32 %v1867_v50, %v1866_v41  ;;  %v1871_v31 = vshll.u32 %v1870_v49, 23  ;;  %v2011_v8 = vadd.s32 1, %v8400_v57 }
 0x1d3   :  { %v1786_v12 = vxor.u32 2147483648, %v9039_v35  ;;  %v1956_v21 = vsel %vm1954_vm7, %v1955_v47, %v10599_v43  ;;  %vm1795_vm10 = vcmp.lt.s32.totalorder %v10465_v51, 0  ;;  %vm1781_vm11 = vweird.f32 %v10381_v4 }
 0x1d4   :  { %v1872_v39 = vor.u32 4788187, %v1871_v31  ;;  %v1875_v58 = vcvt.s32.f32 %v1868_v25  ;;  %v1957_v29 = vadd.s32 %v1956_v21, %v1952_v53  ;;  %vm2012_vm9 = vcmp.gt.s32.totalorder %v2011_v8, 0 }
 0x1d5   :  { %v1787_v13 = vsel %vm1785_vm5, %v9037_v44, %v1786_v12  ;;  %v1790_v14 = vsel %vm1788_vm6, %v1789_v0, %v9039_v35  ;;  %v2013_v27 = vsel %vm2012_vm9, %v2011_v8, 0  ;;  %vm10619_vm12 = vcmp.le.f32.partialorder %v1793_v61, 0.7853982 }
 0x1d6   :  { %v1873_v11 = vand.u32 2147483647, %v1872_v39  ;;  %v1958_v18 = vadd.s32 536870912, %v1957_v29  ;;  %v2015_v48 = vand.u32 31, %v2013_v27  ;;  %v1880_v56 = vsel %vm1795_vm10, %v1879_v33, %v10562_v40 }
 0x1d7   :  { %v1791_v62 = vsel %vm1784_vm8, %v1787_v13, %v1790_v14  ;;  %v2009_v55 = vor.u32 8388608, %v2008_v6  ;;  %v2014_v54 = vshrl.u32 %v2013_v27, 5  ;;  %v1882_v31 = vsel %vm10619_vm12, 0, %v1880_v56 }
 0x1d8   :  { %v1876_v52 = vmul.f32 %v1875_v58, %v1873_v11  ;;  %v10626_v63 = vshrl.u32 %v1958_v18, 30  ;;  %v2016_v17 = vsub.s32 32, %v2015_v48  ;;  %v2018_v42 = vshll.u32 %v9337_v30, %v2015_v48 }
 0x1d9   :  { %v2021_v5 = vshll.u32 %v9338_v32, %v2015_v48  ;;  %v2024_v22 = vshll.u32 %v9339_v34, %v2015_v48  ;;  %v2027_v26 = vshll.u32 %v9340_v36, %v2015_v48  ;;  %v10641_v20 = vsel %vm1781_vm11, nan, %v1791_v62 }
 0x1da   :  { %v1877_v59 = vxor.u32 2147483648, %v1876_v52  ;;  %v1960_v61 = vshll.u32 %v10626_v63, 30  ;;  %v2019_v23 = vshrl.u32 %v9338_v32, %v2016_v17  ;;  %v2022_v45 = vshrl.u32 %v9339_v34, %v2016_v17 }
 0x1db   :  { %v2025_v2 = vshrl.u32 %v9340_v36, %v2016_v17  ;;  %v2028_v43 = vshrl.u32 %v9341_v38, %v2016_v17  ;;  %v2017_v1 = vshrl.u32 %v9337_v30, %v2016_v17  ;;  %v2030_v19 = vshll.u32 %v9341_v38, %v2015_v48 }
 0x1dc   :  { %v1878_v40 = vsel %vm1795_vm10, %v1877_v59, %v1876_v52  ;;  %v1961_v37 = vsub.s32 %v1957_v29, %v1960_v61  ;;  %v2020_v44 = vor.u32 %v2019_v23, %v2018_v42  ;;  %v2023_v10 = vor.u32 %v2022_v45, %v2021_v5 }
 0x1dd   :  { %v1881_v41 = vsel %vm10619_vm12, %v10465_v51, %v1878_v40  ;;  %v2049_v9 = vshll.u32 %v2009_v55, 8  ;;  %v2026_v50 = vor.u32 %v2025_v2, %v2024_v22  ;;  %v2029_v49 = vor.u32 %v2028_v43, %v2027_v26 }
 0x1de   :  { %9040 = vcosq.f32 %v1881_v41  ;;  %v1963_v35 = vsub.s32 0, %v1961_v37  ;;  %v2031_v4 = vshrl.u32 %v9342_v46, %v2016_v17  ;;  %vm2033_vm13 = vcmp.lt.s32.totalorder %v2014_v54, 1 }
 0x1df   :  { %9042 = vsinq.f32 %v1881_v41  ;;  %vm2034_vm14 = vcmp.lt.s32.totalorder %v2014_v54, 2  ;;  %vm2035_vm15 = vcmp.lt.s32.totalorder %v2014_v54, 3  ;;  %vm2036_vm0 = vcmp.lt.s32.totalorder %v2014_v54, 4 }
 0x1e0   :  { %v8397_v53 = vmin.u32 %v1963_v35, %v1961_v37  ;;  %v2037_v47 = vsel %vm2033_vm13, %v2017_v1, %v2020_v44  ;;  %v2032_v57 = vor.u32 %v2031_v4, %v2030_v19  ;;  %v2038_v12 = vsel %vm2036_vm0, %v2026_v50, 2102212464 }
 0x1e1   :  { %v2041_v0 = vsel %vm2033_vm13, %v2020_v44, %v2023_v10  ;;  %v2042_v25 = vsel %vm2036_vm0, %v2029_v49, 920167782  ;;  %v1953_v8 = vadd.s32 %v10598_v15, %v10605_v28  ;;  %v2108_v58 = vand.u32 2139095040, %v10641_v20 }
 0x1e2   :  { %v1965_v39 = vclz %v8397_v53  ;;  %v2039_v33 = vsel %vm2035_vm15, %v2023_v10, %v2038_v12  ;;  %v2043_v21 = vsel %vm2035_vm15, %v2026_v50, %v2042_v25  ;;  %v2045_v29 = vsel %vm2033_vm13, %v2023_v10, %v2026_v50 }
 0x1e3   :  { %v2046_v6 = vsel %vm2036_vm0, %v2032_v57, 1326507024  ;;  %v2040_v14 = vsel %vm2034_vm14, %v2037_v47, %v2039_v33  ;;  %v2044_v11 = vsel %vm2034_vm14, %v2041_v0, %v2043_v21  ;;  %v2105_v48 = vand.u32 2147483647, %v10641_v20 }
 0x1e4   :  { %v8398_v13 = vadd.s32 4294967294, %v1965_v39  ;;  %v2047_v27 = vsel %vm2035_vm15, %v2029_v49, %v2046_v6  ;;  %v10663_v15 = vmul.u32.u64.low %v2049_v9, %v2044_v11  ;;  %v10664_v28 = vmul.u32.u64.high %v2049_v9, %v2044_v11, %v10663_v15 }
 0x1e5   :  { %v2048_v18 = vsel %vm2034_vm14, %v2045_v29, %v2047_v27  ;;  %v2109_v56 = vshrl.u32 %v2108_v58, 23  ;;  %v1886_v62 = vadd.s32 3, %v1882_v31  ;;  %v2056_v17 = vmul.u32 %v2049_v9, %v2040_v14 }
 0x1e6   :  { %vm8399_vm1 = vcmp.lt.s32.totalorder %v8398_v13, 0  ;;  %v10668_v60 = vmul.u32.u64.low %v2049_v9, %v2048_v18  ;;  %v10669_v52 = vmul.u32.u64.high %v2049_v9, %v2048_v18, %v10668_v60  ;;  %v2059_v54 = vadd.s32 1, %v10664_v28 }
 0x1e7   :  { %v1968_v55 = vsel %vm8399_vm1, 0, %v8398_v13  ;;  %v8404_v61 = vadd.s32 4294967169, %v2109_v56  ;;  %v2112_v26 = vand.u32 8388607, %v2105_v48  ;;  %v1887_v41 = vand.u32 3, %v1886_v62 }
 0x1e8   :  { %v1969_v59 = vsub.s32 32, %v1968_v55  ;;  %v1970_v42 = vshll.u32 %v1961_v37, %v1968_v55  ;;  %v1973_v5 = vsub.s32 4294967266, %v1968_v55  ;;  %vm2058_vm2 = vc.u32 %v10669_v52, %v10663_v15 }
 0x1e9   :  { %v2060_v45 = vsel %vm2058_vm2, %v2059_v54, %v10664_v28  ;;  %v2115_v2 = vadd.s32 1, %v8404_v61  ;;  %v1983_v10 = vsub.s32 4, %v10626_v63  ;;  %v2113_v50 = vor.u32 8388608, %v2112_v26 }
 0x1ea   :  { %v1971_v23 = vshrl.u32 %v1953_v8, %v1969_v59  ;;  %v1974_v22 = vadd.s32 127, %v1973_v5  ;;  %v2061_v44 = vadd.s32 %v2060_v45, %v2056_v17  ;;  %vm1885_vm4 = vweird.f32 %v10465_v51 }
 0x1eb   :  { %v9041_v40 = vpop.eup %9040  ;;  %vm2116_vm3 = vcmp.gt.s32.totalorder %v2115_v2, 0  ;;  %vm1889_vm5 = vcmp.eq.s32.totalorder %v1887_v41, 0  ;;  %vm1892_vm6 = vcmp.eq.s32.totalorder %v1887_v41, 2  ;;  %vm1888_vm7 = vcmp.lt.s32.totalorder %v1887_v41, 2 }
 0x1ec   :  { %v9043_v43 = vpop.eup %9042  ;;  %v1972_v1 = vor.u32 %v1971_v23, %v1970_v42  ;;  %v1975_v37 = vshll.u32 %v1974_v22, 23  ;;  %v2062_v35 = vadd.s32 536870912, %v2061_v44  ;;  %v1893_v4 = vxor.u32 2147483648, %v9041_v40 }
 0x1ed   :  { %v1890_v49 = vxor.u32 2147483648, %v9043_v43  ;;  %v2117_v53 = vsel %vm2116_vm3, %v2115_v2, 0  ;;  %vm10683_vm8 = vcmp.le.f32.partialorder %v1897_v24, 0.7853982  ;;  %vm1899_vm9 = vcmp.lt.s32.totalorder %v10530_v16, 0 }
 0x1ee   :  { %v1976_v19 = vor.u32 4788187, %v1975_v37  ;;  %v1979_v9 = vcvt.s32.f32 %v1972_v1  ;;  %v10679_v57 = vshrl.u32 %v2062_v35, 30  ;;  %v2119_v0 = vand.u32 31, %v2117_v53 }
 0x1ef   :  { %v10691_v31 = vsel %vm1899_vm9, %v1983_v10, %v10626_v63  ;;  %v10694_v39 = vshll.u32 %v2113_v50, 8  ;;  %v1891_v58 = vsel %vm1889_vm5, %v9041_v40, %v1890_v49  ;;  %v1894_v33 = vsel %vm1892_vm6, %v1893_v4, %v9043_v43 }
 0x1f0   :  { %v1977_v47 = vand.u32 2147483647, %v1976_v19  ;;  %v2064_v8 = vshll.u32 %v10679_v57, 30  ;;  %v2118_v21 = vshrl.u32 %v2117_v53, 5  ;;  %v2120_v24 = vsub.s32 32, %v2119_v0 }
 0x1f1   :  { %v2122_v13 = vshll.u32 %v9337_v30, %v2119_v0  ;;  %v2125_v14 = vshll.u32 %v9338_v32, %v2119_v0  ;;  %v2128_v63 = vshll.u32 %v9339_v34, %v2119_v0  ;;  %v2131_v18 = vshll.u32 %v9340_v36, %v2119_v0 }
 0x1f2   :  { %v1980_v25 = vmul.f32 %v1979_v9, %v1977_v47  ;;  %v2065_v6 = vsub.s32 %v2061_v44, %v2064_v8  ;;  %v2123_v11 = vshrl.u32 %v9338_v32, %v2120_v24  ;;  %v2126_v27 = vshrl.u32 %v9339_v34, %v2120_v24 }
 0x1f3   :  { %v1895_v28 = vsel %vm1888_vm7, %v1891_v58, %v1894_v33  ;;  %v2129_v62 = vshrl.u32 %v9340_v36, %v2120_v24  ;;  %v2121_v17 = vshrl.u32 %v9337_v30, %v2120_v24  ;;  %v2132_v59 = vshrl.u32 %v9341_v38, %v2120_v24 }
 0x1f4   :  { %v1981_v29 = vxor.u32 2147483648, %v1980_v25  ;;  %v2067_v56 = vsub.s32 0, %v2065_v6  ;;  %vm2137_vm10 = vcmp.lt.s32.totalorder %v2118_v21, 1  ;;  %v2124_v5 = vor.u32 %v2123_v11, %v2122_v13 }
 0x1f5   :  { %v2127_v61 = vor.u32 %v2126_v27, %v2125_v14  ;;  %v2130_v54 = vor.u32 %v2129_v62, %v2128_v63  ;;  %v2133_v23 = vor.u32 %v2132_v59, %v2131_v18  ;;  %v2134_v22 = vshll.u32 %v9341_v38, %v2119_v0 }
 0x1f6   :  { %v1982_v60 = vsel %vm1899_vm9, %v1981_v29, %v1980_v25  ;;  %v8401_v42 = vmin.u32 %v2067_v56, %v2065_v6  ;;  %v2135_v26 = vshrl.u32 %v9342_v46, %v2120_v24  ;;  %v10715_v40 = vsel %vm1885_vm4, nan, %v1895_v28 }
 0x1f7   :  { %v1985_v55 = vsel %vm10683_vm8, %v10530_v16, %v1982_v60  ;;  %v2057_v45 = vadd.s32 %v10663_v15, %v10669_v52  ;;  %vm2138_vm11 = vcmp.lt.s32.totalorder %v2118_v21, 2  ;;  %vm2139_vm12 = vcmp.lt.s32.totalorder %v2118_v21, 3 }
 0x1f8   :  { %9044 = vcosq.f32 %v1985_v55  ;;  %v2069_v2 = vclz %v8401_v42  ;;  %v2136_v43 = vor.u32 %v2135_v26, %v2134_v22  ;;  %vm2140_vm13 = vcmp.lt.s32.totalorder %v2118_v21, 4 }
 0x1f9   :  { %9046 = vsinq.f32 %v1985_v55  ;;  %v2141_v1 = vsel %vm2137_vm10, %v2121_v17, %v2124_v5  ;;  %v2142_v37 = vsel %vm2140_vm13, %v2130_v54, 2102212464  ;;  %v2145_v44 = vsel %vm2137_vm10, %v2124_v5, %v2127_v61 }
 0x1fa   :  { %v8402_v41 = vadd.s32 4294967294, %v2069_v2  ;;  %v2143_v10 = vsel %vm2139_vm12, %v2127_v61, %v2142_v37  ;;  %v2146_v19 = vsel %vm2140_vm13, %v2133_v23, 920167782  ;;  %v2149_v51 = vsel %vm2137_vm10, %v2127_v61, %v2130_v54 }
 0x1fb   :  { %v2150_v9 = vsel %vm2140_vm13, %v2136_v43, 1326507024  ;;  %v2147_v35 = vsel %vm2139_vm12, %v2130_v54, %v2146_v19  ;;  %v2212_v15 = vand.u32 2139095040, %v10715_v40  ;;  %v1986_v52 = vsel %vm10683_vm8, 0, %v10691_v31 }
 0x1fc   :  { %vm8403_vm14 = vcmp.lt.s32.totalorder %v8402_v41, 0  ;;  %v2151_v50 = vsel %vm2139_vm12, %v2133_v23, %v2150_v9  ;;  %v2148_v4 = vsel %vm2138_vm11, %v2145_v44, %v2147_v35  ;;  %v2144_v8 = vsel %vm2138_vm11, %v2141_v1, %v2143_v10 }
 0x1fd   :  { %v2072_v49 = vsel %vm8403_vm14, 0, %v8402_v41  ;;  %v2152_v53 = vsel %vm2138_vm11, %v2149_v51, %v2151_v50  ;;  %v10734_v24 = vmul.u32.u64.low %v10694_v39, %v2148_v4  ;;  %v10735_v29 = vmul.u32.u64.high %v10694_v39, %v2148_v4, %v10734_v24 }
 0x1fe   :  { %v2073_v47 = vsub.s32 32, %v2072_v49  ;;  %v2074_v0 = vshll.u32 %v2065_v6, %v2072_v49  ;;  %v2077_v25 = vsub.s32 4294967266, %v2072_v49  ;;  %v2087_v13 = vsub.s32 4, %v10679_v57 }
 0x1ff   :  { %v10730_v58 = vmul.u32.u64.low %v10694_v39, %v2152_v53  ;;  %v10731_v33 = vmul.u32.u64.high %v10694_v39, %v2152_v53, %v10730_v58  ;;  %v2213_v14 = vshrl.u32 %v2212_v15, 23  ;;  %v1990_v11 = vadd.s32 3, %v1986_v52 }
 0x200   :  { %v2075_v12 = vshrl.u32 %v2057_v45, %v2073_v47  ;;  %v2078_v31 = vadd.s32 127, %v2077_v25  ;;  %v2209_v6 = vand.u32 2147483647, %v10715_v40  ;;  %v2160_v63 = vmul.u32 %v10694_v39, %v2144_v8 }
 0x201   :  { %v8408_v18 = vadd.s32 4294967169, %v2213_v14  ;;  %vm2003_vm15 = vcmp.lt.s32.totalorder %v10582_v7, 0  ;;  %vm2162_vm0 = vc.u32 %v10731_v33, %v10734_v24  ;;  %v2163_v60 = vadd.s32 1, %v10735_v29 }
 0x202   :  { %v2076_v27 = vor.u32 %v2075_v12, %v2074_v0  ;;  %v2079_v21 = vshll.u32 %v2078_v31, 23  ;;  %v2088_v55 = vsel %vm2003_vm15, %v2087_v13, %v10679_v57  ;;  %v1991_v42 = vand.u32 3, %v1990_v11 }
 0x203   :  { %v2219_v17 = vadd.s32 1, %v8408_v18  ;;  %vm10750_vm1 = vcmp.le.f32.partialorder %v2001_v3, 0.7853982  ;;  %v2164_v5 = vsel %vm2162_vm0, %v2163_v60, %v10735_v29  ;;  %v2216_v23 = vand.u32 8388607, %v2209_v6 }
 0x204   :  { %v2080_v56 = vor.u32 4788187, %v2079_v21  ;;  %v2083_v62 = vcvt.s32.f32 %v2076_v27  ;;  %v2165_v54 = vadd.s32 %v2164_v5, %v2160_v63  ;;  %v2090_v57 = vsel %vm10750_vm1, 0, %v2088_v55 }
 0x205   :  { %v9045_v28 = vpop.eup %9044  ;;  %vm2220_vm2 = vcmp.gt.s32.totalorder %v2219_v17, 0  ;;  %vm1992_vm3 = vcmp.lt.s32.totalorder %v1991_v42, 2  ;;  %vm1993_vm4 = vcmp.eq.s32.totalorder %v1991_v42, 0  ;;  %vm1996_vm5 = vcmp.eq.s32.totalorder %v1991_v42, 2 }
 0x206   :  { %v9047_v59 = vpop.eup %9046  ;;  %v2081_v61 = vand.u32 2147483647, %v2080_v56  ;;  %v2221_v22 = vsel %vm2220_vm2, %v2219_v17, 0  ;;  %v2166_v45 = vadd.s32 536870912, %v2165_v54  ;;  %v2094_v43 = vadd.s32 3, %v2090_v57 }
 0x207   :  { %v2223_v3 = vand.u32 31, %v2221_v22  ;;  %v2217_v1 = vor.u32 8388608, %v2216_v23  ;;  %vm1989_vm6 = vweird.f32 %v10530_v16  ;;  %v1994_v37 = vxor.u32 2147483648, %v9047_v59 }
 0x208   :  { %v2084_v26 = vmul.f32 %v2083_v62, %v2081_v61  ;;  %v10759_v41 = vshrl.u32 %v2166_v45, 30  ;;  %v1997_v44 = vxor.u32 2147483648, %v9045_v28  ;;  %v2222_v52 = vshrl.u32 %v2221_v22, 5 }
 0x209   :  { %v2224_v10 = vsub.s32 32, %v2223_v3  ;;  %v2226_v19 = vshll.u32 %v9337_v30, %v2223_v3  ;;  %v2229_v35 = vshll.u32 %v9338_v32, %v2223_v3  ;;  %v2232_v50 = vshll.u32 %v9339_v34, %v2223_v3 }
 0x20a   :  { %v2085_v2 = vxor.u32 2147483648, %v2084_v26  ;;  %v2168_v9 = vshll.u32 %v10759_v41, 30  ;;  %v2235_v0 = vshll.u32 %v9340_v36, %v2223_v3  ;;  %v1995_v25 = vsel %vm1993_vm4, %v9045_v28, %v1994_v37 }
 0x20b   :  { %v2227_v49 = vshrl.u32 %v9338_v32, %v2224_v10  ;;  %v2230_v4 = vshrl.u32 %v9339_v34, %v2224_v10  ;;  %v2233_v47 = vshrl.u32 %v9340_v36, %v2224_v10  ;;  %v1998_v8 = vsel %vm1996_vm5, %v1997_v44, %v9047_v59 }
 0x20c   :  { %v2086_v51 = vsel %vm2003_vm15, %v2085_v2, %v2084_v26  ;;  %v10773_v53 = vsub.s32 %v2165_v54, %v2168_v9  ;;  %v2236_v13 = vshrl.u32 %v9341_v38, %v2224_v10  ;;  %v2225_v14 = vshrl.u32 %v9337_v30, %v2224_v10 }
 0x20d   :  { %v2089_v15 = vsel %vm10750_vm1, %v10582_v7, %v2086_v51  ;;  %v2228_v58 = vor.u32 %v2227_v49, %v2226_v19  ;;  %v2231_v12 = vor.u32 %v2230_v4, %v2229_v35  ;;  %v2234_v31 = vor.u32 %v2233_v47, %v2232_v50 }
 0x20e   :  { %9048 = vcosq.f32 %v2089_v15  ;;  %v2171_v29 = vsub.s32 0, %v10773_v53  ;;  %v2238_v11 = vshll.u32 %v9341_v38, %v2223_v3  ;;  %v2239_v27 = vshrl.u32 %v9342_v46, %v2224_v10 }
 0x20f   :  { %9050 = vsinq.f32 %v2089_v15  ;;  %vm2241_vm7 = vcmp.lt.s32.totalorder %v2222_v52, 1  ;;  %v2237_v63 = vor.u32 %v2236_v13, %v2235_v0  ;;  %vm2244_vm8 = vcmp.lt.s32.totalorder %v2222_v52, 4 }
 0x210   :  { %v8405_v21 = vmin.u32 %v2171_v29, %v10773_v53  ;;  %v2257_v18 = vshll.u32 %v2217_v1, 8  ;;  %v1999_v28 = vsel %vm1992_vm3, %v1995_v25, %v1998_v8  ;;  %v2240_v60 = vor.u32 %v2239_v27, %v2238_v11 }
 0x211   :  { %vm2243_vm9 = vcmp.lt.s32.totalorder %v2222_v52, 3  ;;  %v2246_v56 = vsel %vm2244_vm8, %v2234_v31, 2102212464  ;;  %vm2242_vm10 = vcmp.lt.s32.totalorder %v2222_v52, 2  ;;  %v2249_v55 = vsel %vm2241_vm7, %v2228_v58, %v2231_v12 }
 0x212   :  { %v2173_v62 = vclz %v8405_v21  ;;  %v2253_v17 = vsel %vm2241_vm7, %v2231_v12, %v2234_v31  ;;  %v2245_v59 = vsel %vm2241_vm7, %v2225_v14, %v2228_v58  ;;  %v2247_v39 = vsel %vm2243_vm9, %v2231_v12, %v2246_v56 }
 0x213   :  { %v2250_v5 = vsel %vm2244_vm8, %v2237_v63, 920167782  ;;  %v2254_v61 = vsel %vm2244_vm8, %v2240_v60, 1326507024  ;;  %v10788_v54 = vsel %vm1989_vm6, nan, %v1999_v28  ;;  %v2161_v42 = vadd.s32 %v10734_v24, %v10731_v33 }
 0x214   :  { %v8406_v23 = vadd.s32 4294967294, %v2173_v62  ;;  %v2251_v57 = vsel %vm2243_vm9, %v2234_v31, %v2250_v5  ;;  %v2255_v22 = vsel %vm2243_vm9, %v2237_v63, %v2254_v61  ;;  %v2248_v3 = vsel %vm2242_vm10, %v2245_v59, %v2247_v39 }
 0x215   :  { %v2252_v26 = vsel %vm2242_vm10, %v2249_v55, %v2251_v57  ;;  %v2256_v45 = vsel %vm2242_vm10, %v2253_v17, %v2255_v22  ;;  %v2316_v16 = vand.u32 2139095040, %v10788_v54  ;;  %v2095_v19 = vand.u32 3, %v2094_v43 }
 0x216   :  { %vm8407_vm11 = vcmp.lt.s32.totalorder %v8406_v23, 0  ;;  %v10792_v2 = vmul.u32.u64.low %v2257_v18, %v2256_v45  ;;  %v10793_v1 = vmul.u32.u64.high %v2257_v18, %v2256_v45, %v10792_v2  ;;  %v2191_v49 = vsub.s32 4, %v10759_v41 }
 0x217   :  { %v2176_v37 = vsel %vm8407_vm11, 0, %v8406_v23  ;;  %v10795_v44 = vmul.u32.u64.low %v2257_v18, %v2252_v26  ;;  %v10796_v10 = vmul.u32.u64.high %v2257_v18, %v2252_v26, %v10795_v44  ;;  %v2317_v24 = vshrl.u32 %v2316_v16, 23 }
 0x218   :  { %v2177_v51 = vsub.s32 32, %v2176_v37  ;;  %v2178_v9 = vshll.u32 %v10773_v53, %v2176_v37  ;;  %v2181_v35 = vsub.s32 4294967266, %v2176_v37  ;;  %v2264_v4 = vmul.u32 %v2257_v18, %v2248_v3 }
 0x219   :  { %vm2266_vm12 = vc.u32 %v10793_v1, %v10795_v44  ;;  %v2267_v0 = vadd.s32 1, %v10796_v10  ;;  %v8412_v25 = vadd.s32 4294967169, %v2317_v24  ;;  %vm2100_vm13 = vcmp.eq.s32.totalorder %v2095_v19, 2 }
 0x21a   :  { %v2179_v15 = vshrl.u32 %v2161_v42, %v2177_v51  ;;  %v2182_v52 = vadd.s32 127, %v2181_v35  ;;  %vm2097_vm14 = vcmp.eq.s32.totalorder %v2095_v19, 0  ;;  %vm2107_vm15 = vcmp.lt.s32.totalorder %v10641_v20, 0 }
 0x21b   :  { %v9049_v33 = vpop.eup %9048  ;;  %v2268_v58 = vsel %vm2266_vm12, %v2267_v0, %v10796_v10  ;;  %v2323_v29 = vadd.s32 1, %v8412_v25  ;;  %vm2096_vm0 = vcmp.lt.s32.totalorder %v2095_v19, 2  ;;  %v10810_v11 = vsel %vm2107_vm15, %v2191_v49, %v10759_v41 }
 0x21c   :  { %v9051_v50 = vpop.eup %9050  ;;  %v2101_v47 = vxor.u32 2147483648, %v9049_v33  ;;  %v2180_v8 = vor.u32 %v2179_v15, %v2178_v9  ;;  %v2183_v53 = vshll.u32 %v2182_v52, 23  ;;  %v2269_v13 = vadd.s32 %v2268_v58, %v2264_v4 }
 0x21d   :  { %v2098_v43 = vxor.u32 2147483648, %v9051_v50  ;;  %v2313_v27 = vand.u32 2147483647, %v10788_v54  ;;  %vm2324_vm1 = vcmp.gt.s32.totalorder %v2323_v29, 0  ;;  %vm10815_vm2 = vcmp.le.f32.partialorder %v2105_v48, 0.7853982 }
 0x21e   :  { %v2184_v12 = vor.u32 4788187, %v2183_v53  ;;  %v2187_v31 = vcvt.s32.f32 %v2180_v8  ;;  %v2102_v14 = vsel %vm2100_vm13, %v2101_v47, %v9051_v50  ;;  %v2270_v18 = vadd.s32 536870912, %v2269_v13 }
 0x21f   :  { %v2099_v21 = vsel %vm2097_vm14, %v9049_v33, %v2098_v43  ;;  %v2325_v28 = vsel %vm2324_vm1, %v2323_v29, 0  ;;  %vm2093_vm3 = vweird.f32 %v10582_v7  ;;  %v2194_v41 = vsel %vm10815_vm2, 0, %v10810_v11 }
 0x220   :  { %v2185_v63 = vand.u32 2147483647, %v2184_v12  ;;  %v2327_v56 = vand.u32 31, %v2325_v28  ;;  %v10823_v55 = vshrl.u32 %v2270_v18, 30  ;;  %v2103_v17 = vsel %vm2096_vm0, %v2099_v21, %v2102_v14 }
 0x221   :  { %v2320_v59 = vand.u32 8388607, %v2313_v27  ;;  %v2326_v37 = vshrl.u32 %v2325_v28, 5  ;;  %v10841_v16 = vsel %vm2093_vm3, nan, %v2103_v17  ;;  %v2265_v51 = vadd.s32 %v10795_v44, %v10793_v1 }
 0x222   :  { %v2188_v62 = vmul.f32 %v2187_v31, %v2185_v63  ;;  %v2328_v39 = vsub.s32 32, %v2327_v56  ;;  %v2330_v48 = vshll.u32 %v9337_v30, %v2327_v56  ;;  %v2272_v61 = vshll.u32 %v10823_v55, 30 }
 0x223   :  { %v2333_v23 = vshll.u32 %v9338_v32, %v2327_v56  ;;  %v2336_v57 = vshll.u32 %v9339_v34, %v2327_v56  ;;  %v2339_v45 = vshll.u32 %v9340_v36, %v2327_v56  ;;  %v2321_v9 = vor.u32 8388608, %v2320_v59 }
 0x224   :  { %v2189_v5 = vxor.u32 2147483648, %v2188_v62  ;;  %v2331_v22 = vshrl.u32 %v9338_v32, %v2328_v39  ;;  %v2334_v42 = vshrl.u32 %v9339_v34, %v2328_v39  ;;  %v2337_v26 = vshrl.u32 %v9340_v36, %v2328_v39 }
 0x225   :  { %v2273_v2 = vsub.s32 %v2269_v13, %v2272_v61  ;;  %v2340_v10 = vshrl.u32 %v9341_v38, %v2328_v39  ;;  %v2329_v33 = vshrl.u32 %v9337_v30, %v2328_v39  ;;  %v2342_v49 = vshll.u32 %v9341_v38, %v2327_v56 }
 0x226   :  { %v2190_v3 = vsel %vm2107_vm15, %v2189_v5, %v2188_v62  ;;  %v2332_v24 = vor.u32 %v2331_v22, %v2330_v48  ;;  %v2335_v50 = vor.u32 %v2334_v42, %v2333_v23  ;;  %v2338_v15 = vor.u32 %v2337_v26, %v2336_v57 }
 0x227   :  { %v2193_v19 = vsel %vm10815_vm2, %v10641_v20, %v2190_v3  ;;  %v2275_v35 = vsub.s32 0, %v2273_v2  ;;  %v2341_v52 = vor.u32 %v2340_v10, %v2339_v45  ;;  %v2343_v7 = vshrl.u32 %v9342_v46, %v2328_v39 }
 0x228   :  { %9052 = vcosq.f32 %v2193_v19  ;;  %vm2345_vm4 = vcmp.lt.s32.totalorder %v2326_v37, 1  ;;  %v2420_v47 = vand.u32 2139095040, %v10841_v16  ;;  %vm2347_vm5 = vcmp.lt.s32.totalorder %v2326_v37, 3 }
 0x229   :  { %v8409_v4 = vmin.u32 %v2275_v35, %v2273_v2  ;;  %9054 = vsinq.f32 %v2193_v19  ;;  %v2344_v0 = vor.u32 %v2343_v7, %v2342_v49  ;;  %vm2348_vm6 = vcmp.lt.s32.totalorder %v2326_v37, 4 }
 0x22a   :  { %vm2346_vm7 = vcmp.lt.s32.totalorder %v2326_v37, 2  ;;  %v2349_v44 = vsel %vm2345_vm4, %v2329_v33, %v2332_v24  ;;  %v2361_v25 = vshll.u32 %v2321_v9, 8  ;;  %v2350_v43 = vsel %vm2348_vm6, %v2338_v15, 2102212464 }
 0x22b   :  { %v2277_v1 = vclz %v8409_v4  ;;  %v2353_v8 = vsel %vm2345_vm4, %v2332_v24, %v2335_v50  ;;  %v2354_v53 = vsel %vm2348_vm6, %v2341_v52, 920167782  ;;  %v2357_v58 = vsel %vm2345_vm4, %v2335_v50, %v2338_v15 }
 0x22c   :  { %v2351_v12 = vsel %vm2347_vm5, %v2335_v50, %v2350_v43  ;;  %v2355_v31 = vsel %vm2347_vm5, %v2338_v15, %v2354_v53  ;;  %v2358_v13 = vsel %vm2348_vm6, %v2344_v0, 1326507024  ;;  %v2421_v63 = vshrl.u32 %v2420_v47, 23 }
 0x22d   :  { %v8410_v29 = vadd.s32 4294967294, %v2277_v1  ;;  %v2352_v14 = vsel %vm2346_vm7, %v2349_v44, %v2351_v12  ;;  %v2356_v11 = vsel %vm2346_vm7, %v2353_v8, %v2355_v31  ;;  %v2359_v21 = vsel %vm2347_vm5, %v2341_v52, %v2358_v13 }
 0x22e   :  { %v2360_v18 = vsel %vm2346_vm7, %v2357_v58, %v2359_v21  ;;  %v10858_v28 = vmul.u32.u64.low %v2361_v25, %v2356_v11  ;;  %v10859_v60 = vmul.u32.u64.high %v2361_v25, %v2356_v11, %v10858_v28  ;;  %v2198_v56 = vadd.s32 3, %v2194_v41 }
 0x22f   :  { %vm8411_vm8 = vcmp.lt.s32.totalorder %v8410_v29, 0  ;;  %v10862_v17 = vmul.u32.u64.low %v2361_v25, %v2360_v18  ;;  %v10863_v59 = vmul.u32.u64.high %v2361_v25, %v2360_v18, %v10862_v17  ;;  %v8416_v61 = vadd.s32 4294967169, %v2421_v63 }
 0x230   :  { %v2280_v62 = vsel %vm8411_vm8, 0, %v8410_v29  ;;  %v2368_v23 = vmul.u32 %v2361_v25, %v2352_v14  ;;  %v2371_v42 = vadd.s32 1, %v10859_v60  ;;  %v2199_v45 = vand.u32 3, %v2198_v56 }
 0x231   :  { %v2281_v39 = vsub.s32 32, %v2280_v62  ;;  %v2282_v48 = vshll.u32 %v2273_v2, %v2280_v62  ;;  %v2285_v5 = vsub.s32 4294967266, %v2280_v62  ;;  %v2427_v26 = vadd.s32 1, %v8416_v61 }
 0x232   :  { %vm2370_vm9 = vc.u32 %v10863_v59, %v10858_v28  ;;  %v2417_v10 = vand.u32 2147483647, %v10841_v16  ;;  %vm2211_vm10 = vcmp.lt.s32.totalorder %v10715_v40, 0  ;;  %vm10873_vm12 = vcmp.le.f32.partialorder %v2209_v6, 0.7853982 }
 0x233   :  { %v2283_v57 = vshrl.u32 %v2265_v51, %v2281_v39  ;;  %v2286_v22 = vadd.s32 127, %v2285_v5  ;;  %v2372_v37 = vsel %vm2370_vm9, %v2371_v42, %v10859_v60  ;;  %vm2428_vm11 = vcmp.gt.s32.totalorder %v2427_v26, 0 }
 0x234   :  { %v2373_v2 = vadd.s32 %v2372_v37, %v2368_v23  ;;  %v2429_v24 = vsel %vm2428_vm11, %v2427_v26, 0  ;;  %vm2200_vm13 = vcmp.lt.s32.totalorder %v2199_v45, 2  ;;  %vm2201_vm14 = vcmp.eq.s32.totalorder %v2199_v45, 0 }
 0x235   :  { %v2284_v3 = vor.u32 %v2283_v57, %v2282_v48  ;;  %v2287_v41 = vshll.u32 %v2286_v22, 23  ;;  %v9053_v19 = vpop.eup %9052  ;;  %v2431_v15 = vand.u32 31, %v2429_v24  ;;  %vm2204_vm15 = vcmp.eq.s32.totalorder %v2199_v45, 2 }
 0x236   :  { %v9055_v51 = vpop.eup %9054  ;;  %v2374_v50 = vadd.s32 536870912, %v2373_v2  ;;  %v2295_v49 = vsub.s32 4, %v10823_v55  ;;  %v2424_v7 = vand.u32 8388607, %v2417_v10  ;;  %v2205_v47 = vxor.u32 2147483648, %v9053_v19 }
 0x237   :  { %v2288_v35 = vor.u32 4788187, %v2287_v41  ;;  %v2291_v33 = vcvt.s32.f32 %v2284_v3  ;;  %v2202_v4 = vxor.u32 2147483648, %v9055_v51  ;;  %v2432_v0 = vsub.s32 32, %v2431_v15 }
 0x238   :  { %v10880_v6 = vshrl.u32 %v2374_v50, 30  ;;  %v2430_v44 = vshrl.u32 %v2429_v24, 5  ;;  %v2434_v25 = vshll.u32 %v9337_v30, %v2431_v15  ;;  %v2437_v43 = vshll.u32 %v9338_v32, %v2431_v15 }
 0x239   :  { %v2289_v52 = vand.u32 2147483647, %v2288_v35  ;;  %v2435_v53 = vshrl.u32 %v9338_v32, %v2432_v0  ;;  %v2440_v58 = vshll.u32 %v9339_v34, %v2431_v15  ;;  %v2443_v29 = vshll.u32 %v9340_v36, %v2431_v15 }
 0x23a   :  { %v2376_v8 = vshll.u32 %v10880_v6, 30  ;;  %vm2197_vm0 = vweird.f32 %v10641_v20  ;;  %v2438_v31 = vshrl.u32 %v9339_v34, %v2432_v0  ;;  %v2441_v13 = vshrl.u32 %v9340_v36, %v2432_v0 }
 0x23b   :  { %v2292_v1 = vmul.f32 %v2291_v33, %v2289_v52  ;;  %v2444_v14 = vshrl.u32 %v9341_v38, %v2432_v0  ;;  %v2206_v11 = vsel %vm2204_vm15, %v2205_v47, %v9055_v51  ;;  %v2296_v21 = vsel %vm2211_vm10, %v2295_v49, %v10823_v55 }
 0x23c   :  { %v2377_v63 = vsub.s32 %v2373_v2, %v2376_v8  ;;  %v2425_v18 = vor.u32 8388608, %v2424_v7  ;;  %v2203_v60 = vsel %vm2201_vm14, %v9053_v19, %v2202_v4  ;;  %v2433_v62 = vshrl.u32 %v9337_v30, %v2432_v0 }
 0x23d   :  { %v2293_v12 = vxor.u32 2147483648, %v2292_v1  ;;  %v2446_v17 = vshll.u32 %v9341_v38, %v2431_v15  ;;  %v2436_v5 = vor.u32 %v2435_v53, %v2434_v25  ;;  %v2439_v61 = vor.u32 %v2438_v31, %v2437_v43 }
 0x23e   :  { %v2379_v48 = vsub.s32 0, %v2377_v63  ;;  %v2442_v23 = vor.u32 %v2441_v13, %v2440_v58  ;;  %v2445_v55 = vor.u32 %v2444_v14, %v2443_v29  ;;  %v2447_v57 = vshrl.u32 %v9342_v46, %v2432_v0 }
 0x23f   :  { %v2294_v56 = vsel %vm2211_vm10, %v2293_v12, %v2292_v1  ;;  %vm2449_vm1 = vcmp.lt.s32.totalorder %v2430_v44, 1  ;;  %v2207_v22 = vsel %vm2200_vm13, %v2203_v60, %v2206_v11  ;;  %v2465_v26 = vshll.u32 %v2425_v18, 8 }
 0x240   :  { %v2297_v39 = vsel %vm10873_vm12, %v10715_v40, %v2294_v56  ;;  %v8413_v42 = vmin.u32 %v2379_v48, %v2377_v63  ;;  %v2448_v3 = vor.u32 %v2447_v57, %v2446_v17  ;;  %vm2451_vm2 = vcmp.lt.s32.totalorder %v2430_v44, 3 }
 0x241   :  { %9056 = vcosq.f32 %v2297_v39  ;;  %vm2452_vm3 = vcmp.lt.s32.totalorder %v2430_v44, 4  ;;  %vm2450_vm4 = vcmp.lt.s32.totalorder %v2430_v44, 2  ;;  %v2453_v37 = vsel %vm2449_vm1, %v2433_v62, %v2436_v5 }
 0x242   :  { %9058 = vsinq.f32 %v2297_v39  ;;  %v2381_v41 = vclz %v8413_v42  ;;  %v2457_v19 = vsel %vm2449_vm1, %v2436_v5, %v2439_v61  ;;  %v2454_v2 = vsel %vm2452_vm3, %v2442_v23, 2102212464 }
 0x243   :  { %v2458_v51 = vsel %vm2452_vm3, %v2445_v55, 920167782  ;;  %v2461_v35 = vsel %vm2449_vm1, %v2439_v61, %v2442_v23  ;;  %v2462_v33 = vsel %vm2452_vm3, %v2448_v3, 1326507024  ;;  %v2455_v50 = vsel %vm2451_vm2, %v2439_v61, %v2454_v2 }
 0x244   :  { %v8414_v24 = vadd.s32 4294967294, %v2381_v41  ;;  %v2459_v15 = vsel %vm2451_vm2, %v2442_v23, %v2458_v51  ;;  %v2463_v45 = vsel %vm2451_vm2, %v2445_v55, %v2462_v33  ;;  %v2298_v52 = vsel %vm10873_vm12, 0, %v2296_v21 }
 0x245   :  { %v2369_v49 = vadd.s32 %v10858_v28, %v10863_v59  ;;  %v2460_v7 = vsel %vm2450_vm4, %v2457_v19, %v2459_v15  ;;  %v2464_v4 = vsel %vm2450_vm4, %v2461_v35, %v2463_v45  ;;  %v10914_v47 = vsel %vm2197_vm0, nan, %v2207_v22 }
 0x246   :  { %vm8415_vm5 = vcmp.lt.s32.totalorder %v8414_v24, 0  ;;  %v10916_v0 = vmul.u32.u64.low %v2465_v26, %v2464_v4  ;;  %v10917_v1 = vmul.u32.u64.high %v2465_v26, %v2464_v4, %v10916_v0  ;;  %v2456_v43 = vsel %vm2450_vm4, %v2453_v37, %v2455_v50 }
 0x247   :  { %v2384_v25 = vsel %vm8415_vm5, 0, %v8414_v24  ;;  %v10920_v9 = vmul.u32.u64.low %v2465_v26, %v2460_v7  ;;  %v10921_v8 = vmul.u32.u64.high %v2465_v26, %v2460_v7, %v10920_v9  ;;  %v2302_v28 = vadd.s32 3, %v2298_v52 }
 0x248   :  { %v2385_v59 = vsub.s32 32, %v2384_v25  ;;  %v2386_v53 = vshll.u32 %v2377_v63, %v2384_v25  ;;  %v2389_v58 = vsub.s32 4294967266, %v2384_v25  ;;  %v2399_v29 = vsub.s32 4, %v10880_v6 }
 0x249   :  { %v2524_v20 = vand.u32 2139095040, %v10914_v47  ;;  %v2472_v13 = vmul.u32 %v2465_v26, %v2456_v43  ;;  %vm2474_vm6 = vc.u32 %v10917_v1, %v10920_v9  ;;  %v2475_v44 = vadd.s32 1, %v10921_v8 }
 0x24a   :  { %v2387_v12 = vshrl.u32 %v2369_v49, %v2385_v59  ;;  %v2390_v31 = vadd.s32 127, %v2389_v58  ;;  %v2303_v11 = vand.u32 3, %v2302_v28  ;;  %v2521_v60 = vand.u32 2147483647, %v10914_v47 }
 0x24b   :  { %v2525_v14 = vshrl.u32 %v2524_v20, 23  ;;  %vm2315_vm7 = vcmp.lt.s32.totalorder %v10788_v54, 0  ;;  %v2476_v56 = vsel %vm2474_vm6, %v2475_v44, %v10921_v8  ;;  %vm10937_vm8 = vcmp.le.f32.partialorder %v2313_v27, 0.7853982 }
 0x24c   :  { %v2388_v21 = vor.u32 %v2387_v12, %v2386_v53  ;;  %v2391_v18 = vshll.u32 %v2390_v31, 23  ;;  %v2400_v5 = vsel %vm2315_vm7, %v2399_v29, %v10880_v6  ;;  %v2477_v61 = vadd.s32 %v2476_v56, %v2472_v13 }
 0x24d   :  { %v8420_v62 = vadd.s32 4294967169, %v2525_v14  ;;  %vm2305_vm9 = vcmp.eq.s32.totalorder %v2303_v11, 0  ;;  %v2528_v42 = vand.u32 8388607, %v2521_v60  ;;  %v2402_v41 = vsel %vm10937_vm8, 0, %v2400_v5 }
 0x24e   :  { %v9057_v63 = vpop.eup %9056  ;;  %v2392_v39 = vor.u32 4788187, %v2391_v18  ;;  %v2395_v48 = vcvt.s32.f32 %v2388_v21  ;;  %v2478_v22 = vadd.s32 536870912, %v2477_v61  ;;  %vm2308_vm11 = vcmp.eq.s32.totalorder %v2303_v11, 2 }
 0x24f   :  { %v9059_v17 = vpop.eup %9058  ;;  %v2531_v55 = vadd.s32 1, %v8420_v62  ;;  %v2309_v3 = vxor.u32 2147483648, %v9057_v63  ;;  %vm2301_vm12 = vweird.f32 %v10715_v40  ;;  %vm2304_vm13 = vcmp.lt.s32.totalorder %v2303_v11, 2 }
 0x250   :  { %v2393_v57 = vand.u32 2147483647, %v2392_v39  ;;  %v2306_v26 = vxor.u32 2147483648, %v9059_v17  ;;  %v10945_v37 = vshrl.u32 %v2478_v22, 30  ;;  %v2406_v51 = vadd.s32 3, %v2402_v41 }
 0x251   :  { %vm2532_vm10 = vcmp.gt.s32.totalorder %v2531_v55, 0  ;;  %v2529_v33 = vor.u32 8388608, %v2528_v42  ;;  %v2310_v50 = vsel %vm2308_vm11, %v2309_v3, %v9059_v17 }
 0x252   :  { %v2396_v6 = vmul.f32 %v2395_v48, %v2393_v57  ;;  %v2533_v27 = vsel %vm2532_vm10, %v2531_v55, 0  ;;  %v2480_v35 = vshll.u32 %v10945_v37, 30  ;;  %v2307_v24 = vsel %vm2305_vm9, %v9057_v63, %v2306_v26 }
 0x253   :  { %v2535_v19 = vand.u32 31, %v2533_v27  ;;  %v2534_v15 = vshrl.u32 %v2533_v27, 5  ;;  %v2311_v28 = vsel %vm2304_vm13, %v2307_v24, %v2310_v50  ;;  %v2473_v63 = vadd.s32 %v10920_v9, %v10917_v1 }
 0x254   :  { %v2397_v2 = vxor.u32 2147483648, %v2396_v6  ;;  %v2481_v49 = vsub.s32 %v2477_v61, %v2480_v35  ;;  %v10969_v18 = vsel %vm2301_vm12, nan, %v2311_v28  ;;  %v2569_v62 = vshll.u32 %v2529_v33, 8 }
 0x255   :  { %v2536_v45 = vsub.s32 32, %v2535_v19  ;;  %v2538_v7 = vshll.u32 %v9337_v30, %v2535_v19  ;;  %v2541_v4 = vshll.u32 %v9338_v32, %v2535_v19  ;;  %v2544_v43 = vshll.u32 %v9339_v34, %v2535_v19 }
 0x256   :  { %v2398_v52 = vsel %vm2315_vm7, %v2397_v2, %v2396_v6  ;;  %v2547_v8 = vshll.u32 %v9340_v36, %v2535_v19  ;;  %v2483_v59 = vsub.s32 0, %v2481_v49  ;;  %v2550_v44 = vshll.u32 %v9341_v38, %v2535_v19 }
 0x257   :  { %v2401_v0 = vsel %vm10937_vm8, %v10788_v54, %v2398_v52  ;;  %v2539_v25 = vshrl.u32 %v9338_v32, %v2536_v45  ;;  %v2542_v53 = vshrl.u32 %v9339_v34, %v2536_v45  ;;  %v2537_v58 = vshrl.u32 %v9337_v30, %v2536_v45 }
 0x258   :  { %9060 = vcosq.f32 %v2401_v0  ;;  %v2545_v29 = vshrl.u32 %v9340_v36, %v2536_v45  ;;  %v2548_v20 = vshrl.u32 %v9341_v38, %v2536_v45  ;;  %v8417_v12 = vmin.u32 %v2483_v59, %v2481_v49 }
 0x259   :  { %9062 = vsinq.f32 %v2401_v0  ;;  %v2540_v31 = vor.u32 %v2539_v25, %v2538_v7  ;;  %v2543_v13 = vor.u32 %v2542_v53, %v2541_v4  ;;  %v2551_v11 = vshrl.u32 %v9342_v46, %v2536_v45 }
 0x25a   :  { %v2546_v14 = vor.u32 %v2545_v29, %v2544_v43  ;;  %v2549_v21 = vor.u32 %v2548_v20, %v2547_v8  ;;  %vm2553_vm14 = vcmp.lt.s32.totalorder %v2534_v15, 1  ;;  %v2485_v56 = vclz %v8417_v12 }
 0x25b   :  { %v2552_v17 = vor.u32 %v2551_v11, %v2550_v44  ;;  %vm2554_vm15 = vcmp.lt.s32.totalorder %v2534_v15, 2  ;;  %vm2555_vm0 = vcmp.lt.s32.totalorder %v2534_v15, 3  ;;  %vm2556_vm1 = vcmp.lt.s32.totalorder %v2534_v15, 4 }
 0x25c   :  { %v8418_v39 = vadd.s32 4294967294, %v2485_v56  ;;  %v2557_v48 = vsel %vm2553_vm14, %v2537_v58, %v2540_v31  ;;  %v2558_v5 = vsel %vm2556_vm1, %v2546_v14, 2102212464  ;;  %v2561_v61 = vsel %vm2553_vm14, %v2540_v31, %v2543_v13 }
 0x25d   :  { %v2559_v23 = vsel %vm2555_vm0, %v2543_v13, %v2558_v5  ;;  %v2562_v55 = vsel %vm2556_vm1, %v2549_v21, 920167782  ;;  %v2565_v57 = vsel %vm2553_vm14, %v2543_v13, %v2546_v14  ;;  %v2566_v22 = vsel %vm2556_vm1, %v2552_v17, 1326507024 }
 0x25e   :  { %vm8419_vm2 = vcmp.lt.s32.totalorder %v8418_v39, 0  ;;  %v2563_v40 = vsel %vm2555_vm0, %v2546_v14, %v2562_v55  ;;  %v2567_v42 = vsel %vm2555_vm0, %v2549_v21, %v2566_v22  ;;  %v2628_v26 = vand.u32 2139095040, %v10969_v18 }
 0x25f   :  { %v2488_v1 = vsel %vm8419_vm2, 0, %v8418_v39  ;;  %v2564_v9 = vsel %vm2554_vm15, %v2561_v61, %v2563_v40  ;;  %v2568_v3 = vsel %vm2554_vm15, %v2565_v57, %v2567_v42  ;;  %v2560_v19 = vsel %vm2554_vm15, %v2557_v48, %v2559_v23 }
 0x260   :  { %v2489_v41 = vsub.s32 32, %v2488_v1  ;;  %v2490_v6 = vshll.u32 %v2481_v49, %v2488_v1  ;;  %v2493_v27 = vsub.s32 4294967266, %v2488_v1  ;;  %v2407_v50 = vand.u32 3, %v2406_v51 }
 0x261   :  { %v10977_v2 = vmul.u32.u64.low %v2569_v62, %v2568_v3  ;;  %v10978_v35 = vmul.u32.u64.high %v2569_v62, %v2568_v3, %v10977_v2  ;;  %v10980_v33 = vmul.u32.u64.low %v2569_v62, %v2564_v9  ;;  %v10981_v24 = vmul.u32.u64.high %v2569_v62, %v2564_v9, %v10980_v33 }
 0x262   :  { %v2491_v45 = vshrl.u32 %v2473_v63, %v2489_v41  ;;  %v2494_v52 = vadd.s32 127, %v2493_v27  ;;  %v2629_v7 = vshrl.u32 %v2628_v26, 23  ;;  %v2576_v8 = vmul.u32 %v2569_v62, %v2560_v19 }
 0x263   :  { %vm2578_vm3 = vc.u32 %v10978_v35, %v10980_v33  ;;  %v2579_v15 = vadd.s32 1, %v10981_v24  ;;  %v2625_v59 = vand.u32 2147483647, %v10969_v18  ;;  %vm2412_vm4 = vcmp.eq.s32.totalorder %v2407_v50, 2 }
 0x264   :  { %v2492_v25 = vor.u32 %v2491_v45, %v2490_v6  ;;  %v2495_v43 = vshll.u32 %v2494_v52, 23  ;;  %v8424_v49 = vadd.s32 4294967169, %v2629_v7  ;;  %vm2409_vm5 = vcmp.eq.s32.totalorder %v2407_v50, 0 }
 0x265   :  { %v9061_v4 = vpop.eup %9060  ;;  %v2580_v29 = vsel %vm2578_vm3, %v2579_v15, %v10981_v24  ;;  %v2503_v31 = vsub.s32 4, %v10945_v37  ;;  %vm2408_vm6 = vcmp.lt.s32.totalorder %v2407_v50, 2  ;;  %v2632_v14 = vand.u32 8388607, %v2625_v59 }
 0x266   :  { %v9063_v0 = vpop.eup %9062  ;;  %v2413_v28 = vxor.u32 2147483648, %v9061_v4  ;;  %v2496_v51 = vor.u32 4788187, %v2495_v43  ;;  %v2499_v58 = vcvt.s32.f32 %v2492_v25  ;;  %v2635_v20 = vadd.s32 1, %v8424_v49 }
 0x267   :  { %v2410_v53 = vxor.u32 2147483648, %v9063_v0  ;;  %v2581_v13 = vadd.s32 %v2580_v29, %v2576_v8  ;;  %vm2405_vm8 = vweird.f32 %v10788_v54  ;;  %vm2419_vm9 = vcmp.lt.s32.totalorder %v10841_v16, 0 }
 0x268   :  { %v2497_v12 = vand.u32 2147483647, %v2496_v51  ;;  %v2414_v44 = vsel %vm2412_vm4, %v2413_v28, %v9063_v0  ;;  %vm2636_vm7 = vcmp.gt.s32.totalorder %v2635_v20, 0  ;;  %vm10996_vm10 = vcmp.le.f32.partialorder %v2417_v10, 0.7853982 }
 0x269   :  { %v2411_v21 = vsel %vm2409_vm5, %v9061_v4, %v2410_v53  ;;  %v2582_v63 = vadd.s32 536870912, %v2581_v13  ;;  %v2637_v56 = vsel %vm2636_vm7, %v2635_v20, 0  ;;  %v2504_v48 = vsel %vm2419_vm9, %v2503_v31, %v10945_v37 }
 0x26a   :  { %v2500_v11 = vmul.f32 %v2499_v58, %v2497_v12  ;;  %v2639_v62 = vand.u32 31, %v2637_v56  ;;  %v2415_v61 = vsel %vm2408_vm6, %v2411_v21, %v2414_v44  ;;  %v2633_v23 = vor.u32 8388608, %v2632_v14 }
 0x26b   :  { %v11001_v5 = vshrl.u32 %v2582_v63, 30  ;;  %v2638_v55 = vshrl.u32 %v2637_v56, 5  ;;  %v11018_v27 = vsel %vm2405_vm8, nan, %v2415_v61  ;;  %v2506_v19 = vsel %vm10996_vm10, 0, %v2504_v48 }
 0x26c   :  { %v2501_v39 = vxor.u32 2147483648, %v2500_v11  ;;  %v2640_v57 = vsub.s32 32, %v2639_v62  ;;  %v2642_v42 = vshll.u32 %v9337_v30, %v2639_v62  ;;  %v2645_v26 = vshll.u32 %v9338_v32, %v2639_v62 }
 0x26d   :  { %v2584_v40 = vshll.u32 %v11001_v5, 30  ;;  %v2648_v9 = vshll.u32 %v9339_v34, %v2639_v62  ;;  %v2651_v6 = vshll.u32 %v9340_v36, %v2639_v62  ;;  %v2654_v4 = vshll.u32 %v9341_v38, %v2639_v62 }
 0x26e   :  { %v2502_v22 = vsel %vm2419_vm9, %v2501_v39, %v2500_v11  ;;  %v2643_v1 = vshrl.u32 %v9338_v32, %v2640_v57  ;;  %v2646_v37 = vshrl.u32 %v9339_v34, %v2640_v57  ;;  %v2649_v41 = vshrl.u32 %v9340_v36, %v2640_v57 }
 0x26f   :  { %v2505_v10 = vsel %vm10996_vm10, %v10841_v16, %v2502_v22  ;;  %v11012_v3 = vsub.s32 %v2581_v13, %v2584_v40  ;;  %v2641_v2 = vshrl.u32 %v9337_v30, %v2640_v57  ;;  %v2652_v52 = vshrl.u32 %v9341_v38, %v2640_v57 }
 0x270   :  { %9064 = vcosq.f32 %v2505_v10  ;;  %v2644_v50 = vor.u32 %v2643_v1, %v2642_v42  ;;  %v2647_v45 = vor.u32 %v2646_v37, %v2645_v26  ;;  %v2650_v7 = vor.u32 %v2649_v41, %v2648_v9 }
 0x271   :  { %9066 = vsinq.f32 %v2505_v10  ;;  %v2587_v24 = vsub.s32 0, %v11012_v3  ;;  %v2655_v0 = vshrl.u32 %v9342_v46, %v2640_v57  ;;  %vm2657_vm11 = vcmp.lt.s32.totalorder %v2638_v55, 1 }
 0x272   :  { %v2510_v54 = vadd.s32 3, %v2506_v19  ;;  %v2653_v43 = vor.u32 %v2652_v52, %v2651_v6  ;;  %v2673_v8 = vshll.u32 %v2633_v23, 8  ;;  %vm2659_vm12 = vcmp.lt.s32.totalorder %v2638_v55, 3 }
 0x273   :  { %v8421_v25 = vmin.u32 %v2587_v24, %v11012_v3  ;;  %v2656_v49 = vor.u32 %v2655_v0, %v2654_v4  ;;  %vm2660_vm13 = vcmp.lt.s32.totalorder %v2638_v55, 4  ;;  %v2732_v28 = vand.u32 2139095040, %v11018_v27 }
 0x274   :  { %vm2658_vm14 = vcmp.lt.s32.totalorder %v2638_v55, 2  ;;  %v2661_v53 = vsel %vm2657_vm11, %v2641_v2, %v2644_v50  ;;  %v2665_v51 = vsel %vm2657_vm11, %v2644_v50, %v2647_v45  ;;  %v2662_v58 = vsel %vm2660_vm13, %v2650_v7, 2102212464 }
 0x275   :  { %v2589_v15 = vclz %v8421_v25  ;;  %v2666_v29 = vsel %vm2660_vm13, %v2653_v43, 920167782  ;;  %v2669_v20 = vsel %vm2657_vm11, %v2647_v45, %v2650_v7  ;;  %v2670_v12 = vsel %vm2660_vm13, %v2656_v49, 1326507024 }
 0x276   :  { %v2663_v13 = vsel %vm2659_vm12, %v2647_v45, %v2662_v58  ;;  %v2667_v44 = vsel %vm2659_vm12, %v2650_v7, %v2666_v29  ;;  %v2671_v14 = vsel %vm2659_vm12, %v2653_v43, %v2670_v12  ;;  %v2577_v21 = vadd.s32 %v10980_v33, %v10978_v35 }
 0x277   :  { %v8422_v31 = vadd.s32 4294967294, %v2589_v15  ;;  %v2668_v11 = vsel %vm2658_vm14, %v2665_v51, %v2667_v44  ;;  %v2672_v63 = vsel %vm2658_vm14, %v2669_v20, %v2671_v14  ;;  %v2733_v56 = vshrl.u32 %v2732_v28, 23 }
 0x278   :  { %v2664_v62 = vsel %vm2658_vm14, %v2661_v53, %v2663_v13  ;;  %v11034_v17 = vmul.u32.u64.low %v2673_v8, %v2672_v63  ;;  %v11035_v39 = vmul.u32.u64.high %v2673_v8, %v2672_v63, %v11034_v17  ;;  %v11041_v22 = vand.u32 3, %v2510_v54 }
 0x279   :  { %vm8423_vm15 = vcmp.lt.s32.totalorder %v8422_v31, 0  ;;  %v11037_v61 = vmul.u32.u64.low %v2673_v8, %v2668_v11  ;;  %v11038_v23 = vmul.u32.u64.high %v2673_v8, %v2668_v11, %v11037_v61  ;;  %v8428_v57 = vadd.s32 4294967169, %v2733_v56 }
 0x27a   :  { %v2592_v48 = vsel %vm8423_vm15, 0, %v8422_v31  ;;  %v2729_v26 = vand.u32 2147483647, %v11018_v27  ;;  %v2680_v9 = vmul.u32 %v2673_v8, %v2664_v62  ;;  %vm2523_vm0 = vcmp.lt.s32.totalorder %v10914_v47, 0 }
 0x27b   :  { %v2593_v35 = vsub.s32 32, %v2592_v48  ;;  %v2594_v33 = vshll.u32 %v11012_v3, %v2592_v48  ;;  %v2597_v40 = vsub.s32 4294967266, %v2592_v48  ;;  %v2739_v55 = vadd.s32 1, %v8428_v57 }
 0x27c   :  { %vm2682_vm1 = vc.u32 %v11035_v39, %v11037_v61  ;;  %v2683_v41 = vadd.s32 1, %v11038_v23  ;;  %vm2513_vm3 = vcmp.eq.s32.totalorder %v11041_v22, 0  ;;  %vm11052_vm4 = vcmp.le.f32.partialorder %v2521_v60, 0.7853982 }
 0x27d   :  { %v9065_v42 = vpop.eup %9064  ;;  %v2595_v1 = vshrl.u32 %v2577_v21, %v2593_v35  ;;  %v2598_v37 = vadd.s32 127, %v2597_v40  ;;  %vm2740_vm2 = vcmp.gt.s32.totalorder %v2739_v55, 0  ;;  %vm2512_vm5 = vcmp.lt.s32.totalorder %v11041_v22, 2 }
 0x27e   :  { %v9067_v10 = vpop.eup %9066  ;;  %v2741_v2 = vsel %vm2740_vm2, %v2739_v55, 0  ;;  %vm2516_vm6 = vcmp.eq.s32.totalorder %v11041_v22, 2  ;;  %v2684_v24 = vsel %vm2682_vm1, %v2683_v41, %v11038_v23  ;;  %v2736_v50 = vand.u32 8388607, %v2729_v26 }
 0x27f   :  { %v2596_v6 = vor.u32 %v2595_v1, %v2594_v33  ;;  %v2599_v19 = vshll.u32 %v2598_v37, 23  ;;  %v2743_v45 = vand.u32 31, %v2741_v2  ;;  %v2607_v60 = vsub.s32 4, %v11001_v5 }
 0x280   :  { %v2685_v4 = vadd.s32 %v2684_v24, %v2680_v9  ;;  %v2514_v0 = vxor.u32 2147483648, %v9067_v10  ;;  %v2517_v54 = vxor.u32 2147483648, %v9065_v42  ;;  %vm2509_vm7 = vweird.f32 %v10841_v16 }
 0x281   :  { %v2600_v52 = vor.u32 4788187, %v2599_v19  ;;  %v2603_v7 = vcvt.s32.f32 %v2596_v6  ;;  %v2744_v25 = vsub.s32 32, %v2743_v45  ;;  %v2746_v43 = vshll.u32 %v9337_v30, %v2743_v45 }
 0x282   :  { %v2686_v49 = vadd.s32 536870912, %v2685_v4  ;;  %v2749_v28 = vshll.u32 %v9338_v32, %v2743_v45  ;;  %v2752_v15 = vshll.u32 %v9339_v34, %v2743_v45  ;;  %v2755_v29 = vshll.u32 %v9340_v36, %v2743_v45 }
 0x283   :  { %v2601_v8 = vand.u32 2147483647, %v2600_v52  ;;  %v2747_v53 = vshrl.u32 %v9338_v32, %v2744_v25  ;;  %v2750_v51 = vshrl.u32 %v9339_v34, %v2744_v25  ;;  %v2753_v58 = vshrl.u32 %v9340_v36, %v2744_v25 }
 0x284   :  { %v11070_v12 = vshrl.u32 %v2686_v49, 30  ;;  %v2742_v31 = vshrl.u32 %v2741_v2, 5  ;;  %v2756_v13 = vshrl.u32 %v9341_v38, %v2744_v25  ;;  %v2518_v44 = vsel %vm2516_vm6, %v2517_v54, %v9067_v10 }
 0x285   :  { %v2604_v20 = vmul.f32 %v2603_v7, %v2601_v8  ;;  %v2737_v14 = vor.u32 8388608, %v2736_v50  ;;  %v2758_v21 = vshll.u32 %v9341_v38, %v2743_v45  ;;  %v2759_v11 = vshrl.u32 %v9342_v46, %v2744_v25 }
 0x286   :  { %v2515_v63 = vsel %vm2513_vm3, %v9065_v42, %v2514_v0  ;;  %v2688_v62 = vshll.u32 %v11070_v12, 30  ;;  %v2745_v17 = vshrl.u32 %v9337_v30, %v2744_v25  ;;  %v2748_v48 = vor.u32 %v2747_v53, %v2746_v43 }
 0x287   :  { %v2605_v56 = vxor.u32 2147483648, %v2604_v20  ;;  %v2751_v23 = vor.u32 %v2750_v51, %v2749_v28  ;;  %v2754_v57 = vor.u32 %v2753_v58, %v2752_v15  ;;  %v2757_v35 = vor.u32 %v2756_v13, %v2755_v29 }
 0x288   :  { %v2689_v40 = vsub.s32 %v2685_v4, %v2688_v62  ;;  %vm2761_vm8 = vcmp.lt.s32.totalorder %v2742_v31, 1  ;;  %vm2764_vm9 = vcmp.lt.s32.totalorder %v2742_v31, 4  ;;  %v2760_v42 = vor.u32 %v2759_v11, %v2758_v21 }
 0x289   :  { %v2606_v33 = vsel %vm2523_vm0, %v2605_v56, %v2604_v20  ;;  %vm2763_vm10 = vcmp.lt.s32.totalorder %v2742_v31, 3  ;;  %v2766_v10 = vsel %vm2764_vm9, %v2754_v57, 2102212464  ;;  %v2519_v1 = vsel %vm2512_vm5, %v2515_v63, %v2518_v44 }
 0x28a   :  { %v2609_v55 = vsel %vm11052_vm4, %v10914_v47, %v2606_v33  ;;  %v2608_v37 = vsel %vm2523_vm0, %v2607_v60, %v11001_v5  ;;  %v2691_v9 = vsub.s32 0, %v2689_v40  ;;  %vm2762_vm11 = vcmp.lt.s32.totalorder %v2742_v31, 2 }
 0x28b   :  { %9068 = vcosq.f32 %v2609_v55  ;;  %v2765_v41 = vsel %vm2761_vm8, %v2745_v17, %v2748_v48  ;;  %v2769_v6 = vsel %vm2761_vm8, %v2748_v48, %v2751_v23  ;;  %v2770_v19 = vsel %vm2764_vm9, %v2757_v35, 920167782 }
 0x28c   :  { %9070 = vsinq.f32 %v2609_v55  ;;  %v8425_v2 = vmin.u32 %v2691_v9, %v2689_v40  ;;  %v2767_v24 = vsel %vm2763_vm10, %v2751_v23, %v2766_v10  ;;  %v2771_v22 = vsel %vm2763_vm10, %v2754_v57, %v2770_v19 }
 0x28d   :  { %v2772_v50 = vsel %vm2762_vm11, %v2769_v6, %v2771_v22  ;;  %v2773_v45 = vsel %vm2761_vm8, %v2751_v23, %v2754_v57  ;;  %v2774_v5 = vsel %vm2764_vm9, %v2760_v42, 1326507024  ;;  %v2777_v52 = vshll.u32 %v2737_v14, 8 }
 0x28e   :  { %v11102_v7 = vsel %vm2509_vm7, nan, %v2519_v1  ;;  %v2693_v60 = vclz %v8425_v2  ;;  %v2775_v4 = vsel %vm2763_vm10, %v2757_v35, %v2774_v5  ;;  %v2610_v25 = vsel %vm11052_vm4, 0, %v2608_v37 }
 0x28f   :  { %v11105_v0 = vmul.u32.u64.low %v2777_v52, %v2772_v50  ;;  %v11106_v54 = vmul.u32.u64.high %v2777_v52, %v2772_v50, %v11105_v0  ;;  %v2768_v8 = vsel %vm2762_vm11, %v2765_v41, %v2767_v24  ;;  %v2776_v49 = vsel %vm2762_vm11, %v2773_v45, %v2775_v4 }
 0x290   :  { %v8426_v43 = vadd.s32 4294967294, %v2693_v60  ;;  %v2711_v28 = vsub.s32 4, %v11070_v12  ;;  %v11114_v16 = vmul.u32.u64.low %v2777_v52, %v2776_v49  ;;  %v11115_v15 = vmul.u32.u64.high %v2777_v52, %v2776_v49, %v11114_v16 }
 0x291   :  { %v2836_v53 = vand.u32 2139095040, %v11102_v7  ;;  %vm2627_vm12 = vcmp.lt.s32.totalorder %v10969_v18, 0  ;;  %v2681_v51 = vadd.s32 %v11037_v61, %v11035_v39  ;;  %v2784_v58 = vmul.u32 %v2777_v52, %v2768_v8 }
 0x292   :  { %vm8427_vm13 = vcmp.lt.s32.totalorder %v8426_v43, 0  ;;  %v2787_v29 = vadd.s32 1, %v11106_v54  ;;  %v2614_v31 = vadd.s32 3, %v2610_v25  ;;  %v2712_v21 = vsel %vm2627_vm12, %v2711_v28, %v11070_v12 }
 0x293   :  { %v2696_v3 = vsel %vm8427_vm13, 0, %v8426_v43  ;;  %v2837_v20 = vshrl.u32 %v2836_v53, 23  ;;  %vm2786_vm14 = vc.u32 %v11115_v15, %v11105_v0  ;;  %v2833_v56 = vand.u32 2147483647, %v11102_v7 }
 0x294   :  { %v2697_v13 = vsub.s32 32, %v2696_v3  ;;  %v2698_v44 = vshll.u32 %v2689_v40, %v2696_v3  ;;  %v2701_v14 = vsub.s32 4294967266, %v2696_v3  ;;  %v2788_v61 = vsel %vm2786_vm14, %v2787_v29, %v11106_v54 }
 0x295   :  { %v8432_v11 = vadd.s32 4294967169, %v2837_v20  ;;  %v2789_v62 = vadd.s32 %v2788_v61, %v2784_v58  ;;  %v2615_v23 = vand.u32 3, %v2614_v31  ;;  %vm11131_vm15 = vcmp.le.f32.partialorder %v2625_v59, 0.7853982 }
 0x296   :  { %v2699_v63 = vshrl.u32 %v2681_v51, %v2697_v13  ;;  %v2702_v39 = vadd.s32 127, %v2701_v14  ;;  %v2714_v40 = vsel %vm11131_vm15, 0, %v2712_v21  ;;  %v2840_v1 = vand.u32 8388607, %v2833_v56 }
 0x297   :  { %v2843_v17 = vadd.s32 1, %v8432_v11  ;;  %v2790_v55 = vadd.s32 536870912, %v2789_v62  ;;  %vm2616_vm1 = vcmp.lt.s32.totalorder %v2615_v23, 2  ;;  %vm2617_vm2 = vcmp.eq.s32.totalorder %v2615_v23, 0 }
 0x298   :  { %v9069_v48 = vpop.eup %9068  ;;  %v2700_v12 = vor.u32 %v2699_v63, %v2698_v44  ;;  %v2703_v35 = vshll.u32 %v2702_v39, 23  ;;  %vm2620_vm3 = vcmp.eq.s32.totalorder %v2615_v23, 2  ;;  %v11141_v2 = vadd.s32 3, %v2714_v40 }
 0x299   :  { %v9071_v33 = vpop.eup %9070  ;;  %vm2844_vm0 = vcmp.gt.s32.totalorder %v2843_v17, 0  ;;  %v2621_v9 = vxor.u32 2147483648, %v9069_v48  ;;  %v11139_v41 = vshrl.u32 %v2790_v55, 30  ;;  %v2841_v45 = vor.u32 8388608, %v2840_v1 }
 0x29a   :  { %v2704_v42 = vor.u32 4788187, %v2703_v35  ;;  %v2707_v10 = vcvt.s32.f32 %v2700_v12  ;;  %v2845_v37 = vsel %vm2844_vm0, %v2843_v17, 0  ;;  %v2618_v19 = vxor.u32 2147483648, %v9071_v33 }
 0x29b   :  { %v2847_v59 = vand.u32 31, %v2845_v37  ;;  %v2792_v24 = vshll.u32 %v11139_v41, 30  ;;  %vm2613_vm4 = vweird.f32 %v10914_v47  ;;  %v2622_v60 = vsel %vm2620_vm3, %v2621_v9, %v9071_v33 }
 0x29c   :  { %v2705_v6 = vand.u32 2147483647, %v2704_v42  ;;  %v2846_v8 = vshrl.u32 %v2845_v37, 5  ;;  %v2619_v16 = vsel %vm2617_vm2, %v9069_v48, %v2618_v19  ;;  %v2785_v39 = vadd.s32 %v11105_v0, %v11115_v15 }
 0x29d   :  { %v2848_v22 = vsub.s32 32, %v2847_v59  ;;  %v2850_v5 = vshll.u32 %v9337_v30, %v2847_v59  ;;  %v2853_v52 = vshll.u32 %v9338_v32, %v2847_v59  ;;  %v2793_v4 = vsub.s32 %v2789_v62, %v2792_v24 }
 0x29e   :  { %v2708_v50 = vmul.f32 %v2707_v10, %v2705_v6  ;;  %v2856_v25 = vshll.u32 %v9339_v34, %v2847_v59  ;;  %v2859_v3 = vshll.u32 %v9340_v36, %v2847_v59  ;;  %v2862_v21 = vshll.u32 %v9341_v38, %v2847_v59 }
 0x29f   :  { %v2851_v54 = vshrl.u32 %v9338_v32, %v2848_v22  ;;  %v2854_v49 = vshrl.u32 %v9339_v34, %v2848_v22  ;;  %v2857_v28 = vshrl.u32 %v9340_v36, %v2848_v22  ;;  %v2795_v53 = vsub.s32 0, %v2793_v4 }
 0x2a0   :  { %v2709_v43 = vxor.u32 2147483648, %v2708_v50  ;;  %v2849_v51 = vshrl.u32 %v9337_v30, %v2848_v22  ;;  %v2860_v31 = vshrl.u32 %v9341_v38, %v2848_v22  ;;  %v2863_v63 = vshrl.u32 %v9342_v46, %v2848_v22 }
 0x2a1   :  { %v2852_v29 = vor.u32 %v2851_v54, %v2850_v5  ;;  %v2855_v20 = vor.u32 %v2854_v49, %v2853_v52  ;;  %v8429_v44 = vmin.u32 %v2795_v53, %v2793_v4  ;;  %v2858_v14 = vor.u32 %v2857_v28, %v2856_v25 }
 0x2a2   :  { %v2710_v58 = vsel %vm2627_vm12, %v2709_v43, %v2708_v50  ;;  %v2861_v11 = vor.u32 %v2860_v31, %v2859_v3  ;;  %vm2865_vm5 = vcmp.lt.s32.totalorder %v2846_v8, 1  ;;  %v2881_v62 = vshll.u32 %v2841_v45, 8 }
 0x2a3   :  { %v2713_v13 = vsel %vm11131_vm15, %v10969_v18, %v2710_v58  ;;  %v2797_v61 = vclz %v8429_v44  ;;  %v2623_v17 = vsel %vm2616_vm1, %v2619_v16, %v2622_v60  ;;  %v2864_v48 = vor.u32 %v2863_v63, %v2862_v21 }
 0x2a4   :  { %9072 = vcosq.f32 %v2713_v13  ;;  %vm2866_vm6 = vcmp.lt.s32.totalorder %v2846_v8, 2  ;;  %vm2867_vm7 = vcmp.lt.s32.totalorder %v2846_v8, 3  ;;  %vm2868_vm8 = vcmp.lt.s32.totalorder %v2846_v8, 4 }
 0x2a5   :  { %9074 = vsinq.f32 %v2713_v13  ;;  %v8430_v57 = vadd.s32 4294967294, %v2797_v61  ;;  %v2869_v12 = vsel %vm2865_vm5, %v2849_v51, %v2852_v29  ;;  %v2873_v35 = vsel %vm2865_vm5, %v2852_v29, %v2855_v20 }
 0x2a6   :  { %v2870_v33 = vsel %vm2868_vm8, %v2858_v14, 2102212464  ;;  %v2874_v40 = vsel %vm2868_vm8, %v2861_v11, 920167782  ;;  %v2877_v55 = vsel %vm2865_vm5, %v2855_v20, %v2858_v14  ;;  %v2878_v42 = vsel %vm2868_vm8, %v2864_v48, 1326507024 }
 0x2a7   :  { %vm8431_vm9 = vcmp.lt.s32.totalorder %v8430_v57, 0  ;;  %v2871_v10 = vsel %vm2867_vm7, %v2855_v20, %v2870_v33  ;;  %v2875_v1 = vsel %vm2867_vm7, %v2858_v14, %v2874_v40  ;;  %v2879_v37 = vsel %vm2867_vm7, %v2861_v11, %v2878_v42 }
 0x2a8   :  { %v11167_v0 = vsel %vm2613_vm4, nan, %v2623_v17  ;;  %v2800_v15 = vsel %vm8431_vm9, 0, %v8430_v57  ;;  %v2876_v23 = vsel %vm2866_vm6, %v2873_v35, %v2875_v1  ;;  %v2880_v9 = vsel %vm2866_vm6, %v2877_v55, %v2879_v37 }
 0x2a9   :  { %v2801_v59 = vsub.s32 32, %v2800_v15  ;;  %v2802_v6 = vshll.u32 %v2793_v4, %v2800_v15  ;;  %v2805_v19 = vsub.s32 4294967266, %v2800_v15  ;;  %v2872_v24 = vsel %vm2866_vm6, %v2869_v12, %v2871_v10 }
 0x2aa   :  { %v11172_v22 = vmul.u32.u64.low %v2881_v62, %v2880_v9  ;;  %v11173_v50 = vmul.u32.u64.high %v2881_v62, %v2880_v9, %v11172_v22  ;;  %v11175_v45 = vmul.u32.u64.low %v2881_v62, %v2876_v23  ;;  %v11176_v5 = vmul.u32.u64.high %v2881_v62, %v2876_v23, %v11175_v45 }
 0x2ab   :  { %v2803_v47 = vshrl.u32 %v2785_v39, %v2801_v59  ;;  %v2806_v52 = vadd.s32 127, %v2805_v19  ;;  %v2940_v60 = vand.u32 2139095040, %v11167_v0  ;;  %v2719_v54 = vand.u32 3, %v11141_v2 }
 0x2ac   :  { %v2888_v49 = vmul.u32 %v2881_v62, %v2872_v24  ;;  %vm2890_vm10 = vc.u32 %v11173_v50, %v11175_v45  ;;  %v2891_v4 = vadd.s32 1, %v11176_v5  ;;  %v2815_v51 = vsub.s32 4, %v11139_v41 }
 0x2ad   :  { %v2804_v25 = vor.u32 %v2803_v47, %v2802_v6  ;;  %v2807_v43 = vshll.u32 %v2806_v52, 23  ;;  %v2941_v8 = vshrl.u32 %v2940_v60, 23  ;;  %v2937_v2 = vand.u32 2147483647, %v11167_v0 }
 0x2ae   :  { %v2892_v29 = vsel %vm2890_vm10, %v2891_v4, %v11176_v5  ;;  %vm2724_vm11 = vcmp.eq.s32.totalorder %v2719_v54, 2  ;;  %vm2721_vm12 = vcmp.eq.s32.totalorder %v2719_v54, 0  ;;  %vm2731_vm13 = vcmp.lt.s32.totalorder %v11018_v27, 0 }
 0x2af   :  { %v2808_v16 = vor.u32 4788187, %v2807_v43  ;;  %v2811_v53 = vcvt.s32.f32 %v2804_v25  ;;  %v8436_v20 = vadd.s32 4294967169, %v2941_v8  ;;  %v2893_v44 = vadd.s32 %v2892_v29, %v2888_v49 }
 0x2b0   :  { %vm2720_vm14 = vcmp.lt.s32.totalorder %v2719_v54, 2  ;;  %vm11190_vm15 = vcmp.le.f32.partialorder %v2729_v26, 0.7853982  ;;  %v2816_v61 = vsel %vm2731_vm13, %v2815_v51, %v11139_v41  ;;  %v2944_v62 = vand.u32 8388607, %v2937_v2 }
 0x2b1   :  { %v9073_v28 = vpop.eup %9072  ;;  %v2809_v13 = vand.u32 2147483647, %v2808_v16  ;;  %v2947_v14 = vadd.s32 1, %v8436_v20  ;;  %v2894_v63 = vadd.s32 536870912, %v2893_v44  ;;  %vm2717_vm1 = vweird.f32 %v10969_v18 }
 0x2b2   :  { %v9075_v3 = vpop.eup %9074  ;;  %v2725_v58 = vxor.u32 2147483648, %v9073_v28  ;;  %v2818_v33 = vsel %vm11190_vm15, 0, %v2816_v61  ;;  %v2945_v42 = vor.u32 8388608, %v2944_v62 }
 0x2b3   :  { %v2722_v31 = vxor.u32 2147483648, %v9075_v3  ;;  %v2812_v11 = vmul.f32 %v2811_v53, %v2809_v13  ;;  %vm2948_vm0 = vcmp.gt.s32.totalorder %v2947_v14, 0  ;;  %v11199_v57 = vshrl.u32 %v2894_v63, 30 }
 0x2b4   :  { %v2726_v39 = vsel %vm2724_vm11, %v2725_v58, %v9075_v3  ;;  %v2949_v12 = vsel %vm2948_vm0, %v2947_v14, 0  ;;  %v2822_v54 = vadd.s32 3, %v2818_v33  ;;  %v2985_v16 = vshll.u32 %v2945_v42, 8 }
 0x2b5   :  { %v2723_v17 = vsel %vm2721_vm12, %v9073_v28, %v2722_v31  ;;  %v2813_v48 = vxor.u32 2147483648, %v2812_v11  ;;  %v2951_v26 = vand.u32 31, %v2949_v12  ;;  %v2896_v41 = vshll.u32 %v11199_v57, 30 }
 0x2b6   :  { %v2727_v40 = vsel %vm2720_vm14, %v2723_v17, %v2726_v39  ;;  %v2950_v23 = vshrl.u32 %v2949_v12, 5  ;;  %vm2835_vm12 = vcmp.lt.s32.totalorder %v11102_v7, 0  ;;  %vm11256_vm14 = vcmp.le.f32.partialorder %v2833_v56, 0.7853982 }
 0x2b7   :  { %v2814_v35 = vsel %vm2731_vm13, %v2813_v48, %v2812_v11  ;;  %v2952_v10 = vsub.s32 32, %v2951_v26  ;;  %v11211_v1 = vsub.s32 %v2893_v44, %v2896_v41  ;;  %v2954_v37 = vshll.u32 %v9337_v30, %v2951_v26 }
 0x2b8   :  { %v2817_v55 = vsel %vm11190_vm15, %v11018_v27, %v2814_v35  ;;  %v2957_v15 = vshll.u32 %v9338_v32, %v2951_v26  ;;  %v2960_v59 = vshll.u32 %v9339_v34, %v2951_v26  ;;  %v11219_v6 = vsel %vm2717_vm1, nan, %v2727_v40 }
 0x2b9   :  { %9076 = vcosq.f32 %v2817_v55  ;;  %v2955_v9 = vshrl.u32 %v9338_v32, %v2952_v10  ;;  %v2899_v19 = vsub.s32 0, %v11211_v1  ;;  %v2958_v24 = vshrl.u32 %v9339_v34, %v2952_v10 }
 0x2ba   :  { %9078 = vsinq.f32 %v2817_v55  ;;  %v2961_v22 = vshrl.u32 %v9340_v36, %v2952_v10  ;;  %v2953_v5 = vshrl.u32 %v9337_v30, %v2952_v10  ;;  %v2963_v47 = vshll.u32 %v9340_v36, %v2951_v26 }
 0x2bb   :  { %v2964_v52 = vshrl.u32 %v9341_v38, %v2952_v10  ;;  %v2966_v60 = vshll.u32 %v9341_v38, %v2951_v26  ;;  %v8433_v25 = vmin.u32 %v2899_v19, %v11211_v1  ;;  %v2956_v18 = vor.u32 %v2955_v9, %v2954_v37 }
 0x2bc   :  { %v2959_v43 = vor.u32 %v2958_v24, %v2957_v15  ;;  %v2962_v49 = vor.u32 %v2961_v22, %v2960_v59  ;;  %v2967_v8 = vshrl.u32 %v9342_v46, %v2952_v10  ;;  %vm2969_vm2 = vcmp.lt.s32.totalorder %v2950_v23, 1 }
 0x2bd   :  { %v2965_v4 = vor.u32 %v2964_v52, %v2963_v47  ;;  %v2901_v28 = vclz %v8433_v25  ;;  %vm2970_vm3 = vcmp.lt.s32.totalorder %v2950_v23, 2  ;;  %v3044_v53 = vand.u32 2139095040, %v11219_v6 }
 0x2be   :  { %v2968_v51 = vor.u32 %v2967_v8, %v2966_v60  ;;  %vm2971_vm4 = vcmp.lt.s32.totalorder %v2950_v23, 3  ;;  %vm2972_vm5 = vcmp.lt.s32.totalorder %v2950_v23, 4  ;;  %v2973_v3 = vsel %vm2969_vm2, %v2953_v5, %v2956_v18 }
 0x2bf   :  { %v8434_v58 = vadd.s32 4294967294, %v2901_v28  ;;  %v2974_v29 = vsel %vm2972_vm5, %v2962_v49, 2102212464  ;;  %v2977_v20 = vsel %vm2969_vm2, %v2956_v18, %v2959_v43  ;;  %v2978_v31 = vsel %vm2972_vm5, %v2965_v4, 920167782 }
 0x2c0   :  { %v2975_v13 = vsel %vm2971_vm4, %v2959_v43, %v2974_v29  ;;  %v2979_v44 = vsel %vm2971_vm4, %v2962_v49, %v2978_v31  ;;  %v2981_v14 = vsel %vm2969_vm2, %v2959_v43, %v2962_v49  ;;  %v2982_v21 = vsel %vm2972_vm5, %v2968_v51, 1326507024 }
 0x2c1   :  { %v2889_v11 = vadd.s32 %v11175_v45, %v11173_v50  ;;  %vm8435_vm6 = vcmp.lt.s32.totalorder %v8434_v58, 0  ;;  %v2980_v63 = vsel %vm2970_vm3, %v2977_v20, %v2979_v44  ;;  %v2983_v39 = vsel %vm2971_vm4, %v2965_v4, %v2982_v21 }
 0x2c2   :  { %v2904_v61 = vsel %vm8435_vm6, 0, %v8434_v58  ;;  %v2984_v62 = vsel %vm2970_vm3, %v2981_v14, %v2983_v39  ;;  %v11235_v17 = vmul.u32.u64.low %v2985_v16, %v2980_v63  ;;  %v11236_v48 = vmul.u32.u64.high %v2985_v16, %v2980_v63, %v11235_v17 }
 0x2c3   :  { %v2905_v12 = vsub.s32 32, %v2904_v61  ;;  %v2906_v26 = vshll.u32 %v11211_v1, %v2904_v61  ;;  %v2909_v35 = vsub.s32 4294967266, %v2904_v61  ;;  %v2976_v33 = vsel %vm2970_vm3, %v2973_v3, %v2975_v13 }
 0x2c4   :  { %v2823_v40 = vand.u32 3, %v2822_v54  ;;  %v11241_v50 = vmul.u32.u64.low %v2985_v16, %v2984_v62  ;;  %v11242_v45 = vmul.u32.u64.high %v2985_v16, %v2984_v62, %v11241_v50  ;;  %v3045_v55 = vshrl.u32 %v3044_v53, 23 }
 0x2c5   :  { %v2907_v10 = vshrl.u32 %v2889_v11, %v2905_v12  ;;  %v2910_v37 = vadd.s32 127, %v2909_v35  ;;  %v2992_v15 = vmul.u32 %v2985_v16, %v2976_v33  ;;  %v2995_v9 = vadd.s32 1, %v11236_v48 }
 0x2c6   :  { %v9077_v41 = vpop.eup %9076  ;;  %v3041_v59 = vand.u32 2147483647, %v11219_v6  ;;  %v8440_v19 = vadd.s32 4294967169, %v3045_v55  ;;  %vm2825_vm7 = vcmp.eq.s32.totalorder %v2823_v40, 0  ;;  %vm2828_vm8 = vcmp.eq.s32.totalorder %v2823_v40, 2 }
 0x2c7   :  { %v9079_v42 = vpop.eup %9078  ;;  %v2829_v1 = vxor.u32 2147483648, %v9077_v41  ;;  %v2908_v22 = vor.u32 %v2907_v10, %v2906_v26  ;;  %v2911_v23 = vshll.u32 %v2910_v37, 23  ;;  %vm2994_vm9 = vc.u32 %v11242_v45, %v11235_v17 }
 0x2c8   :  { %v2826_v24 = vxor.u32 2147483648, %v9079_v42  ;;  %v3051_v5 = vadd.s32 1, %v8440_v19  ;;  %v2919_v60 = vsub.s32 4, %v11199_v57  ;;  %v2996_v54 = vsel %vm2994_vm9, %v2995_v9, %v11236_v48 }
 0x2c9   :  { %v2912_v47 = vor.u32 4788187, %v2911_v23  ;;  %v2915_v52 = vcvt.s32.f32 %v2908_v22  ;;  %vm2824_vm10 = vcmp.lt.s32.totalorder %v2823_v40, 2  ;;  %v2997_v25 = vadd.s32 %v2996_v54, %v2992_v15 }
 0x2ca   :  { %v3048_v18 = vand.u32 8388607, %v3041_v59  ;;  %vm3052_vm11 = vcmp.gt.s32.totalorder %v3051_v5, 0  ;;  %v2827_v43 = vsel %vm2825_vm7, %v9077_v41, %v2826_v24  ;;  %v2830_v49 = vsel %vm2828_vm8, %v2829_v1, %v9079_v42 }
 0x2cb   :  { %v2913_v4 = vand.u32 2147483647, %v2912_v47  ;;  %v3053_v8 = vsel %vm3052_vm11, %v3051_v5, 0  ;;  %v2998_v28 = vadd.s32 536870912, %v2997_v25  ;;  %vm2821_vm13 = vweird.f32 %v11018_v27 }
 0x2cc   :  { %v3055_v16 = vand.u32 31, %v3053_v8  ;;  %v2920_v3 = vsel %vm2835_vm12, %v2919_v60, %v11199_v57  ;;  %v2831_v58 = vsel %vm2824_vm10, %v2827_v43, %v2830_v49  ;;  %v3049_v20 = vor.u32 8388608, %v3048_v18 }
 0x2cd   :  { %v2916_v51 = vmul.f32 %v2915_v52, %v2913_v4  ;;  %v11263_v29 = vshrl.u32 %v2998_v28, 30  ;;  %v3054_v44 = vshrl.u32 %v3053_v8, 5  ;;  %v11278_v12 = vsel %vm2821_vm13, nan, %v2831_v58 }
 0x2ce   :  { %v3056_v31 = vsub.s32 32, %v3055_v16  ;;  %v3058_v14 = vshll.u32 %v9337_v30, %v3055_v16  ;;  %v3061_v21 = vshll.u32 %v9338_v32, %v3055_v16  ;;  %v3064_v63 = vshll.u32 %v9339_v34, %v3055_v16 }
 0x2cf   :  { %v2917_v13 = vxor.u32 2147483648, %v2916_v51  ;;  %v3000_v56 = vshll.u32 %v11263_v29, 30  ;;  %v3067_v39 = vshll.u32 %v9340_v36, %v3055_v16  ;;  %v3070_v50 = vshll.u32 %v9341_v38, %v3055_v16 }
 0x2d0   :  { %v3059_v11 = vshrl.u32 %v9338_v32, %v3056_v31  ;;  %v3062_v61 = vshrl.u32 %v9339_v34, %v3056_v31  ;;  %v3065_v62 = vshrl.u32 %v9340_v36, %v3056_v31  ;;  %v3068_v48 = vshrl.u32 %v9341_v38, %v3056_v31 }
 0x2d1   :  { %v2918_v57 = vsel %vm2835_vm12, %v2917_v13, %v2916_v51  ;;  %v3001_v35 = vsub.s32 %v2997_v25, %v3000_v56  ;;  %v3057_v33 = vshrl.u32 %v9337_v30, %v3056_v31  ;;  %v3089_v55 = vshll.u32 %v3049_v20, 8 }
 0x2d2   :  { %v2921_v26 = vsel %vm11256_vm14, %v11102_v7, %v2918_v57  ;;  %v3060_v41 = vor.u32 %v3059_v11, %v3058_v14  ;;  %v3063_v40 = vor.u32 %v3062_v61, %v3061_v21  ;;  %v3066_v10 = vor.u32 %v3065_v62, %v3064_v63 }
 0x2d3   :  { %9080 = vcosq.f32 %v2921_v26  ;;  %v3003_v42 = vsub.s32 0, %v3001_v35  ;;  %v3069_v37 = vor.u32 %v3068_v48, %v3067_v39  ;;  %v3071_v27 = vshrl.u32 %v9342_v46, %v3056_v31 }
 0x2d4   :  { %9082 = vsinq.f32 %v2921_v26  ;;  %vm3073_vm15 = vcmp.lt.s32.totalorder %v3054_v44, 1  ;;  %vm3074_vm0 = vcmp.lt.s32.totalorder %v3054_v44, 2  ;;  %vm3075_vm1 = vcmp.lt.s32.totalorder %v3054_v44, 3 }
 0x2d5   :  { %v8437_v15 = vmin.u32 %v3003_v42, %v3001_v35  ;;  %vm3076_vm2 = vcmp.lt.s32.totalorder %v3054_v44, 4  ;;  %v3077_v9 = vsel %vm3073_vm15, %v3057_v33, %v3060_v41  ;;  %v3072_v19 = vor.u32 %v3071_v27, %v3070_v50 }
 0x2d6   :  { %v3078_v24 = vsel %vm3076_vm2, %v3066_v10, 2102212464  ;;  %v3081_v1 = vsel %vm3073_vm15, %v3060_v41, %v3063_v40  ;;  %v3082_v22 = vsel %vm3076_vm2, %v3069_v37, 920167782  ;;  %v2922_v23 = vsel %vm11256_vm14, 0, %v2920_v3 }
 0x2d7   :  { %v2993_v5 = vadd.s32 %v11235_v17, %v11242_v45  ;;  %v3005_v47 = vclz %v8437_v15  ;;  %v3148_v52 = vand.u32 2139095040, %v11278_v12  ;;  %v3079_v60 = vsel %vm3075_vm1, %v3063_v40, %v3078_v24 }
 0x2d8   :  { %v3083_v54 = vsel %vm3075_vm1, %v3066_v10, %v3082_v22  ;;  %v3085_v25 = vsel %vm3073_vm15, %v3063_v40, %v3066_v10  ;;  %v3086_v18 = vsel %vm3076_vm2, %v3072_v19, 1326507024  ;;  %v3080_v49 = vsel %vm3074_vm0, %v3077_v9, %v3079_v60 }
 0x2d9   :  { %v8438_v43 = vadd.s32 4294967294, %v3005_v47  ;;  %v3084_v4 = vsel %vm3074_vm0, %v3081_v1, %v3083_v54  ;;  %v3087_v8 = vsel %vm3075_vm1, %v3069_v37, %v3086_v18  ;;  %v3145_v16 = vand.u32 2147483647, %v11278_v12 }
 0x2da   :  { %v3088_v28 = vsel %vm3074_vm0, %v3085_v25, %v3087_v8  ;;  %v11300_v17 = vmul.u32.u64.low %v3089_v55, %v3084_v4  ;;  %v11301_v45 = vmul.u32.u64.high %v3089_v55, %v3084_v4, %v11300_v17  ;;  %v3149_v3 = vshrl.u32 %v3148_v52, 23 }
 0x2db   :  { %vm8439_vm3 = vcmp.lt.s32.totalorder %v8438_v43, 0  ;;  %v11305_v53 = vmul.u32.u64.low %v3089_v55, %v3088_v28  ;;  %v11306_v51 = vmul.u32.u64.high %v3089_v55, %v3088_v28, %v11305_v53  ;;  %v2926_v58 = vadd.s32 3, %v2922_v23 }
 0x2dc   :  { %v3008_v20 = vsel %vm8439_vm3, 0, %v8438_v43  ;;  %v3096_v31 = vmul.u32 %v3089_v55, %v3080_v49  ;;  %v8444_v56 = vadd.s32 4294967169, %v3149_v3  ;;  %v3099_v44 = vadd.s32 1, %v11301_v45 }
 0x2dd   :  { %v3009_v13 = vsub.s32 32, %v3008_v20  ;;  %v3010_v14 = vshll.u32 %v3001_v35, %v3008_v20  ;;  %v3013_v21 = vsub.s32 4294967266, %v3008_v20  ;;  %vm3098_vm4 = vc.u32 %v11306_v51, %v11300_v17 }
 0x2de   :  { %v3152_v39 = vand.u32 8388607, %v3145_v16  ;;  %v3100_v61 = vsel %vm3098_vm4, %v3099_v44, %v11301_v45  ;;  %v3155_v62 = vadd.s32 1, %v8444_v56  ;;  %v2927_v26 = vand.u32 3, %v2926_v58 }
 0x2df   :  { %v3011_v11 = vshrl.u32 %v2993_v5, %v3009_v13  ;;  %v3014_v63 = vadd.s32 127, %v3013_v21  ;;  %v3101_v41 = vadd.s32 %v3100_v61, %v3096_v31  ;;  %v3023_v40 = vsub.s32 4, %v11263_v29 }
 0x2e0   :  { %v9081_v57 = vpop.eup %9080  ;;  %vm3156_vm5 = vcmp.gt.s32.totalorder %v3155_v62, 0  ;;  %v3153_v10 = vor.u32 8388608, %v3152_v39  ;;  %vm2925_vm6 = vweird.f32 %v11102_v7  ;;  %vm2929_vm7 = vcmp.eq.s32.totalorder %v2927_v26, 0 }
 0x2e1   :  { %v9083_v48 = vpop.eup %9082  ;;  %v3012_v33 = vor.u32 %v3011_v11, %v3010_v14  ;;  %v3015_v35 = vshll.u32 %v3014_v63, 23  ;;  %v3102_v42 = vadd.s32 536870912, %v3101_v41  ;;  %v2933_v27 = vxor.u32 2147483648, %v9081_v57 }
 0x2e2   :  { %v2930_v37 = vxor.u32 2147483648, %v9083_v48  ;;  %v3157_v15 = vsel %vm3156_vm5, %v3155_v62, 0  ;;  %vm2932_vm8 = vcmp.eq.s32.totalorder %v2927_v26, 2  ;;  %vm2928_vm9 = vcmp.lt.s32.totalorder %v2927_v26, 2 }
 0x2e3   :  { %v3016_v50 = vor.u32 4788187, %v3015_v35  ;;  %v3019_v55 = vcvt.s32.f32 %v3012_v33  ;;  %v11316_v19 = vshrl.u32 %v3102_v42, 30  ;;  %vm11320_vm10 = vcmp.le.f32.partialorder %v2937_v2, 0.7853982 }
 0x2e4   :  { %vm2939_vm11 = vcmp.lt.s32.totalorder %v11167_v0, 0  ;;  %v3159_v1 = vand.u32 31, %v3157_v15  ;;  %v11331_v47 = vshll.u32 %v3153_v10, 8  ;;  %v2931_v52 = vsel %vm2929_vm7, %v9081_v57, %v2930_v37 }
 0x2e5   :  { %v3017_v9 = vand.u32 2147483647, %v3016_v50  ;;  %v11328_v23 = vsel %vm2939_vm11, %v3023_v40, %v11263_v29  ;;  %v3104_v5 = vshll.u32 %v11316_v19, 30  ;;  %v2934_v60 = vsel %vm2932_vm8, %v2933_v27, %v9083_v48 }
 0x2e6   :  { %v3158_v54 = vshrl.u32 %v3157_v15, 5  ;;  %v3160_v2 = vsub.s32 32, %v3159_v1  ;;  %v3162_v43 = vshll.u32 %v9337_v30, %v3159_v1  ;;  %v3165_v49 = vshll.u32 %v9338_v32, %v3159_v1 }
 0x2e7   :  { %v3020_v22 = vmul.f32 %v3019_v55, %v3017_v9  ;;  %v3105_v18 = vsub.s32 %v3101_v41, %v3104_v5  ;;  %v3168_v29 = vshll.u32 %v9339_v34, %v3159_v1  ;;  %v3171_v28 = vshll.u32 %v9340_v36, %v3159_v1 }
 0x2e8   :  { %v3163_v4 = vshrl.u32 %v9338_v32, %v3160_v2  ;;  %v3166_v8 = vshrl.u32 %v9339_v34, %v3160_v2  ;;  %v2935_v45 = vsel %vm2928_vm9, %v2931_v52, %v2934_v60  ;;  %v3169_v58 = vshrl.u32 %v9340_v36, %v3160_v2 }
 0x2e9   :  { %v3021_v25 = vxor.u32 2147483648, %v3020_v22  ;;  %v3107_v3 = vsub.s32 0, %v3105_v18  ;;  %v3161_v31 = vshrl.u32 %v9337_v30, %v3160_v2  ;;  %v3172_v13 = vshrl.u32 %v9341_v38, %v3160_v2 }
 0x2ea   :  { %vm3177_vm12 = vcmp.lt.s32.totalorder %v3158_v54, 1  ;;  %v3164_v21 = vor.u32 %v3163_v4, %v3162_v43  ;;  %v3167_v56 = vor.u32 %v3166_v8, %v3165_v49  ;;  %v3170_v44 = vor.u32 %v3169_v58, %v3168_v29 }
 0x2eb   :  { %v3022_v53 = vsel %vm2939_vm11, %v3021_v25, %v3020_v22  ;;  %v8441_v14 = vmin.u32 %v3107_v3, %v3105_v18  ;;  %v3173_v11 = vor.u32 %v3172_v13, %v3171_v28  ;;  %v3174_v63 = vshll.u32 %v9341_v38, %v3159_v1 }
 0x2ec   :  { %v3025_v20 = vsel %vm11320_vm10, %v11167_v0, %v3022_v53  ;;  %v3175_v39 = vshrl.u32 %v9342_v46, %v3160_v2  ;;  %v11352_v57 = vsel %vm2925_vm6, nan, %v2935_v45  ;;  %v3097_v61 = vadd.s32 %v11300_v17, %v11306_v51 }
 0x2ed   :  { %9084 = vcosq.f32 %v3025_v20  ;;  %v3109_v62 = vclz %v8441_v14  ;;  %vm3178_vm13 = vcmp.lt.s32.totalorder %v3158_v54, 2  ;;  %vm3179_vm14 = vcmp.lt.s32.totalorder %v3158_v54, 3 }
 0x2ee   :  { %9086 = vsinq.f32 %v3025_v20  ;;  %v3176_v48 = vor.u32 %v3175_v39, %v3174_v63  ;;  %vm3180_vm15 = vcmp.lt.s32.totalorder %v3158_v54, 4  ;;  %v3181_v33 = vsel %vm3177_vm12, %v3161_v31, %v3164_v21 }
 0x2ef   :  { %v8442_v26 = vadd.s32 4294967294, %v3109_v62  ;;  %v3182_v35 = vsel %vm3180_vm15, %v3170_v44, 2102212464  ;;  %v3185_v41 = vsel %vm3177_vm12, %v3164_v21, %v3167_v56  ;;  %v3186_v50 = vsel %vm3180_vm15, %v3173_v11, 920167782 }
 0x2f0   :  { %v3183_v40 = vsel %vm3179_vm14, %v3167_v56, %v3182_v35  ;;  %v3189_v7 = vsel %vm3177_vm12, %v3167_v56, %v3170_v44  ;;  %v3190_v55 = vsel %vm3180_vm15, %v3176_v48, 1326507024  ;;  %v3187_v42 = vsel %vm3179_vm14, %v3170_v44, %v3186_v50 }
 0x2f1   :  { %vm8443_vm0 = vcmp.lt.s32.totalorder %v8442_v26, 0  ;;  %v3191_v10 = vsel %vm3179_vm14, %v3173_v11, %v3190_v55  ;;  %v3252_v17 = vand.u32 2139095040, %v11352_v57  ;;  %v3026_v51 = vsel %vm11320_vm10, 0, %v11328_v23 }
 0x2f2   :  { %v3112_v37 = vsel %vm8443_vm0, 0, %v8442_v26  ;;  %v3188_v27 = vsel %vm3178_vm13, %v3185_v41, %v3187_v42  ;;  %v3192_v15 = vsel %vm3178_vm13, %v3189_v7, %v3191_v10  ;;  %v3184_v5 = vsel %vm3178_vm13, %v3181_v33, %v3183_v40 }
 0x2f3   :  { %v3113_v9 = vsub.s32 32, %v3112_v37  ;;  %v3114_v1 = vshll.u32 %v3105_v18, %v3112_v37  ;;  %v3117_v22 = vsub.s32 4294967266, %v3112_v37  ;;  %v3127_v43 = vsub.s32 4, %v11316_v19 }
 0x2f4   :  { %v11367_v52 = vmul.u32.u64.low %v11331_v47, %v3192_v15  ;;  %v11368_v60 = vmul.u32.u64.high %v11331_v47, %v3192_v15, %v11367_v52  ;;  %v11371_v2 = vmul.u32.u64.low %v11331_v47, %v3188_v27  ;;  %v11372_v25 = vmul.u32.u64.high %v11331_v47, %v3188_v27, %v11371_v2 }
 0x2f5   :  { %v3115_v24 = vshrl.u32 %v3097_v61, %v3113_v9  ;;  %v3118_v23 = vadd.s32 127, %v3117_v22  ;;  %v3253_v49 = vshrl.u32 %v3252_v17, 23  ;;  %v3030_v4 = vadd.s32 3, %v3026_v51 }
 0x2f6   :  { %v3249_v18 = vand.u32 2147483647, %v11352_v57  ;;  %v3200_v29 = vmul.u32 %v11331_v47, %v3184_v5  ;;  %vm3043_vm1 = vcmp.lt.s32.totalorder %v11219_v6, 0  ;;  %vm3202_vm2 = vc.u32 %v11368_v60, %v11371_v2 }
 0x2f7   :  { %v3116_v8 = vor.u32 %v3115_v24, %v3114_v1  ;;  %v3119_v54 = vshll.u32 %v3118_v23, 23  ;;  %v8448_v28 = vadd.s32 4294967169, %v3253_v49  ;;  %v3203_v53 = vadd.s32 1, %v11372_v25 }
 0x2f8   :  { %v3128_v20 = vsel %vm3043_vm1, %v3127_v43, %v11316_v19  ;;  %v3031_v14 = vand.u32 3, %v3030_v4  ;;  %vm11387_vm3 = vcmp.le.f32.partialorder %v3041_v59, 0.7853982  ;;  %v3256_v11 = vand.u32 8388607, %v3249_v18 }
 0x2f9   :  { %v3120_v3 = vor.u32 4788187, %v3119_v54  ;;  %v3123_v58 = vcvt.s32.f32 %v3116_v8  ;;  %v3259_v31 = vadd.s32 1, %v8448_v28  ;;  %v3204_v21 = vsel %vm3202_vm2, %v3203_v53, %v11372_v25 }
 0x2fa   :  { %v9085_v45 = vpop.eup %9084  ;;  %v3205_v44 = vadd.s32 %v3204_v21, %v3200_v29  ;;  %v3130_v19 = vsel %vm11387_vm3, 0, %v3128_v20  ;;  %vm3032_vm5 = vcmp.lt.s32.totalorder %v3031_v14, 2  ;;  %vm3033_vm6 = vcmp.eq.s32.totalorder %v3031_v14, 0 }
 0x2fb   :  { %v9087_v13 = vpop.eup %9086  ;;  %v3121_v56 = vand.u32 2147483647, %v3120_v3  ;;  %vm3260_vm4 = vcmp.gt.s32.totalorder %v3259_v31, 0  ;;  %vm3036_vm7 = vcmp.eq.s32.totalorder %v3031_v14, 2  ;;  %v3134_v48 = vadd.s32 3, %v3130_v19 }
 0x2fc   :  { %v3261_v63 = vsel %vm3260_vm4, %v3259_v31, 0  ;;  %v3206_v61 = vadd.s32 536870912, %v3205_v44  ;;  %v3257_v33 = vor.u32 8388608, %v3256_v11  ;;  %vm3029_vm8 = vweird.f32 %v11167_v0 }
 0x2fd   :  { %v3124_v39 = vmul.f32 %v3123_v58, %v3121_v56  ;;  %v3263_v59 = vand.u32 31, %v3261_v63  ;;  %v3034_v35 = vxor.u32 2147483648, %v9087_v13  ;;  %v3037_v41 = vxor.u32 2147483648, %v9085_v45 }
 0x2fe   :  { %v11396_v26 = vshrl.u32 %v3206_v61, 30  ;;  %v3262_v51 = vshrl.u32 %v3261_v63, 5  ;;  %v3297_v28 = vshll.u32 %v3257_v33, 8  ;;  %v3201_v14 = vadd.s32 %v11371_v2, %v11368_v60 }
 0x2ff   :  { %v3125_v62 = vxor.u32 2147483648, %v3124_v39  ;;  %v3264_v40 = vsub.s32 32, %v3263_v59  ;;  %v3266_v50 = vshll.u32 %v9337_v30, %v3263_v59  ;;  %v3269_v42 = vshll.u32 %v9338_v32, %v3263_v59 }
 0x300   :  { %v3208_v55 = vshll.u32 %v11396_v26, 30  ;;  %v3272_v10 = vshll.u32 %v9339_v34, %v3263_v59  ;;  %v3275_v1 = vshll.u32 %v9340_v36, %v3263_v59  ;;  %v3035_v22 = vsel %vm3033_vm6, %v9085_v45, %v3034_v35 }
 0x301   :  { %v3126_v7 = vsel %vm3043_vm1, %v3125_v62, %v3124_v39  ;;  %v3267_v37 = vshrl.u32 %v9338_v32, %v3264_v40  ;;  %v3270_v27 = vshrl.u32 %v9339_v34, %v3264_v40  ;;  %v3273_v9 = vshrl.u32 %v9340_v36, %v3264_v40 }
 0x302   :  { %v3129_v17 = vsel %vm11387_vm3, %v11219_v6, %v3126_v7  ;;  %v11410_v15 = vsub.s32 %v3205_v44, %v3208_v55  ;;  %v3038_v5 = vsel %vm3036_vm7, %v3037_v41, %v9087_v13  ;;  %v3276_v43 = vshrl.u32 %v9341_v38, %v3264_v40 }
 0x303   :  { %9088 = vcosq.f32 %v3129_v17  ;;  %v3268_v52 = vor.u32 %v3267_v37, %v3266_v50  ;;  %v3271_v24 = vor.u32 %v3270_v27, %v3269_v42  ;;  %v3274_v23 = vor.u32 %v3273_v9, %v3272_v10 }
 0x304   :  { %9090 = vsinq.f32 %v3129_v17  ;;  %v3211_v25 = vsub.s32 0, %v11410_v15  ;;  %v3265_v49 = vshrl.u32 %v9337_v30, %v3264_v40  ;;  %v3278_v4 = vshll.u32 %v9341_v38, %v3263_v59 }
 0x305   :  { %v3279_v8 = vshrl.u32 %v9342_v46, %v3264_v40  ;;  %vm3281_vm9 = vcmp.lt.s32.totalorder %v3262_v51, 1  ;;  %v3277_v29 = vor.u32 %v3276_v43, %v3275_v1  ;;  %vm3284_vm10 = vcmp.lt.s32.totalorder %v3262_v51, 4 }
 0x306   :  { %v8445_v54 = vmin.u32 %v3211_v25, %v11410_v15  ;;  %v3039_v45 = vsel %vm3032_vm5, %v3035_v22, %v3038_v5  ;;  %vm3283_vm11 = vcmp.lt.s32.totalorder %v3262_v51, 3  ;;  %v3286_v3 = vsel %vm3284_vm10, %v3274_v23, 2102212464 }
 0x307   :  { %v3280_v53 = vor.u32 %v3279_v8, %v3278_v4  ;;  %vm3282_vm12 = vcmp.lt.s32.totalorder %v3262_v51, 2  ;;  %v3289_v20 = vsel %vm3281_vm9, %v3268_v52, %v3271_v24  ;;  %v3293_v31 = vsel %vm3281_vm9, %v3271_v24, %v3274_v23 }
 0x308   :  { %v3213_v58 = vclz %v8445_v54  ;;  %v3285_v13 = vsel %vm3281_vm9, %v3265_v49, %v3268_v52  ;;  %v3287_v47 = vsel %vm3283_vm11, %v3271_v24, %v3286_v3  ;;  %v3290_v21 = vsel %vm3284_vm10, %v3277_v29, 920167782 }
 0x309   :  { %v3294_v56 = vsel %vm3284_vm10, %v3280_v53, 1326507024  ;;  %v11425_v44 = vsel %vm3029_vm8, nan, %v3039_v45  ;;  %v3291_v19 = vsel %vm3283_vm11, %v3274_v23, %v3290_v21  ;;  %v3288_v59 = vsel %vm3282_vm12, %v3285_v13, %v3287_v47 }
 0x30a   :  { %v8446_v11 = vadd.s32 4294967294, %v3213_v58  ;;  %v3295_v63 = vsel %vm3283_vm11, %v3277_v29, %v3294_v56  ;;  %v3292_v39 = vsel %vm3282_vm12, %v3289_v20, %v3291_v19  ;;  %v3356_v0 = vand.u32 2139095040, %v11425_v44 }
 0x30b   :  { %v3296_v61 = vsel %vm3282_vm12, %v3293_v31, %v3295_v63  ;;  %v11432_v41 = vmul.u32.u64.low %v3297_v28, %v3292_v39  ;;  %v11433_v40 = vmul.u32.u64.high %v3297_v28, %v3292_v39, %v11432_v41  ;;  %v3135_v50 = vand.u32 3, %v3134_v48 }
 0x30c   :  { %vm8447_vm13 = vcmp.lt.s32.totalorder %v8446_v11, 0  ;;  %v11429_v62 = vmul.u32.u64.low %v3297_v28, %v3296_v61  ;;  %v11430_v33 = vmul.u32.u64.high %v3297_v28, %v3296_v61, %v11429_v62  ;;  %v3357_v2 = vshrl.u32 %v3356_v0, 23 }
 0x30d   :  { %v3216_v35 = vsel %vm8447_vm13, 0, %v8446_v11  ;;  %v3231_v37 = vsub.s32 4, %v11396_v26  ;;  %v3304_v27 = vmul.u32 %v3297_v28, %v3288_v59  ;;  %v3307_v1 = vadd.s32 1, %v11433_v40 }
 0x30e   :  { %v3217_v7 = vsub.s32 32, %v3216_v35  ;;  %v3218_v55 = vshll.u32 %v11410_v15, %v3216_v35  ;;  %v3221_v42 = vsub.s32 4294967266, %v3216_v35  ;;  %vm3306_vm14 = vc.u32 %v11430_v33, %v11432_v41 }
 0x30f   :  { %v8452_v22 = vadd.s32 4294967169, %v3357_v2  ;;  %vm3140_vm15 = vcmp.eq.s32.totalorder %v3135_v50, 2  ;;  %vm3137_vm0 = vcmp.eq.s32.totalorder %v3135_v50, 0  ;;  %vm3147_vm1 = vcmp.lt.s32.totalorder %v11278_v12, 0 }
 0x310   :  { %v9089_v60 = vpop.eup %9088  ;;  %v3219_v17 = vshrl.u32 %v3201_v14, %v3217_v7  ;;  %v3222_v51 = vadd.s32 127, %v3221_v42  ;;  %v3308_v52 = vsel %vm3306_vm14, %v3307_v1, %v11433_v40  ;;  %vm3136_vm2 = vcmp.lt.s32.totalorder %v3135_v50, 2 }
 0x311   :  { %v9091_v10 = vpop.eup %9090  ;;  %v3141_v9 = vxor.u32 2147483648, %v9089_v60  ;;  %v3363_v25 = vadd.s32 1, %v8452_v22  ;;  %v3309_v43 = vadd.s32 %v3308_v52, %v3304_v27  ;;  %v11447_v4 = vsel %vm3147_vm1, %v3231_v37, %v11396_v26 }
 0x312   :  { %v3138_v48 = vxor.u32 2147483648, %v9091_v10  ;;  %v3220_v5 = vor.u32 %v3219_v17, %v3218_v55  ;;  %v3223_v15 = vshll.u32 %v3222_v51, 23  ;;  %v3353_v8 = vand.u32 2147483647, %v11425_v44 }
 0x313   :  { %v3142_v49 = vsel %vm3140_vm15, %v3141_v9, %v9091_v10  ;;  %vm3364_vm3 = vcmp.gt.s32.totalorder %v3363_v25, 0  ;;  %v3310_v28 = vadd.s32 536870912, %v3309_v43  ;;  %vm11452_vm4 = vcmp.le.f32.partialorder %v3145_v16, 0.7853982 }
 0x314   :  { %v3224_v24 = vor.u32 4788187, %v3223_v15  ;;  %v3227_v23 = vcvt.s32.f32 %v3220_v5  ;;  %v3139_v54 = vsel %vm3137_vm0, %v9089_v60, %v3138_v48  ;;  %v3365_v45 = vsel %vm3364_vm3, %v3363_v25, 0 }
 0x315   :  { %v3367_v3 = vand.u32 31, %v3365_v45  ;;  %vm3133_vm5 = vweird.f32 %v11219_v6  ;;  %v3234_v26 = vsel %vm11452_vm4, 0, %v11447_v4  ;;  %v11460_v20 = vshrl.u32 %v3310_v28, 30 }
 0x316   :  { %v3225_v29 = vand.u32 2147483647, %v3224_v24  ;;  %v3143_v31 = vsel %vm3136_vm2, %v3139_v54, %v3142_v49  ;;  %v3360_v13 = vand.u32 8388607, %v3353_v8  ;;  %v3366_v35 = vshrl.u32 %v3365_v45, 5 }
 0x317   :  { %v3368_v47 = vsub.s32 32, %v3367_v3  ;;  %v3370_v16 = vshll.u32 %v9337_v30, %v3367_v3  ;;  %v3312_v56 = vshll.u32 %v11460_v20, 30  ;;  %v3373_v11 = vshll.u32 %v9338_v32, %v3367_v3 }
 0x318   :  { %v3228_v58 = vmul.f32 %v3227_v23, %v3225_v29  ;;  %v3376_v19 = vshll.u32 %v9339_v34, %v3367_v3  ;;  %v3379_v61 = vshll.u32 %v9340_v36, %v3367_v3  ;;  %v11478_v0 = vsel %vm3133_vm5, nan, %v3143_v31 }
 0x319   :  { %v3371_v63 = vshrl.u32 %v9338_v32, %v3368_v47  ;;  %v3374_v14 = vshrl.u32 %v9339_v34, %v3368_v47  ;;  %v3377_v39 = vshrl.u32 %v9340_v36, %v3368_v47  ;;  %v3313_v62 = vsub.s32 %v3309_v43, %v3312_v56 }
 0x31a   :  { %v3229_v21 = vxor.u32 2147483648, %v3228_v58  ;;  %v3380_v40 = vshrl.u32 %v9341_v38, %v3368_v47  ;;  %v3305_v7 = vadd.s32 %v11432_v41, %v11430_v33  ;;  %v3361_v55 = vor.u32 8388608, %v3360_v13 }
 0x31b   :  { %v3315_v42 = vsub.s32 0, %v3313_v62  ;;  %v3369_v60 = vshrl.u32 %v9337_v30, %v3368_v47  ;;  %v3372_v2 = vor.u32 %v3371_v63, %v3370_v16  ;;  %v3375_v10 = vor.u32 %v3374_v14, %v3373_v11 }
 0x31c   :  { %v3230_v59 = vsel %vm3147_vm1, %v3229_v21, %v3228_v58  ;;  %v3378_v17 = vor.u32 %v3377_v39, %v3376_v19  ;;  %v3381_v51 = vor.u32 %v3380_v40, %v3379_v61  ;;  %v3382_v37 = vshll.u32 %v9341_v38, %v3367_v3 }
 0x31d   :  { %v3233_v50 = vsel %vm11452_vm4, %v11278_v12, %v3230_v59  ;;  %v3383_v6 = vshrl.u32 %v9342_v46, %v3368_v47  ;;  %v8449_v27 = vmin.u32 %v3315_v42, %v3313_v62  ;;  %vm3385_vm6 = vcmp.lt.s32.totalorder %v3366_v35, 1 }
 0x31e   :  { %9092 = vcosq.f32 %v3233_v50  ;;  %v3460_v9 = vand.u32 2139095040, %v11478_v0  ;;  %vm3387_vm7 = vcmp.lt.s32.totalorder %v3366_v35, 3  ;;  %vm3388_vm8 = vcmp.lt.s32.totalorder %v3366_v35, 4 }
 0x31f   :  { %9094 = vsinq.f32 %v3233_v50  ;;  %v3384_v1 = vor.u32 %v3383_v6, %v3382_v37  ;;  %v3317_v33 = vclz %v8449_v27  ;;  %vm3386_vm9 = vcmp.lt.s32.totalorder %v3366_v35, 2 }
 0x320   :  { %v3389_v41 = vsel %vm3385_vm6, %v3369_v60, %v3372_v2  ;;  %v3401_v22 = vshll.u32 %v3361_v55, 8  ;;  %v3390_v48 = vsel %vm3388_vm8, %v3378_v17, 2102212464  ;;  %v3393_v5 = vsel %vm3385_vm6, %v3372_v2, %v3375_v10 }
 0x321   :  { %v3394_v15 = vsel %vm3388_vm8, %v3381_v51, 920167782  ;;  %v3397_v52 = vsel %vm3385_vm6, %v3375_v10, %v3378_v17  ;;  %v8450_v25 = vadd.s32 4294967294, %v3317_v33  ;;  %v3391_v24 = vsel %vm3387_vm7, %v3375_v10, %v3390_v48 }
 0x322   :  { %v3395_v23 = vsel %vm3387_vm7, %v3378_v17, %v3394_v15  ;;  %v3398_v43 = vsel %vm3388_vm8, %v3384_v1, 1326507024  ;;  %v3392_v49 = vsel %vm3386_vm9, %v3389_v41, %v3391_v24  ;;  %v3461_v29 = vshrl.u32 %v3460_v9, 23 }
 0x323   :  { %v3396_v4 = vsel %vm3386_vm9, %v3393_v5, %v3395_v23  ;;  %v3399_v54 = vsel %vm3387_vm7, %v3381_v51, %v3398_v43  ;;  %vm8451_vm10 = vcmp.lt.s32.totalorder %v8450_v25, 0  ;;  %v3238_v3 = vadd.s32 3, %v3234_v26 }
 0x324   :  { %v3400_v28 = vsel %vm3386_vm9, %v3397_v52, %v3399_v54  ;;  %v11495_v45 = vmul.u32.u64.low %v3401_v22, %v3396_v4  ;;  %v11496_v53 = vmul.u32.u64.high %v3401_v22, %v3396_v4, %v11495_v45  ;;  %v3320_v58 = vsel %vm8451_vm10, 0, %v8450_v25 }
 0x325   :  { %v11499_v31 = vmul.u32.u64.low %v3401_v22, %v3400_v28  ;;  %v11500_v13 = vmul.u32.u64.high %v3401_v22, %v3400_v28, %v11499_v31  ;;  %v3321_v47 = vsub.s32 32, %v3320_v58  ;;  %v3322_v16 = vshll.u32 %v3313_v62, %v3320_v58 }
 0x326   :  { %v3325_v21 = vsub.s32 4294967266, %v3320_v58  ;;  %v8456_v56 = vadd.s32 4294967169, %v3461_v29  ;;  %v3408_v11 = vmul.u32 %v3401_v22, %v3392_v49  ;;  %v3411_v14 = vadd.s32 1, %v11496_v53 }
 0x327   :  { %v3323_v19 = vshrl.u32 %v3305_v7, %v3321_v47  ;;  %v3239_v61 = vand.u32 3, %v3238_v3  ;;  %vm3410_vm11 = vc.u32 %v11500_v13, %v11495_v45  ;;  %v3457_v40 = vand.u32 2147483647, %v11478_v0 }
 0x328   :  { %v3326_v63 = vadd.s32 127, %v3325_v21  ;;  %v3467_v39 = vadd.s32 1, %v8456_v56  ;;  %v3412_v35 = vsel %vm3410_vm11, %v3411_v14, %v11496_v53  ;;  %vm3251_vm12 = vcmp.lt.s32.totalorder %v11352_v57, 0 }
 0x329   :  { %v3324_v59 = vor.u32 %v3323_v19, %v3322_v16  ;;  %v3413_v62 = vadd.s32 %v3412_v35, %v3408_v11  ;;  %vm11510_vm14 = vcmp.le.f32.partialorder %v3249_v18, 0.7853982  ;;  %vm3240_vm15 = vcmp.lt.s32.totalorder %v3239_v61, 2 }
 0x32a   :  { %v3327_v26 = vshll.u32 %v3326_v63, 23  ;;  %vm3468_vm13 = vcmp.gt.s32.totalorder %v3467_v39, 0  ;;  %vm3241_vm0 = vcmp.eq.s32.totalorder %v3239_v61, 0  ;;  %vm3244_vm1 = vcmp.eq.s32.totalorder %v3239_v61, 2 }
 0x32b   :  { %v9093_v50 = vpop.eup %9092  ;;  %v3331_v60 = vcvt.s32.f32 %v3324_v59  ;;  %v3469_v2 = vsel %vm3468_vm13, %v3467_v39, 0  ;;  %v3414_v10 = vadd.s32 536870912, %v3413_v62  ;;  %v3335_v37 = vsub.s32 4, %v11460_v20 }
 0x32c   :  { %v9095_v7 = vpop.eup %9094  ;;  %v3328_v42 = vor.u32 4788187, %v3327_v26  ;;  %v3471_v17 = vand.u32 31, %v3469_v2  ;;  %v3464_v6 = vand.u32 8388607, %v3457_v40  ;;  %v3245_v9 = vxor.u32 2147483648, %v9093_v50 }
 0x32d   :  { %v3242_v27 = vxor.u32 2147483648, %v9095_v7  ;;  %v11517_v18 = vshrl.u32 %v3414_v10, 30  ;;  %v3470_v41 = vshrl.u32 %v3469_v2, 5  ;;  %vm3237_vm2 = vweird.f32 %v11278_v12 }
 0x32e   :  { %v3329_v51 = vand.u32 2147483647, %v3328_v42  ;;  %v3472_v1 = vsub.s32 32, %v3471_v17  ;;  %v3474_v22 = vshll.u32 %v9337_v30, %v3471_v17  ;;  %v3477_v48 = vshll.u32 %v9338_v32, %v3471_v17 }
 0x32f   :  { %v3416_v5 = vshll.u32 %v11517_v18, 30  ;;  %v3480_v52 = vshll.u32 %v9339_v34, %v3471_v17  ;;  %v3483_v25 = vshll.u32 %v9340_v36, %v3471_v17  ;;  %v3246_v4 = vsel %vm3244_vm1, %v3245_v9, %v9095_v7 }
 0x330   :  { %v3332_v33 = vmul.f32 %v3331_v60, %v3329_v51  ;;  %v3475_v15 = vshrl.u32 %v9338_v32, %v3472_v1  ;;  %v3478_v23 = vshrl.u32 %v9339_v34, %v3472_v1  ;;  %v3481_v43 = vshrl.u32 %v9340_v36, %v3472_v1 }
 0x331   :  { %v3484_v49 = vshrl.u32 %v9341_v38, %v3472_v1  ;;  %v3336_v54 = vsel %vm3251_vm12, %v3335_v37, %v11460_v20  ;;  %v3417_v29 = vsub.s32 %v3413_v62, %v3416_v5  ;;  %v3465_v28 = vor.u32 8388608, %v3464_v6 }
 0x332   :  { %v3333_v24 = vxor.u32 2147483648, %v3332_v33  ;;  %v3243_v53 = vsel %vm3241_vm0, %v9093_v50, %v3242_v27  ;;  %v3473_v58 = vshrl.u32 %v9337_v30, %v3472_v1  ;;  %v3486_v31 = vshll.u32 %v9341_v38, %v3471_v17 }
 0x333   :  { %v3419_v16 = vsub.s32 0, %v3417_v29  ;;  %v3476_v21 = vor.u32 %v3475_v15, %v3474_v22  ;;  %v3479_v56 = vor.u32 %v3478_v23, %v3477_v48  ;;  %v3482_v11 = vor.u32 %v3481_v43, %v3480_v52 }
 0x334   :  { %v3334_v3 = vsel %vm3251_vm12, %v3333_v24, %v3332_v33  ;;  %v3485_v20 = vor.u32 %v3484_v49, %v3483_v25  ;;  %v3487_v19 = vshrl.u32 %v9342_v46, %v3472_v1  ;;  %vm3489_vm3 = vcmp.lt.s32.totalorder %v3470_v41, 1 }
 0x335   :  { %v3337_v47 = vsel %vm11510_vm14, %v11352_v57, %v3334_v3  ;;  %v3247_v63 = vsel %vm3240_vm15, %v3243_v53, %v3246_v4  ;;  %v8453_v14 = vmin.u32 %v3419_v16, %v3417_v29  ;;  %v3505_v39 = vshll.u32 %v3465_v28, 8 }
 0x336   :  { %9096 = vcosq.f32 %v3337_v47  ;;  %v3488_v59 = vor.u32 %v3487_v19, %v3486_v31  ;;  %vm3491_vm4 = vcmp.lt.s32.totalorder %v3470_v41, 3  ;;  %vm3492_vm5 = vcmp.lt.s32.totalorder %v3470_v41, 4 }
 0x337   :  { %9098 = vsinq.f32 %v3337_v47  ;;  %v3421_v26 = vclz %v8453_v14  ;;  %vm3490_vm6 = vcmp.lt.s32.totalorder %v3470_v41, 2  ;;  %v3493_v35 = vsel %vm3489_vm3, %v3473_v58, %v3476_v21 }
 0x338   :  { %v3497_v50 = vsel %vm3489_vm3, %v3476_v21, %v3479_v56  ;;  %v3494_v62 = vsel %vm3492_vm5, %v3482_v11, 2102212464  ;;  %v3498_v7 = vsel %vm3492_vm5, %v3485_v20, 920167782  ;;  %v3501_v42 = vsel %vm3489_vm3, %v3479_v56, %v3482_v11 }
 0x339   :  { %v3502_v60 = vsel %vm3492_vm5, %v3488_v59, 1326507024  ;;  %v8454_v2 = vadd.s32 4294967294, %v3421_v26  ;;  %v3495_v10 = vsel %vm3491_vm4, %v3479_v56, %v3494_v62  ;;  %v3499_v17 = vsel %vm3491_vm4, %v3482_v11, %v3498_v7 }
 0x33a   :  { %v3503_v61 = vsel %vm3491_vm4, %v3485_v20, %v3502_v60  ;;  %v3338_v51 = vsel %vm11510_vm14, 0, %v3336_v54  ;;  %v3409_v37 = vadd.s32 %v11495_v45, %v11500_v13  ;;  %v3500_v6 = vsel %vm3490_vm6, %v3497_v50, %v3499_v17 }
 0x33b   :  { %v3504_v27 = vsel %vm3490_vm6, %v3501_v42, %v3503_v61  ;;  %v11551_v9 = vsel %vm3237_vm2, nan, %v3247_v63  ;;  %vm8455_vm7 = vcmp.lt.s32.totalorder %v8454_v2, 0  ;;  %v3496_v48 = vsel %vm3490_vm6, %v3493_v35, %v3495_v10 }
 0x33c   :  { %v11553_v1 = vmul.u32.u64.low %v3505_v39, %v3504_v27  ;;  %v11554_v33 = vmul.u32.u64.high %v3505_v39, %v3504_v27, %v11553_v1  ;;  %v3424_v22 = vsel %vm8455_vm7, 0, %v8454_v2  ;;  %v3342_v45 = vadd.s32 3, %v3338_v51 }
 0x33d   :  { %v11557_v55 = vmul.u32.u64.low %v3505_v39, %v3500_v6  ;;  %v11558_v5 = vmul.u32.u64.high %v3505_v39, %v3500_v6, %v11557_v55  ;;  %v3425_v13 = vsub.s32 32, %v3424_v22  ;;  %v3426_v15 = vshll.u32 %v3417_v29, %v3424_v22 }
 0x33e   :  { %v3429_v52 = vsub.s32 4294967266, %v3424_v22  ;;  %v3439_v25 = vsub.s32 4, %v11517_v18  ;;  %v3564_v12 = vand.u32 2139095040, %v11551_v9  ;;  %v3512_v43 = vmul.u32 %v3505_v39, %v3496_v48 }
 0x33f   :  { %v3427_v24 = vshrl.u32 %v3409_v37, %v3425_v13  ;;  %vm3514_vm8 = vc.u32 %v11554_v33, %v11557_v55  ;;  %v3515_v41 = vadd.s32 1, %v11558_v5  ;;  %v3343_v4 = vand.u32 3, %v3342_v45 }
 0x340   :  { %v3430_v23 = vadd.s32 127, %v3429_v52  ;;  %v3565_v49 = vshrl.u32 %v3564_v12, 23  ;;  %v3561_v53 = vand.u32 2147483647, %v11551_v9  ;;  %vm3355_vm9 = vcmp.lt.s32.totalorder %v11425_v44, 0 }
 0x341   :  { %v3428_v54 = vor.u32 %v3427_v24, %v3426_v15  ;;  %v3516_v3 = vsel %vm3514_vm8, %v3515_v41, %v11558_v5  ;;  %v3440_v21 = vsel %vm3355_vm9, %v3439_v25, %v11517_v18  ;;  %vm11574_vm10 = vcmp.le.f32.partialorder %v3353_v8, 0.7853982 }
 0x342   :  { %v3431_v28 = vshll.u32 %v3430_v23, 23  ;;  %v8460_v58 = vadd.s32 4294967169, %v3565_v49  ;;  %v3517_v56 = vadd.s32 %v3516_v3, %v3512_v43  ;;  %vm3345_vm11 = vcmp.eq.s32.totalorder %v3343_v4, 0 }
 0x343   :  { %v9097_v29 = vpop.eup %9096  ;;  %v3435_v16 = vcvt.s32.f32 %v3428_v54  ;;  %v3568_v14 = vand.u32 8388607, %v3561_v53  ;;  %v3442_v26 = vsel %vm11574_vm10, 0, %v3440_v21  ;;  %vm3348_vm13 = vcmp.eq.s32.totalorder %v3343_v4, 2 }
 0x344   :  { %v9099_v31 = vpop.eup %9098  ;;  %v3432_v47 = vor.u32 4788187, %v3431_v28  ;;  %v3571_v20 = vadd.s32 1, %v8460_v58  ;;  %v3518_v63 = vadd.s32 536870912, %v3517_v56  ;;  %v3349_v59 = vxor.u32 2147483648, %v9097_v29 }
 0x345   :  { %v3346_v39 = vxor.u32 2147483648, %v9099_v31  ;;  %vm3341_vm14 = vweird.f32 %v11352_v57  ;;  %vm3344_vm15 = vcmp.lt.s32.totalorder %v3343_v4, 2  ;;  %v3446_v7 = vadd.s32 3, %v3442_v26 }
 0x346   :  { %v3433_v19 = vand.u32 2147483647, %v3432_v47  ;;  %vm3572_vm12 = vcmp.gt.s32.totalorder %v3571_v20, 0  ;;  %v11582_v35 = vshrl.u32 %v3518_v63, 30  ;;  %v3569_v60 = vor.u32 8388608, %v3568_v14 }
 0x347   :  { %v3573_v8 = vsel %vm3572_vm12, %v3571_v20, 0  ;;  %v3347_v2 = vsel %vm3345_vm11, %v9097_v29, %v3346_v39  ;;  %v3350_v10 = vsel %vm3348_vm13, %v3349_v59, %v9099_v31  ;;  %v3513_v29 = vadd.s32 %v11557_v55, %v11554_v33 }
 0x348   :  { %v3436_v18 = vmul.f32 %v3435_v16, %v3433_v19  ;;  %v3575_v50 = vand.u32 31, %v3573_v8  ;;  %v3520_v42 = vshll.u32 %v11582_v35, 30  ;;  %v3574_v17 = vshrl.u32 %v3573_v8, 5 }
 0x349   :  { %v3351_v45 = vsel %vm3344_vm15, %v3347_v2, %v3350_v10  ;;  %v3609_v58 = vshll.u32 %v3569_v60, 8  ;;  %v3447_v10 = vand.u32 3, %v3446_v7  ;;  %vm3459_vm11 = vcmp.lt.s32.totalorder %v11478_v0, 0 }
 0x34a   :  { %v3437_v62 = vxor.u32 2147483648, %v3436_v18  ;;  %v3576_v61 = vsub.s32 32, %v3575_v50  ;;  %v3521_v37 = vsub.s32 %v3517_v56, %v3520_v42  ;;  %v3578_v6 = vshll.u32 %v9337_v30, %v3575_v50 }
 0x34b   :  { %v3581_v27 = vshll.u32 %v9338_v32, %v3575_v50  ;;  %v3584_v48 = vshll.u32 %v9339_v34, %v3575_v50  ;;  %v3587_v5 = vshll.u32 %v9340_v36, %v3575_v50  ;;  %v3590_v41 = vshll.u32 %v9341_v38, %v3575_v50 }
 0x34c   :  { %v3438_v51 = vsel %vm3355_vm9, %v3437_v62, %v3436_v18  ;;  %v3579_v22 = vshrl.u32 %v9338_v32, %v3576_v61  ;;  %v3523_v13 = vsub.s32 0, %v3521_v37  ;;  %v3582_v15 = vshrl.u32 %v9339_v34, %v3576_v61 }
 0x34d   :  { %v3441_v1 = vsel %vm11574_vm10, %v11425_v44, %v3438_v51  ;;  %v3577_v52 = vshrl.u32 %v9337_v30, %v3576_v61  ;;  %v3585_v25 = vshrl.u32 %v9340_v36, %v3576_v61  ;;  %v3588_v12 = vshrl.u32 %v9341_v38, %v3576_v61 }
 0x34e   :  { %9100 = vcosq.f32 %v3441_v1  ;;  %v8457_v24 = vmin.u32 %v3523_v13, %v3521_v37  ;;  %v3580_v23 = vor.u32 %v3579_v22, %v3578_v6  ;;  %v3583_v43 = vor.u32 %v3582_v15, %v3581_v27 }
 0x34f   :  { %9102 = vsinq.f32 %v3441_v1  ;;  %v3586_v49 = vor.u32 %v3585_v25, %v3584_v48  ;;  %v3589_v54 = vor.u32 %v3588_v12, %v3587_v5  ;;  %v3591_v4 = vshrl.u32 %v9342_v46, %v3576_v61 }
 0x350   :  { %vm3593_vm0 = vcmp.lt.s32.totalorder %v3574_v17, 1  ;;  %v11606_v28 = vsel %vm3341_vm14, nan, %v3351_v45  ;;  %v3525_v3 = vclz %v8457_v24  ;;  %vm3594_vm1 = vcmp.lt.s32.totalorder %v3574_v17, 2 }
 0x351   :  { %v3592_v31 = vor.u32 %v3591_v4, %v3590_v41  ;;  %vm3595_vm2 = vcmp.lt.s32.totalorder %v3574_v17, 3  ;;  %vm3596_vm3 = vcmp.lt.s32.totalorder %v3574_v17, 4  ;;  %v3597_v16 = vsel %vm3593_vm0, %v3577_v52, %v3580_v23 }
 0x352   :  { %v8458_v47 = vadd.s32 4294967294, %v3525_v3  ;;  %v3598_v21 = vsel %vm3596_vm3, %v3586_v49, 2102212464  ;;  %v3601_v56 = vsel %vm3593_vm0, %v3580_v23, %v3583_v43  ;;  %v3602_v20 = vsel %vm3596_vm3, %v3589_v54, 920167782 }
 0x353   :  { %v3599_v11 = vsel %vm3595_vm2, %v3583_v43, %v3598_v21  ;;  %v3605_v19 = vsel %vm3593_vm0, %v3583_v43, %v3586_v49  ;;  %v3606_v63 = vsel %vm3596_vm3, %v3592_v31, 1326507024  ;;  %v3603_v57 = vsel %vm3595_vm2, %v3586_v49, %v3602_v20 }
 0x354   :  { %vm8459_vm4 = vcmp.lt.s32.totalorder %v8458_v47, 0  ;;  %v3607_v14 = vsel %vm3595_vm2, %v3589_v54, %v3606_v63  ;;  %v3668_v39 = vand.u32 2139095040, %v11606_v28  ;;  %v3604_v55 = vsel %vm3594_vm1, %v3601_v56, %v3603_v57 }
 0x355   :  { %v3528_v33 = vsel %vm8459_vm4, 0, %v8458_v47  ;;  %v3608_v59 = vsel %vm3594_vm1, %v3605_v19, %v3607_v14  ;;  %v3600_v50 = vsel %vm3594_vm1, %v3597_v16, %v3599_v11  ;;  %v3665_v13 = vand.u32 2147483647, %v11606_v28 }
 0x356   :  { %v3529_v26 = vsub.s32 32, %v3528_v33  ;;  %v3530_v18 = vshll.u32 %v3521_v37, %v3528_v33  ;;  %v3533_v8 = vsub.s32 4294967266, %v3528_v33  ;;  %v3669_v6 = vshrl.u32 %v3668_v39, 23 }
 0x357   :  { %v11614_v62 = vmul.u32.u64.low %v3609_v58, %v3608_v59  ;;  %v11615_v42 = vmul.u32.u64.high %v3609_v58, %v3608_v59, %v11614_v62  ;;  %v11617_v60 = vmul.u32.u64.low %v3609_v58, %v3604_v55  ;;  %v11618_v2 = vmul.u32.u64.high %v3609_v58, %v3604_v55, %v11617_v60 }
 0x358   :  { %v3531_v61 = vshrl.u32 %v3513_v29, %v3529_v26  ;;  %v3534_v51 = vadd.s32 127, %v3533_v8  ;;  %v3616_v5 = vmul.u32 %v3609_v58, %v3600_v50  ;;  %v8464_v37 = vadd.s32 4294967169, %v3669_v6 }
 0x359   :  { %vm3618_vm5 = vc.u32 %v11615_v42, %v11617_v60  ;;  %v3619_v17 = vadd.s32 1, %v11618_v2  ;;  %vm3452_vm6 = vcmp.eq.s32.totalorder %v3447_v10, 2  ;;  %vm3449_vm7 = vcmp.eq.s32.totalorder %v3447_v10, 0 }
 0x35a   :  { %v3532_v22 = vor.u32 %v3531_v61, %v3530_v18  ;;  %v3535_v48 = vshll.u32 %v3534_v51, 23  ;;  %v3675_v12 = vadd.s32 1, %v8464_v37  ;;  %v3543_v23 = vsub.s32 4, %v11582_v35 }
 0x35b   :  { %v9101_v27 = vpop.eup %9100  ;;  %v3620_v25 = vsel %vm3618_vm5, %v3619_v17, %v11618_v2  ;;  %vm3448_vm8 = vcmp.lt.s32.totalorder %v3447_v10, 2  ;;  %v3672_v49 = vand.u32 8388607, %v3665_v13  ;;  %vm3445_vm10 = vweird.f32 %v11425_v44 }
 0x35c   :  { %v9103_v1 = vpop.eup %9102  ;;  %v3453_v45 = vxor.u32 2147483648, %v9101_v27  ;;  %v3536_v7 = vor.u32 4788187, %v3535_v48  ;;  %v3539_v52 = vcvt.s32.f32 %v3532_v22  ;;  %v3621_v43 = vadd.s32 %v3620_v25, %v3616_v5 }
 0x35d   :  { %v3450_v15 = vxor.u32 2147483648, %v9103_v1  ;;  %vm3676_vm9 = vcmp.gt.s32.totalorder %v3675_v12, 0  ;;  %vm11633_vm12 = vcmp.le.f32.partialorder %v3457_v40, 0.7853982  ;;  %v3544_v16 = vsel %vm3459_vm11, %v3543_v23, %v11582_v35 }
 0x35e   :  { %v3537_v24 = vand.u32 2147483647, %v3536_v7  ;;  %v3454_v41 = vsel %vm3452_vm6, %v3453_v45, %v9103_v1  ;;  %v3622_v29 = vadd.s32 536870912, %v3621_v43  ;;  %v3677_v3 = vsel %vm3676_vm9, %v3675_v12, 0 }
 0x35f   :  { %v3451_v54 = vsel %vm3449_vm7, %v9101_v27, %v3450_v15  ;;  %v3679_v58 = vand.u32 31, %v3677_v3  ;;  %v3673_v11 = vor.u32 8388608, %v3672_v49  ;;  %v3678_v20 = vshrl.u32 %v3677_v3, 5 }
 0x360   :  { %v3540_v4 = vmul.f32 %v3539_v52, %v3537_v24  ;;  %v11638_v21 = vshrl.u32 %v3622_v29, 30  ;;  %v3455_v56 = vsel %vm3448_vm8, %v3451_v54, %v3454_v41  ;;  %v3546_v50 = vsel %vm11633_vm12, 0, %v3544_v16 }
 0x361   :  { %v3680_v19 = vsub.s32 32, %v3679_v58  ;;  %v3682_v14 = vshll.u32 %v9337_v30, %v3679_v58  ;;  %v3685_v39 = vshll.u32 %v9338_v32, %v3679_v58  ;;  %v3688_v55 = vshll.u32 %v9339_v34, %v3679_v58 }
 0x362   :  { %v3541_v47 = vxor.u32 2147483648, %v3540_v4  ;;  %v3624_v57 = vshll.u32 %v11638_v21, 30  ;;  %v3691_v18 = vshll.u32 %v9340_v36, %v3679_v58  ;;  %v11655_v8 = vsel %vm3445_vm10, nan, %v3455_v56 }
 0x363   :  { %v3683_v33 = vshrl.u32 %v9338_v32, %v3680_v19  ;;  %v3686_v35 = vshrl.u32 %v9339_v34, %v3680_v19  ;;  %v3689_v26 = vshrl.u32 %v9340_v36, %v3680_v19  ;;  %v3681_v62 = vshrl.u32 %v9337_v30, %v3680_v19 }
 0x364   :  { %v3542_v63 = vsel %vm3459_vm11, %v3541_v47, %v3540_v4  ;;  %v11649_v59 = vsub.s32 %v3621_v43, %v3624_v57  ;;  %v3692_v51 = vshrl.u32 %v9341_v38, %v3680_v19  ;;  %v3694_v27 = vshll.u32 %v9341_v38, %v3679_v58 }
 0x365   :  { %v3545_v40 = vsel %vm11633_vm12, %v11478_v0, %v3542_v63  ;;  %v3684_v10 = vor.u32 %v3683_v33, %v3682_v14  ;;  %v3687_v61 = vor.u32 %v3686_v35, %v3685_v39  ;;  %v3690_v6 = vor.u32 %v3689_v26, %v3688_v55 }
 0x366   :  { %9104 = vcosq.f32 %v3545_v40  ;;  %v3627_v2 = vsub.s32 0, %v11649_v59  ;;  %v3695_v1 = vshrl.u32 %v9342_v46, %v3680_v19  ;;  %vm3697_vm13 = vcmp.lt.s32.totalorder %v3678_v20, 1 }
 0x367   :  { %9106 = vsinq.f32 %v3545_v40  ;;  %v3550_v44 = vadd.s32 3, %v3546_v50  ;;  %v3693_v48 = vor.u32 %v3692_v51, %v3691_v18  ;;  %v3713_v5 = vshll.u32 %v3673_v11, 8 }
 0x368   :  { %v8461_v22 = vmin.u32 %v3627_v2, %v11649_v59  ;;  %v3696_v37 = vor.u32 %v3695_v1, %v3694_v27  ;;  %vm3699_vm14 = vcmp.lt.s32.totalorder %v3678_v20, 3  ;;  %vm3700_vm15 = vcmp.lt.s32.totalorder %v3678_v20, 4 }
 0x369   :  { %v3772_v45 = vand.u32 2139095040, %v11655_v8  ;;  %vm3698_vm0 = vcmp.lt.s32.totalorder %v3678_v20, 2  ;;  %v3701_v15 = vsel %vm3697_vm13, %v3681_v62, %v3684_v10  ;;  %v3705_v7 = vsel %vm3697_vm13, %v3684_v10, %v3687_v61 }
 0x36a   :  { %v3629_v17 = vclz %v8461_v22  ;;  %v3702_v52 = vsel %vm3700_vm15, %v3690_v6, 2102212464  ;;  %v3706_v25 = vsel %vm3700_vm15, %v3693_v48, 920167782  ;;  %v3709_v12 = vsel %vm3697_vm13, %v3687_v61, %v3690_v6 }
 0x36b   :  { %v3710_v24 = vsel %vm3700_vm15, %v3696_v37, 1326507024  ;;  %v3703_v43 = vsel %vm3699_vm14, %v3687_v61, %v3702_v52  ;;  %v3707_v41 = vsel %vm3699_vm14, %v3690_v6, %v3706_v25  ;;  %v3617_v54 = vadd.s32 %v11617_v60, %v11615_v42 }
 0x36c   :  { %v8462_v23 = vadd.s32 4294967294, %v3629_v17  ;;  %v3711_v49 = vsel %vm3699_vm14, %v3693_v48, %v3710_v24  ;;  %v3708_v4 = vsel %vm3698_vm0, %v3705_v7, %v3707_v41  ;;  %v3773_v3 = vshrl.u32 %v3772_v45, 23 }
 0x36d   :  { %v3712_v29 = vsel %vm3698_vm0, %v3709_v12, %v3711_v49  ;;  %v3704_v58 = vsel %vm3698_vm0, %v3701_v15, %v3703_v43  ;;  %v11674_v56 = vmul.u32.u64.low %v3713_v5, %v3708_v4  ;;  %v11675_v11 = vmul.u32.u64.high %v3713_v5, %v3708_v4, %v11674_v56 }
 0x36e   :  { %vm8463_vm1 = vcmp.lt.s32.totalorder %v8462_v23, 0  ;;  %v11671_v31 = vmul.u32.u64.low %v3713_v5, %v3712_v29  ;;  %v11672_v47 = vmul.u32.u64.high %v3713_v5, %v3712_v29, %v11671_v31  ;;  %v8468_v19 = vadd.s32 4294967169, %v3773_v3 }
 0x36f   :  { %v3632_v16 = vsel %vm8463_vm1, 0, %v8462_v23  ;;  %v11678_v63 = vand.u32 3, %v3550_v44  ;;  %v3769_v39 = vand.u32 2147483647, %v11655_v8  ;;  %v3720_v55 = vmul.u32 %v3713_v5, %v3704_v58 }
 0x370   :  { %v3633_v42 = vsub.s32 32, %v3632_v16  ;;  %v3634_v60 = vshll.u32 %v11649_v59, %v3632_v16  ;;  %v3637_v57 = vsub.s32 4294967266, %v3632_v16  ;;  %v3779_v20 = vadd.s32 1, %v8468_v19 }
 0x371   :  { %vm3563_vm2 = vcmp.lt.s32.totalorder %v11551_v9, 0  ;;  %vm3722_vm3 = vc.u32 %v11672_v47, %v11674_v56  ;;  %v3723_v26 = vadd.s32 1, %v11675_v11  ;;  %vm3553_vm5 = vcmp.eq.s32.totalorder %v11678_v63, 0 }
 0x372   :  { %v3635_v33 = vshrl.u32 %v3617_v54, %v3633_v42  ;;  %v3638_v35 = vadd.s32 127, %v3637_v57  ;;  %vm3780_vm4 = vcmp.gt.s32.totalorder %v3779_v20, 0  ;;  %vm11689_vm6 = vcmp.le.f32.partialorder %v3561_v53, 0.7853982 }
 0x373   :  { %v9105_v14 = vpop.eup %9104  ;;  %v3781_v62 = vsel %vm3780_vm4, %v3779_v20, 0  ;;  %vm3552_vm7 = vcmp.lt.s32.totalorder %v11678_v63, 2  ;;  %vm3556_vm8 = vcmp.eq.s32.totalorder %v11678_v63, 2  ;;  %v3724_v2 = vsel %vm3722_vm3, %v3723_v26, %v11675_v11 }
 0x374   :  { %v9107_v40 = vpop.eup %9106  ;;  %v3636_v18 = vor.u32 %v3635_v33, %v3634_v60  ;;  %v3639_v50 = vshll.u32 %v3638_v35, 23  ;;  %v3776_v10 = vand.u32 8388607, %v3769_v39  ;;  %v3783_v61 = vand.u32 31, %v3781_v62 }
 0x375   :  { %v3647_v53 = vsub.s32 4, %v11638_v21  ;;  %v3725_v27 = vadd.s32 %v3724_v2, %v3720_v55  ;;  %v3554_v1 = vxor.u32 2147483648, %v9107_v40  ;;  %v3557_v44 = vxor.u32 2147483648, %v9105_v14 }
 0x376   :  { %v3640_v51 = vor.u32 4788187, %v3639_v50  ;;  %v3643_v6 = vcvt.s32.f32 %v3636_v18  ;;  %v3784_v22 = vsub.s32 32, %v3783_v61  ;;  %v3786_v48 = vshll.u32 %v9337_v30, %v3783_v61 }
 0x377   :  { %v3726_v37 = vadd.s32 536870912, %v3725_v27  ;;  %v3789_v45 = vshll.u32 %v9338_v32, %v3783_v61  ;;  %v3792_v17 = vshll.u32 %v9339_v34, %v3783_v61  ;;  %vm3549_vm9 = vweird.f32 %v11478_v0 }
 0x378   :  { %v3641_v5 = vand.u32 2147483647, %v3640_v51  ;;  %v3787_v15 = vshrl.u32 %v9338_v32, %v3784_v22  ;;  %v3790_v7 = vshrl.u32 %v9339_v34, %v3784_v22  ;;  %v3793_v52 = vshrl.u32 %v9340_v36, %v3784_v22 }
 0x379   :  { %v3795_v25 = vshll.u32 %v9340_v36, %v3783_v61  ;;  %v11707_v24 = vshrl.u32 %v3726_v37, 30  ;;  %v3782_v23 = vshrl.u32 %v3781_v62, 5  ;;  %v3796_v43 = vshrl.u32 %v9341_v38, %v3784_v22 }
 0x37a   :  { %v3644_v12 = vmul.f32 %v3643_v6, %v3641_v5  ;;  %v3558_v41 = vsel %vm3556_vm8, %v3557_v44, %v9107_v40  ;;  %v3777_v49 = vor.u32 8388608, %v3776_v10  ;;  %v3798_v54 = vshll.u32 %v9341_v38, %v3783_v61 }
 0x37b   :  { %v3799_v4 = vshrl.u32 %v9342_v46, %v3784_v22  ;;  %v3555_v29 = vsel %vm3553_vm5, %v9105_v14, %v3554_v1  ;;  %v3728_v58 = vshll.u32 %v11707_v24, 30  ;;  %v3785_v31 = vshrl.u32 %v9337_v30, %v3784_v22 }
 0x37c   :  { %v3645_v3 = vxor.u32 2147483648, %v3644_v12  ;;  %v3788_v16 = vor.u32 %v3787_v15, %v3786_v48  ;;  %v3791_v11 = vor.u32 %v3790_v7, %v3789_v45  ;;  %v3794_v19 = vor.u32 %v3793_v52, %v3792_v17 }
 0x37d   :  { %v3797_v42 = vor.u32 %v3796_v43, %v3795_v25  ;;  %v3729_v57 = vsub.s32 %v3725_v27, %v3728_v58  ;;  %vm3801_vm10 = vcmp.lt.s32.totalorder %v3782_v23, 1  ;;  %vm3804_vm11 = vcmp.lt.s32.totalorder %v3782_v23, 4 }
 0x37e   :  { %v3646_v60 = vsel %vm3563_vm2, %v3645_v3, %v3644_v12  ;;  %v3800_v14 = vor.u32 %v3799_v4, %v3798_v54  ;;  %vm3803_vm12 = vcmp.lt.s32.totalorder %v3782_v23, 3  ;;  %v3806_v40 = vsel %vm3804_vm11, %v3794_v19, 2102212464 }
 0x37f   :  { %v3649_v20 = vsel %vm11689_vm6, %v11551_v9, %v3646_v60  ;;  %v3559_v33 = vsel %vm3552_vm7, %v3555_v29, %v3558_v41  ;;  %v3648_v35 = vsel %vm3563_vm2, %v3647_v53, %v11638_v21  ;;  %v3731_v55 = vsub.s32 0, %v3729_v57 }
 0x380   :  { %vm3802_vm13 = vcmp.lt.s32.totalorder %v3782_v23, 2  ;;  %9108 = vcosq.f32 %v3649_v20  ;;  %v3805_v26 = vsel %vm3801_vm10, %v3785_v31, %v3788_v16  ;;  %v3809_v18 = vsel %vm3801_vm10, %v3788_v16, %v3791_v11 }
 0x381   :  { %v3810_v50 = vsel %vm3804_vm11, %v3797_v42, 920167782  ;;  %9110 = vsinq.f32 %v3649_v20  ;;  %v8465_v62 = vmin.u32 %v3731_v55, %v3729_v57  ;;  %v3807_v2 = vsel %vm3803_vm12, %v3791_v11, %v3806_v40 }
 0x382   :  { %v3811_v63 = vsel %vm3803_vm12, %v3794_v19, %v3810_v50  ;;  %v3813_v61 = vsel %vm3801_vm10, %v3791_v11, %v3794_v19  ;;  %v3814_v21 = vsel %vm3804_vm11, %v3800_v14, 1326507024  ;;  %v3817_v51 = vshll.u32 %v3777_v49, 8 }
 0x383   :  { %v3812_v10 = vsel %vm3802_vm13, %v3809_v18, %v3811_v63  ;;  %v11739_v6 = vsel %vm3549_vm9, nan, %v3559_v33  ;;  %v3733_v53 = vclz %v8465_v62  ;;  %v3815_v27 = vsel %vm3803_vm12, %v3797_v42, %v3814_v21 }
 0x384   :  { %v11742_v1 = vmul.u32.u64.low %v3817_v51, %v3812_v10  ;;  %v11743_v44 = vmul.u32.u64.high %v3817_v51, %v3812_v10, %v11742_v1  ;;  %v3650_v22 = vsel %vm11689_vm6, 0, %v3648_v35  ;;  %v3808_v5 = vsel %vm3802_vm13, %v3805_v26, %v3807_v2 }
 0x385   :  { %v8466_v48 = vadd.s32 4294967294, %v3733_v53  ;;  %v3816_v37 = vsel %vm3802_vm13, %v3813_v61, %v3815_v27  ;;  %v3751_v45 = vsub.s32 4, %v11707_v24  ;;  %v3876_v15 = vand.u32 2139095040, %v11739_v6 }
 0x386   :  { %v11751_v0 = vmul.u32.u64.low %v3817_v51, %v3816_v37  ;;  %v11752_v17 = vmul.u32.u64.high %v3817_v51, %v3816_v37, %v11751_v0  ;;  %vm3667_vm14 = vcmp.lt.s32.totalorder %v11606_v28, 0  ;;  %v3721_v7 = vadd.s32 %v11674_v56, %v11672_v47 }
 0x387   :  { %vm8467_vm15 = vcmp.lt.s32.totalorder %v8466_v48, 0  ;;  %v3824_v52 = vmul.u32 %v3817_v51, %v3808_v5  ;;  %v3827_v25 = vadd.s32 1, %v11743_v44  ;;  %v3877_v12 = vshrl.u32 %v3876_v15, 23 }
 0x388   :  { %v3736_v59 = vsel %vm8467_vm15, 0, %v8466_v48  ;;  %v3654_v23 = vadd.s32 3, %v3650_v22  ;;  %v3752_v54 = vsel %vm3667_vm14, %v3751_v45, %v11707_v24  ;;  %vm3826_vm0 = vc.u32 %v11752_v17, %v11742_v1 }
 0x389   :  { %v3737_v43 = vsub.s32 32, %v3736_v59  ;;  %v3738_v41 = vshll.u32 %v3729_v57, %v3736_v59  ;;  %v3741_v49 = vsub.s32 4294967266, %v3736_v59  ;;  %v8472_v4 = vadd.s32 4294967169, %v3877_v12 }
 0x38a   :  { %v3828_v56 = vsel %vm3826_vm0, %v3827_v25, %v11743_v44  ;;  %v3873_v3 = vand.u32 2147483647, %v11739_v6  ;;  %v3655_v11 = vand.u32 3, %v3654_v23  ;;  %vm11768_vm1 = vcmp.le.f32.partialorder %v3665_v13, 0.7853982 }
 0x38b   :  { %v3739_v29 = vshrl.u32 %v3721_v7, %v3737_v43  ;;  %v3742_v47 = vadd.s32 127, %v3741_v49  ;;  %v3829_v58 = vadd.s32 %v3828_v56, %v3824_v52  ;;  %v3883_v31 = vadd.s32 1, %v8472_v4 }
 0x38c   :  { %v3754_v57 = vsel %vm11768_vm1, 0, %v3752_v54  ;;  %v3880_v33 = vand.u32 8388607, %v3873_v3  ;;  %vm3656_vm3 = vcmp.lt.s32.totalorder %v3655_v11, 2  ;;  %vm3657_vm4 = vcmp.eq.s32.totalorder %v3655_v11, 0 }
 0x38d   :  { %v9109_v16 = vpop.eup %9108  ;;  %v3740_v24 = vor.u32 %v3739_v29, %v3738_v41  ;;  %v3743_v42 = vshll.u32 %v3742_v47, 23  ;;  %v3830_v20 = vadd.s32 536870912, %v3829_v58  ;;  %vm3884_vm2 = vcmp.gt.s32.totalorder %v3883_v31, 0 }
 0x38e   :  { %v9111_v60 = vpop.eup %9110  ;;  %v3885_v35 = vsel %vm3884_vm2, %v3883_v31, 0  ;;  %v3661_v55 = vxor.u32 2147483648, %v9109_v16  ;;  %vm3660_vm5 = vcmp.eq.s32.totalorder %v3655_v11, 2  ;;  %v11778_v62 = vadd.s32 3, %v3754_v57 }
 0x38f   :  { %v3744_v14 = vor.u32 4788187, %v3743_v42  ;;  %v3747_v40 = vcvt.s32.f32 %v3740_v24  ;;  %v11776_v26 = vshrl.u32 %v3830_v20, 30  ;;  %v3887_v13 = vand.u32 31, %v3885_v35 }
 0x390   :  { %v3658_v50 = vxor.u32 2147483648, %v9111_v60  ;;  %v3881_v61 = vor.u32 8388608, %v3880_v33  ;;  %vm3653_vm6 = vweird.f32 %v11551_v9  ;;  %v3662_v53 = vsel %vm3660_vm5, %v3661_v55, %v9111_v60 }
 0x391   :  { %v3745_v18 = vand.u32 2147483647, %v3744_v14  ;;  %v3832_v2 = vshll.u32 %v11776_v26, 30  ;;  %v3888_v63 = vsub.s32 32, %v3887_v13  ;;  %v3890_v21 = vshll.u32 %v9337_v30, %v3887_v13 }
 0x392   :  { %v3893_v51 = vshll.u32 %v9338_v32, %v3887_v13  ;;  %v3896_v22 = vshll.u32 %v9339_v34, %v3887_v13  ;;  %v3886_v5 = vshrl.u32 %v3885_v35, 5  ;;  %v3659_v0 = vsel %vm3657_vm4, %v9109_v16, %v3658_v50 }
 0x393   :  { %v3748_v10 = vmul.f32 %v3747_v40, %v3745_v18  ;;  %v3833_v27 = vsub.s32 %v3829_v58, %v3832_v2  ;;  %v3891_v44 = vshrl.u32 %v9338_v32, %v3888_v63  ;;  %v3894_v37 = vshrl.u32 %v9339_v34, %v3888_v63 }
 0x394   :  { %v3897_v45 = vshrl.u32 %v9340_v36, %v3888_v63  ;;  %v3889_v7 = vshrl.u32 %v9337_v30, %v3888_v63  ;;  %v3899_v59 = vshll.u32 %v9340_v36, %v3887_v13  ;;  %v3900_v23 = vshrl.u32 %v9341_v38, %v3888_v63 }
 0x395   :  { %v3749_v48 = vxor.u32 2147483648, %v3748_v10  ;;  %v3835_v15 = vsub.s32 0, %v3833_v27  ;;  %v3892_v25 = vor.u32 %v3891_v44, %v3890_v21  ;;  %v3895_v12 = vor.u32 %v3894_v37, %v3893_v51 }
 0x396   :  { %v3898_v49 = vor.u32 %v3897_v45, %v3896_v22  ;;  %v3902_v54 = vshll.u32 %v9341_v38, %v3887_v13  ;;  %v3901_v4 = vor.u32 %v3900_v23, %v3899_v59  ;;  %v3903_v29 = vshrl.u32 %v9342_v46, %v3888_v63 }
 0x397   :  { %v3750_v52 = vsel %vm3667_vm14, %v3749_v48, %v3748_v10  ;;  %v8469_v41 = vmin.u32 %v3835_v15, %v3833_v27  ;;  %vm3905_vm7 = vcmp.lt.s32.totalorder %v3886_v5, 1  ;;  %v3825_v47 = vadd.s32 %v11742_v1, %v11752_v17 }
 0x398   :  { %v3753_v43 = vsel %vm11768_vm1, %v11606_v28, %v3750_v52  ;;  %v3921_v58 = vshll.u32 %v3881_v61, 8  ;;  %v3663_v31 = vsel %vm3656_vm3, %v3659_v0, %v3662_v53  ;;  %v3904_v16 = vor.u32 %v3903_v29, %v3902_v54 }
 0x399   :  { %9112 = vcosq.f32 %v3753_v43  ;;  %v3837_v56 = vclz %v8469_v41  ;;  %vm3906_vm8 = vcmp.lt.s32.totalorder %v3886_v5, 2  ;;  %vm3907_vm9 = vcmp.lt.s32.totalorder %v3886_v5, 3 }
 0x39a   :  { %9114 = vsinq.f32 %v3753_v43  ;;  %vm3908_vm10 = vcmp.lt.s32.totalorder %v3886_v5, 4  ;;  %v3909_v24 = vsel %vm3905_vm7, %v3889_v7, %v3892_v25  ;;  %v3913_v42 = vsel %vm3905_vm7, %v3892_v25, %v3895_v12 }
 0x39b   :  { %v8470_v19 = vadd.s32 4294967294, %v3837_v56  ;;  %v3910_v60 = vsel %vm3908_vm10, %v3898_v49, 2102212464  ;;  %v3914_v57 = vsel %vm3908_vm10, %v3901_v4, 920167782  ;;  %v3917_v20 = vsel %vm3905_vm7, %v3895_v12, %v3898_v49 }
 0x39c   :  { %v3918_v14 = vsel %vm3908_vm10, %v3904_v16, 1326507024  ;;  %v3911_v40 = vsel %vm3907_vm9, %v3895_v12, %v3910_v60  ;;  %v3915_v33 = vsel %vm3907_vm9, %v3898_v49, %v3914_v57  ;;  %v11804_v1 = vsel %vm3653_vm6, nan, %v3663_v31 }
 0x39d   :  { %vm8471_vm11 = vcmp.lt.s32.totalorder %v8470_v19, 0  ;;  %v3919_v35 = vsel %vm3907_vm9, %v3901_v4, %v3918_v14  ;;  %v3916_v11 = vsel %vm3906_vm8, %v3913_v42, %v3915_v33  ;;  %v3912_v2 = vsel %vm3906_vm8, %v3909_v24, %v3911_v40 }
 0x39e   :  { %v3840_v17 = vsel %vm8471_vm11, 0, %v8470_v19  ;;  %v3920_v55 = vsel %vm3906_vm8, %v3917_v20, %v3919_v35  ;;  %v11812_v61 = vmul.u32.u64.low %v3921_v58, %v3916_v11  ;;  %v11813_v21 = vmul.u32.u64.high %v3921_v58, %v3916_v11, %v11812_v61 }
 0x39f   :  { %v3841_v13 = vsub.s32 32, %v3840_v17  ;;  %v3842_v18 = vshll.u32 %v3833_v27, %v3840_v17  ;;  %v3845_v50 = vsub.s32 4294967266, %v3840_v17  ;;  %v3980_v53 = vand.u32 2139095040, %v11804_v1 }
 0x3a0   :  { %v11809_v63 = vmul.u32.u64.low %v3921_v58, %v3920_v55  ;;  %v11810_v10 = vmul.u32.u64.high %v3921_v58, %v3920_v55, %v11809_v63  ;;  %v3759_v44 = vand.u32 3, %v11778_v62  ;;  %v3928_v37 = vmul.u32 %v3921_v58, %v3912_v2 }
 0x3a1   :  { %v3843_v9 = vshrl.u32 %v3825_v47, %v3841_v13  ;;  %v3846_v51 = vadd.s32 127, %v3845_v50  ;;  %v3931_v27 = vadd.s32 1, %v11813_v21  ;;  %v3981_v5 = vshrl.u32 %v3980_v53, 23 }
 0x3a2   :  { %vm3930_vm12 = vc.u32 %v11810_v10, %v11812_v61  ;;  %v3855_v7 = vsub.s32 4, %v11776_v26  ;;  %v3977_v62 = vand.u32 2147483647, %v11804_v1  ;;  %vm3764_vm13 = vcmp.eq.s32.totalorder %v3759_v44, 2 }
 0x3a3   :  { %v3844_v22 = vor.u32 %v3843_v9, %v3842_v18  ;;  %v3847_v48 = vshll.u32 %v3846_v51, 23  ;;  %v3932_v25 = vsel %vm3930_vm12, %v3931_v27, %v11813_v21  ;;  %v8476_v12 = vadd.s32 4294967169, %v3981_v5 }
 0x3a4   :  { %v3933_v41 = vadd.s32 %v3932_v25, %v3928_v37  ;;  %vm3761_vm14 = vcmp.eq.s32.totalorder %v3759_v44, 0  ;;  %vm3771_vm15 = vcmp.lt.s32.totalorder %v11655_v8, 0  ;;  %vm3760_vm0 = vcmp.lt.s32.totalorder %v3759_v44, 2 }
 0x3a5   :  { %v3848_v0 = vor.u32 4788187, %v3847_v48  ;;  %v3851_v15 = vcvt.s32.f32 %v3844_v22  ;;  %v3987_v49 = vadd.s32 1, %v8476_v12  ;;  %vm11827_vm1 = vcmp.le.f32.partialorder %v3769_v39, 0.7853982 }
 0x3a6   :  { %v9113_v45 = vpop.eup %9112  ;;  %v3934_v29 = vadd.s32 536870912, %v3933_v41  ;;  %v3856_v56 = vsel %vm3771_vm15, %v3855_v7, %v11776_v26  ;;  %v3984_v58 = vand.u32 8388607, %v3977_v62  ;;  %vm3757_vm3 = vweird.f32 %v11606_v28 }
 0x3a7   :  { %v9115_v59 = vpop.eup %9114  ;;  %v3765_v52 = vxor.u32 2147483648, %v9113_v45  ;;  %v3849_v43 = vand.u32 2147483647, %v3848_v0  ;;  %vm3988_vm2 = vcmp.gt.s32.totalorder %v3987_v49, 0  ;;  %v3858_v60 = vsel %vm11827_vm1, 0, %v3856_v56 }
 0x3a8   :  { %v3762_v23 = vxor.u32 2147483648, %v9115_v59  ;;  %v11836_v19 = vshrl.u32 %v3934_v29, 30  ;;  %v3989_v24 = vsel %vm3988_vm2, %v3987_v49, 0  ;;  %v3985_v14 = vor.u32 8388608, %v3984_v58 }
 0x3a9   :  { %v3852_v4 = vmul.f32 %v3851_v15, %v3849_v43  ;;  %v3766_v47 = vsel %vm3764_vm13, %v3765_v52, %v9115_v59  ;;  %v3991_v39 = vand.u32 31, %v3989_v24  ;;  %v3990_v11 = vshrl.u32 %v3989_v24, 5 }
 0x3aa   :  { %v3763_v31 = vsel %vm3761_vm14, %v9113_v45, %v3762_v23  ;;  %v3936_v26 = vshll.u32 %v11836_v19, 30  ;;  %v3862_v44 = vadd.s32 3, %v3858_v60  ;;  %v4025_v0 = vshll.u32 %v3985_v14, 8 }
 0x3ab   :  { %v3853_v16 = vxor.u32 2147483648, %v3852_v4  ;;  %v3767_v57 = vsel %vm3760_vm0, %v3763_v31, %v3766_v47  ;;  %v3992_v40 = vsub.s32 32, %v3991_v39  ;;  %v3994_v35 = vshll.u32 %v9337_v30, %v3991_v39 }
 0x3ac   :  { %v11848_v33 = vsub.s32 %v3933_v41, %v3936_v26  ;;  %v3997_v17 = vshll.u32 %v9338_v32, %v3991_v39  ;;  %v4000_v13 = vshll.u32 %v9339_v34, %v3991_v39  ;;  %v11856_v18 = vsel %vm3757_vm3, nan, %v3767_v57 }
 0x3ad   :  { %v3854_v42 = vsel %vm3771_vm15, %v3853_v16, %v3852_v4  ;;  %v3995_v55 = vshrl.u32 %v9338_v32, %v3992_v40  ;;  %v3998_v2 = vshrl.u32 %v9339_v34, %v3992_v40  ;;  %v4001_v63 = vshrl.u32 %v9340_v36, %v3992_v40 }
 0x3ae   :  { %v3857_v20 = vsel %vm11827_vm1, %v11655_v8, %v3854_v42  ;;  %v3939_v50 = vsub.s32 0, %v11848_v33  ;;  %v3993_v21 = vshrl.u32 %v9337_v30, %v3992_v40  ;;  %v4003_v9 = vshll.u32 %v9340_v36, %v3991_v39 }
 0x3af   :  { %9116 = vcosq.f32 %v3857_v20  ;;  %v4004_v51 = vshrl.u32 %v9341_v38, %v3992_v40  ;;  %v4006_v53 = vshll.u32 %v9341_v38, %v3991_v39  ;;  %v3996_v28 = vor.u32 %v3995_v55, %v3994_v35 }
 0x3b0   :  { %9118 = vsinq.f32 %v3857_v20  ;;  %v8473_v22 = vmin.u32 %v3939_v50, %v11848_v33  ;;  %v3999_v48 = vor.u32 %v3998_v2, %v3997_v17  ;;  %v4002_v37 = vor.u32 %v4001_v63, %v4000_v13 }
 0x3b1   :  { %v4005_v27 = vor.u32 %v4004_v51, %v4003_v9  ;;  %v4007_v5 = vshrl.u32 %v9342_v46, %v3992_v40  ;;  %vm4009_vm4 = vcmp.lt.s32.totalorder %v3990_v11, 1  ;;  %vm4010_vm5 = vcmp.lt.s32.totalorder %v3990_v11, 2 }
 0x3b2   :  { %v3941_v45 = vclz %v8473_v22  ;;  %v4084_v15 = vand.u32 2139095040, %v11856_v18  ;;  %vm4011_vm6 = vcmp.lt.s32.totalorder %v3990_v11, 3  ;;  %vm4012_vm7 = vcmp.lt.s32.totalorder %v3990_v11, 4 }
 0x3b3   :  { %v4008_v7 = vor.u32 %v4007_v5, %v4006_v53  ;;  %v4013_v59 = vsel %vm4009_vm4, %v3993_v21, %v3996_v28  ;;  %v4014_v25 = vsel %vm4012_vm7, %v4002_v37, 2102212464  ;;  %v4017_v12 = vsel %vm4009_vm4, %v3996_v28, %v3999_v48 }
 0x3b4   :  { %v8474_v52 = vadd.s32 4294967294, %v3941_v45  ;;  %v4018_v23 = vsel %vm4012_vm7, %v4005_v27, 920167782  ;;  %v4015_v43 = vsel %vm4011_vm6, %v3999_v48, %v4014_v25  ;;  %v4021_v49 = vsel %vm4009_vm4, %v3999_v48, %v4002_v37 }
 0x3b5   :  { %v4019_v41 = vsel %vm4011_vm6, %v4002_v37, %v4018_v23  ;;  %v4022_v54 = vsel %vm4012_vm7, %v4008_v7, 1326507024  ;;  %v3929_v4 = vadd.s32 %v11812_v61, %v11810_v10  ;;  %v4016_v60 = vsel %vm4010_vm5, %v4013_v59, %v4015_v43 }
 0x3b6   :  { %vm8475_vm8 = vcmp.lt.s32.totalorder %v8474_v52, 0  ;;  %v4020_v29 = vsel %vm4010_vm5, %v4017_v12, %v4019_v41  ;;  %v4023_v47 = vsel %vm4011_vm6, %v4005_v27, %v4022_v54  ;;  %v3863_v57 = vand.u32 3, %v3862_v44 }
 0x3b7   :  { %v3944_v56 = vsel %vm8475_vm8, 0, %v8474_v52  ;;  %v4024_v58 = vsel %vm4010_vm5, %v4021_v49, %v4023_v47  ;;  %v11872_v31 = vmul.u32.u64.low %v4025_v0, %v4020_v29  ;;  %v11873_v16 = vmul.u32.u64.high %v4025_v0, %v4020_v29, %v11872_v31 }
 0x3b8   :  { %v3945_v24 = vsub.s32 32, %v3944_v56  ;;  %v3946_v39 = vshll.u32 %v11848_v33, %v3944_v56  ;;  %v3949_v42 = vsub.s32 4294967266, %v3944_v56  ;;  %v4085_v20 = vshrl.u32 %v4084_v15, 23 }
 0x3b9   :  { %v11878_v10 = vmul.u32.u64.low %v4025_v0, %v4024_v58  ;;  %v11879_v61 = vmul.u32.u64.high %v4025_v0, %v4024_v58, %v11878_v10  ;;  %vm3875_vm9 = vcmp.lt.s32.totalorder %v11739_v6, 0  ;;  %v4081_v17 = vand.u32 2147483647, %v11856_v18 }
 0x3ba   :  { %v3947_v40 = vshrl.u32 %v3929_v4, %v3945_v24  ;;  %v3950_v35 = vadd.s32 127, %v3949_v42  ;;  %v3959_v55 = vsub.s32 4, %v11836_v19  ;;  %v4032_v13 = vmul.u32 %v4025_v0, %v4016_v60 }
 0x3bb   :  { %v4035_v33 = vadd.s32 1, %v11873_v16  ;;  %v8480_v11 = vadd.s32 4294967169, %v4085_v20  ;;  %vm3865_vm10 = vcmp.eq.s32.totalorder %v3863_v57, 0  ;;  %vm3868_vm11 = vcmp.eq.s32.totalorder %v3863_v57, 2 }
 0x3bc   :  { %v9117_v26 = vpop.eup %9116  ;;  %v3948_v63 = vor.u32 %v3947_v40, %v3946_v39  ;;  %v3951_v21 = vshll.u32 %v3950_v35, 23  ;;  %vm4034_vm12 = vc.u32 %v11879_v61, %v11872_v31  ;;  %vm3864_vm13 = vcmp.lt.s32.totalorder %v3863_v57, 2 }
 0x3bd   :  { %v9119_v14 = vpop.eup %9118  ;;  %v3869_v2 = vxor.u32 2147483648, %v9117_v26  ;;  %v4091_v9 = vadd.s32 1, %v8480_v11  ;;  %v4036_v44 = vsel %vm4034_vm12, %v4035_v33, %v11873_v16  ;;  %v3960_v22 = vsel %vm3875_vm9, %v3959_v55, %v11836_v19 }
 0x3be   :  { %v3866_v50 = vxor.u32 2147483648, %v9119_v14  ;;  %v3952_v51 = vor.u32 4788187, %v3951_v21  ;;  %v3955_v53 = vcvt.s32.f32 %v3948_v63  ;;  %v4037_v28 = vadd.s32 %v4036_v44, %v4032_v13 }
 0x3bf   :  { %v4088_v48 = vand.u32 8388607, %v4081_v17  ;;  %vm4092_vm14 = vcmp.gt.s32.totalorder %v4091_v9, 0  ;;  %v3870_v27 = vsel %vm3868_vm11, %v3869_v2, %v9119_v14  ;;  %vm11895_vm15 = vcmp.le.f32.partialorder %v3873_v3, 0.7853982 }
 0x3c0   :  { %v3867_v37 = vsel %vm3865_vm10, %v9117_v26, %v3866_v50  ;;  %v3953_v5 = vand.u32 2147483647, %v3952_v51  ;;  %v4093_v45 = vsel %vm4092_vm14, %v4091_v9, 0  ;;  %v4038_v15 = vadd.s32 536870912, %v4037_v28 }
 0x3c1   :  { %v4095_v7 = vand.u32 31, %v4093_v45  ;;  %vm3861_vm0 = vweird.f32 %v11655_v8  ;;  %v3962_v59 = vsel %vm11895_vm15, 0, %v3960_v22  ;;  %v3871_v52 = vsel %vm3864_vm13, %v3867_v37, %v3870_v27 }
 0x3c2   :  { %v3956_v19 = vmul.f32 %v3955_v53, %v3953_v5  ;;  %v11903_v25 = vshrl.u32 %v4038_v15, 30  ;;  %v4089_v12 = vor.u32 8388608, %v4088_v48  ;;  %v4094_v41 = vshrl.u32 %v4093_v45, 5 }
 0x3c3   :  { %v4096_v23 = vsub.s32 32, %v4095_v7  ;;  %v4098_v3 = vshll.u32 %v9337_v30, %v4095_v7  ;;  %v4101_v49 = vshll.u32 %v9338_v32, %v4095_v7  ;;  %v4104_v29 = vshll.u32 %v9339_v34, %v4095_v7 }
 0x3c4   :  { %v3957_v43 = vxor.u32 2147483648, %v3956_v19  ;;  %v4040_v54 = vshll.u32 %v11903_v25, 30  ;;  %v4107_v47 = vshll.u32 %v9340_v36, %v4095_v7  ;;  %v11918_v39 = vsel %vm3861_vm0, nan, %v3871_v52 }
 0x3c5   :  { %v4099_v4 = vshrl.u32 %v9338_v32, %v4096_v23  ;;  %v4102_v58 = vshrl.u32 %v9339_v34, %v4096_v23  ;;  %v4105_v16 = vshrl.u32 %v9340_v36, %v4096_v23  ;;  %v4108_v24 = vshrl.u32 %v9341_v38, %v4096_v23 }
 0x3c6   :  { %v3958_v56 = vsel %vm3875_vm9, %v3957_v43, %v3956_v19  ;;  %v4041_v60 = vsub.s32 %v4037_v28, %v4040_v54  ;;  %v4097_v26 = vshrl.u32 %v9337_v30, %v4096_v23  ;;  %v4110_v20 = vshll.u32 %v9341_v38, %v4095_v7 }
 0x3c7   :  { %v3961_v42 = vsel %vm11895_vm15, %v11739_v6, %v3958_v56  ;;  %v4100_v57 = vor.u32 %v4099_v4, %v4098_v3  ;;  %v4103_v10 = vor.u32 %v4102_v58, %v4101_v49  ;;  %v4109_v40 = vor.u32 %v4108_v24, %v4107_v47 }
 0x3c8   :  { %9120 = vcosq.f32 %v3961_v42  ;;  %v4043_v14 = vsub.s32 0, %v4041_v60  ;;  %v4129_v35 = vshll.u32 %v4089_v12, 8  ;;  %v4106_v55 = vor.u32 %v4105_v16, %v4104_v29 }
 0x3c9   :  { %9122 = vsinq.f32 %v3961_v42  ;;  %v4111_v8 = vshrl.u32 %v9342_v46, %v4096_v23  ;;  %vm4113_vm1 = vcmp.lt.s32.totalorder %v4094_v41, 1  ;;  %vm4114_vm2 = vcmp.lt.s32.totalorder %v4094_v41, 2 }
 0x3ca   :  { %v8477_v13 = vmin.u32 %v4043_v14, %v4041_v60  ;;  %vm4115_vm3 = vcmp.lt.s32.totalorder %v4094_v41, 3  ;;  %vm4116_vm4 = vcmp.lt.s32.totalorder %v4094_v41, 4  ;;  %v4117_v33 = vsel %vm4113_vm1, %v4097_v26, %v4100_v57 }
 0x3cb   :  { %v4112_v11 = vor.u32 %v4111_v8, %v4110_v20  ;;  %v4118_v50 = vsel %vm4116_vm4, %v4106_v55, 2102212464  ;;  %v4121_v2 = vsel %vm4113_vm1, %v4100_v57, %v4103_v10  ;;  %v4122_v63 = vsel %vm4116_vm4, %v4109_v40, 920167782 }
 0x3cc   :  { %v3966_v21 = vadd.s32 3, %v3962_v59  ;;  %v4045_v9 = vclz %v8477_v13  ;;  %v4188_v51 = vand.u32 2139095040, %v11918_v39  ;;  %v4119_v53 = vsel %vm4115_vm3, %v4103_v10, %v4118_v50 }
 0x3cd   :  { %v4123_v44 = vsel %vm4115_vm3, %v4106_v55, %v4122_v63  ;;  %v4125_v22 = vsel %vm4113_vm1, %v4103_v10, %v4106_v55  ;;  %v4126_v28 = vsel %vm4116_vm4, %v4112_v11, 1326507024  ;;  %v4120_v37 = vsel %vm4114_vm2, %v4117_v33, %v4119_v53 }
 0x3ce   :  { %v8478_v48 = vadd.s32 4294967294, %v4045_v9  ;;  %v4124_v27 = vsel %vm4114_vm2, %v4121_v2, %v4123_v44  ;;  %v4127_v5 = vsel %vm4115_vm3, %v4109_v40, %v4126_v28  ;;  %v4033_v45 = vadd.s32 %v11872_v31, %v11879_v61 }
 0x3cf   :  { %v4128_v0 = vsel %vm4114_vm2, %v4125_v22, %v4127_v5  ;;  %v11935_v15 = vmul.u32.u64.low %v4129_v35, %v4124_v27  ;;  %v11936_v7 = vmul.u32.u64.high %v4129_v35, %v4124_v27, %v11935_v15  ;;  %v4189_v52 = vshrl.u32 %v4188_v51, 23 }
 0x3d0   :  { %vm8479_vm5 = vcmp.lt.s32.totalorder %v8478_v48, 0  ;;  %v11939_v19 = vmul.u32.u64.low %v4129_v35, %v4128_v0  ;;  %v11940_v59 = vmul.u32.u64.high %v4129_v35, %v4128_v0, %v11939_v19  ;;  %v4136_v23 = vmul.u32 %v4129_v35, %v4120_v37 }
 0x3d1   :  { %v4048_v12 = vsel %vm8479_vm5, 0, %v8478_v48  ;;  %v4185_v43 = vand.u32 2147483647, %v11918_v39  ;;  %v8484_v4 = vadd.s32 4294967169, %v4189_v52  ;;  %v3967_v31 = vand.u32 3, %v3966_v21 }
 0x3d2   :  { %v4049_v3 = vsub.s32 32, %v4048_v12  ;;  %v4050_v49 = vshll.u32 %v4041_v60, %v4048_v12  ;;  %v4053_v54 = vsub.s32 4294967266, %v4048_v12  ;;  %v4139_v61 = vadd.s32 1, %v11936_v7 }
 0x3d3   :  { %vm4138_vm6 = vc.u32 %v11940_v59, %v11935_v15  ;;  %v4192_v24 = vand.u32 8388607, %v4185_v43  ;;  %v4195_v42 = vadd.s32 1, %v8484_v4  ;;  %vm3969_vm7 = vcmp.eq.s32.totalorder %v3967_v31, 0 }
 0x3d4   :  { %v4051_v29 = vshrl.u32 %v4033_v45, %v4049_v3  ;;  %v4054_v47 = vadd.s32 127, %v4053_v54  ;;  %v4140_v16 = vsel %vm4138_vm6, %v4139_v61, %v11936_v7  ;;  %vm3972_vm8 = vcmp.eq.s32.totalorder %v3967_v31, 2 }
 0x3d5   :  { %v9121_v41 = vpop.eup %9120  ;;  %v4141_v10 = vadd.s32 %v4140_v16, %v4136_v23  ;;  %vm4196_vm9 = vcmp.gt.s32.totalorder %v4195_v42, 0  ;;  %v4063_v40 = vsub.s32 4, %v11903_v25  ;;  %vm3968_vm10 = vcmp.lt.s32.totalorder %v3967_v31, 2 }
 0x3d6   :  { %v9123_v56 = vpop.eup %9122  ;;  %v3973_v58 = vxor.u32 2147483648, %v9121_v41  ;;  %v4052_v26 = vor.u32 %v4051_v29, %v4050_v49  ;;  %v4055_v57 = vshll.u32 %v4054_v47, 23  ;;  %v4193_v55 = vor.u32 8388608, %v4192_v24 }
 0x3d7   :  { %v3970_v60 = vxor.u32 2147483648, %v9123_v56  ;;  %v4142_v35 = vadd.s32 536870912, %v4141_v10  ;;  %v4197_v8 = vsel %vm4196_vm9, %v4195_v42, 0  ;;  %vm3965_vm11 = vweird.f32 %v11739_v6 }
 0x3d8   :  { %v4056_v20 = vor.u32 4788187, %v4055_v57  ;;  %v4059_v14 = vcvt.s32.f32 %v4052_v26  ;;  %v3974_v33 = vsel %vm3972_vm8, %v3973_v58, %v9123_v56  ;;  %vm3979_vm12 = vcmp.lt.s32.totalorder %v11804_v1, 0 }
 0x3d9   :  { %v3971_v13 = vsel %vm3969_vm7, %v9121_v41, %v3970_v60  ;;  %v11950_v50 = vshrl.u32 %v4142_v35, 30  ;;  %v4199_v2 = vand.u32 31, %v4197_v8  ;;  %vm11956_vm13 = vcmp.le.f32.partialorder %v3977_v62, 0.7853982 }
 0x3da   :  { %v4057_v11 = vand.u32 2147483647, %v4056_v20  ;;  %v11963_v9 = vsel %vm3979_vm12, %v4063_v40, %v11903_v25  ;;  %v3975_v53 = vsel %vm3968_vm10, %v3971_v13, %v3974_v33  ;;  %v4198_v44 = vshrl.u32 %v4197_v8, 5 }
 0x3db   :  { %v4144_v51 = vshll.u32 %v11950_v50, 30  ;;  %v4200_v22 = vsub.s32 32, %v4199_v2  ;;  %v11966_v28 = vshll.u32 %v4193_v55, 8  ;;  %v4202_v62 = vshll.u32 %v9337_v30, %v4199_v2 }
 0x3dc   :  { %v4060_v21 = vmul.f32 %v4059_v14, %v4057_v11  ;;  %v4205_v27 = vshll.u32 %v9338_v32, %v4199_v2  ;;  %v4208_v25 = vshll.u32 %v9339_v34, %v4199_v2  ;;  %v4211_v0 = vshll.u32 %v9340_v36, %v4199_v2 }
 0x3dd   :  { %v11968_v37 = vsub.s32 %v4141_v10, %v4144_v51  ;;  %v4203_v5 = vshrl.u32 %v9338_v32, %v4200_v22  ;;  %v4206_v45 = vshrl.u32 %v9339_v34, %v4200_v22  ;;  %v11978_v7 = vsel %vm3965_vm11, nan, %v3975_v53 }
 0x3de   :  { %v4061_v48 = vxor.u32 2147483648, %v4060_v21  ;;  %v4209_v12 = vshrl.u32 %v9340_v36, %v4200_v22  ;;  %v4201_v3 = vshrl.u32 %v9337_v30, %v4200_v22  ;;  %v4212_v49 = vshrl.u32 %v9341_v38, %v4200_v22 }
 0x3df   :  { %v4147_v52 = vsub.s32 0, %v11968_v37  ;;  %vm4217_vm14 = vcmp.lt.s32.totalorder %v4198_v44, 1  ;;  %v4204_v54 = vor.u32 %v4203_v5, %v4202_v62  ;;  %v4207_v4 = vor.u32 %v4206_v45, %v4205_v27 }
 0x3e0   :  { %v4062_v19 = vsel %vm3979_vm12, %v4061_v48, %v4060_v21  ;;  %vm4083_vm15 = vcmp.lt.s32.totalorder %v11856_v18, 0  ;;  %v4210_v31 = vor.u32 %v4209_v12, %v4208_v25  ;;  %v4213_v61 = vor.u32 %v4212_v49, %v4211_v0 }
 0x3e1   :  { %v4065_v23 = vsel %vm11956_vm13, %v11804_v1, %v4062_v19  ;;  %v8481_v6 = vmin.u32 %v4147_v52, %v11968_v37  ;;  %v4214_v41 = vshll.u32 %v9341_v38, %v4199_v2  ;;  %v4215_v29 = vshrl.u32 %v9342_v46, %v4200_v22 }
 0x3e2   :  { %9124 = vcosq.f32 %v4065_v23  ;;  %v4137_v47 = vadd.s32 %v11935_v15, %v11940_v59  ;;  %v4291_v58 = vand.u32 2139095040, %v11978_v7  ;;  %vm4218_vm0 = vcmp.lt.s32.totalorder %v4198_v44, 2 }
 0x3e3   :  { %9126 = vsinq.f32 %v4065_v23  ;;  %v4149_v56 = vclz %v8481_v6  ;;  %v4216_v16 = vor.u32 %v4215_v29, %v4214_v41  ;;  %vm4219_vm1 = vcmp.lt.s32.totalorder %v4198_v44, 3 }
 0x3e4   :  { %vm4220_vm2 = vcmp.lt.s32.totalorder %v4198_v44, 4  ;;  %v4221_v42 = vsel %vm4217_vm14, %v4201_v3, %v4204_v54  ;;  %v4225_v26 = vsel %vm4217_vm14, %v4204_v54, %v4207_v4  ;;  %v4229_v20 = vsel %vm4217_vm14, %v4207_v4, %v4210_v31 }
 0x3e5   :  { %v8482_v24 = vadd.s32 4294967294, %v4149_v56  ;;  %v4222_v60 = vsel %vm4220_vm2, %v4210_v31, 2102212464  ;;  %v4226_v10 = vsel %vm4220_vm2, %v4213_v61, 920167782  ;;  %v4167_v15 = vsub.s32 4, %v11950_v50 }
 0x3e6   :  { %v4223_v57 = vsel %vm4219_vm1, %v4207_v4, %v4222_v60  ;;  %v4230_v14 = vsel %vm4220_vm2, %v4216_v16, 1326507024  ;;  %v4227_v59 = vsel %vm4219_vm1, %v4210_v31, %v4226_v10  ;;  %v4066_v35 = vsel %vm11956_vm13, 0, %v11963_v9 }
 0x3e7   :  { %vm8483_vm3 = vcmp.lt.s32.totalorder %v8482_v24, 0  ;;  %v4231_v40 = vsel %vm4219_vm1, %v4213_v61, %v4230_v14  ;;  %v4228_v8 = vsel %vm4218_vm0, %v4225_v26, %v4227_v59  ;;  %v4224_v21 = vsel %vm4218_vm0, %v4221_v42, %v4223_v57 }
 0x3e8   :  { %v4152_v55 = vsel %vm8483_vm3, 0, %v8482_v24  ;;  %v4232_v13 = vsel %vm4218_vm0, %v4229_v20, %v4231_v40  ;;  %v12012_v22 = vmul.u32.u64.low %v11966_v28, %v4228_v8  ;;  %v12013_v48 = vmul.u32.u64.high %v11966_v28, %v4228_v8, %v12012_v22 }
 0x3e9   :  { %v4153_v33 = vsub.s32 32, %v4152_v55  ;;  %v4154_v11 = vshll.u32 %v11968_v37, %v4152_v55  ;;  %v4157_v2 = vsub.s32 4294967266, %v4152_v55  ;;  %v4168_v62 = vsel %vm4083_vm15, %v4167_v15, %v11950_v50 }
 0x3ea   :  { %v12008_v51 = vmul.u32.u64.low %v11966_v28, %v4232_v13  ;;  %v12009_v53 = vmul.u32.u64.high %v11966_v28, %v4232_v13, %v12008_v51  ;;  %v4292_v27 = vshrl.u32 %v4291_v58, 23  ;;  %v4070_v37 = vadd.s32 3, %v4066_v35 }
 0x3eb   :  { %v4155_v63 = vshrl.u32 %v4137_v47, %v4153_v33  ;;  %v4158_v9 = vadd.s32 127, %v4157_v2  ;;  %vm12021_vm4 = vcmp.le.f32.partialorder %v4081_v17, 0.7853982  ;;  %v4240_v25 = vmul.u32 %v11966_v28, %v4224_v21 }
 0x3ec   :  { %v8488_v0 = vadd.s32 4294967169, %v4292_v27  ;;  %v4170_v52 = vsel %vm12021_vm4, 0, %v4168_v62  ;;  %vm4242_vm5 = vc.u32 %v12009_v53, %v12012_v22  ;;  %v4243_v50 = vadd.s32 1, %v12013_v48 }
 0x3ed   :  { %v4156_v5 = vor.u32 %v4155_v63, %v4154_v11  ;;  %v4159_v45 = vshll.u32 %v4158_v9, 23  ;;  %v4288_v12 = vand.u32 2147483647, %v11978_v7  ;;  %v4071_v6 = vand.u32 3, %v4070_v37 }
 0x3ee   :  { %v4298_v3 = vadd.s32 1, %v8488_v0  ;;  %v4244_v54 = vsel %vm4242_vm5, %v4243_v50, %v12013_v48  ;;  %v4174_v4 = vadd.s32 3, %v4170_v52  ;;  %vm4069_vm10 = vweird.f32 %v11804_v1 }
 0x3ef   :  { %v9125_v19 = vpop.eup %9124  ;;  %v4160_v17 = vor.u32 4788187, %v4159_v45  ;;  %v4163_v23 = vcvt.s32.f32 %v4156_v5  ;;  %v4245_v31 = vadd.s32 %v4244_v54, %v4240_v25  ;;  %v4295_v61 = vand.u32 8388607, %v4288_v12 }
 0x3f0   :  { %v9127_v49 = vpop.eup %9126  ;;  %vm4299_vm6 = vcmp.gt.s32.totalorder %v4298_v3, 0  ;;  %vm4072_vm7 = vcmp.lt.s32.totalorder %v4071_v6, 2  ;;  %vm4073_vm8 = vcmp.eq.s32.totalorder %v4071_v6, 0  ;;  %vm4076_vm9 = vcmp.eq.s32.totalorder %v4071_v6, 2 }
 0x3f1   :  { %v4161_v28 = vand.u32 2147483647, %v4160_v17  ;;  %v4300_v41 = vsel %vm4299_vm6, %v4298_v3, 0  ;;  %v4246_v47 = vadd.s32 536870912, %v4245_v31  ;;  %v4077_v58 = vxor.u32 2147483648, %v9125_v19 }
 0x3f2   :  { %v4302_v56 = vand.u32 31, %v4300_v41  ;;  %v12036_v24 = vand.u32 3, %v4174_v4  ;;  %v4074_v60 = vxor.u32 2147483648, %v9127_v49  ;;  %v4296_v26 = vor.u32 8388608, %v4295_v61 }
 0x3f3   :  { %v4164_v29 = vmul.f32 %v4163_v23, %v4161_v28  ;;  %v12038_v42 = vshrl.u32 %v4246_v47, 30  ;;  %v4301_v35 = vshrl.u32 %v4300_v41, 5  ;;  %v4078_v13 = vsel %vm4076_vm9, %v4077_v58, %v9127_v49 }
 0x3f4   :  { %v4303_v57 = vsub.s32 32, %v4302_v56  ;;  %v4305_v10 = vshll.u32 %v9337_v30, %v4302_v56  ;;  %v4308_v15 = vshll.u32 %v9338_v32, %v4302_v56  ;;  %v4311_v59 = vshll.u32 %v9339_v34, %v4302_v56 }
 0x3f5   :  { %v4165_v16 = vxor.u32 2147483648, %v4164_v29  ;;  %v4248_v14 = vshll.u32 %v12038_v42, 30  ;;  %v4075_v2 = vsel %vm4073_vm8, %v9125_v19, %v4074_v60  ;;  %v4314_v51 = vshll.u32 %v9340_v36, %v4302_v56 }
 0x3f6   :  { %v4306_v55 = vshrl.u32 %v9338_v32, %v4303_v57  ;;  %v4309_v8 = vshrl.u32 %v9339_v34, %v4303_v57  ;;  %v4312_v11 = vshrl.u32 %v9340_v36, %v4303_v57  ;;  %v4315_v62 = vshrl.u32 %v9341_v38, %v4303_v57 }
 0x3f7   :  { %v4166_v20 = vsel %vm4083_vm15, %v4165_v16, %v4164_v29  ;;  %v12052_v33 = vsub.s32 %v4245_v31, %v4248_v14  ;;  %v4304_v27 = vshrl.u32 %v9337_v30, %v4303_v57  ;;  %v4317_v37 = vshll.u32 %v9341_v38, %v4302_v56 }
 0x3f8   :  { %v4169_v40 = vsel %vm12021_vm4, %v11856_v18, %v4166_v20  ;;  %v4307_v21 = vor.u32 %v4306_v55, %v4305_v10  ;;  %v4310_v63 = vor.u32 %v4309_v8, %v4308_v15  ;;  %v4313_v9 = vor.u32 %v4312_v11, %v4311_v59 }
 0x3f9   :  { %9128 = vcosq.f32 %v4169_v40  ;;  %v4251_v48 = vsub.s32 0, %v12052_v33  ;;  %v4318_v44 = vshrl.u32 %v9342_v46, %v4303_v57  ;;  %vm4320_vm11 = vcmp.lt.s32.totalorder %v4301_v35, 1 }
 0x3fa   :  { %9130 = vsinq.f32 %v4169_v40  ;;  %v4079_v5 = vsel %vm4072_vm7, %v4075_v2, %v4078_v13  ;;  %vm4323_vm12 = vcmp.lt.s32.totalorder %v4301_v35, 4  ;;  %v4336_v25 = vshll.u32 %v4296_v26, 8 }
 0x3fb   :  { %v8485_v45 = vmin.u32 %v4251_v48, %v12052_v33  ;;  %v4316_v0 = vor.u32 %v4315_v62, %v4314_v51  ;;  %v4319_v19 = vor.u32 %v4318_v44, %v4317_v37  ;;  %vm4322_vm13 = vcmp.lt.s32.totalorder %v4301_v35, 3 }
 0x3fc   :  { %v4325_v52 = vsel %vm4323_vm12, %v4313_v9, 2102212464  ;;  %vm4321_vm14 = vcmp.lt.s32.totalorder %v4301_v35, 2  ;;  %v4328_v17 = vsel %vm4320_vm11, %v4307_v21, %v4310_v63  ;;  %v4332_v23 = vsel %vm4320_vm11, %v4310_v63, %v4313_v9 }
 0x3fd   :  { %v4253_v50 = vclz %v8485_v45  ;;  %v12066_v3 = vsel %vm4069_vm10, nan, %v4079_v5  ;;  %v4324_v49 = vsel %vm4320_vm11, %v4304_v27, %v4307_v21  ;;  %v4329_v54 = vsel %vm4323_vm12, %v4316_v0, 920167782 }
 0x3fe   :  { %v4333_v6 = vsel %vm4323_vm12, %v4319_v19, 1326507024  ;;  %v4326_v4 = vsel %vm4322_vm13, %v4310_v63, %v4325_v52  ;;  %v4330_v31 = vsel %vm4322_vm13, %v4313_v9, %v4329_v54  ;;  %v4241_v41 = vadd.s32 %v12012_v22, %v12009_v53 }
 0x3ff   :  { %v8486_v28 = vadd.s32 4294967294, %v4253_v50  ;;  %v4334_v61 = vsel %vm4322_vm13, %v4316_v0, %v4333_v6  ;;  %v4271_v29 = vsub.s32 4, %v12038_v42  ;;  %v4331_v47 = vsel %vm4321_vm14, %v4328_v17, %v4330_v31 }
 0x400   :  { %v4335_v56 = vsel %vm4321_vm14, %v4332_v23, %v4334_v61  ;;  %v4394_v16 = vand.u32 2139095040, %v12066_v3  ;;  %v4327_v26 = vsel %vm4321_vm14, %v4324_v49, %v4326_v4  ;;  %vm4180_vm0 = vcmp.eq.s32.totalorder %v12036_v24, 2 }
 0x401   :  { %vm8487_vm15 = vcmp.lt.s32.totalorder %v8486_v28, 0  ;;  %v12073_v1 = vmul.u32.u64.low %v4336_v25, %v4335_v56  ;;  %v12074_v58 = vmul.u32.u64.high %v4336_v25, %v4335_v56, %v12073_v1  ;;  %vm4187_vm1 = vcmp.lt.s32.totalorder %v11918_v39, 0 }
 0x402   :  { %v4256_v60 = vsel %vm8487_vm15, 0, %v8486_v28  ;;  %v12078_v57 = vmul.u32.u64.low %v4336_v25, %v4331_v47  ;;  %v12079_v10 = vmul.u32.u64.high %v4336_v25, %v4331_v47, %v12078_v57  ;;  %v4395_v14 = vshrl.u32 %v4394_v16, 23 }
 0x403   :  { %v4257_v53 = vsub.s32 32, %v4256_v60  ;;  %v4258_v22 = vshll.u32 %v12052_v33, %v4256_v60  ;;  %v4261_v20 = vsub.s32 4294967266, %v4256_v60  ;;  %v4343_v8 = vmul.u32 %v4336_v25, %v4327_v26 }
 0x404   :  { %v4391_v35 = vand.u32 2147483647, %v12066_v3  ;;  %vm4345_vm2 = vc.u32 %v12074_v58, %v12078_v57  ;;  %v4346_v11 = vadd.s32 1, %v12079_v10  ;;  %v8492_v33 = vadd.s32 4294967169, %v4395_v14 }
 0x405   :  { %v4259_v40 = vshrl.u32 %v4241_v41, %v4257_v53  ;;  %v4262_v55 = vadd.s32 127, %v4261_v20  ;;  %v4272_v48 = vsel %vm4187_vm1, %v4271_v29, %v12038_v42  ;;  %vm4177_vm3 = vcmp.eq.s32.totalorder %v12036_v24, 0 }
 0x406   :  { %v9129_v15 = vpop.eup %9128  ;;  %vm12095_vm4 = vcmp.le.f32.partialorder %v4185_v43, 0.7853982  ;;  %v4347_v9 = vsel %vm4345_vm2, %v4346_v11, %v12079_v10  ;;  %v4401_v62 = vadd.s32 1, %v8492_v33  ;;  %vm4176_vm5 = vcmp.lt.s32.totalorder %v12036_v24, 2 }
 0x407   :  { %v9131_v59 = vpop.eup %9130  ;;  %v4181_v13 = vxor.u32 2147483648, %v9129_v15  ;;  %v4260_v21 = vor.u32 %v4259_v40, %v4258_v22  ;;  %v4263_v51 = vshll.u32 %v4262_v55, 23  ;;  %v4348_v44 = vadd.s32 %v4347_v9, %v4343_v8 }
 0x408   :  { %v4178_v2 = vxor.u32 2147483648, %v9131_v59  ;;  %v4274_v42 = vsel %vm12095_vm4, 0, %v4272_v48  ;;  %v4398_v43 = vand.u32 8388607, %v4391_v35  ;;  %vm4402_vm6 = vcmp.gt.s32.totalorder %v4401_v62, 0 }
 0x409   :  { %v4264_v27 = vor.u32 4788187, %v4263_v51  ;;  %v4267_v37 = vcvt.s32.f32 %v4260_v21  ;;  %v4182_v5 = vsel %vm4180_vm0, %v4181_v13, %v9131_v59  ;;  %v4349_v0 = vadd.s32 536870912, %v4348_v44 }
 0x40a   :  { %v4179_v45 = vsel %vm4177_vm3, %v9129_v15, %v4178_v2  ;;  %v4403_v19 = vsel %vm4402_vm6, %v4401_v62, 0  ;;  %vm4173_vm7 = vweird.f32 %v11856_v18  ;;  %v12108_v17 = vand.u32 3, %v4274_v42 }
 0x40b   :  { %v4265_v25 = vand.u32 2147483647, %v4264_v27  ;;  %v4405_v52 = vand.u32 31, %v4403_v19  ;;  %v12110_v23 = vshrl.u32 %v4349_v0, 30  ;;  %v4183_v49 = vsel %vm4176_vm5, %v4179_v45, %v4182_v5 }
 0x40c   :  { %v4399_v54 = vor.u32 8388608, %v4398_v43  ;;  %v12124_v1 = vsel %vm4173_vm7, nan, %v4183_v49  ;;  %v4404_v53 = vshrl.u32 %v4403_v19, 5  ;;  %v4344_v8 = vadd.s32 %v12078_v57, %v12074_v58 }
 0x40d   :  { %v4268_v50 = vmul.f32 %v4267_v37, %v4265_v25  ;;  %v4406_v6 = vsub.s32 32, %v4405_v52  ;;  %v4408_v28 = vshll.u32 %v9337_v30, %v4405_v52  ;;  %v4351_v31 = vshll.u32 %v12110_v23, 30 }
 0x40e   :  { %v4411_v61 = vshll.u32 %v9338_v32, %v4405_v52  ;;  %v4414_v41 = vshll.u32 %v9339_v34, %v4405_v52  ;;  %v4417_v24 = vshll.u32 %v9340_v36, %v4405_v52  ;;  %v4420_v40 = vshll.u32 %v9341_v38, %v4405_v52 }
 0x40f   :  { %v4269_v4 = vxor.u32 2147483648, %v4268_v50  ;;  %v4409_v29 = vshrl.u32 %v9338_v32, %v4406_v6  ;;  %v4412_v47 = vshrl.u32 %v9339_v34, %v4406_v6  ;;  %v4415_v56 = vshrl.u32 %v9340_v36, %v4406_v6 }
 0x410   :  { %v12128_v60 = vsub.s32 %v4348_v44, %v4351_v31  ;;  %v4418_v26 = vshrl.u32 %v9341_v38, %v4406_v6  ;;  %v4407_v22 = vshrl.u32 %v9337_v30, %v4406_v6  ;;  %v4421_v55 = vshrl.u32 %v9342_v46, %v4406_v6 }
 0x411   :  { %v4270_v16 = vsel %vm4187_vm1, %v4269_v4, %v4268_v50  ;;  %v4410_v20 = vor.u32 %v4409_v29, %v4408_v28  ;;  %v4413_v14 = vor.u32 %v4412_v47, %v4411_v61  ;;  %v4416_v15 = vor.u32 %v4415_v56, %v4414_v41 }
 0x412   :  { %v4273_v10 = vsel %vm12095_vm4, %v11918_v39, %v4270_v16  ;;  %v4354_v18 = vsub.s32 0, %v12128_v60  ;;  %v4419_v59 = vor.u32 %v4418_v26, %v4417_v24  ;;  %v4439_v11 = vshll.u32 %v4399_v54, 8 }
 0x413   :  { %9132 = vcosq.f32 %v4273_v10  ;;  %v4497_v33 = vand.u32 2139095040, %v12124_v1  ;;  %v4422_v2 = vor.u32 %v4421_v55, %v4420_v40  ;;  %vm4423_vm8 = vcmp.lt.s32.totalorder %v4404_v53, 1 }
 0x414   :  { %9134 = vsinq.f32 %v4273_v10  ;;  %v8489_v13 = vmin.u32 %v4354_v18, %v12128_v60  ;;  %vm4424_vm9 = vcmp.lt.s32.totalorder %v4404_v53, 2  ;;  %vm4425_vm10 = vcmp.lt.s32.totalorder %v4404_v53, 3 }
 0x415   :  { %vm4426_vm11 = vcmp.lt.s32.totalorder %v4404_v53, 4  ;;  %v4427_v51 = vsel %vm4423_vm8, %v4407_v22, %v4410_v20  ;;  %v4431_v48 = vsel %vm4423_vm8, %v4410_v20, %v4413_v14  ;;  %v4435_v62 = vsel %vm4423_vm8, %v4413_v14, %v4416_v15 }
 0x416   :  { %v4356_v21 = vclz %v8489_v13  ;;  %v4428_v63 = vsel %vm4426_vm11, %v4416_v15, 2102212464  ;;  %v4432_v9 = vsel %vm4426_vm11, %v4419_v59, 920167782  ;;  %v4436_v27 = vsel %vm4426_vm11, %v4422_v2, 1326507024 }
 0x417   :  { %v4429_v44 = vsel %vm4425_vm10, %v4413_v14, %v4428_v63  ;;  %v4433_v58 = vsel %vm4425_vm10, %v4416_v15, %v4432_v9  ;;  %v4437_v57 = vsel %vm4425_vm10, %v4419_v59, %v4436_v27  ;;  %v4494_v43 = vand.u32 2147483647, %v12124_v1 }
 0x418   :  { %v8490_v37 = vadd.s32 4294967294, %v4356_v21  ;;  %v4434_v5 = vsel %vm4424_vm9, %v4431_v48, %v4433_v58  ;;  %v4438_v42 = vsel %vm4424_vm9, %v4435_v62, %v4437_v57  ;;  %v4498_v45 = vshrl.u32 %v4497_v33, 23 }
 0x419   :  { %v4430_v25 = vsel %vm4424_vm9, %v4427_v51, %v4429_v44  ;;  %v12146_v0 = vmul.u32.u64.low %v4439_v11, %v4438_v42  ;;  %v12147_v19 = vmul.u32.u64.high %v4439_v11, %v4438_v42, %v12146_v0  ;;  %vm4280_vm14 = vcmp.eq.s32.totalorder %v12108_v17, 0 }
 0x41a   :  { %vm8491_vm12 = vcmp.lt.s32.totalorder %v8490_v37, 0  ;;  %v12149_v50 = vmul.u32.u64.low %v4439_v11, %v4434_v5  ;;  %v12150_v49 = vmul.u32.u64.high %v4439_v11, %v4434_v5, %v12149_v50  ;;  %v8496_v54 = vadd.s32 4294967169, %v4498_v45 }
 0x41b   :  { %v4359_v52 = vsel %vm8491_vm12, 0, %v8490_v37  ;;  %v4446_v29 = vmul.u32 %v4439_v11, %v4430_v25  ;;  %vm4290_vm15 = vcmp.lt.s32.totalorder %v11978_v7, 0  ;;  %v4501_v24 = vand.u32 8388607, %v4494_v43 }
 0x41c   :  { %v4360_v6 = vsub.s32 32, %v4359_v52  ;;  %v4361_v28 = vshll.u32 %v12128_v60, %v4359_v52  ;;  %v4364_v4 = vsub.s32 4294967266, %v4359_v52  ;;  %v4504_v31 = vadd.s32 1, %v8496_v54 }
 0x41d   :  { %vm4448_vm13 = vc.u32 %v12147_v19, %v12149_v50  ;;  %v4449_v56 = vadd.s32 1, %v12150_v49  ;;  %vm4283_vm1 = vcmp.eq.s32.totalorder %v12108_v17, 2  ;;  %vm12165_vm2 = vcmp.le.f32.partialorder %v4288_v12, 0.7853982 }
 0x41e   :  { %v4362_v61 = vshrl.u32 %v4344_v8, %v4360_v6  ;;  %v4365_v41 = vadd.s32 127, %v4364_v4  ;;  %vm4505_vm0 = vcmp.gt.s32.totalorder %v4504_v31, 0  ;;  %vm4279_vm3 = vcmp.lt.s32.totalorder %v12108_v17, 2 }
 0x41f   :  { %v4506_v53 = vsel %vm4505_vm0, %v4504_v31, 0  ;;  %v4450_v20 = vsel %vm4448_vm13, %v4449_v56, %v12150_v49  ;;  %v4374_v55 = vsub.s32 4, %v12110_v23  ;;  %v4502_v8 = vor.u32 8388608, %v4501_v24 }
 0x420   :  { %v9133_v47 = vpop.eup %9132  ;;  %v4363_v26 = vor.u32 %v4362_v61, %v4361_v28  ;;  %v4366_v10 = vshll.u32 %v4365_v41, 23  ;;  %v4508_v18 = vand.u32 31, %v4506_v53  ;;  %v4451_v40 = vadd.s32 %v4450_v20, %v4446_v29 }
 0x421   :  { %v9135_v16 = vpop.eup %9134  ;;  %v4284_v60 = vxor.u32 2147483648, %v9133_v47  ;;  %vm4277_vm4 = vweird.f32 %v11918_v39  ;;  %v4507_v27 = vshrl.u32 %v4506_v53, 5  ;;  %v4542_v0 = vshll.u32 %v4502_v8, 8 }
 0x422   :  { %v4281_v22 = vxor.u32 2147483648, %v9135_v16  ;;  %v4367_v15 = vor.u32 4788187, %v4366_v10  ;;  %v4370_v59 = vcvt.s32.f32 %v4363_v26  ;;  %v4509_v13 = vsub.s32 32, %v4508_v18 }
 0x423   :  { %v4285_v33 = vsel %vm4283_vm1, %v4284_v60, %v9135_v16  ;;  %v4452_v21 = vadd.s32 536870912, %v4451_v40  ;;  %v4511_v12 = vshll.u32 %v9337_v30, %v4508_v18  ;;  %v4514_v48 = vshll.u32 %v9338_v32, %v4508_v18 }
 0x424   :  { %v4282_v11 = vsel %vm4280_vm14, %v9133_v47, %v4281_v22  ;;  %v4368_v2 = vand.u32 2147483647, %v4367_v15  ;;  %v4512_v51 = vshrl.u32 %v9338_v32, %v4509_v13  ;;  %v4515_v63 = vshrl.u32 %v9339_v34, %v4509_v13 }
 0x425   :  { %v12178_v62 = vshrl.u32 %v4452_v21, 30  ;;  %v4520_v37 = vshll.u32 %v9340_v36, %v4508_v18  ;;  %v4517_v44 = vshll.u32 %v9339_v34, %v4508_v18  ;;  %v4518_v58 = vshrl.u32 %v9340_v36, %v4509_v13 }
 0x426   :  { %v4371_v9 = vmul.f32 %v4370_v59, %v4368_v2  ;;  %v4521_v57 = vshrl.u32 %v9341_v38, %v4509_v13  ;;  %v4523_v5 = vshll.u32 %v9341_v38, %v4508_v18  ;;  %v4286_v42 = vsel %vm4279_vm3, %v4282_v11, %v4285_v33 }
 0x427   :  { %v4454_v25 = vshll.u32 %v12178_v62, 30  ;;  %v4513_v52 = vor.u32 %v4512_v51, %v4511_v12  ;;  %v4516_v49 = vor.u32 %v4515_v63, %v4514_v48  ;;  %v4524_v6 = vshrl.u32 %v9342_v46, %v4509_v13 }
 0x428   :  { %v4372_v45 = vxor.u32 2147483648, %v4371_v9  ;;  %v4522_v54 = vor.u32 %v4521_v57, %v4520_v37  ;;  %v4510_v31 = vshrl.u32 %v9337_v30, %v4509_v13  ;;  %vm4526_vm5 = vcmp.lt.s32.totalorder %v4507_v27, 1 }
 0x429   :  { %v4455_v4 = vsub.s32 %v4451_v40, %v4454_v25  ;;  %v4519_v61 = vor.u32 %v4518_v58, %v4517_v44  ;;  %v4525_v41 = vor.u32 %v4524_v6, %v4523_v5  ;;  %vm4529_vm6 = vcmp.lt.s32.totalorder %v4507_v27, 4 }
 0x42a   :  { %v4373_v28 = vsel %vm4290_vm15, %v4372_v45, %v4371_v9  ;;  %vm4527_vm7 = vcmp.lt.s32.totalorder %v4507_v27, 2  ;;  %vm4528_vm8 = vcmp.lt.s32.totalorder %v4507_v27, 3  ;;  %v4534_v56 = vsel %vm4526_vm5, %v4513_v52, %v4516_v49 }
 0x42b   :  { %v4376_v17 = vsel %vm12165_vm2, %v11978_v7, %v4373_v28  ;;  %v4457_v29 = vsub.s32 0, %v4455_v4  ;;  %v4531_v47 = vsel %vm4529_vm6, %v4519_v61, 2102212464  ;;  %v4535_v24 = vsel %vm4529_vm6, %v4522_v54, 920167782 }
 0x42c   :  { %9136 = vcosq.f32 %v4376_v17  ;;  %v4530_v60 = vsel %vm4526_vm5, %v4510_v31, %v4513_v52  ;;  %v4532_v26 = vsel %vm4528_vm8, %v4516_v49, %v4531_v47  ;;  %v4536_v10 = vsel %vm4528_vm8, %v4519_v61, %v4535_v24 }
 0x42d   :  { %9138 = vsinq.f32 %v4376_v17  ;;  %v8493_v16 = vmin.u32 %v4457_v29, %v4455_v4  ;;  %v4538_v53 = vsel %vm4526_vm5, %v4516_v49, %v4519_v61  ;;  %v4539_v22 = vsel %vm4529_vm6, %v4525_v41, 1326507024 }
 0x42e   :  { %v12200_v20 = vsel %vm4277_vm4, nan, %v4286_v42  ;;  %v4537_v15 = vsel %vm4527_vm7, %v4534_v56, %v4536_v10  ;;  %v4540_v59 = vsel %vm4528_vm8, %v4522_v54, %v4539_v22  ;;  %v4375_v40 = vsel %vm4290_vm15, %v4374_v55, %v12110_v23 }
 0x42f   :  { %v4459_v18 = vclz %v8493_v16  ;;  %v4541_v8 = vsel %vm4527_vm7, %v4538_v53, %v4540_v59  ;;  %v12207_v13 = vmul.u32.u64.low %v4542_v0, %v4537_v15  ;;  %v12208_v11 = vmul.u32.u64.high %v4542_v0, %v4537_v15, %v12207_v13 }
 0x430   :  { %v4533_v2 = vsel %vm4527_vm7, %v4530_v60, %v4532_v26  ;;  %v12211_v21 = vmul.u32.u64.low %v4542_v0, %v4541_v8  ;;  %v12212_v39 = vmul.u32.u64.high %v4542_v0, %v4541_v8, %v12211_v21  ;;  %v4600_v12 = vand.u32 2139095040, %v12200_v20 }
 0x431   :  { %v8494_v33 = vadd.s32 4294967294, %v4459_v18  ;;  %v4377_v51 = vsel %vm12165_vm2, 0, %v4375_v40  ;;  %v4447_v48 = vadd.s32 %v12149_v50, %v12147_v19  ;;  %v4549_v55 = vmul.u32 %v4542_v0, %v4533_v2 }
 0x432   :  { %v4552_v63 = vadd.s32 1, %v12208_v11  ;;  %v4601_v9 = vshrl.u32 %v4600_v12, 23  ;;  %v4477_v58 = vsub.s32 4, %v12178_v62  ;;  %vm4551_vm10 = vc.u32 %v12212_v39, %v12207_v13 }
 0x433   :  { %vm8495_vm9 = vcmp.lt.s32.totalorder %v8494_v33, 0  ;;  %v4381_v19 = vand.u32 3, %v4377_v51  ;;  %vm4393_vm11 = vcmp.lt.s32.totalorder %v12066_v3, 0  ;;  %vm12234_vm0 = vcmp.le.f32.partialorder %v4391_v35, 0.7853982 }
 0x434   :  { %v4462_v23 = vsel %vm8495_vm9, 0, %v8494_v33  ;;  %v8500_v57 = vadd.s32 4294967169, %v4601_v9  ;;  %v4553_v42 = vsel %vm4551_vm10, %v4552_v63, %v12208_v11  ;;  %v12227_v54 = vsel %vm4393_vm11, %v4477_v58, %v12178_v62 }
 0x435   :  { %v4463_v37 = vsub.s32 32, %v4462_v23  ;;  %v4464_v27 = vshll.u32 %v4455_v4, %v4462_v23  ;;  %v4467_v44 = vsub.s32 4294967266, %v4462_v23  ;;  %v4554_v50 = vadd.s32 %v4553_v42, %v4549_v55 }
 0x436   :  { %v4607_v25 = vadd.s32 1, %v8500_v57  ;;  %v4597_v4 = vand.u32 2147483647, %v12200_v20  ;;  %vm4383_vm13 = vcmp.eq.s32.totalorder %v4381_v19, 0  ;;  %vm4386_vm14 = vcmp.eq.s32.totalorder %v4381_v19, 2 }
 0x437   :  { %v4465_v5 = vshrl.u32 %v4447_v48, %v4463_v37  ;;  %v4468_v14 = vadd.s32 127, %v4467_v44  ;;  %v4555_v28 = vadd.s32 536870912, %v4554_v50  ;;  %vm4382_vm15 = vcmp.lt.s32.totalorder %v4381_v19, 2 }
 0x438   :  { %vm4608_vm12 = vcmp.gt.s32.totalorder %v4607_v25, 0  ;;  %v4480_v24 = vsel %vm12234_vm0, 0, %v12227_v54  ;;  %v4604_v60 = vand.u32 8388607, %v4597_v4  ;;  %vm4380_vm1 = vweird.f32 %v11978_v7 }
 0x439   :  { %v9137_v45 = vpop.eup %9136  ;;  %v4466_v52 = vor.u32 %v4465_v5, %v4464_v27  ;;  %v4469_v49 = vshll.u32 %v4468_v14, 23  ;;  %v4609_v41 = vsel %vm4608_vm12, %v4607_v25, 0  ;;  %v12230_v29 = vshrl.u32 %v4555_v28, 30 }
 0x43a   :  { %v9139_v0 = vpop.eup %9138  ;;  %v4387_v6 = vxor.u32 2147483648, %v9137_v45  ;;  %v4611_v47 = vand.u32 31, %v4609_v41  ;;  %v4550_v35 = vadd.s32 %v12207_v13, %v12212_v39  ;;  %v4605_v12 = vor.u32 8388608, %v4604_v60 }
 0x43b   :  { %v4384_v31 = vxor.u32 2147483648, %v9139_v0  ;;  %v4470_v17 = vor.u32 4788187, %v4469_v49  ;;  %v4473_v61 = vcvt.s32.f32 %v4466_v52  ;;  %v4557_v16 = vshll.u32 %v12230_v29, 30 }
 0x43c   :  { %v4612_v26 = vsub.s32 32, %v4611_v47  ;;  %v4388_v53 = vsel %vm4386_vm14, %v4387_v6, %v9139_v0  ;;  %v4614_v15 = vshll.u32 %v9337_v30, %v4611_v47  ;;  %v4617_v40 = vshll.u32 %v9338_v32, %v4611_v47 }
 0x43d   :  { %v4471_v56 = vand.u32 2147483647, %v4470_v17  ;;  %v4385_v10 = vsel %vm4383_vm13, %v9137_v45, %v4384_v31  ;;  %v4558_v18 = vsub.s32 %v4554_v50, %v4557_v16  ;;  %v4620_v33 = vshll.u32 %v9339_v34, %v4611_v47 }
 0x43e   :  { %v4615_v59 = vshrl.u32 %v9338_v32, %v4612_v26  ;;  %v4618_v11 = vshrl.u32 %v9339_v34, %v4612_v26  ;;  %v4621_v2 = vshrl.u32 %v9340_v36, %v4612_v26  ;;  %v4610_v51 = vshrl.u32 %v4609_v41, 5 }
 0x43f   :  { %v4474_v22 = vmul.f32 %v4473_v61, %v4471_v56  ;;  %v4560_v21 = vsub.s32 0, %v4558_v18  ;;  %v4623_v48 = vshll.u32 %v9340_v36, %v4611_v47  ;;  %v4389_v13 = vsel %vm4382_vm15, %v4385_v10, %v4388_v53 }
 0x440   :  { %v4613_v23 = vshrl.u32 %v9337_v30, %v4612_v26  ;;  %v4624_v55 = vshrl.u32 %v9341_v38, %v4612_v26  ;;  %v4616_v37 = vor.u32 %v4615_v59, %v4614_v15  ;;  %v4619_v27 = vor.u32 %v4618_v11, %v4617_v40 }
 0x441   :  { %v4475_v8 = vxor.u32 2147483648, %v4474_v22  ;;  %v8497_v9 = vmin.u32 %v4560_v21, %v4558_v18  ;;  %v4622_v44 = vor.u32 %v4621_v2, %v4620_v33  ;;  %v4626_v57 = vshll.u32 %v9341_v38, %v4611_v47 }
 0x442   :  { %v4625_v58 = vor.u32 %v4624_v55, %v4623_v48  ;;  %v4627_v14 = vshrl.u32 %v9342_v46, %v4612_v26  ;;  %vm4629_vm2 = vcmp.lt.s32.totalorder %v4610_v51, 1  ;;  %vm4630_vm3 = vcmp.lt.s32.totalorder %v4610_v51, 2 }
 0x443   :  { %v4476_v39 = vsel %vm4393_vm11, %v4475_v8, %v4474_v22  ;;  %v4562_v5 = vclz %v8497_v9  ;;  %vm4631_vm4 = vcmp.lt.s32.totalorder %v4610_v51, 3  ;;  %vm4632_vm5 = vcmp.lt.s32.totalorder %v4610_v51, 4 }
 0x444   :  { %v4479_v63 = vsel %vm12234_vm0, %v12066_v3, %v4476_v39  ;;  %v4633_v42 = vsel %vm4629_vm2, %v4613_v23, %v4616_v37  ;;  %v4628_v19 = vor.u32 %v4627_v14, %v4626_v57  ;;  %v4634_v50 = vsel %vm4632_vm5, %v4622_v44, 2102212464 }
 0x445   :  { %9140 = vcosq.f32 %v4479_v63  ;;  %v8498_v45 = vadd.s32 4294967294, %v4562_v5  ;;  %v4637_v25 = vsel %vm4629_vm2, %v4616_v37, %v4619_v27  ;;  %v4635_v0 = vsel %vm4631_vm4, %v4619_v27, %v4634_v50 }
 0x446   :  { %9142 = vsinq.f32 %v4479_v63  ;;  %v4638_v52 = vsel %vm4632_vm5, %v4625_v58, 920167782  ;;  %v4641_v49 = vsel %vm4629_vm2, %v4619_v27, %v4622_v44  ;;  %v4645_v6 = vshll.u32 %v4605_v12, 8 }
 0x447   :  { %v12266_v28 = vsel %vm4380_vm1, nan, %v4389_v13  ;;  %vm8499_vm6 = vcmp.lt.s32.totalorder %v8498_v45, 0  ;;  %v4639_v31 = vsel %vm4631_vm4, %v4622_v44, %v4638_v52  ;;  %v4642_v17 = vsel %vm4632_vm5, %v4628_v19, 1326507024 }
 0x448   :  { %v4565_v61 = vsel %vm8499_vm6, 0, %v8498_v45  ;;  %v4636_v41 = vsel %vm4630_vm3, %v4633_v42, %v4635_v0  ;;  %v4640_v47 = vsel %vm4630_vm3, %v4637_v25, %v4639_v31  ;;  %v4643_v56 = vsel %vm4631_vm4, %v4625_v58, %v4642_v17 }
 0x449   :  { %v4566_v16 = vsub.s32 32, %v4565_v61  ;;  %v4567_v60 = vshll.u32 %v4558_v18, %v4565_v61  ;;  %v4570_v26 = vsub.s32 4294967266, %v4565_v61  ;;  %v4644_v10 = vsel %vm4630_vm3, %v4641_v49, %v4643_v56 }
 0x44a   :  { %v12273_v53 = vmul.u32.u64.low %v4645_v6, %v4644_v10  ;;  %v12274_v7 = vmul.u32.u64.high %v4645_v6, %v4644_v10, %v12273_v53  ;;  %v12276_v22 = vmul.u32.u64.low %v4645_v6, %v4640_v47  ;;  %v12277_v15 = vmul.u32.u64.high %v4645_v6, %v4640_v47, %v12276_v22 }
 0x44b   :  { %v4484_v59 = vand.u32 3, %v4480_v24  ;;  %v4568_v40 = vshrl.u32 %v4550_v35, %v4566_v16  ;;  %v4571_v8 = vadd.s32 127, %v4570_v26  ;;  %v4703_v11 = vand.u32 2139095040, %v12266_v28 }
 0x44c   :  { %v4652_v2 = vmul.u32 %v4645_v6, %v4636_v41  ;;  %vm4654_vm7 = vc.u32 %v12274_v7, %v12276_v22  ;;  %v4655_v21 = vadd.s32 1, %v12277_v15  ;;  %v4700_v63 = vand.u32 2147483647, %v12266_v28 }
 0x44d   :  { %v4569_v18 = vor.u32 %v4568_v40, %v4567_v60  ;;  %v4572_v33 = vshll.u32 %v4571_v8, 23  ;;  %v4704_v12 = vshrl.u32 %v4703_v11, 23  ;;  %vm4486_vm8 = vcmp.eq.s32.totalorder %v4484_v59, 0 }
 0x44e   :  { %vm4489_vm9 = vcmp.eq.s32.totalorder %v4484_v59, 2  ;;  %v4656_v24 = vsel %vm4654_vm7, %v4655_v21, %v12277_v15  ;;  %vm4485_vm10 = vcmp.lt.s32.totalorder %v4484_v59, 2  ;;  %vm12292_vm11 = vcmp.le.f32.partialorder %v4494_v43, 0.7853982 }
 0x44f   :  { %v4573_v48 = vor.u32 4788187, %v4572_v33  ;;  %v4576_v62 = vcvt.s32.f32 %v4569_v18  ;;  %v8504_v35 = vadd.s32 4294967169, %v4704_v12  ;;  %v4657_v55 = vadd.s32 %v4656_v24, %v4652_v2 }
 0x450   :  { %vm4496_vm12 = vcmp.lt.s32.totalorder %v12124_v1, 0  ;;  %v4580_v5 = vsub.s32 4, %v12230_v29  ;;  %v4707_v45 = vand.u32 8388607, %v4700_v63  ;;  %vm4483_vm14 = vweird.f32 %v12066_v3 }
 0x451   :  { %v4574_v23 = vand.u32 2147483647, %v4573_v48  ;;  %v4710_v9 = vadd.s32 1, %v8504_v35  ;;  %v4658_v58 = vadd.s32 536870912, %v4657_v55 }
 0x452   :  { %v9141_v51 = vpop.eup %9140  ;;  %v4581_v52 = vsel %vm4496_vm12, %v4580_v5, %v12230_v29  ;;  %v4708_v3 = vor.u32 8388608, %v4707_v45 }
 0x453   :  { %v9143_v13 = vpop.eup %9142  ;;  %v4490_v54 = vxor.u32 2147483648, %v9141_v51  ;;  %v4577_v44 = vmul.f32 %v4576_v62, %v4574_v23  ;;  %vm4711_vm13 = vcmp.gt.s32.totalorder %v4710_v9, 0  ;;  %v12298_v42 = vshrl.u32 %v4658_v58, 30 }
 0x454   :  { %v4487_v39 = vxor.u32 2147483648, %v9143_v13  ;;  %v4712_v19 = vsel %vm4711_vm13, %v4710_v9, 0  ;;  %v4583_v40 = vsel %vm12292_vm11, 0, %v4581_v52  ;;  %v4748_v18 = vshll.u32 %v4708_v3, 8 }
 0x455   :  { %v4491_v27 = vsel %vm4489_vm9, %v4490_v54, %v9143_v13  ;;  %v4578_v14 = vxor.u32 2147483648, %v4577_v44  ;;  %v4714_v25 = vand.u32 31, %v4712_v19  ;;  %v4660_v0 = vshll.u32 %v12298_v42, 30 }
 0x456   :  { %v4488_v37 = vsel %vm4486_vm8, %v9141_v51, %v4487_v39  ;;  %v4713_v16 = vshrl.u32 %v4712_v19, 5  ;;  %vm4599_vm9 = vcmp.lt.s32.totalorder %v12200_v20, 0 }
 0x457   :  { %v4492_v50 = vsel %vm4485_vm10, %v4488_v37, %v4491_v27  ;;  %v4579_v43 = vsel %vm4496_vm12, %v4578_v14, %v4577_v44  ;;  %v4715_v6 = vsub.s32 32, %v4714_v25  ;;  %v4717_v31 = vshll.u32 %v9337_v30, %v4714_v25 }
 0x458   :  { %v4582_v49 = vsel %vm12292_vm11, %v12124_v1, %v4579_v43  ;;  %v12309_v17 = vsel %vm4483_vm14, nan, %v4492_v50  ;;  %v12311_v61 = vsub.s32 %v4657_v55, %v4660_v0  ;;  %v4720_v47 = vshll.u32 %v9338_v32, %v4714_v25 }
 0x459   :  { %9144 = vcosq.f32 %v4582_v49  ;;  %v4718_v41 = vshrl.u32 %v9338_v32, %v4715_v6  ;;  %v4723_v29 = vshll.u32 %v9339_v34, %v4714_v25  ;;  %v4721_v60 = vshrl.u32 %v9339_v34, %v4715_v6 }
 0x45a   :  { %9146 = vsinq.f32 %v4582_v49  ;;  %v4663_v56 = vsub.s32 0, %v12311_v61  ;;  %v4724_v26 = vshrl.u32 %v9340_v36, %v4715_v6  ;;  %v4726_v53 = vshll.u32 %v9340_v36, %v4714_v25 }
 0x45b   :  { %v4719_v10 = vor.u32 %v4718_v41, %v4717_v31  ;;  %v4727_v15 = vshrl.u32 %v9341_v38, %v4715_v6  ;;  %v4729_v59 = vshll.u32 %v9341_v38, %v4714_v25  ;;  %v4716_v11 = vshrl.u32 %v9337_v30, %v4715_v6 }
 0x45c   :  { %v8501_v8 = vmin.u32 %v4663_v56, %v12311_v61  ;;  %v4722_v33 = vor.u32 %v4721_v60, %v4720_v47  ;;  %v4725_v2 = vor.u32 %v4724_v26, %v4723_v29  ;;  %v4730_v12 = vshrl.u32 %v9342_v46, %v4715_v6 }
 0x45d   :  { %v4728_v21 = vor.u32 %v4727_v15, %v4726_v53  ;;  %vm4732_vm15 = vcmp.lt.s32.totalorder %v4713_v16, 1  ;;  %vm4734_vm0 = vcmp.lt.s32.totalorder %v4713_v16, 3  ;;  %v4806_v48 = vand.u32 2139095040, %v12309_v17 }
 0x45e   :  { %v4665_v51 = vclz %v8501_v8  ;;  %v4731_v62 = vor.u32 %v4730_v12, %v4729_v59  ;;  %vm4733_vm1 = vcmp.lt.s32.totalorder %v4713_v16, 2  ;;  %vm4735_vm2 = vcmp.lt.s32.totalorder %v4713_v16, 4 }
 0x45f   :  { %v4740_v13 = vsel %vm4732_vm15, %v4719_v10, %v4722_v33  ;;  %v4737_v24 = vsel %vm4735_vm2, %v4725_v2, 2102212464  ;;  %v4741_v35 = vsel %vm4735_vm2, %v4728_v21, 920167782  ;;  %v4744_v39 = vsel %vm4732_vm15, %v4722_v33, %v4725_v2 }
 0x460   :  { %v8502_v54 = vadd.s32 4294967294, %v4665_v51  ;;  %v4736_v23 = vsel %vm4732_vm15, %v4716_v11, %v4719_v10  ;;  %v4738_v55 = vsel %vm4734_vm0, %v4722_v33, %v4737_v24  ;;  %v4742_v9 = vsel %vm4734_vm0, %v4725_v2, %v4741_v35 }
 0x461   :  { %v4745_v37 = vsel %vm4735_vm2, %v4731_v62, 1326507024  ;;  %v4653_v27 = vadd.s32 %v12276_v22, %v12274_v7  ;;  %v4743_v44 = vsel %vm4733_vm1, %v4740_v13, %v4742_v9  ;;  %v4739_v43 = vsel %vm4733_vm1, %v4736_v23, %v4738_v55 }
 0x462   :  { %vm8503_vm3 = vcmp.lt.s32.totalorder %v8502_v54, 0  ;;  %v4746_v58 = vsel %vm4734_vm0, %v4728_v21, %v4745_v37  ;;  %v12335_v14 = vmul.u32.u64.low %v4748_v18, %v4743_v44  ;;  %v12336_v45 = vmul.u32.u64.high %v4748_v18, %v4743_v44, %v12335_v14 }
 0x463   :  { %v4668_v57 = vsel %vm8503_vm3, 0, %v8502_v54  ;;  %v4747_v5 = vsel %vm4733_vm1, %v4744_v39, %v4746_v58  ;;  %v4587_v7 = vand.u32 3, %v4583_v40  ;;  %v4807_v49 = vshrl.u32 %v4806_v48, 23 }
 0x464   :  { %v4669_v19 = vsub.s32 32, %v4668_v57  ;;  %v4670_v50 = vshll.u32 %v12311_v61, %v4668_v57  ;;  %v4673_v25 = vsub.s32 4294967266, %v4668_v57  ;;  %v4755_v41 = vmul.u32 %v4748_v18, %v4739_v43 }
 0x465   :  { %v12341_v22 = vmul.u32.u64.low %v4748_v18, %v4747_v5  ;;  %v12342_v52 = vmul.u32.u64.high %v4748_v18, %v4747_v5, %v12341_v22  ;;  %v4758_v47 = vadd.s32 1, %v12336_v45  ;;  %v4803_v29 = vand.u32 2147483647, %v12309_v17 }
 0x466   :  { %v9145_v0 = vpop.eup %9144  ;;  %v4671_v31 = vshrl.u32 %v4653_v27, %v4669_v19  ;;  %v4674_v3 = vadd.s32 127, %v4673_v25  ;;  %v8508_v56 = vadd.s32 4294967169, %v4807_v49  ;;  %vm4589_vm4 = vcmp.eq.s32.totalorder %v4587_v7, 0 }
 0x467   :  { %v9147_v6 = vpop.eup %9146  ;;  %v4593_v61 = vxor.u32 2147483648, %v9145_v0  ;;  %vm4592_vm5 = vcmp.eq.s32.totalorder %v4587_v7, 2  ;;  %vm4757_vm6 = vc.u32 %v12342_v52, %v12335_v14  ;;  %v4683_v59 = vsub.s32 4, %v12298_v42 }
 0x468   :  { %v4590_v60 = vxor.u32 2147483648, %v9147_v6  ;;  %v4672_v26 = vor.u32 %v4671_v31, %v4670_v50  ;;  %v4675_v16 = vshll.u32 %v4674_v3, 23  ;;  %v4813_v10 = vadd.s32 1, %v8508_v56 }
 0x469   :  { %v4759_v40 = vsel %vm4757_vm6, %v4758_v47, %v12336_v45  ;;  %vm4588_vm7 = vcmp.lt.s32.totalorder %v4587_v7, 2  ;;  %v4810_v11 = vand.u32 8388607, %v4803_v29  ;;  %v4594_v33 = vsel %vm4592_vm5, %v4593_v61, %v9147_v6 }
 0x46a   :  { %v4676_v53 = vor.u32 4788187, %v4675_v16  ;;  %v4679_v15 = vcvt.s32.f32 %v4672_v26  ;;  %v4760_v8 = vadd.s32 %v4759_v40, %v4755_v41  ;;  %vm4814_vm8 = vcmp.gt.s32.totalorder %v4813_v10, 0 }
 0x46b   :  { %v4591_v18 = vsel %vm4589_vm4, %v9145_v0, %v4590_v60  ;;  %v4815_v21 = vsel %vm4814_vm8, %v4813_v10, 0  ;;  %vm4586_vm10 = vweird.f32 %v12124_v1  ;;  %vm12356_vm11 = vcmp.le.f32.partialorder %v4597_v4, 0.7853982 }
 0x46c   :  { %v4677_v2 = vand.u32 2147483647, %v4676_v53  ;;  %v4761_v12 = vadd.s32 536870912, %v4760_v8  ;;  %v4817_v51 = vand.u32 31, %v4815_v21  ;;  %v12363_v13 = vsel %vm4599_vm9, %v4683_v59, %v12298_v42 }
 0x46d   :  { %v4595_v54 = vsel %vm4588_vm7, %v4591_v18, %v4594_v33  ;;  %v4811_v35 = vor.u32 8388608, %v4810_v11  ;;  %v4816_v55 = vshrl.u32 %v4815_v21, 5  ;;  %vm12417_vm3 = vcmp.le.f32.partialorder %v4700_v63, 0.7853982 }
 0x46e   :  { %v4680_v62 = vmul.f32 %v4679_v15, %v4677_v2  ;;  %v12365_v24 = vshrl.u32 %v4761_v12, 30  ;;  %v4818_v39 = vsub.s32 32, %v4817_v51  ;;  %v4820_v9 = vshll.u32 %v9337_v30, %v4817_v51 }
 0x46f   :  { %v4823_v4 = vshll.u32 %v9338_v32, %v4817_v51  ;;  %v4826_v44 = vshll.u32 %v9339_v34, %v4817_v51  ;;  %v4829_v42 = vshll.u32 %v9340_v36, %v4817_v51  ;;  %v12380_v19 = vsel %vm4586_vm10, nan, %v4595_v54 }
 0x470   :  { %v4681_v23 = vxor.u32 2147483648, %v4680_v62  ;;  %v4763_v37 = vshll.u32 %v12365_v24, 30  ;;  %v4821_v27 = vshrl.u32 %v9338_v32, %v4818_v39  ;;  %v4824_v57 = vshrl.u32 %v9339_v34, %v4818_v39 }
 0x471   :  { %v4827_v5 = vshrl.u32 %v9340_v36, %v4818_v39  ;;  %v4830_v45 = vshrl.u32 %v9341_v38, %v4818_v39  ;;  %v4851_v43 = vshll.u32 %v4811_v35, 8  ;;  %v4819_v0 = vshrl.u32 %v9337_v30, %v4818_v39 }
 0x472   :  { %v4682_v58 = vsel %vm4599_vm9, %v4681_v23, %v4680_v62  ;;  %v4764_v25 = vsub.s32 %v4760_v8, %v4763_v37  ;;  %v4822_v7 = vor.u32 %v4821_v27, %v4820_v9  ;;  %v4825_v22 = vor.u32 %v4824_v57, %v4823_v4 }
 0x473   :  { %v4685_v50 = vsel %vm12356_vm11, %v12200_v20, %v4682_v58  ;;  %v4832_v49 = vshll.u32 %v9341_v38, %v4817_v51  ;;  %v4828_v31 = vor.u32 %v4827_v5, %v4826_v44  ;;  %v4831_v3 = vor.u32 %v4830_v45, %v4829_v42 }
 0x474   :  { %v4766_v6 = vsub.s32 0, %v4764_v25  ;;  %v4906_v41 = vand.u32 2147483647, %v12380_v19  ;;  %9148 = vcosq.f32 %v4685_v50  ;;  %v4833_v1 = vshrl.u32 %v9342_v46, %v4818_v39 }
 0x475   :  { %vm4835_vm12 = vcmp.lt.s32.totalorder %v4816_v55, 1  ;;  %v4909_v47 = vand.u32 2139095040, %v12380_v19  ;;  %9150 = vsinq.f32 %v4685_v50  ;;  %vm4836_vm13 = vcmp.lt.s32.totalorder %v4816_v55, 2 }
 0x476   :  { %v8505_v56 = vmin.u32 %v4766_v6, %v4764_v25  ;;  %vm4837_vm14 = vcmp.lt.s32.totalorder %v4816_v55, 3  ;;  %v4834_v60 = vor.u32 %v4833_v1, %v4832_v49  ;;  %vm4838_vm15 = vcmp.lt.s32.totalorder %v4816_v55, 4 }
 0x477   :  { %v4839_v61 = vsel %vm4835_vm12, %v4819_v0, %v4822_v7  ;;  %v4843_v26 = vsel %vm4835_vm12, %v4822_v7, %v4825_v22  ;;  %v4840_v10 = vsel %vm4838_vm15, %v4828_v31, 2102212464  ;;  %v4844_v53 = vsel %vm4838_vm15, %v4831_v3, 920167782 }
 0x478   :  { %v4768_v16 = vclz %v8505_v56  ;;  %v4847_v15 = vsel %vm4835_vm12, %v4825_v22, %v4828_v31  ;;  %v4841_v59 = vsel %vm4837_vm14, %v4825_v22, %v4840_v10  ;;  %v4845_v40 = vsel %vm4837_vm14, %v4828_v31, %v4844_v53 }
 0x479   :  { %v4848_v8 = vsel %vm4838_vm15, %v4834_v60, 1326507024  ;;  %v4910_v11 = vshrl.u32 %v4909_v47, 23  ;;  %v4842_v33 = vsel %vm4836_vm13, %v4839_v61, %v4841_v59  ;;  %v4846_v2 = vsel %vm4836_vm13, %v4843_v26, %v4845_v40 }
 0x47a   :  { %v8506_v18 = vadd.s32 4294967294, %v4768_v16  ;;  %v4849_v21 = vsel %vm4837_vm14, %v4831_v3, %v4848_v8  ;;  %v4756_v12 = vadd.s32 %v12335_v14, %v12342_v52  ;;  %v4686_v9 = vsel %vm12356_vm11, 0, %v12363_v13 }
 0x47b   :  { %v4850_v51 = vsel %vm4836_vm13, %v4847_v15, %v4849_v21  ;;  %v12398_v62 = vmul.u32.u64.low %v4851_v43, %v4846_v2  ;;  %v12399_v54 = vmul.u32.u64.high %v4851_v43, %v4846_v2, %v12398_v62  ;;  %v8512_v23 = vadd.s32 4294967169, %v4910_v11 }
 0x47c   :  { %vm8507_vm0 = vcmp.lt.s32.totalorder %v8506_v18, 0  ;;  %v12402_v35 = vmul.u32.u64.low %v4851_v43, %v4850_v51  ;;  %v12403_v39 = vmul.u32.u64.high %v4851_v43, %v4850_v51, %v12402_v35  ;;  %v4858_v37 = vmul.u32 %v4851_v43, %v4842_v33 }
 0x47d   :  { %v4771_v4 = vsel %vm8507_vm0, 0, %v8506_v18  ;;  %v4913_v14 = vand.u32 8388607, %v4906_v41  ;;  %v4916_v44 = vadd.s32 1, %v8512_v23  ;;  %v4861_v42 = vadd.s32 1, %v12399_v54 }
 0x47e   :  { %v4772_v52 = vsub.s32 32, %v4771_v4  ;;  %v4773_v55 = vshll.u32 %v4764_v25, %v4771_v4  ;;  %v4776_v27 = vsub.s32 4294967266, %v4771_v4  ;;  %vm4860_vm1 = vc.u32 %v12403_v39, %v12398_v62 }
 0x47f   :  { %v4690_v5 = vand.u32 3, %v4686_v9  ;;  %v4786_v48 = vsub.s32 4, %v12365_v24  ;;  %v4862_v13 = vsel %vm4860_vm1, %v4861_v42, %v12399_v54  ;;  %vm4917_vm2 = vcmp.gt.s32.totalorder %v4916_v44, 0 }
 0x480   :  { %v4774_v58 = vshrl.u32 %v4756_v12, %v4772_v52  ;;  %v4777_v57 = vadd.s32 127, %v4776_v27  ;;  %v4863_v0 = vadd.s32 %v4862_v13, %v4858_v37  ;;  %v4914_v25 = vor.u32 8388608, %v4913_v14 }
 0x481   :  { %v9149_v45 = vpop.eup %9148  ;;  %v4918_v49 = vsel %vm4917_vm2, %v4916_v44, 0  ;;  %vm4702_vm4 = vcmp.lt.s32.totalorder %v12266_v28, 0  ;;  %vm4691_vm5 = vcmp.lt.s32.totalorder %v4690_v5, 2  ;;  %vm4692_vm6 = vcmp.eq.s32.totalorder %v4690_v5, 0 }
 0x482   :  { %v4775_v50 = vor.u32 %v4774_v58, %v4773_v55  ;;  %v4778_v43 = vshll.u32 %v4777_v57, 23  ;;  %v9151_v7 = vpop.eup %9150  ;;  %v4864_v3 = vadd.s32 536870912, %v4863_v0  ;;  %vm4695_vm7 = vcmp.eq.s32.totalorder %v4690_v5, 2 }
 0x483   :  { %v4920_v1 = vand.u32 31, %v4918_v49  ;;  %v12425_v56 = vsel %vm4702_vm4, %v4786_v48, %v12365_v24  ;;  %v12429_v60 = vshll.u32 %v4914_v25, 8  ;;  %v4693_v61 = vxor.u32 2147483648, %v9151_v7 }
 0x484   :  { %v4779_v6 = vor.u32 4788187, %v4778_v43  ;;  %v4782_v31 = vcvt.s32.f32 %v4775_v50  ;;  %v12427_v63 = vshrl.u32 %v4864_v3, 30  ;;  %v4696_v26 = vxor.u32 2147483648, %v9149_v45 }
 0x485   :  { %v4921_v16 = vsub.s32 32, %v4920_v1  ;;  %v4923_v10 = vshll.u32 %v9337_v30, %v4920_v1  ;;  %vm4689_vm8 = vweird.f32 %v12200_v20  ;;  %v4926_v59 = vshll.u32 %v9338_v32, %v4920_v1 }
 0x486   :  { %v4780_v47 = vand.u32 2147483647, %v4779_v6  ;;  %v4866_v15 = vshll.u32 %v12427_v63, 30  ;;  %v4929_v40 = vshll.u32 %v9339_v34, %v4920_v1  ;;  %v4932_v18 = vshll.u32 %v9340_v36, %v4920_v1 }
 0x487   :  { %v4924_v24 = vshrl.u32 %v9338_v32, %v4921_v16  ;;  %v4927_v8 = vshrl.u32 %v9339_v34, %v4921_v16  ;;  %v4930_v11 = vshrl.u32 %v9340_v36, %v4921_v16  ;;  %v4919_v21 = vshrl.u32 %v4918_v49, 5 }
 0x488   :  { %v4783_v53 = vmul.f32 %v4782_v31, %v4780_v47  ;;  %v4867_v2 = vsub.s32 %v4863_v0, %v4866_v15  ;;  %v4933_v12 = vshrl.u32 %v9341_v38, %v4921_v16  ;;  %v4694_v51 = vsel %vm4692_vm6, %v9149_v45, %v4693_v61 }
 0x489   :  { %v4697_v54 = vsel %vm4695_vm7, %v4696_v26, %v9151_v7  ;;  %v4922_v35 = vshrl.u32 %v9337_v30, %v4921_v16  ;;  %v4925_v23 = vor.u32 %v4924_v24, %v4923_v10  ;;  %v4928_v37 = vor.u32 %v4927_v8, %v4926_v59 }
 0x48a   :  { %v4784_v33 = vxor.u32 2147483648, %v4783_v53  ;;  %v4869_v4 = vsub.s32 0, %v4867_v2  ;;  %v4931_v14 = vor.u32 %v4930_v11, %v4929_v40  ;;  %v4934_v55 = vor.u32 %v4933_v12, %v4932_v18 }
 0x48b   :  { %v4935_v27 = vshll.u32 %v9341_v38, %v4920_v1  ;;  %v4936_v44 = vshrl.u32 %v9342_v46, %v4921_v16  ;;  %v4859_v42 = vadd.s32 %v12398_v62, %v12403_v39  ;;  %vm4938_vm9 = vcmp.lt.s32.totalorder %v4919_v21, 1 }
 0x48c   :  { %v4785_v9 = vsel %vm4702_vm4, %v4784_v33, %v4783_v53  ;;  %v8509_v58 = vmin.u32 %v4869_v4, %v4867_v2  ;;  %v4698_v57 = vsel %vm4691_vm5, %v4694_v51, %v4697_v54  ;;  %vm4939_vm10 = vcmp.lt.s32.totalorder %v4919_v21, 2 }
 0x48d   :  { %v4788_v52 = vsel %vm12417_vm3, %v12266_v28, %v4785_v9  ;;  %v4937_v48 = vor.u32 %v4936_v44, %v4935_v27  ;;  %vm4940_vm11 = vcmp.lt.s32.totalorder %v4919_v21, 3  ;;  %vm4941_vm12 = vcmp.lt.s32.totalorder %v4919_v21, 4 }
 0x48e   :  { %9152 = vcosq.f32 %v4788_v52  ;;  %v4871_v13 = vclz %v8509_v58  ;;  %v4942_v45 = vsel %vm4938_vm9, %v4922_v35, %v4925_v23  ;;  %v4943_v50 = vsel %vm4941_vm12, %v4931_v14, 2102212464 }
 0x48f   :  { %9154 = vsinq.f32 %v4788_v52  ;;  %v4946_v43 = vsel %vm4938_vm9, %v4925_v23, %v4928_v37  ;;  %v4947_v0 = vsel %vm4941_vm12, %v4934_v55, 920167782  ;;  %v4950_v25 = vsel %vm4938_vm9, %v4928_v37, %v4931_v14 }
 0x490   :  { %v8510_v7 = vadd.s32 4294967294, %v4871_v13  ;;  %v4944_v49 = vsel %vm4940_vm11, %v4928_v37, %v4943_v50  ;;  %v4948_v6 = vsel %vm4940_vm11, %v4931_v14, %v4947_v0  ;;  %v4951_v31 = vsel %vm4941_vm12, %v4937_v48, 1326507024 }
 0x491   :  { %v12456_v62 = vsel %vm4689_vm8, nan, %v4698_v57  ;;  %v4945_v39 = vsel %vm4939_vm10, %v4942_v45, %v4944_v49  ;;  %v4949_v5 = vsel %vm4939_vm10, %v4946_v43, %v4948_v6  ;;  %v4952_v3 = vsel %vm4940_vm11, %v4934_v55, %v4951_v31 }
 0x492   :  { %vm8511_vm13 = vcmp.lt.s32.totalorder %v8510_v7, 0  ;;  %v4953_v1 = vsel %vm4939_vm10, %v4950_v25, %v4952_v3  ;;  %v12462_v47 = vmul.u32.u64.low %v12429_v60, %v4949_v5  ;;  %v12463_v61 = vmul.u32.u64.high %v12429_v60, %v4949_v5, %v12462_v47 }
 0x493   :  { %v4874_v26 = vsel %vm8511_vm13, 0, %v8510_v7  ;;  %v12466_v16 = vmul.u32.u64.low %v12429_v60, %v4953_v1  ;;  %v12467_v10 = vmul.u32.u64.high %v12429_v60, %v4953_v1, %v12466_v16  ;;  %v4789_v20 = vsel %vm12417_vm3, 0, %v12425_v56 }
 0x494   :  { %v4875_v53 = vsub.s32 32, %v4874_v26  ;;  %v4876_v15 = vshll.u32 %v4867_v2, %v4874_v26  ;;  %v4879_v59 = vsub.s32 4294967266, %v4874_v26  ;;  %v4961_v40 = vmul.u32 %v12429_v60, %v4945_v39 }
 0x495   :  { %v5012_v24 = vand.u32 2139095040, %v12456_v62  ;;  %v4964_v18 = vadd.s32 1, %v12463_v61  ;;  %v4793_v33 = vand.u32 3, %v4789_v20  ;;  %vm4963_vm14 = vc.u32 %v12467_v10, %v12462_v47 }
 0x496   :  { %v4877_v8 = vshrl.u32 %v4859_v42, %v4875_v53  ;;  %v4880_v11 = vadd.s32 127, %v4879_v59  ;;  %v5009_v56 = vand.u32 2147483647, %v12456_v62  ;;  %v4889_v4 = vsub.s32 4, %v12427_v63 }
 0x497   :  { %v5013_v21 = vshrl.u32 %v5012_v24, 23  ;;  %v4965_v22 = vsel %vm4963_vm14, %v4964_v18, %v12463_v61  ;;  %vm4795_vm15 = vcmp.eq.s32.totalorder %v4793_v33, 0  ;;  %vm4798_vm0 = vcmp.eq.s32.totalorder %v4793_v33, 2 }
 0x498   :  { %v4878_v12 = vor.u32 %v4877_v8, %v4876_v15  ;;  %v4881_v51 = vshll.u32 %v4880_v11, 23  ;;  %v4966_v54 = vadd.s32 %v4965_v22, %v4961_v40  ;;  %v5016_v44 = vand.u32 8388607, %v5009_v56 }
 0x499   :  { %v8516_v35 = vadd.s32 4294967169, %v5013_v21  ;;  %vm4805_vm1 = vcmp.lt.s32.totalorder %v12309_v17, 0  ;;  %vm4794_vm3 = vcmp.lt.s32.totalorder %v4793_v33, 2  ;;  %vm12490_vm4 = vcmp.le.f32.partialorder %v4803_v29, 0.7853982 }
 0x49a   :  { %v4882_v23 = vor.u32 4788187, %v4881_v51  ;;  %v4885_v9 = vcvt.s32.f32 %v4878_v12  ;;  %v4967_v52 = vadd.s32 536870912, %v4966_v54  ;;  %v4890_v57 = vsel %vm4805_vm1, %v4889_v4, %v12427_v63 }
 0x49b   :  { %v9153_v2 = vpop.eup %9152  ;;  %v5019_v55 = vadd.s32 1, %v8516_v35  ;;  %v5017_v25 = vor.u32 8388608, %v5016_v44  ;;  %vm4792_vm5 = vweird.f32 %v12266_v28  ;;  %v4892_v63 = vsel %vm12490_vm4, 0, %v4890_v57 }
 0x49c   :  { %v9155_v60 = vpop.eup %9154  ;;  %v4799_v14 = vxor.u32 2147483648, %v9153_v2  ;;  %v4883_v27 = vand.u32 2147483647, %v4882_v23  ;;  %v12482_v42 = vshrl.u32 %v4967_v52, 30  ;;  %v4962_v1 = vadd.s32 %v12462_v47, %v12467_v10 }
 0x49d   :  { %v4796_v37 = vxor.u32 2147483648, %v9155_v60  ;;  %vm5020_vm2 = vcmp.gt.s32.totalorder %v5019_v55, 0  ;;  %v12507_v53 = vshll.u32 %v5017_v25, 8  ;;  %v4896_v57 = vand.u32 3, %v4892_v63 }
 0x49e   :  { %v4886_v58 = vmul.f32 %v4885_v9, %v4883_v27  ;;  %v5021_v48 = vsel %vm5020_vm2, %v5019_v55, 0  ;;  %v4800_v45 = vsel %vm4798_vm0, %v4799_v14, %v9155_v60  ;;  %v4969_v50 = vshll.u32 %v12482_v42, 30 }
 0x49f   :  { %v4797_v13 = vsel %vm4795_vm15, %v9153_v2, %v4796_v37  ;;  %v5023_v7 = vand.u32 31, %v5021_v48  ;;  %v5022_v6 = vshrl.u32 %v5021_v48, 5  ;;  %vm4901_vm11 = vcmp.eq.s32.totalorder %v4896_v57, 2 }
 0x4a0   :  { %v4887_v0 = vxor.u32 2147483648, %v4886_v58  ;;  %v4970_v49 = vsub.s32 %v4966_v54, %v4969_v50  ;;  %v4801_v31 = vsel %vm4794_vm3, %v4797_v13, %v4800_v45  ;;  %vm4898_vm12 = vcmp.eq.s32.totalorder %v4896_v57, 0 }
 0x4a1   :  { %v5024_v5 = vsub.s32 32, %v5023_v7  ;;  %v5026_v29 = vshll.u32 %v9337_v30, %v5023_v7  ;;  %v5029_v26 = vshll.u32 %v9338_v32, %v5023_v7  ;;  %v12511_v15 = vsel %vm4792_vm5, nan, %v4801_v31 }
 0x4a2   :  { %v4888_v39 = vsel %vm4805_vm1, %v4887_v0, %v4886_v58  ;;  %v4972_v61 = vsub.s32 0, %v4970_v49  ;;  %vm5041_vm6 = vcmp.lt.s32.totalorder %v5022_v6, 1  ;;  %v5032_v24 = vshll.u32 %v9339_v34, %v5023_v7 }
 0x4a3   :  { %v4891_v3 = vsel %vm12490_vm4, %v12309_v17, %v4888_v39  ;;  %v5027_v16 = vshrl.u32 %v9338_v32, %v5024_v5  ;;  %v5030_v20 = vshrl.u32 %v9339_v34, %v5024_v5  ;;  %v5025_v40 = vshrl.u32 %v9337_v30, %v5024_v5 }
 0x4a4   :  { %9156 = vcosq.f32 %v4891_v3  ;;  %v8513_v59 = vmin.u32 %v4972_v61, %v4970_v49  ;;  %v5033_v11 = vshrl.u32 %v9340_v36, %v5024_v5  ;;  %v5035_v18 = vshll.u32 %v9340_v36, %v5023_v7 }
 0x4a5   :  { %9158 = vsinq.f32 %v4891_v3  ;;  %v5028_v47 = vor.u32 %v5027_v16, %v5026_v29  ;;  %v5031_v10 = vor.u32 %v5030_v20, %v5029_v26  ;;  %v5036_v33 = vshrl.u32 %v9341_v38, %v5024_v5 }
 0x4a6   :  { %v4974_v8 = vclz %v8513_v59  ;;  %v5038_v28 = vshll.u32 %v9341_v38, %v5023_v7  ;;  %v5039_v21 = vshrl.u32 %v9342_v46, %v5024_v5  ;;  %vm5042_vm7 = vcmp.lt.s32.totalorder %v5022_v6, 2 }
 0x4a7   :  { %vm5044_vm8 = vcmp.lt.s32.totalorder %v5022_v6, 4  ;;  %v5034_v51 = vor.u32 %v5033_v11, %v5032_v24  ;;  %v5037_v22 = vor.u32 %v5036_v33, %v5035_v18  ;;  %vm5043_vm9 = vcmp.lt.s32.totalorder %v5022_v6, 3 }
 0x4a8   :  { %v8514_v12 = vadd.s32 4294967294, %v4974_v8  ;;  %v5040_v2 = vor.u32 %v5039_v21, %v5038_v28  ;;  %v5045_v54 = vsel %vm5041_vm6, %v5025_v40, %v5028_v47  ;;  %v5049_v35 = vsel %vm5041_vm6, %v5028_v47, %v5031_v10 }
 0x4a9   :  { %v5115_v60 = vand.u32 2139095040, %v12511_v15  ;;  %v5046_v23 = vsel %vm5044_vm8, %v5034_v51, 2102212464  ;;  %v5050_v9 = vsel %vm5044_vm8, %v5037_v22, 920167782  ;;  %v5053_v4 = vsel %vm5041_vm6, %v5031_v10, %v5034_v51 }
 0x4aa   :  { %vm8515_vm10 = vcmp.lt.s32.totalorder %v8514_v12, 0  ;;  %v5047_v14 = vsel %vm5043_vm9, %v5031_v10, %v5046_v23  ;;  %v5051_v52 = vsel %vm5043_vm9, %v5034_v51, %v5050_v9  ;;  %v5054_v55 = vsel %vm5044_vm8, %v5040_v2, 1326507024 }
 0x4ab   :  { %v4977_v37 = vsel %vm8515_vm10, 0, %v8514_v12  ;;  %v5052_v48 = vsel %vm5042_vm7, %v5049_v35, %v5051_v52  ;;  %v5055_v13 = vsel %vm5043_vm9, %v5037_v22, %v5054_v55  ;;  %v5116_v45 = vshrl.u32 %v5115_v60, 23 }
 0x4ac   :  { %v4978_v27 = vsub.s32 32, %v4977_v37  ;;  %v4979_v44 = vshll.u32 %v4970_v49, %v4977_v37  ;;  %v4982_v58 = vsub.s32 4294967266, %v4977_v37  ;;  %v5048_v0 = vsel %vm5042_vm7, %v5045_v54, %v5047_v14 }
 0x4ad   :  { %v5056_v25 = vsel %vm5042_vm7, %v5053_v4, %v5055_v13  ;;  %v12538_v39 = vmul.u32.u64.low %v12507_v53, %v5052_v48  ;;  %v12539_v49 = vmul.u32.u64.high %v12507_v53, %v5052_v48, %v12538_v39  ;;  %v5112_v3 = vand.u32 2147483647, %v12511_v15 }
 0x4ae   :  { %v4980_v50 = vshrl.u32 %v4962_v1, %v4978_v27  ;;  %v4983_v43 = vadd.s32 127, %v4982_v58  ;;  %v12534_v7 = vmul.u32.u64.low %v12507_v53, %v5056_v25  ;;  %v12535_v31 = vmul.u32.u64.high %v12507_v53, %v5056_v25, %v12534_v7 }
 0x4af   :  { %v8520_v1 = vadd.s32 4294967169, %v5116_v45  ;;  %v5064_v6 = vmul.u32 %v12507_v53, %v5048_v0  ;;  %v5067_v47 = vadd.s32 1, %v12539_v49  ;;  %v5119_v24 = vand.u32 8388607, %v5112_v3 }
 0x4b0   :  { %v4981_v5 = vor.u32 %v4980_v50, %v4979_v44  ;;  %v4984_v29 = vshll.u32 %v4983_v43, 23  ;;  %vm5066_vm13 = vc.u32 %v12535_v31, %v12538_v39  ;;  %vm4897_vm15 = vcmp.lt.s32.totalorder %v4896_v57, 2 }
 0x4b1   :  { %v9157_v63 = vpop.eup %9156  ;;  %v5122_v40 = vadd.s32 1, %v8520_v1  ;;  %v5068_v53 = vsel %vm5066_vm13, %v5067_v47, %v12539_v49  ;;  %vm4895_vm0 = vweird.f32 %v12309_v17  ;;  %vm12554_vm1 = vcmp.le.f32.partialorder %v4906_v41, 0.7853982 }
 0x4b2   :  { %v9159_v61 = vpop.eup %9158  ;;  %v4902_v26 = vxor.u32 2147483648, %v9157_v63  ;;  %v4985_v20 = vor.u32 4788187, %v4984_v29  ;;  %v4988_v59 = vcvt.s32.f32 %v4981_v5  ;;  %v5069_v28 = vadd.s32 %v5068_v53, %v5064_v6 }
 0x4b3   :  { %v4899_v16 = vxor.u32 2147483648, %v9159_v61  ;;  %vm5123_vm14 = vcmp.gt.s32.totalorder %v5122_v40, 0  ;;  %vm4908_vm2 = vcmp.lt.s32.totalorder %v12380_v19, 0  ;;  %v4992_v2 = vsub.s32 4, %v12482_v42 }
 0x4b4   :  { %v4986_v10 = vand.u32 2147483647, %v4985_v20  ;;  %v4903_v8 = vsel %vm4901_vm11, %v4902_v26, %v9159_v61  ;;  %v5124_v11 = vsel %vm5123_vm14, %v5122_v40, 0  ;;  %v5070_v54 = vadd.s32 536870912, %v5069_v28 }
 0x4b5   :  { %v4900_v18 = vsel %vm4898_vm12, %v9157_v63, %v4899_v16  ;;  %v5125_v21 = vshrl.u32 %v5124_v11, 5  ;;  %v5126_v51 = vand.u32 31, %v5124_v11  ;;  %v5120_v35 = vor.u32 8388608, %v5119_v24 }
 0x4b6   :  { %v4989_v33 = vmul.f32 %v4988_v59, %v4986_v10  ;;  %v4904_v60 = vsel %vm4897_vm15, %v4900_v18, %v4903_v8  ;;  %v12565_v37 = vshrl.u32 %v5070_v54, 30  ;;  %v4993_v63 = vsel %vm4908_vm2, %v4992_v2, %v12482_v42 }
 0x4b7   :  { %v5127_v23 = vsub.s32 32, %v5126_v51  ;;  %v5129_v9 = vshll.u32 %v9337_v30, %v5126_v51  ;;  %v5132_v4 = vshll.u32 %v9338_v32, %v5126_v51  ;;  %v5135_v14 = vshll.u32 %v9339_v34, %v5126_v51 }
 0x4b8   :  { %v4990_v22 = vxor.u32 2147483648, %v4989_v33  ;;  %vm5144_vm3 = vcmp.lt.s32.totalorder %v5125_v21, 1  ;;  %v5138_v44 = vshll.u32 %v9340_v36, %v5126_v51  ;;  %v5072_v58 = vshll.u32 %v12565_v37, 30 }
 0x4b9   :  { %v5130_v55 = vshrl.u32 %v9338_v32, %v5127_v23  ;;  %v5133_v27 = vshrl.u32 %v9339_v34, %v5127_v23  ;;  %v5136_v57 = vshrl.u32 %v9340_v36, %v5127_v23  ;;  %v5141_v48 = vshll.u32 %v9341_v38, %v5126_v51 }
 0x4ba   :  { %v4991_v41 = vsel %vm4908_vm2, %v4990_v22, %v4989_v33  ;;  %v5139_v50 = vshrl.u32 %v9341_v38, %v5127_v23  ;;  %v5073_v43 = vsub.s32 %v5069_v28, %v5072_v58  ;;  %v5128_v0 = vshrl.u32 %v9337_v30, %v5127_v23 }
 0x4bb   :  { %v4994_v52 = vsel %vm12554_vm1, %v12380_v19, %v4991_v41  ;;  %v5131_v13 = vor.u32 %v5130_v55, %v5129_v9  ;;  %v5134_v45 = vor.u32 %v5133_v27, %v5132_v4  ;;  %v5137_v25 = vor.u32 %v5136_v57, %v5135_v14 }
 0x4bc   :  { %9160 = vcosq.f32 %v4994_v52  ;;  %v5142_v7 = vshrl.u32 %v9342_v46, %v5127_v23  ;;  %v12582_v49 = vsel %vm4895_vm0, nan, %v4904_v60  ;;  %v5140_v5 = vor.u32 %v5139_v50, %v5138_v44 }
 0x4bd   :  { %9162 = vsinq.f32 %v4994_v52  ;;  %vm5147_vm4 = vcmp.lt.s32.totalorder %v5125_v21, 4  ;;  %v5075_v29 = vsub.s32 0, %v5073_v43  ;;  %vm5146_vm5 = vcmp.lt.s32.totalorder %v5125_v21, 3 }
 0x4be   :  { %v5143_v1 = vor.u32 %v5142_v7, %v5141_v48  ;;  %v5160_v61 = vshll.u32 %v5120_v35, 8  ;;  %vm5145_vm6 = vcmp.lt.s32.totalorder %v5125_v21, 2  ;;  %v5149_v26 = vsel %vm5147_vm4, %v5137_v25, 2102212464 }
 0x4bf   :  { %v5152_v6 = vsel %vm5144_vm3, %v5131_v13, %v5134_v45  ;;  %v5153_v16 = vsel %vm5147_vm4, %v5140_v5, 920167782  ;;  %v8517_v20 = vmin.u32 %v5075_v29, %v5073_v43  ;;  %v5148_v17 = vsel %vm5144_vm3, %v5128_v0, %v5131_v13 }
 0x4c0   :  { %v5156_v59 = vsel %vm5144_vm3, %v5134_v45, %v5137_v25  ;;  %v5218_v40 = vand.u32 2139095040, %v12582_v49  ;;  %v5150_v42 = vsel %vm5146_vm5, %v5134_v45, %v5149_v26  ;;  %v5154_v47 = vsel %vm5146_vm5, %v5137_v25, %v5153_v16 }
 0x4c1   :  { %v5157_v10 = vsel %vm5147_vm4, %v5143_v1, 1326507024  ;;  %v4995_v24 = vsel %vm12554_vm1, 0, %v4993_v63  ;;  %v5077_v8 = vclz %v8517_v20  ;;  %v5155_v53 = vsel %vm5145_vm6, %v5152_v6, %v5154_v47 }
 0x4c2   :  { %v5158_v11 = vsel %vm5146_vm5, %v5140_v5, %v5157_v10  ;;  %v5151_v18 = vsel %vm5145_vm6, %v5148_v17, %v5150_v42  ;;  %v12599_v28 = vmul.u32.u64.low %v5160_v61, %v5155_v53  ;;  %v12600_v51 = vmul.u32.u64.high %v5160_v61, %v5155_v53, %v12599_v28 }
 0x4c3   :  { %v5159_v33 = vsel %vm5145_vm6, %v5156_v59, %v5158_v11  ;;  %v8518_v22 = vadd.s32 4294967294, %v5077_v8  ;;  %v5219_v35 = vshrl.u32 %v5218_v40, 23  ;;  %v5065_v12 = vadd.s32 %v12538_v39, %v12535_v31 }
 0x4c4   :  { %v12603_v2 = vmul.u32.u64.low %v5160_v61, %v5159_v33  ;;  %v12604_v54 = vmul.u32.u64.high %v5160_v61, %v5159_v33, %v12603_v2  ;;  %v4999_v9 = vand.u32 3, %v4995_v24  ;;  %v5167_v41 = vmul.u32 %v5160_v61, %v5151_v18 }
 0x4c5   :  { %vm8519_vm7 = vcmp.lt.s32.totalorder %v8518_v22, 0  ;;  %v8524_v60 = vadd.s32 4294967169, %v5219_v35  ;;  %v5170_v21 = vadd.s32 1, %v12600_v51  ;;  %v5215_v44 = vand.u32 2147483647, %v12582_v49 }
 0x4c6   :  { %v5080_v4 = vsel %vm8519_vm7, 0, %v8518_v22  ;;  %vm5169_vm8 = vc.u32 %v12604_v54, %v12599_v28  ;;  %vm5004_vm9 = vcmp.eq.s32.totalorder %v4999_v9, 2  ;;  %vm4998_vm11 = vweird.f32 %v12380_v19 }
 0x4c7   :  { %v5081_v52 = vsub.s32 32, %v5080_v4  ;;  %v5082_v55 = vshll.u32 %v5073_v43, %v5080_v4  ;;  %v5085_v27 = vsub.s32 4294967266, %v5080_v4  ;;  %v5225_v58 = vadd.s32 1, %v8524_v60 }
 0x4c8   :  { %v5171_v48 = vsel %vm5169_vm8, %v5170_v21, %v12600_v51  ;;  %vm5001_vm12 = vcmp.eq.s32.totalorder %v4999_v9, 0  ;;  %vm5000_vm13 = vcmp.lt.s32.totalorder %v4999_v9, 2  ;;  %vm12616_vm14 = vcmp.le.f32.partialorder %v5009_v56, 0.7853982 }
 0x4c9   :  { %v9161_v23 = vpop.eup %9160  ;;  %v5083_v31 = vshrl.u32 %v5065_v12, %v5081_v52  ;;  %v5086_v39 = vadd.s32 127, %v5085_v27  ;;  %v5172_v45 = vadd.s32 %v5171_v48, %v5167_v41  ;;  %vm5226_vm10 = vcmp.gt.s32.totalorder %v5225_v58, 0 }
 0x4ca   :  { %v9163_v14 = vpop.eup %9162  ;;  %v5005_v57 = vxor.u32 2147483648, %v9161_v23  ;;  %v5227_v0 = vsel %vm5226_vm10, %v5225_v58, 0  ;;  %v5222_v61 = vand.u32 8388607, %v5215_v44  ;;  %vm5011_vm15 = vcmp.lt.s32.totalorder %v12456_v62, 0 }
 0x4cb   :  { %v5002_v13 = vxor.u32 2147483648, %v9163_v14  ;;  %v5084_v50 = vor.u32 %v5083_v31, %v5082_v55  ;;  %v5087_v43 = vshll.u32 %v5086_v39, 23  ;;  %v5173_v7 = vadd.s32 536870912, %v5172_v45 }
 0x4cc   :  { %v5229_v63 = vand.u32 31, %v5227_v0  ;;  %v5006_v5 = vsel %vm5004_vm9, %v5005_v57, %v9163_v14  ;;  %v5228_v16 = vshrl.u32 %v5227_v0, 5  ;;  %v5223_v51 = vor.u32 8388608, %v5222_v61 }
 0x4cd   :  { %v5088_v29 = vor.u32 4788187, %v5087_v43  ;;  %v5091_v1 = vcvt.s32.f32 %v5084_v50  ;;  %v5003_v26 = vsel %vm5001_vm12, %v9161_v23, %v5002_v13  ;;  %v12622_v6 = vshrl.u32 %v5173_v7, 30 }
 0x4ce   :  { %v5230_v20 = vsub.s32 32, %v5229_v63  ;;  %v5232_v59 = vshll.u32 %v9337_v30, %v5229_v63  ;;  %v5235_v56 = vshll.u32 %v9338_v32, %v5229_v63  ;;  %v5238_v40 = vshll.u32 %v9339_v34, %v5229_v63 }
 0x4cf   :  { %v5089_v17 = vand.u32 2147483647, %v5088_v29  ;;  %v5175_v42 = vshll.u32 %v12622_v6, 30  ;;  %v5241_v10 = vshll.u32 %v9340_v36, %v5229_v63  ;;  %v5244_v24 = vshll.u32 %v9341_v38, %v5229_v63 }
 0x4d0   :  { %v5233_v47 = vshrl.u32 %v9338_v32, %v5230_v20  ;;  %v5236_v53 = vshrl.u32 %v9339_v34, %v5230_v20  ;;  %v5239_v11 = vshrl.u32 %v9340_v36, %v5230_v20  ;;  %v5242_v18 = vshrl.u32 %v9341_v38, %v5230_v20 }
 0x4d1   :  { %v5092_v8 = vmul.f32 %v5091_v1, %v5089_v17  ;;  %v5176_v33 = vsub.s32 %v5172_v45, %v5175_v42  ;;  %v5245_v22 = vshrl.u32 %v9342_v46, %v5230_v20  ;;  %v5007_v2 = vsel %vm5000_vm13, %v5003_v26, %v5006_v5 }
 0x4d2   :  { %v5095_v12 = vsub.s32 4, %v12565_v37  ;;  %v5231_v60 = vshrl.u32 %v9337_v30, %v5230_v20  ;;  %v5234_v4 = vor.u32 %v5233_v47, %v5232_v59  ;;  %v5237_v41 = vor.u32 %v5236_v53, %v5235_v56 }
 0x4d3   :  { %v5093_v35 = vxor.u32 2147483648, %v5092_v8  ;;  %v5178_v23 = vsub.s32 0, %v5176_v33  ;;  %v5240_v21 = vor.u32 %v5239_v11, %v5238_v40  ;;  %v5243_v52 = vor.u32 %v5242_v18, %v5241_v10 }
 0x4d4   :  { %v5246_v55 = vor.u32 %v5245_v22, %v5244_v24  ;;  %vm5247_vm0 = vcmp.lt.s32.totalorder %v5228_v16, 1  ;;  %v12643_v27 = vsel %vm4998_vm11, nan, %v5007_v2  ;;  %v5263_v57 = vshll.u32 %v5223_v51, 8 }
 0x4d5   :  { %v5094_v14 = vsel %vm5011_vm15, %v5093_v35, %v5092_v8  ;;  %v8521_v58 = vmin.u32 %v5178_v23, %v5176_v33  ;;  %vm5248_vm1 = vcmp.lt.s32.totalorder %v5228_v16, 2  ;;  %vm5249_vm2 = vcmp.lt.s32.totalorder %v5228_v16, 3 }
 0x4d6   :  { %v5097_v9 = vsel %vm12616_vm14, %v12456_v62, %v5094_v14  ;;  %vm5250_vm3 = vcmp.lt.s32.totalorder %v5228_v16, 4  ;;  %v5251_v39 = vsel %vm5247_vm0, %v5231_v60, %v5234_v4  ;;  %v5255_v13 = vsel %vm5247_vm0, %v5234_v4, %v5237_v41 }
 0x4d7   :  { %9164 = vcosq.f32 %v5097_v9  ;;  %v5180_v31 = vclz %v8521_v58  ;;  %v5252_v48 = vsel %vm5250_vm3, %v5240_v21, 2102212464  ;;  %v5256_v45 = vsel %vm5250_vm3, %v5243_v52, 920167782 }
 0x4d8   :  { %9166 = vsinq.f32 %v5097_v9  ;;  %v5259_v50 = vsel %vm5247_vm0, %v5237_v41, %v5240_v21  ;;  %v5260_v19 = vsel %vm5250_vm3, %v5246_v55, 1326507024  ;;  %v5253_v0 = vsel %vm5249_vm2, %v5237_v41, %v5252_v48 }
 0x4d9   :  { %v8522_v43 = vadd.s32 4294967294, %v5180_v31  ;;  %v5257_v7 = vsel %vm5249_vm2, %v5240_v21, %v5256_v45  ;;  %v5261_v63 = vsel %vm5249_vm2, %v5243_v52, %v5260_v19  ;;  %v5096_v5 = vsel %vm5011_vm15, %v5095_v12, %v12565_v37 }
 0x4da   :  { %v5168_v29 = vadd.s32 %v12599_v28, %v12604_v54  ;;  %v5258_v1 = vsel %vm5248_vm1, %v5255_v13, %v5257_v7  ;;  %v5262_v61 = vsel %vm5248_vm1, %v5259_v50, %v5261_v63  ;;  %v5321_v17 = vand.u32 2139095040, %v12643_v27 }
 0x4db   :  { %vm8523_vm4 = vcmp.lt.s32.totalorder %v8522_v43, 0  ;;  %v12655_v26 = vmul.u32.u64.low %v5263_v57, %v5262_v61  ;;  %v12656_v20 = vmul.u32.u64.high %v5263_v57, %v5262_v61, %v12655_v26  ;;  %v5254_v56 = vsel %vm5248_vm1, %v5251_v39, %v5253_v0 }
 0x4dc   :  { %v5183_v59 = vsel %vm8523_vm4, 0, %v8522_v43  ;;  %v12660_v40 = vmul.u32.u64.low %v5263_v57, %v5258_v1  ;;  %v12661_v42 = vmul.u32.u64.high %v5263_v57, %v5258_v1, %v12660_v40  ;;  %v5322_v28 = vshrl.u32 %v5321_v17, 23 }
 0x4dd   :  { %v5184_v37 = vsub.s32 32, %v5183_v59  ;;  %v5185_v47 = vshll.u32 %v5176_v33, %v5183_v59  ;;  %v5188_v10 = vsub.s32 4294967266, %v5183_v59  ;;  %v5098_v54 = vsel %vm12616_vm14, 0, %v5096_v5 }
 0x4de   :  { %v5270_v53 = vmul.u32 %v5263_v57, %v5254_v56  ;;  %vm5272_vm5 = vc.u32 %v12656_v20, %v12660_v40  ;;  %v5273_v11 = vadd.s32 1, %v12661_v42  ;;  %v8528_v18 = vadd.s32 4294967169, %v5322_v28 }
 0x4df   :  { %v5186_v24 = vshrl.u32 %v5168_v29, %v5184_v37  ;;  %v5189_v8 = vadd.s32 127, %v5188_v10  ;;  %v5198_v22 = vsub.s32 4, %v12622_v6  ;;  %v5102_v2 = vand.u32 3, %v5098_v54 }
 0x4e0   :  { %v5274_v33 = vsel %vm5272_vm5, %v5273_v11, %v12661_v42  ;;  %v5318_v35 = vand.u32 2147483647, %v12643_v27  ;;  %v5328_v12 = vadd.s32 1, %v8528_v18  ;;  %vm5114_vm6 = vcmp.lt.s32.totalorder %v12511_v15, 0 }
 0x4e1   :  { %v5187_v16 = vor.u32 %v5186_v24, %v5185_v47  ;;  %v5190_v51 = vshll.u32 %v5189_v8, 23  ;;  %v5275_v4 = vadd.s32 %v5274_v33, %v5270_v53  ;;  %v12674_v14 = vsel %vm5114_vm6, %v5198_v22, %v12622_v6 }
 0x4e2   :  { %vm5329_vm7 = vcmp.gt.s32.totalorder %v5328_v12, 0  ;;  %vm5103_vm8 = vcmp.lt.s32.totalorder %v5102_v2, 2  ;;  %vm12678_vm9 = vcmp.le.f32.partialorder %v5112_v3, 0.7853982  ;;  %v5325_v58 = vand.u32 8388607, %v5318_v35 }
 0x4e3   :  { %v5191_v60 = vor.u32 4788187, %v5190_v51  ;;  %v5194_v23 = vcvt.s32.f32 %v5187_v16  ;;  %v5276_v52 = vadd.s32 536870912, %v5275_v4  ;;  %v5330_v55 = vsel %vm5329_vm7, %v5328_v12, 0 }
 0x4e4   :  { %v9165_v25 = vpop.eup %9164  ;;  %v5332_v57 = vand.u32 31, %v5330_v55  ;;  %vm5104_vm10 = vcmp.eq.s32.totalorder %v5102_v2, 0  ;;  %vm5107_vm11 = vcmp.eq.s32.totalorder %v5102_v2, 2  ;;  %vm5101_vm12 = vweird.f32 %v12456_v62 }
 0x4e5   :  { %v9167_v41 = vpop.eup %9166  ;;  %v5192_v21 = vand.u32 2147483647, %v5191_v60  ;;  %v12684_v39 = vshrl.u32 %v5276_v52, 30  ;;  %v5108_v48 = vxor.u32 2147483648, %v9165_v25  ;;  %v5201_v3 = vsel %vm12678_vm9, 0, %v12674_v14 }
 0x4e6   :  { %v5105_v6 = vxor.u32 2147483648, %v9167_v41  ;;  %v5333_v13 = vsub.s32 32, %v5332_v57  ;;  %v5335_v19 = vshll.u32 %v9337_v30, %v5332_v57  ;;  %v5338_v43 = vshll.u32 %v9338_v32, %v5332_v57 }
 0x4e7   :  { %v5195_v31 = vmul.f32 %v5194_v23, %v5192_v21  ;;  %v5278_v50 = vshll.u32 %v12684_v39, 30  ;;  %v5271_v0 = vadd.s32 %v12660_v40, %v12656_v20  ;;  %v5326_v7 = vor.u32 8388608, %v5325_v58 }
 0x4e8   :  { %v5336_v63 = vshrl.u32 %v9338_v32, %v5333_v13  ;;  %v5339_v5 = vshrl.u32 %v9339_v34, %v5333_v13  ;;  %v5341_v61 = vshll.u32 %v9339_v34, %v5332_v57  ;;  %v5342_v26 = vshrl.u32 %v9340_v36, %v5333_v13 }
 0x4e9   :  { %v5196_v45 = vxor.u32 2147483648, %v5195_v31  ;;  %v12698_v1 = vsub.s32 %v5275_v4, %v5278_v50  ;;  %v5106_v17 = vsel %vm5104_vm10, %v9165_v25, %v5105_v6  ;;  %v5109_v59 = vsel %vm5107_vm11, %v5108_v48, %v9167_v41 }
 0x4ea   :  { %v5331_v56 = vshrl.u32 %v5330_v55, 5  ;;  %v5337_v42 = vor.u32 %v5336_v63, %v5335_v19  ;;  %v5340_v37 = vor.u32 %v5339_v5, %v5338_v43  ;;  %v5344_v47 = vshll.u32 %v9340_v36, %v5332_v57 }
 0x4eb   :  { %v5197_v29 = vsel %vm5114_vm6, %v5196_v45, %v5195_v31  ;;  %v5281_v40 = vsub.s32 0, %v12698_v1  ;;  %v5345_v10 = vshrl.u32 %v9341_v38, %v5333_v13  ;;  %v5347_v28 = vshll.u32 %v9341_v38, %v5332_v57 }
 0x4ec   :  { %v5200_v20 = vsel %vm12678_vm9, %v12511_v15, %v5197_v29  ;;  %v5110_v54 = vsel %vm5103_vm8, %v5106_v17, %v5109_v59  ;;  %v5343_v8 = vor.u32 %v5342_v26, %v5341_v61  ;;  %v5366_v53 = vshll.u32 %v5326_v7, 8 }
 0x4ed   :  { %9168 = vcosq.f32 %v5200_v20  ;;  %v8525_v24 = vmin.u32 %v5281_v40, %v12698_v1  ;;  %v5334_v11 = vshrl.u32 %v9337_v30, %v5333_v13  ;;  %v5346_v18 = vor.u32 %v5345_v10, %v5344_v47 }
 0x4ee   :  { %9170 = vsinq.f32 %v5200_v20  ;;  %v5348_v16 = vshrl.u32 %v9342_v46, %v5333_v13  ;;  %vm5350_vm13 = vcmp.lt.s32.totalorder %v5331_v56, 1  ;;  %vm5351_vm14 = vcmp.lt.s32.totalorder %v5331_v56, 2 }
 0x4ef   :  { %v5283_v51 = vclz %v8525_v24  ;;  %vm5352_vm15 = vcmp.lt.s32.totalorder %v5331_v56, 3  ;;  %vm5353_vm0 = vcmp.lt.s32.totalorder %v5331_v56, 4  ;;  %v5358_v12 = vsel %vm5350_vm13, %v5337_v42, %v5340_v37 }
 0x4f0   :  { %v5349_v22 = vor.u32 %v5348_v16, %v5347_v28  ;;  %v5355_v33 = vsel %vm5353_vm0, %v5343_v8, 2102212464  ;;  %v5359_v25 = vsel %vm5353_vm0, %v5346_v18, 920167782  ;;  %v12717_v2 = vsel %vm5101_vm12, nan, %v5110_v54 }
 0x4f1   :  { %v8526_v60 = vadd.s32 4294967294, %v5283_v51  ;;  %v5360_v23 = vsel %vm5352_vm15, %v5343_v8, %v5359_v25  ;;  %v5362_v4 = vsel %vm5350_vm13, %v5340_v37, %v5343_v8  ;;  %v5354_v41 = vsel %vm5350_vm13, %v5334_v11, %v5337_v42 }
 0x4f2   :  { %v5356_v21 = vsel %vm5352_vm15, %v5340_v37, %v5355_v33  ;;  %v5361_v14 = vsel %vm5351_vm14, %v5358_v12, %v5360_v23  ;;  %v5363_v52 = vsel %vm5353_vm0, %v5349_v22, 1326507024  ;;  %v5205_v57 = vand.u32 3, %v5201_v3 }
 0x4f3   :  { %vm8527_vm1 = vcmp.lt.s32.totalorder %v8526_v60, 0  ;;  %v5364_v55 = vsel %vm5352_vm15, %v5346_v18, %v5363_v52  ;;  %v12720_v9 = vmul.u32.u64.low %v5366_v53, %v5361_v14  ;;  %v12721_v58 = vmul.u32.u64.high %v5366_v53, %v5361_v14, %v12720_v9 }
 0x4f4   :  { %v5286_v31 = vsel %vm8527_vm1, 0, %v8526_v60  ;;  %v5365_v6 = vsel %vm5351_vm14, %v5362_v4, %v5364_v55  ;;  %v5357_v45 = vsel %vm5351_vm14, %v5354_v41, %v5356_v21  ;;  %v5424_v43 = vand.u32 2139095040, %v12717_v2 }
 0x4f5   :  { %v5287_v62 = vsub.s32 32, %v5286_v31  ;;  %v5288_v48 = vshll.u32 %v12698_v1, %v5286_v31  ;;  %v5291_v13 = vsub.s32 4294967266, %v5286_v31  ;;  %v5376_v5 = vadd.s32 1, %v12721_v58 }
 0x4f6   :  { %v12726_v50 = vmul.u32.u64.low %v5366_v53, %v5365_v6  ;;  %v12727_v19 = vmul.u32.u64.high %v5366_v53, %v5365_v6, %v12726_v50  ;;  %vm5207_vm2 = vcmp.eq.s32.totalorder %v5205_v57, 0  ;;  %v5373_v3 = vmul.u32 %v5366_v53, %v5357_v45 }
 0x4f7   :  { %v5289_v7 = vshrl.u32 %v5271_v0, %v5287_v62  ;;  %v5292_v63 = vadd.s32 127, %v5291_v13  ;;  %v5425_v61 = vshrl.u32 %v5424_v43, 23  ;;  %vm5210_vm3 = vcmp.eq.s32.totalorder %v5205_v57, 2 }
 0x4f8   :  { %v5421_v59 = vand.u32 2147483647, %v12717_v2  ;;  %vm5375_vm4 = vc.u32 %v12727_v19, %v12720_v9  ;;  %v5301_v37 = vsub.s32 4, %v12684_v39  ;;  %vm5206_vm5 = vcmp.lt.s32.totalorder %v5205_v57, 2 }
 0x4f9   :  { %v5290_v17 = vor.u32 %v5289_v7, %v5288_v48  ;;  %v5293_v1 = vshll.u32 %v5292_v63, 23  ;;  %v8532_v40 = vadd.s32 4294967169, %v5425_v61  ;;  %v5377_v47 = vsel %vm5375_vm4, %v5376_v5, %v12721_v58 }
 0x4fa   :  { %v9169_v29 = vpop.eup %9168  ;;  %v5378_v10 = vadd.s32 %v5377_v47, %v5373_v3  ;;  %vm5217_vm6 = vcmp.lt.s32.totalorder %v12582_v49, 0  ;;  %v5428_v24 = vand.u32 8388607, %v5421_v59  ;;  %vm5204_vm8 = vweird.f32 %v12511_v15 }
 0x4fb   :  { %v9171_v26 = vpop.eup %9170  ;;  %v5211_v56 = vxor.u32 2147483648, %v9169_v29  ;;  %v5294_v42 = vor.u32 4788187, %v5293_v1  ;;  %v5297_v0 = vcvt.s32.f32 %v5290_v17  ;;  %v5431_v28 = vadd.s32 1, %v8532_v40 }
 0x4fc   :  { %v5208_v20 = vxor.u32 2147483648, %v9171_v26  ;;  %v5379_v11 = vadd.s32 536870912, %v5378_v10  ;;  %v12743_v16 = vsel %vm5217_vm6, %v5301_v37, %v12684_v39  ;;  %vm12750_vm9 = vcmp.le.f32.partialorder %v5215_v44, 0.7853982 }
 0x4fd   :  { %v5295_v54 = vand.u32 2147483647, %v5294_v42  ;;  %v5212_v53 = vsel %vm5210_vm3, %v5211_v56, %v9171_v26  ;;  %vm5432_vm7 = vcmp.gt.s32.totalorder %v5431_v28, 0  ;;  %v5304_v23 = vsel %vm12750_vm9, 0, %v12743_v16 }
 0x4fe   :  { %v5209_v8 = vsel %vm5207_vm2, %v9169_v29, %v5208_v20  ;;  %v5433_v51 = vsel %vm5432_vm7, %v5431_v28, 0  ;;  %v12745_v22 = vshrl.u32 %v5379_v11, 30  ;;  %v5429_v4 = vor.u32 8388608, %v5428_v24 }
 0x4ff   :  { %v5298_v18 = vmul.f32 %v5297_v0, %v5295_v54  ;;  %v5435_v33 = vand.u32 31, %v5433_v51  ;;  %v5213_v12 = vsel %vm5206_vm5, %v5209_v8, %v5212_v53  ;;  %v5374_v15 = vadd.s32 %v12720_v9, %v12727_v19 }
 0x500   :  { %v5381_v39 = vshll.u32 %v12745_v22, 30  ;;  %v12763_v52 = vsel %vm5204_vm8, nan, %v5213_v12  ;;  %v5434_v57 = vshrl.u32 %v5433_v51, 5  ;;  %v5469_v5 = vshll.u32 %v5429_v4, 8 }
 0x501   :  { %v5299_v60 = vxor.u32 2147483648, %v5298_v18  ;;  %v5436_v41 = vsub.s32 32, %v5435_v33  ;;  %v5438_v14 = vshll.u32 %v9337_v30, %v5435_v33  ;;  %v5441_v44 = vshll.u32 %v9338_v32, %v5435_v33 }
 0x502   :  { %v5382_v58 = vsub.s32 %v5378_v10, %v5381_v39  ;;  %v5444_v62 = vshll.u32 %v9339_v34, %v5435_v33  ;;  %v5447_v9 = vshll.u32 %v9340_v36, %v5435_v33  ;;  %v5450_v7 = vshll.u32 %v9341_v38, %v5435_v33 }
 0x503   :  { %v5300_v21 = vsel %vm5217_vm6, %v5299_v60, %v5298_v18  ;;  %v5439_v31 = vshrl.u32 %v9338_v32, %v5436_v41  ;;  %v5442_v6 = vshrl.u32 %v9339_v34, %v5436_v41  ;;  %v5437_v13 = vshrl.u32 %v9337_v30, %v5436_v41 }
 0x504   :  { %v5303_v55 = vsel %vm12750_vm9, %v12582_v49, %v5300_v21  ;;  %v5384_v48 = vsub.s32 0, %v5382_v58  ;;  %v5445_v45 = vshrl.u32 %v9340_v36, %v5436_v41  ;;  %v5448_v43 = vshrl.u32 %v9341_v38, %v5436_v41 }
 0x505   :  { %9172 = vcosq.f32 %v5303_v55  ;;  %v5440_v50 = vor.u32 %v5439_v31, %v5438_v14  ;;  %v5443_v19 = vor.u32 %v5442_v6, %v5441_v44  ;;  %v5527_v29 = vand.u32 2139095040, %v12763_v52 }
 0x506   :  { %9174 = vsinq.f32 %v5303_v55  ;;  %v8529_v63 = vmin.u32 %v5384_v48, %v5382_v58  ;;  %v5446_v3 = vor.u32 %v5445_v45, %v5444_v62  ;;  %v5449_v61 = vor.u32 %v5448_v43, %v5447_v9 }
 0x507   :  { %v5451_v26 = vshrl.u32 %v9342_v46, %v5436_v41  ;;  %vm5453_vm10 = vcmp.lt.s32.totalorder %v5434_v57, 1  ;;  %vm5454_vm11 = vcmp.lt.s32.totalorder %v5434_v57, 2  ;;  %vm5455_vm12 = vcmp.lt.s32.totalorder %v5434_v57, 3 }
 0x508   :  { %v5386_v17 = vclz %v8529_v63  ;;  %vm5456_vm13 = vcmp.lt.s32.totalorder %v5434_v57, 4  ;;  %v5457_v20 = vsel %vm5453_vm10, %v5437_v13, %v5440_v50  ;;  %v5461_v40 = vsel %vm5453_vm10, %v5440_v50, %v5443_v19 }
 0x509   :  { %v5452_v1 = vor.u32 %v5451_v26, %v5450_v7  ;;  %v5458_v56 = vsel %vm5456_vm13, %v5446_v3, 2102212464  ;;  %v5462_v37 = vsel %vm5456_vm13, %v5449_v61, 920167782  ;;  %v5465_v47 = vsel %vm5453_vm10, %v5443_v19, %v5446_v3 }
 0x50a   :  { %v8530_v42 = vadd.s32 4294967294, %v5386_v17  ;;  %v5459_v0 = vsel %vm5455_vm12, %v5443_v19, %v5458_v56  ;;  %v5463_v10 = vsel %vm5455_vm12, %v5446_v3, %v5462_v37  ;;  %v5524_v54 = vand.u32 2147483647, %v12763_v52 }
 0x50b   :  { %v5466_v28 = vsel %vm5456_vm13, %v5452_v1, 1326507024  ;;  %v5528_v24 = vshrl.u32 %v5527_v29, 23  ;;  %v5460_v8 = vsel %vm5454_vm11, %v5457_v20, %v5459_v0  ;;  %v5464_v53 = vsel %vm5454_vm11, %v5461_v40, %v5463_v10 }
 0x50c   :  { %vm8531_vm14 = vcmp.lt.s32.totalorder %v8530_v42, 0  ;;  %v5467_v11 = vsel %vm5455_vm12, %v5449_v61, %v5466_v28  ;;  %v12785_v51 = vmul.u32.u64.low %v5469_v5, %v5464_v53  ;;  %v12786_v33 = vmul.u32.u64.high %v5469_v5, %v5464_v53, %v12785_v51 }
 0x50d   :  { %v5389_v18 = vsel %vm8531_vm14, 0, %v8530_v42  ;;  %v5468_v16 = vsel %vm5454_vm11, %v5465_v47, %v5467_v11  ;;  %v8536_v39 = vadd.s32 4294967169, %v5528_v24  ;;  %v5308_v21 = vand.u32 3, %v5304_v23 }
 0x50e   :  { %v5390_v12 = vsub.s32 32, %v5389_v18  ;;  %v5391_v25 = vshll.u32 %v5382_v58, %v5389_v18  ;;  %v5394_v60 = vsub.s32 4294967266, %v5389_v18  ;;  %v5476_v6 = vmul.u32 %v5469_v5, %v5460_v8 }
 0x50f   :  { %v12789_v4 = vmul.u32.u64.low %v5469_v5, %v5468_v16  ;;  %v12790_v41 = vmul.u32.u64.high %v5469_v5, %v5468_v16, %v12789_v4  ;;  %v5534_v55 = vadd.s32 1, %v8536_v39  ;;  %v5479_v57 = vadd.s32 1, %v12786_v33 }
 0x510   :  { %v5392_v14 = vshrl.u32 %v5374_v15, %v5390_v12  ;;  %v5395_v44 = vadd.s32 127, %v5394_v60  ;;  %v5531_v48 = vand.u32 8388607, %v5524_v54  ;;  %vm12797_vm0 = vcmp.le.f32.partialorder %v5318_v35, 0.7853982 }
 0x511   :  { %vm5535_vm15 = vcmp.gt.s32.totalorder %v5534_v55, 0  ;;  %vm5320_vm1 = vcmp.lt.s32.totalorder %v12643_v27, 0  ;;  %vm5478_vm2 = vc.u32 %v12790_v41, %v12785_v51  ;;  %vm5309_vm3 = vcmp.lt.s32.totalorder %v5308_v21, 2 }
 0x512   :  { %v9173_v31 = vpop.eup %9172  ;;  %v5393_v62 = vor.u32 %v5392_v14, %v5391_v25  ;;  %v5396_v9 = vshll.u32 %v5395_v44, 23  ;;  %v5536_v23 = vsel %vm5535_vm15, %v5534_v55, 0  ;;  %v5480_v50 = vsel %vm5478_vm2, %v5479_v57, %v12786_v33 }
 0x513   :  { %v9175_v58 = vpop.eup %9174  ;;  %vm5310_vm4 = vcmp.eq.s32.totalorder %v5308_v21, 0  ;;  %vm5313_vm5 = vcmp.eq.s32.totalorder %v5308_v21, 2  ;;  %v5481_v19 = vadd.s32 %v5480_v50, %v5476_v6  ;;  %v5538_v43 = vand.u32 31, %v5536_v23 }
 0x514   :  { %v5397_v15 = vor.u32 4788187, %v5396_v9  ;;  %v5400_v45 = vcvt.s32.f32 %v5393_v62  ;;  %v5311_v7 = vxor.u32 2147483648, %v9175_v58  ;;  %v5314_v35 = vxor.u32 2147483648, %v9173_v31 }
 0x515   :  { %v5532_v5 = vor.u32 8388608, %v5531_v48  ;;  %v5482_v29 = vadd.s32 536870912, %v5481_v19  ;;  %v5537_v3 = vshrl.u32 %v5536_v23, 5  ;;  %v5539_v61 = vsub.s32 32, %v5538_v43 }
 0x516   :  { %v5398_v63 = vand.u32 2147483647, %v5397_v15  ;;  %v5541_v26 = vshll.u32 %v9337_v30, %v5538_v43  ;;  %vm5307_vm6 = vweird.f32 %v12582_v49  ;;  %v5544_v1 = vshll.u32 %v9338_v32, %v5538_v43 }
 0x517   :  { %v5547_v20 = vshll.u32 %v9339_v34, %v5538_v43  ;;  %v5550_v56 = vshll.u32 %v9340_v36, %v5538_v43  ;;  %v12810_v40 = vshrl.u32 %v5482_v29, 30  ;;  %v5542_v42 = vshrl.u32 %v9338_v32, %v5539_v61 }
 0x518   :  { %v5401_v17 = vmul.f32 %v5400_v45, %v5398_v63  ;;  %v5545_v0 = vshrl.u32 %v9339_v34, %v5539_v61  ;;  %v5553_v37 = vshll.u32 %v9341_v38, %v5538_v43  ;;  %v5548_v10 = vshrl.u32 %v9340_v36, %v5539_v61 }
 0x519   :  { %v5551_v28 = vshrl.u32 %v9341_v38, %v5539_v61  ;;  %v5554_v24 = vshrl.u32 %v9342_v46, %v5539_v61  ;;  %v5312_v8 = vsel %vm5310_vm4, %v9173_v31, %v5311_v7  ;;  %v5315_v53 = vsel %vm5313_vm5, %v5314_v35, %v9175_v58 }
 0x51a   :  { %v5402_v47 = vxor.u32 2147483648, %v5401_v17  ;;  %v5484_v11 = vshll.u32 %v12810_v40, 30  ;;  %v5572_v18 = vshll.u32 %v5532_v5, 8  ;;  %v5543_v33 = vor.u32 %v5542_v42, %v5541_v26 }
 0x51b   :  { %v5546_v12 = vor.u32 %v5545_v0, %v5544_v1  ;;  %v5552_v25 = vor.u32 %v5551_v28, %v5550_v56  ;;  %v5540_v4 = vshrl.u32 %v9337_v30, %v5539_v61  ;;  %vm5556_vm7 = vcmp.lt.s32.totalorder %v5537_v3, 1 }
 0x51c   :  { %v5403_v16 = vsel %vm5320_vm1, %v5402_v47, %v5401_v17  ;;  %v5485_v39 = vsub.s32 %v5481_v19, %v5484_v11  ;;  %v5316_v14 = vsel %vm5309_vm3, %v5312_v8, %v5315_v53  ;;  %v5549_v44 = vor.u32 %v5548_v10, %v5547_v20 }
 0x51d   :  { %v5406_v60 = vsel %vm12797_vm0, %v12643_v27, %v5403_v16  ;;  %v5555_v55 = vor.u32 %v5554_v24, %v5553_v37  ;;  %vm5558_vm8 = vcmp.lt.s32.totalorder %v5537_v3, 3  ;;  %vm5559_vm9 = vcmp.lt.s32.totalorder %v5537_v3, 4 }
 0x51e   :  { %9176 = vcosq.f32 %v5406_v60  ;;  %v5487_v31 = vsub.s32 0, %v5485_v39  ;;  %vm5557_vm10 = vcmp.lt.s32.totalorder %v5537_v3, 2  ;;  %v5561_v6 = vsel %vm5559_vm9, %v5549_v44, 2102212464 }
 0x51f   :  { %9178 = vsinq.f32 %v5406_v60  ;;  %v5564_v57 = vsel %vm5556_vm7, %v5543_v33, %v5546_v12  ;;  %v5565_v62 = vsel %vm5559_vm9, %v5552_v25, 920167782  ;;  %v5404_v9 = vsub.s32 4, %v12745_v22 }
 0x520   :  { %v8533_v48 = vmin.u32 %v5487_v31, %v5485_v39  ;;  %v5560_v58 = vsel %vm5556_vm7, %v5540_v4, %v5543_v33  ;;  %v5562_v21 = vsel %vm5558_vm8, %v5546_v12, %v5561_v6  ;;  %v5566_v23 = vsel %vm5558_vm8, %v5549_v44, %v5565_v62 }
 0x521   :  { %v5568_v15 = vsel %vm5556_vm7, %v5546_v12, %v5549_v44  ;;  %v5569_v45 = vsel %vm5559_vm9, %v5555_v55, 1326507024  ;;  %v12836_v50 = vsel %vm5307_vm6, nan, %v5316_v14  ;;  %v5567_v43 = vsel %vm5557_vm10, %v5564_v57, %v5566_v23 }
 0x522   :  { %v5489_v19 = vclz %v8533_v48  ;;  %v5570_v7 = vsel %vm5558_vm8, %v5552_v25, %v5569_v45  ;;  %v12841_v63 = vmul.u32.u64.low %v5572_v18, %v5567_v43  ;;  %v12842_v5 = vmul.u32.u64.high %v5572_v18, %v5567_v43, %v12841_v63 }
 0x523   :  { %v5571_v35 = vsel %vm5557_vm10, %v5568_v15, %v5570_v7  ;;  %v5563_v61 = vsel %vm5557_vm10, %v5560_v58, %v5562_v21  ;;  %v5405_v49 = vsel %vm5320_vm1, %v5404_v9, %v12745_v22  ;;  %v5630_v1 = vand.u32 2139095040, %v12836_v50 }
 0x524   :  { %v8534_v29 = vadd.s32 4294967294, %v5489_v19  ;;  %v12845_v26 = vmul.u32.u64.low %v5572_v18, %v5571_v35  ;;  %v12846_v17 = vmul.u32.u64.high %v5572_v18, %v5571_v35, %v12845_v26  ;;  %v5477_v20 = vadd.s32 %v12785_v51, %v12790_v41 }
 0x525   :  { %v5579_v42 = vmul.u32 %v5572_v18, %v5563_v61  ;;  %v5582_v0 = vadd.s32 1, %v12842_v5  ;;  %v5631_v37 = vshrl.u32 %v5630_v1, 23  ;;  %v5407_v3 = vsel %vm12797_vm0, 0, %v5405_v49 }
 0x526   :  { %vm8535_vm11 = vcmp.lt.s32.totalorder %v8534_v29, 0  ;;  %vm5581_vm12 = vc.u32 %v12846_v17, %v12841_v63  ;;  %v5627_v22 = vand.u32 2147483647, %v12836_v50  ;;  %v5411_v18 = vand.u32 3, %v5407_v3 }
 0x527   :  { %v5492_v56 = vsel %vm8535_vm11, 0, %v8534_v29  ;;  %v8540_v24 = vadd.s32 4294967169, %v5631_v37  ;;  %v5583_v41 = vsel %vm5581_vm12, %v5582_v0, %v12842_v5  ;;  %vm12862_vm13 = vcmp.le.f32.partialorder %v5421_v59, 0.7853982 }
 0x528   :  { %v5493_v47 = vsub.s32 32, %v5492_v56  ;;  %v5494_v10 = vshll.u32 %v5485_v39, %v5492_v56  ;;  %v5497_v28 = vsub.s32 4294967266, %v5492_v56  ;;  %v5584_v16 = vadd.s32 %v5583_v41, %v5579_v42 }
 0x529   :  { %v5637_v33 = vadd.s32 1, %v8540_v24  ;;  %v5634_v4 = vand.u32 8388607, %v5627_v22  ;;  %vm5413_vm15 = vcmp.eq.s32.totalorder %v5411_v18, 0  ;;  %vm5416_vm0 = vcmp.eq.s32.totalorder %v5411_v18, 2 }
 0x52a   :  { %v5495_v53 = vshrl.u32 %v5477_v20, %v5493_v47  ;;  %v5498_v51 = vadd.s32 127, %v5497_v28  ;;  %v5585_v39 = vadd.s32 536870912, %v5584_v16  ;;  %vm5412_vm1 = vcmp.lt.s32.totalorder %v5411_v18, 2 }
 0x52b   :  { %v9177_v8 = vpop.eup %9176  ;;  %vm5638_vm14 = vcmp.gt.s32.totalorder %v5637_v33, 0  ;;  %vm5423_vm2 = vcmp.lt.s32.totalorder %v12717_v2, 0  ;;  %v5507_v62 = vsub.s32 4, %v12810_v40  ;;  %v12873_v9 = vadd.s32 %v12841_v63, %v12846_v17 }
 0x52c   :  { %v9179_v11 = vpop.eup %9178  ;;  %v5496_v12 = vor.u32 %v5495_v53, %v5494_v10  ;;  %v5499_v25 = vshll.u32 %v5498_v51, 23  ;;  %v5417_v60 = vxor.u32 2147483648, %v9177_v8  ;;  %v5639_v31 = vsel %vm5638_vm14, %v5637_v33, 0 }
 0x52d   :  { %v5414_v14 = vxor.u32 2147483648, %v9179_v11  ;;  %v12868_v6 = vshrl.u32 %v5585_v39, 30  ;;  %v5641_v59 = vand.u32 31, %v5639_v31  ;;  %v5635_v58 = vor.u32 8388608, %v5634_v4 }
 0x52e   :  { %v5500_v44 = vor.u32 4788187, %v5499_v25  ;;  %v5503_v55 = vcvt.s32.f32 %v5496_v12  ;;  %vm5410_vm3 = vweird.f32 %v12643_v27  ;;  %v5418_v15 = vsel %vm5416_vm0, %v5417_v60, %v9179_v11 }
 0x52f   :  { %v5587_v48 = vshll.u32 %v12868_v6, 30  ;;  %v5642_v21 = vsub.s32 32, %v5641_v59  ;;  %v5415_v23 = vsel %vm5413_vm15, %v9177_v8, %v5414_v14  ;;  %v5644_v19 = vshll.u32 %v9337_v30, %v5641_v59 }
 0x530   :  { %v5501_v57 = vand.u32 2147483647, %v5500_v44  ;;  %v5647_v35 = vshll.u32 %v9338_v32, %v5641_v59  ;;  %v5650_v63 = vshll.u32 %v9339_v34, %v5641_v59  ;;  %v5653_v26 = vshll.u32 %v9340_v36, %v5641_v59 }
 0x531   :  { %v12878_v43 = vsub.s32 %v5584_v16, %v5587_v48  ;;  %v5645_v7 = vshrl.u32 %v9338_v32, %v5642_v21  ;;  %v5648_v29 = vshrl.u32 %v9339_v34, %v5642_v21  ;;  %v5651_v61 = vshrl.u32 %v9340_v36, %v5642_v21 }
 0x532   :  { %v5504_v45 = vmul.f32 %v5503_v55, %v5501_v57  ;;  %v5640_v49 = vshrl.u32 %v5639_v31, 5  ;;  %v5654_v1 = vshrl.u32 %v9341_v38, %v5642_v21  ;;  %v12888_v20 = vshll.u32 %v5635_v58, 8 }
 0x533   :  { %v5590_v17 = vsub.s32 0, %v12878_v43  ;;  %v5419_v56 = vsel %vm5412_vm1, %v5415_v23, %v5418_v15  ;;  %v5643_v0 = vshrl.u32 %v9337_v30, %v5642_v21  ;;  %v5656_v37 = vshll.u32 %v9341_v38, %v5641_v59 }
 0x534   :  { %v5505_v5 = vxor.u32 2147483648, %v5504_v45  ;;  %v5646_v10 = vor.u32 %v5645_v7, %v5644_v19  ;;  %v5649_v28 = vor.u32 %v5648_v29, %v5647_v35  ;;  %v5652_v24 = vor.u32 %v5651_v61, %v5650_v63 }
 0x535   :  { %v8537_v47 = vmin.u32 %v5590_v17, %v12878_v43  ;;  %v5655_v8 = vor.u32 %v5654_v1, %v5653_v26  ;;  %v5657_v53 = vshrl.u32 %v9342_v46, %v5642_v21  ;;  %vm5659_vm4 = vcmp.lt.s32.totalorder %v5640_v49, 1 }
 0x536   :  { %v5506_v42 = vsel %vm5423_vm2, %v5505_v5, %v5504_v45  ;;  %vm5660_vm5 = vcmp.lt.s32.totalorder %v5640_v49, 2  ;;  %vm5661_vm6 = vcmp.lt.s32.totalorder %v5640_v49, 3  ;;  %vm5662_vm7 = vcmp.lt.s32.totalorder %v5640_v49, 4 }
 0x537   :  { %v5509_v3 = vsel %vm12862_vm13, %v12717_v2, %v5506_v42  ;;  %v5592_v51 = vclz %v8537_v47  ;;  %v5658_v41 = vor.u32 %v5657_v53, %v5656_v37  ;;  %v5663_v11 = vsel %vm5659_vm4, %v5643_v0, %v5646_v10 }
 0x538   :  { %9180 = vcosq.f32 %v5509_v3  ;;  %v5664_v16 = vsel %vm5662_vm7, %v5652_v24, 2102212464  ;;  %v5667_v33 = vsel %vm5659_vm4, %v5646_v10, %v5649_v28  ;;  %v5668_v12 = vsel %vm5662_vm7, %v5655_v8, 920167782 }
 0x539   :  { %9182 = vsinq.f32 %v5509_v3  ;;  %v8538_v18 = vadd.s32 4294967294, %v5592_v51  ;;  %v5665_v25 = vsel %vm5661_vm6, %v5649_v28, %v5664_v16  ;;  %v5669_v60 = vsel %vm5661_vm6, %v5652_v24, %v5668_v12 }
 0x53a   :  { %v5671_v39 = vsel %vm5659_vm4, %v5649_v28, %v5652_v24  ;;  %v5672_v4 = vsel %vm5662_vm7, %v5658_v41, 1326507024  ;;  %v12902_v14 = vsel %vm5410_vm3, nan, %v5419_v56  ;;  %v5670_v44 = vsel %vm5660_vm5, %v5667_v33, %v5669_v60 }
 0x53b   :  { %vm8539_vm8 = vcmp.lt.s32.totalorder %v8538_v18, 0  ;;  %v5673_v55 = vsel %vm5661_vm6, %v5655_v8, %v5672_v4  ;;  %v12907_v57 = vmul.u32.u64.low %v12888_v20, %v5670_v44  ;;  %v12908_v48 = vmul.u32.u64.high %v12888_v20, %v5670_v44, %v12907_v57 }
 0x53c   :  { %v5595_v31 = vsel %vm8539_vm8, 0, %v8538_v18  ;;  %v5674_v59 = vsel %vm5660_vm5, %v5671_v39, %v5673_v55  ;;  %v5666_v27 = vsel %vm5660_vm5, %v5663_v11, %v5665_v25  ;;  %v5508_v15 = vsel %vm5423_vm2, %v5507_v62, %v12810_v40 }
 0x53d   :  { %v5596_v58 = vsub.s32 32, %v5595_v31  ;;  %v5597_v21 = vshll.u32 %v12878_v43, %v5595_v31  ;;  %v5600_v23 = vsub.s32 4294967266, %v5595_v31  ;;  %v5733_v63 = vand.u32 2139095040, %v12902_v14 }
 0x53e   :  { %v12917_v45 = vmul.u32.u64.low %v12888_v20, %v5674_v59  ;;  %v12918_v19 = vmul.u32.u64.high %v12888_v20, %v5674_v59, %v12917_v45  ;;  %v5610_v5 = vsub.s32 4, %v12868_v6  ;;  %v5682_v43 = vmul.u32 %v12888_v20, %v5666_v27 }
 0x53f   :  { %v5598_v7 = vshrl.u32 %v12873_v9, %v5596_v58  ;;  %v5601_v35 = vadd.s32 127, %v5600_v23  ;;  %v5685_v29 = vadd.s32 1, %v12908_v48  ;;  %v5510_v61 = vsel %vm12862_vm13, 0, %v5508_v15 }
 0x540   :  { %v5734_v62 = vshrl.u32 %v5733_v63, 23  ;;  %vm5526_vm9 = vcmp.lt.s32.totalorder %v12763_v52, 0  ;;  %vm5684_vm10 = vc.u32 %v12918_v19, %v12907_v57  ;;  %v5730_v9 = vand.u32 2147483647, %v12902_v14 }
 0x541   :  { %v5599_v26 = vor.u32 %v5598_v7, %v5597_v21  ;;  %v5602_v40 = vshll.u32 %v5601_v35, 23  ;;  %v5686_v20 = vsel %vm5684_vm10, %v5685_v29, %v12908_v48  ;;  %v5514_v0 = vand.u32 3, %v5510_v61 }
 0x542   :  { %v8544_v56 = vadd.s32 4294967169, %v5734_v62  ;;  %v5611_v13 = vsel %vm5526_vm9, %v5610_v5, %v12868_v6  ;;  %v5687_v37 = vadd.s32 %v5686_v20, %v5682_v43  ;;  %vm12937_vm11 = vcmp.le.f32.partialorder %v5524_v54, 0.7853982 }
 0x543   :  { %v5603_v49 = vor.u32 4788187, %v5602_v40  ;;  %v5606_v1 = vcvt.s32.f32 %v5599_v26  ;;  %v5737_v24 = vand.u32 8388607, %v5730_v9  ;;  %v5613_v51 = vsel %vm12937_vm11, 0, %v5611_v13 }
 0x544   :  { %v5740_v47 = vadd.s32 1, %v8544_v56  ;;  %v5688_v28 = vadd.s32 536870912, %v5687_v37  ;;  %vm5519_vm13 = vcmp.eq.s32.totalorder %v5514_v0, 2  ;;  %vm5516_vm14 = vcmp.eq.s32.totalorder %v5514_v0, 0 }
 0x545   :  { %v9181_v17 = vpop.eup %9180  ;;  %v5604_v3 = vand.u32 2147483647, %v5603_v49  ;;  %vm5513_vm15 = vweird.f32 %v12717_v2  ;;  %vm5515_vm0 = vcmp.lt.s32.totalorder %v5514_v0, 2  ;;  %v12948_v16 = vand.u32 3, %v5613_v51 }
 0x546   :  { %v9183_v42 = vpop.eup %9182  ;;  %v5520_v8 = vxor.u32 2147483648, %v9181_v17  ;;  %vm5741_vm12 = vcmp.gt.s32.totalorder %v5740_v47, 0  ;;  %v12945_v41 = vshrl.u32 %v5688_v28, 30  ;;  %v5738_v12 = vor.u32 8388608, %v5737_v24 }
 0x547   :  { %v5607_v53 = vmul.f32 %v5606_v1, %v5604_v3  ;;  %v5517_v6 = vxor.u32 2147483648, %v9183_v42  ;;  %v5742_v11 = vsel %vm5741_vm12, %v5740_v47, 0  ;;  %v5683_v43 = vadd.s32 %v12907_v57, %v12918_v19 }
 0x548   :  { %v5744_v18 = vand.u32 31, %v5742_v11  ;;  %v5690_v33 = vshll.u32 %v12945_v41, 30  ;;  %v5521_v25 = vsel %vm5519_vm13, %v5520_v8, %v9183_v42  ;;  %v5743_v59 = vshrl.u32 %v5742_v11, 5 }
 0x549   :  { %v5608_v54 = vxor.u32 2147483648, %v5607_v53  ;;  %v5518_v44 = vsel %vm5516_vm14, %v9181_v17, %v5517_v6  ;;  %v5778_v61 = vshll.u32 %v5738_v12, 8  ;;  %vm5619_vm6 = vcmp.eq.s32.totalorder %v12948_v16, 0 }
 0x54a   :  { %v5745_v39 = vsub.s32 32, %v5744_v18  ;;  %v5747_v4 = vshll.u32 %v9337_v30, %v5744_v18  ;;  %v12957_v31 = vsub.s32 %v5687_v37, %v5690_v33  ;;  %v5750_v58 = vshll.u32 %v9338_v32, %v5744_v18 }
 0x54b   :  { %v5609_v60 = vsel %vm5526_vm9, %v5608_v54, %v5607_v53  ;;  %v5753_v21 = vshll.u32 %v9339_v34, %v5744_v18  ;;  %v5756_v35 = vshll.u32 %v9340_v36, %v5744_v18  ;;  %v5522_v5 = vsel %vm5515_vm0, %v5518_v44, %v5521_v25 }
 0x54c   :  { %v5612_v55 = vsel %vm12937_vm11, %v12763_v52, %v5609_v60  ;;  %v5748_v48 = vshrl.u32 %v9338_v32, %v5745_v39  ;;  %v5693_v23 = vsub.s32 0, %v12957_v31  ;;  %v5746_v27 = vshrl.u32 %v9337_v30, %v5745_v39 }
 0x54d   :  { %9184 = vcosq.f32 %v5612_v55  ;;  %v5751_v15 = vshrl.u32 %v9339_v34, %v5745_v39  ;;  %v5754_v7 = vshrl.u32 %v9340_v36, %v5745_v39  ;;  %v5757_v63 = vshrl.u32 %v9341_v38, %v5745_v39 }
 0x54e   :  { %9186 = vsinq.f32 %v5612_v55  ;;  %v5749_v45 = vor.u32 %v5748_v48, %v5747_v4  ;;  %v8541_v29 = vmin.u32 %v5693_v23, %v12957_v31  ;;  %v5759_v17 = vshll.u32 %v9341_v38, %v5744_v18 }
 0x54f   :  { %v5752_v26 = vor.u32 %v5751_v15, %v5750_v58  ;;  %v5755_v40 = vor.u32 %v5754_v7, %v5753_v21  ;;  %v5758_v62 = vor.u32 %v5757_v63, %v5756_v35  ;;  %v5760_v1 = vshrl.u32 %v9342_v46, %v5745_v39 }
 0x550   :  { %v5695_v49 = vclz %v8541_v29  ;;  %vm5762_vm1 = vcmp.lt.s32.totalorder %v5743_v59, 1  ;;  %vm5763_vm2 = vcmp.lt.s32.totalorder %v5743_v59, 2  ;;  %vm5764_vm3 = vcmp.lt.s32.totalorder %v5743_v59, 3 }
 0x551   :  { %vm5765_vm4 = vcmp.lt.s32.totalorder %v5743_v59, 4  ;;  %v5766_v20 = vsel %vm5762_vm1, %v5746_v27, %v5749_v45  ;;  %v5770_v56 = vsel %vm5762_vm1, %v5749_v45, %v5752_v26  ;;  %v5761_v0 = vor.u32 %v5760_v1, %v5759_v17 }
 0x552   :  { %v8542_v42 = vadd.s32 4294967294, %v5695_v49  ;;  %v5767_v57 = vsel %vm5765_vm4, %v5755_v40, 2102212464  ;;  %v5771_v19 = vsel %vm5765_vm4, %v5758_v62, 920167782  ;;  %v12976_v13 = vsel %vm5513_vm15, nan, %v5522_v5 }
 0x553   :  { %v5768_v37 = vsel %vm5764_vm3, %v5752_v26, %v5767_v57  ;;  %v5772_v3 = vsel %vm5764_vm3, %v5755_v40, %v5771_v19  ;;  %v5774_v47 = vsel %vm5762_vm1, %v5752_v26, %v5755_v40  ;;  %v5775_v24 = vsel %vm5765_vm4, %v5761_v0, 1326507024 }
 0x554   :  { %vm8543_vm5 = vcmp.lt.s32.totalorder %v8542_v42, 0  ;;  %v5769_v10 = vsel %vm5763_vm2, %v5766_v20, %v5768_v37  ;;  %v5773_v28 = vsel %vm5763_vm2, %v5770_v56, %v5772_v3  ;;  %v5776_v53 = vsel %vm5764_vm3, %v5758_v62, %v5775_v24 }
 0x555   :  { %v5698_v8 = vsel %vm8543_vm5, 0, %v8542_v42  ;;  %v12983_v51 = vmul.u32.u64.low %v5778_v61, %v5773_v28  ;;  %v12984_v6 = vmul.u32.u64.high %v5778_v61, %v5773_v28, %v12983_v51  ;;  %v5777_v18 = vsel %vm5763_vm2, %v5774_v47, %v5776_v53 }
 0x556   :  { %v5699_v2 = vsub.s32 32, %v5698_v8  ;;  %v5700_v11 = vshll.u32 %v12957_v31, %v5698_v8  ;;  %v5703_v54 = vsub.s32 4294967266, %v5698_v8  ;;  %v5836_v25 = vand.u32 2139095040, %v12976_v13 }
 0x557   :  { %v12989_v33 = vmul.u32.u64.low %v5778_v61, %v5777_v18  ;;  %v12990_v12 = vmul.u32.u64.high %v5778_v61, %v5777_v18, %v12989_v33  ;;  %vm5622_vm7 = vcmp.eq.s32.totalorder %v12948_v16, 2  ;;  %v5785_v48 = vmul.u32 %v5778_v61, %v5769_v10 }
 0x558   :  { %v5701_v39 = vshrl.u32 %v5683_v43, %v5699_v2  ;;  %v5704_v4 = vadd.s32 127, %v5703_v54  ;;  %v5788_v31 = vadd.s32 1, %v12984_v6  ;;  %v5837_v58 = vshrl.u32 %v5836_v25, 23 }
 0x559   :  { %vm5618_vm8 = vcmp.lt.s32.totalorder %v12948_v16, 2  ;;  %v5713_v15 = vsub.s32 4, %v12945_v41  ;;  %vm5787_vm9 = vc.u32 %v12990_v12, %v12983_v51  ;;  %vm5616_vm10 = vweird.f32 %v12763_v52 }
 0x55a   :  { %v9185_v60 = vpop.eup %9184  ;;  %v5702_v21 = vor.u32 %v5701_v39, %v5700_v11  ;;  %v5705_v23 = vshll.u32 %v5704_v4, 23  ;;  %v8548_v45 = vadd.s32 4294967169, %v5837_v58  ;;  %v5789_v5 = vsel %vm5787_vm9, %v5788_v31, %v12984_v6 }
 0x55b   :  { %v9187_v44 = vpop.eup %9186  ;;  %v5623_v55 = vxor.u32 2147483648, %v9185_v60  ;;  %v5790_v43 = vadd.s32 %v5789_v5, %v5785_v48  ;;  %vm5629_vm11 = vcmp.lt.s32.totalorder %v12836_v50, 0  ;;  %v5833_v62 = vand.u32 2147483647, %v12976_v13 }
 0x55c   :  { %v5620_v59 = vxor.u32 2147483648, %v9187_v44  ;;  %v5706_v35 = vor.u32 4788187, %v5705_v23  ;;  %v5709_v63 = vcvt.s32.f32 %v5702_v21  ;;  %v5843_v29 = vadd.s32 1, %v8548_v45 }
 0x55d   :  { %v5624_v27 = vsel %vm5622_vm7, %v5623_v55, %v9187_v44  ;;  %v5791_v40 = vadd.s32 536870912, %v5790_v43  ;;  %v13009_v16 = vsel %vm5629_vm11, %v5713_v15, %v12945_v41  ;;  %vm13017_vm13 = vcmp.le.f32.partialorder %v5627_v22, 0.7853982 }
 0x55e   :  { %v5621_v7 = vsel %vm5619_vm6, %v9185_v60, %v5620_v59  ;;  %v5707_v26 = vand.u32 2147483647, %v5706_v35  ;;  %vm5844_vm12 = vcmp.gt.s32.totalorder %v5843_v29, 0  ;;  %v5716_v0 = vsel %vm13017_vm13, 0, %v13009_v16 }
 0x55f   :  { %v5625_v61 = vsel %vm5618_vm8, %v5621_v7, %v5624_v27  ;;  %v5845_v49 = vsel %vm5844_vm12, %v5843_v29, 0  ;;  %v13013_v20 = vshrl.u32 %v5791_v40, 30  ;;  %v5840_v57 = vand.u32 8388607, %v5833_v62 }
 0x560   :  { %v5710_v17 = vmul.f32 %v5709_v63, %v5707_v26  ;;  %v13011_v1 = vsel %vm5616_vm10, nan, %v5625_v61  ;;  %v5847_v52 = vand.u32 31, %v5845_v49  ;;  %v5846_v24 = vshrl.u32 %v5845_v49, 5 }
 0x561   :  { %v5793_v41 = vshll.u32 %v13013_v20, 30  ;;  %v5939_v47 = vand.u32 2139095040, %v13011_v1  ;;  %v5786_v11 = vadd.s32 %v12983_v51, %v12990_v12  ;;  %v5841_v18 = vor.u32 8388608, %v5840_v57 }
 0x562   :  { %v5711_v42 = vxor.u32 2147483648, %v5710_v17  ;;  %v5848_v19 = vsub.s32 32, %v5847_v52  ;;  %v5850_v3 = vshll.u32 %v9337_v30, %v5847_v52  ;;  %v5853_v22 = vshll.u32 %v9338_v32, %v5847_v52 }
 0x563   :  { %v13035_v28 = vsub.s32 %v5790_v43, %v5793_v41  ;;  %v5856_v8 = vshll.u32 %v9339_v34, %v5847_v52  ;;  %v5859_v2 = vshll.u32 %v9340_v36, %v5847_v52  ;;  %v5862_v4 = vshll.u32 %v9341_v38, %v5847_v52 }
 0x564   :  { %v5712_v37 = vsel %vm5629_vm11, %v5711_v42, %v5710_v17  ;;  %v5851_v53 = vshrl.u32 %v9338_v32, %v5848_v19  ;;  %v5854_v6 = vshrl.u32 %v9339_v34, %v5848_v19  ;;  %v5857_v33 = vshrl.u32 %v9340_v36, %v5848_v19 }
 0x565   :  { %v5715_v10 = vsel %vm13017_vm13, %v12836_v50, %v5712_v37  ;;  %v5796_v54 = vsub.s32 0, %v13035_v28  ;;  %v5860_v39 = vshrl.u32 %v9341_v38, %v5848_v19  ;;  %v5849_v55 = vshrl.u32 %v9337_v30, %v5848_v19 }
 0x566   :  { %9188 = vcosq.f32 %v5715_v10  ;;  %v5852_v25 = vor.u32 %v5851_v53, %v5850_v3  ;;  %v5855_v60 = vor.u32 %v5854_v6, %v5853_v22  ;;  %v5940_v48 = vshrl.u32 %v5939_v47, 23 }
 0x567   :  { %9190 = vsinq.f32 %v5715_v10  ;;  %v8545_v44 = vmin.u32 %v5796_v54, %v13035_v28  ;;  %v5858_v31 = vor.u32 %v5857_v33, %v5856_v8  ;;  %v5861_v58 = vor.u32 %v5860_v39, %v5859_v2 }
 0x568   :  { %v5863_v51 = vshrl.u32 %v9342_v46, %v5848_v19  ;;  %vm5865_vm14 = vcmp.lt.s32.totalorder %v5846_v24, 1  ;;  %vm5867_vm15 = vcmp.lt.s32.totalorder %v5846_v24, 3  ;;  %vm5868_vm0 = vcmp.lt.s32.totalorder %v5846_v24, 4 }
 0x569   :  { %v5798_v12 = vclz %v8545_v44  ;;  %v5881_v59 = vshll.u32 %v5841_v18, 8  ;;  %vm5866_vm1 = vcmp.lt.s32.totalorder %v5846_v24, 2  ;;  %v5870_v23 = vsel %vm5868_vm0, %v5858_v31, 2102212464 }
 0x56a   :  { %v5864_v21 = vor.u32 %v5863_v51, %v5862_v4  ;;  %v5873_v27 = vsel %vm5865_vm14, %v5852_v25, %v5855_v60  ;;  %v5869_v45 = vsel %vm5865_vm14, %v5849_v55, %v5852_v25  ;;  %v5874_v7 = vsel %vm5868_vm0, %v5861_v58, 920167782 }
 0x56b   :  { %v8546_v15 = vadd.s32 4294967294, %v5798_v12  ;;  %v5877_v35 = vsel %vm5865_vm14, %v5855_v60, %v5858_v31  ;;  %v5871_v63 = vsel %vm5867_vm15, %v5855_v60, %v5870_v23  ;;  %v5875_v5 = vsel %vm5867_vm15, %v5858_v31, %v5874_v7 }
 0x56c   :  { %v5878_v43 = vsel %vm5868_vm0, %v5864_v21, 1326507024  ;;  %v8552_v29 = vadd.s32 4294967169, %v5940_v48  ;;  %v5876_v61 = vsel %vm5866_vm1, %v5873_v27, %v5875_v5  ;;  %v5936_v40 = vand.u32 2147483647, %v13011_v1 }
 0x56d   :  { %vm8547_vm2 = vcmp.lt.s32.totalorder %v8546_v15, 0  ;;  %v5879_v26 = vsel %vm5867_vm15, %v5861_v58, %v5878_v43  ;;  %v13056_v49 = vmul.u32.u64.low %v5881_v59, %v5876_v61  ;;  %v13057_v52 = vmul.u32.u64.high %v5881_v59, %v5876_v61, %v13056_v49 }
 0x56e   :  { %v5801_v17 = vsel %vm8547_vm2, 0, %v8546_v15  ;;  %v5880_v16 = vsel %vm5866_vm1, %v5877_v35, %v5879_v26  ;;  %v5872_v57 = vsel %vm5866_vm1, %v5869_v45, %v5871_v63  ;;  %v13062_v19 = vand.u32 3, %v5716_v0 }
 0x56f   :  { %v5802_v56 = vsub.s32 32, %v5801_v17  ;;  %v5803_v42 = vshll.u32 %v13035_v28, %v5801_v17  ;;  %v5806_v41 = vsub.s32 4294967266, %v5801_v17  ;;  %v5946_v22 = vadd.s32 1, %v8552_v29 }
 0x570   :  { %v13064_v37 = vmul.u32.u64.low %v5881_v59, %v5880_v16  ;;  %v13065_v3 = vmul.u32.u64.high %v5881_v59, %v5880_v16, %v13064_v37  ;;  %v5888_v53 = vmul.u32 %v5881_v59, %v5872_v57  ;;  %v5891_v6 = vadd.s32 1, %v13057_v52 }
 0x571   :  { %v5804_v10 = vshrl.u32 %v5786_v11, %v5802_v56  ;;  %v5807_v8 = vadd.s32 127, %v5806_v41  ;;  %v5943_v2 = vand.u32 8388607, %v5936_v40  ;;  %vm5947_vm3 = vcmp.gt.s32.totalorder %v5946_v22, 0 }
 0x572   :  { %v5948_v18 = vsel %vm5947_vm3, %v5946_v22, 0  ;;  %vm5725_vm4 = vcmp.eq.s32.totalorder %v13062_v19, 2  ;;  %vm5732_vm5 = vcmp.lt.s32.totalorder %v12902_v14, 0  ;;  %vm5890_vm6 = vc.u32 %v13065_v3, %v13056_v49 }
 0x573   :  { %v9189_v47 = vpop.eup %9188  ;;  %v5805_v54 = vor.u32 %v5804_v10, %v5803_v42  ;;  %v5808_v24 = vshll.u32 %v5807_v8, 23  ;;  %vm13076_vm7 = vcmp.le.f32.partialorder %v5730_v9, 0.7853982  ;;  %v5892_v60 = vsel %vm5890_vm6, %v5891_v6, %v13057_v52 }
 0x574   :  { %v5726_v28 = vxor.u32 2147483648, %v9189_v47  ;;  %v9191_v0 = vpop.eup %9190  ;;  %vm5721_vm8 = vcmp.lt.s32.totalorder %v13062_v19, 2  ;;  %vm5722_vm9 = vcmp.eq.s32.totalorder %v13062_v19, 0  ;;  %v5893_v39 = vadd.s32 %v5892_v60, %v5888_v53 }
 0x575   :  { %v5809_v33 = vor.u32 4788187, %v5808_v24  ;;  %v5812_v25 = vcvt.s32.f32 %v5805_v54  ;;  %v5950_v4 = vand.u32 31, %v5948_v18  ;;  %v5723_v44 = vxor.u32 2147483648, %v9191_v0 }
 0x576   :  { %v5727_v55 = vsel %vm5725_vm4, %v5726_v28, %v9191_v0  ;;  %v5944_v31 = vor.u32 8388608, %v5943_v2  ;;  %v5894_v58 = vadd.s32 536870912, %v5893_v39  ;;  %v5949_v51 = vshrl.u32 %v5948_v18, 5 }
 0x577   :  { %v5810_v48 = vand.u32 2147483647, %v5809_v33  ;;  %v5951_v9 = vsub.s32 32, %v5950_v4  ;;  %v5953_v12 = vshll.u32 %v9337_v30, %v5950_v4  ;;  %v5956_v21 = vshll.u32 %v9338_v32, %v5950_v4 }
 0x578   :  { %v5959_v23 = vshll.u32 %v9339_v34, %v5950_v4  ;;  %v5962_v27 = vshll.u32 %v9340_v36, %v5950_v4  ;;  %v13087_v15 = vshrl.u32 %v5894_v58, 30  ;;  %v5965_v35 = vshll.u32 %v9341_v38, %v5950_v4 }
 0x579   :  { %v5813_v59 = vmul.f32 %v5812_v25, %v5810_v48  ;;  %v5954_v45 = vshrl.u32 %v9338_v32, %v5951_v9  ;;  %v5957_v7 = vshrl.u32 %v9339_v34, %v5951_v9  ;;  %v5960_v5 = vshrl.u32 %v9340_v36, %v5951_v9 }
 0x57a   :  { %v5963_v43 = vshrl.u32 %v9341_v38, %v5951_v9  ;;  %v5966_v29 = vshrl.u32 %v9342_v46, %v5951_v9  ;;  %v5724_v61 = vsel %vm5722_vm9, %v9189_v47, %v5723_v44  ;;  %v5896_v26 = vshll.u32 %v13087_v15, 30 }
 0x57b   :  { %v5814_v63 = vxor.u32 2147483648, %v5813_v59  ;;  %v5955_v17 = vor.u32 %v5954_v45, %v5953_v12  ;;  %vm5968_vm10 = vcmp.lt.s32.totalorder %v5949_v51, 1  ;;  %v5958_v52 = vor.u32 %v5957_v7, %v5956_v21 }
 0x57c   :  { %v5961_v56 = vor.u32 %v5960_v5, %v5959_v23  ;;  %v5964_v42 = vor.u32 %v5963_v43, %v5962_v27  ;;  %v5897_v57 = vsub.s32 %v5893_v39, %v5896_v26  ;;  %v5952_v37 = vshrl.u32 %v9337_v30, %v5951_v9 }
 0x57d   :  { %v5815_v16 = vsel %vm5732_vm5, %v5814_v63, %v5813_v59  ;;  %vm5971_vm11 = vcmp.lt.s32.totalorder %v5949_v51, 4  ;;  %vm5719_vm12 = vweird.f32 %v12836_v50  ;;  %v5967_v22 = vor.u32 %v5966_v29, %v5965_v35 }
 0x57e   :  { %v5818_v41 = vsel %vm13076_vm7, %v12902_v14, %v5815_v16  ;;  %v5973_v47 = vsel %vm5971_vm11, %v5961_v56, 2102212464  ;;  %v5728_v10 = vsel %vm5721_vm8, %v5724_v61, %v5727_v55  ;;  %v5899_v8 = vsub.s32 0, %v5897_v57 }
 0x57f   :  { %9192 = vcosq.f32 %v5818_v41  ;;  %vm5970_vm13 = vcmp.lt.s32.totalorder %v5949_v51, 3  ;;  %vm5969_vm14 = vcmp.lt.s32.totalorder %v5949_v51, 2  ;;  %v5976_v53 = vsel %vm5968_vm10, %v5955_v17, %v5958_v52 }
 0x580   :  { %9194 = vsinq.f32 %v5818_v41  ;;  %v5977_v6 = vsel %vm5971_vm11, %v5964_v42, 920167782  ;;  %v5984_v2 = vshll.u32 %v5944_v31, 8  ;;  %v8549_v28 = vmin.u32 %v5899_v8, %v5897_v57 }
 0x581   :  { %v5972_v54 = vsel %vm5968_vm10, %v5952_v37, %v5955_v17  ;;  %v5974_v24 = vsel %vm5970_vm13, %v5958_v52, %v5973_v47  ;;  %v5980_v18 = vsel %vm5968_vm10, %v5958_v52, %v5961_v56  ;;  %v13114_v0 = vsel %vm5719_vm12, nan, %v5728_v10 }
 0x582   :  { %v5816_v19 = vsub.s32 4, %v13013_v20  ;;  %v5978_v33 = vsel %vm5970_vm13, %v5961_v56, %v5977_v6  ;;  %v5981_v25 = vsel %vm5971_vm11, %v5967_v22, 1326507024  ;;  %v5901_v60 = vclz %v8549_v28 }
 0x583   :  { %v5979_v39 = vsel %vm5969_vm14, %v5976_v53, %v5978_v33  ;;  %v5982_v4 = vsel %vm5970_vm13, %v5964_v42, %v5981_v25  ;;  %v5975_v44 = vsel %vm5969_vm14, %v5972_v54, %v5974_v24  ;;  %v6042_v12 = vand.u32 2139095040, %v13114_v0 }
 0x584   :  { %v5983_v55 = vsel %vm5969_vm14, %v5980_v18, %v5982_v4  ;;  %v13121_v48 = vmul.u32.u64.low %v5984_v2, %v5979_v39  ;;  %v13122_v31 = vmul.u32.u64.high %v5984_v2, %v5979_v39, %v13121_v48  ;;  %v8550_v58 = vadd.s32 4294967294, %v5901_v60 }
 0x585   :  { %v13124_v50 = vmul.u32.u64.low %v5984_v2, %v5983_v55  ;;  %v13125_v9 = vmul.u32.u64.high %v5984_v2, %v5983_v55, %v13124_v50  ;;  %v5817_v59 = vsel %vm5732_vm5, %v5816_v19, %v13013_v20  ;;  %v5889_v21 = vadd.s32 %v13056_v49, %v13065_v3 }
 0x586   :  { %vm8551_vm15 = vcmp.lt.s32.totalorder %v8550_v58, 0  ;;  %v6043_v23 = vshrl.u32 %v6042_v12, 23  ;;  %v5991_v27 = vmul.u32 %v5984_v2, %v5975_v44  ;;  %v5994_v45 = vadd.s32 1, %v13122_v31 }
 0x587   :  { %v5904_v51 = vsel %vm8551_vm15, 0, %v8550_v58  ;;  %v5819_v7 = vsel %vm13076_vm7, 0, %v5817_v59  ;;  %vm5993_vm0 = vc.u32 %v13125_v9, %v13121_v48  ;;  %v6039_v43 = vand.u32 2147483647, %v13114_v0 }
 0x588   :  { %v5905_v35 = vsub.s32 32, %v5904_v51  ;;  %v5906_v63 = vshll.u32 %v5897_v57, %v5904_v51  ;;  %v5909_v5 = vsub.s32 4294967266, %v5904_v51  ;;  %v8556_v20 = vadd.s32 4294967169, %v6043_v23 }
 0x589   :  { %v5995_v3 = vsel %vm5993_vm0, %v5994_v45, %v13122_v31  ;;  %v5823_v17 = vand.u32 3, %v5819_v7  ;;  %vm5835_vm1 = vcmp.lt.s32.totalorder %v12976_v13, 0  ;;  %v6046_v57 = vand.u32 8388607, %v6039_v43 }
 0x58a   :  { %v5907_v61 = vshrl.u32 %v5889_v21, %v5905_v35  ;;  %v5910_v49 = vadd.s32 127, %v5909_v5  ;;  %v5996_v16 = vadd.s32 %v5995_v3, %v5991_v27  ;;  %v6049_v52 = vadd.s32 1, %v8556_v20 }
 0x58b   :  { %vm5825_vm3 = vcmp.eq.s32.totalorder %v5823_v17, 0  ;;  %vm5828_vm4 = vcmp.eq.s32.totalorder %v5823_v17, 2  ;;  %vm5824_vm5 = vcmp.lt.s32.totalorder %v5823_v17, 2  ;;  %vm13146_vm6 = vcmp.le.f32.partialorder %v5833_v62, 0.7853982 }
 0x58c   :  { %v9193_v29 = vpop.eup %9192  ;;  %v5908_v11 = vor.u32 %v5907_v61, %v5906_v63  ;;  %v5911_v56 = vshll.u32 %v5910_v49, 23  ;;  %v5997_v41 = vadd.s32 536870912, %v5996_v16  ;;  %vm6050_vm2 = vcmp.gt.s32.totalorder %v6049_v52, 0 }
 0x58d   :  { %v9195_v26 = vpop.eup %9194  ;;  %v5829_v42 = vxor.u32 2147483648, %v9193_v29  ;;  %v6051_v10 = vsel %vm6050_vm2, %v6049_v52, 0  ;;  %v5919_v28 = vsub.s32 4, %v13087_v15  ;;  %v13152_v54 = vadd.s32 %v13121_v48, %v13125_v9 }
 0x58e   :  { %v5826_v37 = vxor.u32 2147483648, %v9195_v26  ;;  %v5912_v22 = vor.u32 4788187, %v5911_v56  ;;  %v5915_v47 = vcvt.s32.f32 %v5908_v11  ;;  %v13142_v8 = vshrl.u32 %v5997_v41, 30 }
 0x58f   :  { %v6053_v53 = vand.u32 31, %v6051_v10  ;;  %v6047_v18 = vor.u32 8388608, %v6046_v57  ;;  %vm5822_vm7 = vweird.f32 %v12902_v14  ;;  %v5830_v25 = vsel %vm5828_vm4, %v5829_v42, %v9195_v26 }
 0x590   :  { %v5913_v2 = vand.u32 2147483647, %v5912_v22  ;;  %v5999_v24 = vshll.u32 %v13142_v8, 30  ;;  %v5827_v33 = vsel %vm5825_vm3, %v9193_v29, %v5826_v37  ;;  %v6052_v12 = vshrl.u32 %v6051_v10, 5 }
 0x591   :  { %v6054_v19 = vsub.s32 32, %v6053_v53  ;;  %v6056_v62 = vshll.u32 %v9337_v30, %v6053_v53  ;;  %v6059_v44 = vshll.u32 %v9338_v32, %v6053_v53  ;;  %v6062_v55 = vshll.u32 %v9339_v34, %v6053_v53 }
 0x592   :  { %v5916_v60 = vmul.f32 %v5915_v47, %v5913_v2  ;;  %v13157_v39 = vsub.s32 %v5996_v16, %v5999_v24  ;;  %v6065_v50 = vshll.u32 %v9340_v36, %v6053_v53  ;;  %v13167_v21 = vshll.u32 %v6047_v18, 8 }
 0x593   :  { %v6057_v4 = vshrl.u32 %v9338_v32, %v6054_v19  ;;  %v6060_v31 = vshrl.u32 %v9339_v34, %v6054_v19  ;;  %v6063_v58 = vshrl.u32 %v9340_v36, %v6054_v19  ;;  %v6066_v59 = vshrl.u32 %v9341_v38, %v6054_v19 }
 0x594   :  { %v5917_v48 = vxor.u32 2147483648, %v5916_v60  ;;  %v6002_v9 = vsub.s32 0, %v13157_v39  ;;  %v5831_v23 = vsel %vm5824_vm5, %v5827_v33, %v5830_v25  ;;  %v6055_v27 = vshrl.u32 %v9337_v30, %v6054_v19 }
 0x595   :  { %v6068_v45 = vshll.u32 %v9341_v38, %v6053_v53  ;;  %v6058_v63 = vor.u32 %v6057_v4, %v6056_v62  ;;  %v6061_v5 = vor.u32 %v6060_v31, %v6059_v44  ;;  %v6064_v20 = vor.u32 %v6063_v58, %v6062_v55 }
 0x596   :  { %v5918_v51 = vsel %vm5835_vm1, %v5917_v48, %v5916_v60  ;;  %v8553_v35 = vmin.u32 %v6002_v9, %v13157_v39  ;;  %v6067_v29 = vor.u32 %v6066_v59, %v6065_v50  ;;  %v6069_v61 = vshrl.u32 %v9342_v46, %v6054_v19 }
 0x597   :  { %v5921_v7 = vsel %vm13146_vm6, %v12976_v13, %v5918_v51  ;;  %vm6071_vm8 = vcmp.lt.s32.totalorder %v6052_v12, 1  ;;  %vm6072_vm9 = vcmp.lt.s32.totalorder %v6052_v12, 2  ;;  %vm6073_vm10 = vcmp.lt.s32.totalorder %v6052_v12, 3 }
 0x598   :  { %9196 = vcosq.f32 %v5921_v7  ;;  %v6004_v49 = vclz %v8553_v35  ;;  %v6070_v3 = vor.u32 %v6069_v61, %v6068_v45  ;;  %vm6074_vm11 = vcmp.lt.s32.totalorder %v6052_v12, 4 }
 0x599   :  { %9198 = vsinq.f32 %v5921_v7  ;;  %v6075_v26 = vsel %vm6071_vm8, %v6055_v27, %v6058_v63  ;;  %v6076_v16 = vsel %vm6074_vm11, %v6064_v20, 2102212464  ;;  %v6079_v52 = vsel %vm6071_vm8, %v6058_v63, %v6061_v5 }
 0x59a   :  { %v8554_v17 = vadd.s32 4294967294, %v6004_v49  ;;  %v6080_v11 = vsel %vm6074_vm11, %v6067_v29, 920167782  ;;  %v6077_v56 = vsel %vm6073_vm10, %v6061_v5, %v6076_v16  ;;  %v6083_v41 = vsel %vm6071_vm8, %v6061_v5, %v6064_v20 }
 0x59b   :  { %v6081_v42 = vsel %vm6073_vm10, %v6064_v20, %v6080_v11  ;;  %v6084_v57 = vsel %vm6074_vm11, %v6070_v3, 1326507024  ;;  %v13181_v37 = vsel %vm5822_vm7, nan, %v5831_v23  ;;  %v6078_v14 = vsel %vm6072_vm9, %v6075_v26, %v6077_v56 }
 0x59c   :  { %vm8555_vm12 = vcmp.lt.s32.totalorder %v8554_v17, 0  ;;  %v6082_v22 = vsel %vm6072_vm9, %v6079_v52, %v6081_v42  ;;  %v6085_v47 = vsel %vm6073_vm10, %v6067_v29, %v6084_v57  ;;  %v5920_v25 = vsel %vm5835_vm1, %v5919_v28, %v13087_v15 }
 0x59d   :  { %v6007_v10 = vsel %vm8555_vm12, 0, %v8554_v17  ;;  %v6086_v53 = vsel %vm6072_vm9, %v6083_v41, %v6085_v47  ;;  %v13186_v2 = vmul.u32.u64.low %v13167_v21, %v6082_v22  ;;  %v13187_v24 = vmul.u32.u64.high %v13167_v21, %v6082_v22, %v13186_v2 }
 0x59e   :  { %v6008_v18 = vsub.s32 32, %v6007_v10  ;;  %v6009_v19 = vshll.u32 %v13157_v39, %v6007_v10  ;;  %v6012_v33 = vsub.s32 4294967266, %v6007_v10  ;;  %v6145_v55 = vand.u32 2139095040, %v13181_v37 }
 0x59f   :  { %v13196_v60 = vmul.u32.u64.low %v13167_v21, %v6086_v53  ;;  %v13197_v62 = vmul.u32.u64.high %v13167_v21, %v6086_v53, %v13196_v60  ;;  %v6022_v48 = vsub.s32 4, %v13142_v8  ;;  %v6094_v39 = vmul.u32 %v13167_v21, %v6078_v14 }
 0x5a0   :  { %v6010_v4 = vshrl.u32 %v13152_v54, %v6008_v18  ;;  %v6013_v44 = vadd.s32 127, %v6012_v33  ;;  %v6097_v31 = vadd.s32 1, %v13187_v24  ;;  %v5922_v58 = vsel %vm13146_vm6, 0, %v5920_v25 }
 0x5a1   :  { %v6146_v28 = vshrl.u32 %v6145_v55, 23  ;;  %vm5938_vm13 = vcmp.lt.s32.totalorder %v13011_v1, 0  ;;  %vm6096_vm14 = vc.u32 %v13197_v62, %v13186_v2  ;;  %v6142_v54 = vand.u32 2147483647, %v13181_v37 }
 0x5a2   :  { %v6011_v50 = vor.u32 %v6010_v4, %v6009_v19  ;;  %v6014_v15 = vshll.u32 %v6013_v44, 23  ;;  %v6098_v21 = vsel %vm6096_vm14, %v6097_v31, %v13187_v24  ;;  %v5926_v27 = vand.u32 3, %v5922_v58 }
 0x5a3   :  { %v8560_v23 = vadd.s32 4294967169, %v6146_v28  ;;  %v6023_v6 = vsel %vm5938_vm13, %v6022_v48, %v13142_v8  ;;  %v6099_v45 = vadd.s32 %v6098_v21, %v6094_v39  ;;  %vm13216_vm15 = vcmp.le.f32.partialorder %v5936_v40, 0.7853982 }
 0x5a4   :  { %v6015_v12 = vor.u32 4788187, %v6014_v15  ;;  %v6018_v59 = vcvt.s32.f32 %v6011_v50  ;;  %v6149_v20 = vand.u32 8388607, %v6142_v54  ;;  %v6025_v49 = vsel %vm13216_vm15, 0, %v6023_v6 }
 0x5a5   :  { %v9197_v9 = vpop.eup %9196  ;;  %v6152_v35 = vadd.s32 1, %v8560_v23  ;;  %v6100_v5 = vadd.s32 536870912, %v6099_v45  ;;  %vm5931_vm1 = vcmp.eq.s32.totalorder %v5926_v27, 2  ;;  %vm5928_vm2 = vcmp.eq.s32.totalorder %v5926_v27, 0 }
 0x5a6   :  { %v9199_v51 = vpop.eup %9198  ;;  %v6016_v7 = vand.u32 2147483647, %v6015_v12  ;;  %v5932_v29 = vxor.u32 2147483648, %v9197_v9  ;;  %vm5925_vm3 = vweird.f32 %v12976_v13  ;;  %vm5927_vm4 = vcmp.lt.s32.totalorder %v5926_v27, 2 }
 0x5a7   :  { %vm6153_vm0 = vcmp.gt.s32.totalorder %v6152_v35, 0  ;;  %v5929_v8 = vxor.u32 2147483648, %v9199_v51  ;;  %v13224_v3 = vshrl.u32 %v6100_v5, 30  ;;  %v13227_v16 = vand.u32 3, %v6025_v49 }
 0x5a8   :  { %v6019_v61 = vmul.f32 %v6018_v59, %v6016_v7  ;;  %v6154_v26 = vsel %vm6153_vm0, %v6152_v35, 0  ;;  %v6150_v11 = vor.u32 8388608, %v6149_v20  ;;  %v5933_v56 = vsel %vm5931_vm1, %v5932_v29, %v9199_v51 }
 0x5a9   :  { %v6156_v17 = vand.u32 31, %v6154_v26  ;;  %v6102_v52 = vshll.u32 %v13224_v3, 30  ;;  %v5930_v22 = vsel %vm5928_vm2, %v9197_v9, %v5929_v8  ;;  %v6155_v53 = vshrl.u32 %v6154_v26, 5 }
 0x5aa   :  { %v6020_v40 = vxor.u32 2147483648, %v6019_v61  ;;  %v5934_v48 = vsel %vm5927_vm4, %v5930_v22, %v5933_v56  ;;  %v6095_v39 = vadd.s32 %v13186_v2, %v13197_v62  ;;  %v6190_v58 = vshll.u32 %v6150_v11, 8 }
 0x5ab   :  { %v6157_v41 = vsub.s32 32, %v6156_v17  ;;  %v6159_v57 = vshll.u32 %v9337_v30, %v6156_v17  ;;  %v13236_v10 = vsub.s32 %v6099_v45, %v6102_v52  ;;  %v6162_v18 = vshll.u32 %v9338_v32, %v6156_v17 }
 0x5ac   :  { %v6021_v42 = vsel %vm5938_vm13, %v6020_v40, %v6019_v61  ;;  %v6165_v19 = vshll.u32 %v9339_v34, %v6156_v17  ;;  %v6168_v44 = vshll.u32 %v9340_v36, %v6156_v17  ;;  %v6171_v9 = vshll.u32 %v9341_v38, %v6156_v17 }
 0x5ad   :  { %v6024_v47 = vsel %vm13216_vm15, %v13011_v1, %v6021_v42  ;;  %v6160_v24 = vshrl.u32 %v9338_v32, %v6157_v41  ;;  %v6105_v33 = vsub.s32 0, %v13236_v10  ;;  %v6158_v14 = vshrl.u32 %v9337_v30, %v6157_v41 }
 0x5ae   :  { %9200 = vcosq.f32 %v6024_v47  ;;  %v6163_v25 = vshrl.u32 %v9339_v34, %v6157_v41  ;;  %v6166_v4 = vshrl.u32 %v9340_v36, %v6157_v41  ;;  %v6169_v55 = vshrl.u32 %v9341_v38, %v6157_v41 }
 0x5af   :  { %9202 = vsinq.f32 %v6024_v47  ;;  %v6161_v60 = vor.u32 %v6160_v24, %v6159_v57  ;;  %v8557_v31 = vmin.u32 %v6105_v33, %v13236_v10  ;;  %v6172_v59 = vshrl.u32 %v9342_v46, %v6157_v41 }
 0x5b0   :  { %v6164_v50 = vor.u32 %v6163_v25, %v6162_v18  ;;  %v6167_v15 = vor.u32 %v6166_v4, %v6165_v19  ;;  %v6170_v28 = vor.u32 %v6169_v55, %v6168_v44  ;;  %vm6174_vm5 = vcmp.lt.s32.totalorder %v6155_v53, 1 }
 0x5b1   :  { %v6107_v12 = vclz %v8557_v31  ;;  %vm6175_vm6 = vcmp.lt.s32.totalorder %v6155_v53, 2  ;;  %vm6176_vm7 = vcmp.lt.s32.totalorder %v6155_v53, 3  ;;  %vm6177_vm8 = vcmp.lt.s32.totalorder %v6155_v53, 4 }
 0x5b2   :  { %v6178_v21 = vsel %vm6174_vm5, %v6158_v14, %v6161_v60  ;;  %v6182_v23 = vsel %vm6174_vm5, %v6161_v60, %v6164_v50  ;;  %v6173_v27 = vor.u32 %v6172_v59, %v6171_v9  ;;  %v6179_v2 = vsel %vm6177_vm8, %v6167_v15, 2102212464 }
 0x5b3   :  { %v8558_v51 = vadd.s32 4294967294, %v6107_v12  ;;  %v6183_v62 = vsel %vm6177_vm8, %v6170_v28, 920167782  ;;  %v13255_v6 = vsel %vm5925_vm3, nan, %v5934_v48  ;;  %v6180_v45 = vsel %vm6176_vm7, %v6164_v50, %v6179_v2 }
 0x5b4   :  { %v6184_v7 = vsel %vm6176_vm7, %v6167_v15, %v6183_v62  ;;  %v6186_v35 = vsel %vm6174_vm5, %v6164_v50, %v6167_v15  ;;  %v6181_v63 = vsel %vm6175_vm6, %v6178_v21, %v6180_v45  ;;  %v6187_v20 = vsel %vm6177_vm8, %v6173_v27, 1326507024 }
 0x5b5   :  { %vm8559_vm9 = vcmp.lt.s32.totalorder %v8558_v51, 0  ;;  %v6185_v5 = vsel %vm6175_vm6, %v6182_v23, %v6184_v7  ;;  %v6188_v61 = vsel %vm6176_vm7, %v6170_v28, %v6187_v20  ;;  %v6248_v56 = vand.u32 2139095040, %v13255_v6 }
 0x5b6   :  { %v6110_v29 = vsel %vm8559_vm9, 0, %v8558_v51  ;;  %v13262_v49 = vmul.u32.u64.low %v6190_v58, %v6185_v5  ;;  %v13263_v8 = vmul.u32.u64.high %v6190_v58, %v6185_v5, %v13262_v49  ;;  %v6189_v17 = vsel %vm6175_vm6, %v6186_v35, %v6188_v61 }
 0x5b7   :  { %v6111_v13 = vsub.s32 32, %v6110_v29  ;;  %v6112_v26 = vshll.u32 %v13236_v10, %v6110_v29  ;;  %v6115_v40 = vsub.s32 4294967266, %v6110_v29  ;;  %vm6031_vm10 = vcmp.eq.s32.totalorder %v13227_v16, 0 }
 0x5b8   :  { %v13268_v52 = vmul.u32.u64.low %v6190_v58, %v6189_v17  ;;  %v13269_v11 = vmul.u32.u64.high %v6190_v58, %v6189_v17, %v13268_v52  ;;  %vm6034_vm11 = vcmp.eq.s32.totalorder %v13227_v16, 2  ;;  %v6197_v24 = vmul.u32 %v6190_v58, %v6181_v63 }
 0x5b9   :  { %v6113_v41 = vshrl.u32 %v6095_v39, %v6111_v13  ;;  %v6116_v57 = vadd.s32 127, %v6115_v40  ;;  %v6200_v10 = vadd.s32 1, %v13263_v8  ;;  %v6249_v18 = vshrl.u32 %v6248_v56, 23 }
 0x5ba   :  { %vm6030_vm12 = vcmp.lt.s32.totalorder %v13227_v16, 2  ;;  %v6125_v25 = vsub.s32 4, %v13224_v3  ;;  %vm6199_vm13 = vc.u32 %v13269_v11, %v13262_v49  ;;  %vm6028_vm14 = vweird.f32 %v13011_v1 }
 0x5bb   :  { %v9201_v42 = vpop.eup %9200  ;;  %v6114_v19 = vor.u32 %v6113_v41, %v6112_v26  ;;  %v6117_v33 = vshll.u32 %v6116_v57, 23  ;;  %v8564_v60 = vadd.s32 4294967169, %v6249_v18  ;;  %v6201_v48 = vsel %vm6199_vm13, %v6200_v10, %v13263_v8 }
 0x5bc   :  { %v9203_v22 = vpop.eup %9202  ;;  %v6035_v47 = vxor.u32 2147483648, %v9201_v42  ;;  %v6202_v39 = vadd.s32 %v6201_v48, %v6197_v24  ;;  %vm6041_vm15 = vcmp.lt.s32.totalorder %v13114_v0, 0  ;;  %v6245_v28 = vand.u32 2147483647, %v13255_v6 }
 0x5bd   :  { %v6032_v53 = vxor.u32 2147483648, %v9203_v22  ;;  %v6118_v44 = vor.u32 4788187, %v6117_v33  ;;  %v6121_v55 = vcvt.s32.f32 %v6114_v19  ;;  %v6255_v31 = vadd.s32 1, %v8564_v60 }
 0x5be   :  { %v6036_v14 = vsel %vm6034_vm11, %v6035_v47, %v9203_v22  ;;  %v6203_v15 = vadd.s32 536870912, %v6202_v39  ;;  %v13288_v16 = vsel %vm6041_vm15, %v6125_v25, %v13224_v3  ;;  %vm13296_vm1 = vcmp.le.f32.partialorder %v6039_v43, 0.7853982 }
 0x5bf   :  { %v6033_v4 = vsel %vm6031_vm10, %v9201_v42, %v6032_v53  ;;  %v6119_v50 = vand.u32 2147483647, %v6118_v44  ;;  %vm6256_vm0 = vcmp.gt.s32.totalorder %v6255_v31, 0  ;;  %v6128_v27 = vsel %vm13296_vm1, 0, %v13288_v16 }
 0x5c0   :  { %v6037_v58 = vsel %vm6030_vm12, %v6033_v4, %v6036_v14  ;;  %v6257_v12 = vsel %vm6256_vm0, %v6255_v31, 0  ;;  %v13292_v21 = vshrl.u32 %v6203_v15, 30  ;;  %v6252_v2 = vand.u32 8388607, %v6245_v28 }
 0x5c1   :  { %v6122_v9 = vmul.f32 %v6121_v55, %v6119_v50  ;;  %v13290_v59 = vsel %vm6028_vm14, nan, %v6037_v58  ;;  %v6259_v1 = vand.u32 31, %v6257_v12  ;;  %v6258_v20 = vshrl.u32 %v6257_v12, 5 }
 0x5c2   :  { %v6205_v3 = vshll.u32 %v13292_v21, 30  ;;  %v6351_v35 = vand.u32 2139095040, %v13290_v59  ;;  %v6198_v26 = vadd.s32 %v13262_v49, %v13269_v11  ;;  %v6253_v17 = vor.u32 8388608, %v6252_v2 }
 0x5c3   :  { %v6123_v51 = vxor.u32 2147483648, %v6122_v9  ;;  %v6260_v62 = vsub.s32 32, %v6259_v1  ;;  %v6262_v7 = vshll.u32 %v9337_v30, %v6259_v1  ;;  %v6265_v43 = vshll.u32 %v9338_v32, %v6259_v1 }
 0x5c4   :  { %v13314_v5 = vsub.s32 %v6202_v39, %v6205_v3  ;;  %v6268_v29 = vshll.u32 %v9339_v34, %v6259_v1  ;;  %v6271_v13 = vshll.u32 %v9340_v36, %v6259_v1  ;;  %v6274_v57 = vshll.u32 %v9341_v38, %v6259_v1 }
 0x5c5   :  { %v6124_v45 = vsel %vm6041_vm15, %v6123_v51, %v6122_v9  ;;  %v6263_v61 = vshrl.u32 %v9338_v32, %v6260_v62  ;;  %v6266_v8 = vshrl.u32 %v9339_v34, %v6260_v62  ;;  %v6269_v52 = vshrl.u32 %v9340_v36, %v6260_v62 }
 0x5c6   :  { %v6127_v63 = vsel %vm13296_vm1, %v13114_v0, %v6124_v45  ;;  %v6208_v40 = vsub.s32 0, %v13314_v5  ;;  %v6272_v41 = vshrl.u32 %v9341_v38, %v6260_v62  ;;  %v6261_v47 = vshrl.u32 %v9337_v30, %v6260_v62 }
 0x5c7   :  { %9204 = vcosq.f32 %v6127_v63  ;;  %v6264_v56 = vor.u32 %v6263_v61, %v6262_v7  ;;  %v6267_v42 = vor.u32 %v6266_v8, %v6265_v43  ;;  %v6352_v24 = vshrl.u32 %v6351_v35, 23 }
 0x5c8   :  { %9206 = vsinq.f32 %v6127_v63  ;;  %v8561_v22 = vmin.u32 %v6208_v40, %v13314_v5  ;;  %v6270_v10 = vor.u32 %v6269_v52, %v6268_v29  ;;  %v6273_v18 = vor.u32 %v6272_v41, %v6271_v13 }
 0x5c9   :  { %v6275_v49 = vshrl.u32 %v9342_v46, %v6260_v62  ;;  %vm6277_vm2 = vcmp.lt.s32.totalorder %v6258_v20, 1  ;;  %vm6279_vm3 = vcmp.lt.s32.totalorder %v6258_v20, 3  ;;  %vm6280_vm4 = vcmp.lt.s32.totalorder %v6258_v20, 4 }
 0x5ca   :  { %v6210_v11 = vclz %v8561_v22  ;;  %v6293_v53 = vshll.u32 %v6253_v17, 8  ;;  %vm6278_vm5 = vcmp.lt.s32.totalorder %v6258_v20, 2  ;;  %v6282_v33 = vsel %vm6280_vm4, %v6270_v10, 2102212464 }
 0x5cb   :  { %v6276_v19 = vor.u32 %v6275_v49, %v6274_v57  ;;  %v6285_v14 = vsel %vm6277_vm2, %v6264_v56, %v6267_v42  ;;  %v6281_v60 = vsel %vm6277_vm2, %v6261_v47, %v6264_v56  ;;  %v6286_v4 = vsel %vm6280_vm4, %v6273_v18, 920167782 }
 0x5cc   :  { %v8562_v25 = vadd.s32 4294967294, %v6210_v11  ;;  %v6289_v44 = vsel %vm6277_vm2, %v6267_v42, %v6270_v10  ;;  %v6283_v55 = vsel %vm6279_vm3, %v6267_v42, %v6282_v33  ;;  %v6287_v48 = vsel %vm6279_vm3, %v6270_v10, %v6286_v4 }
 0x5cd   :  { %v6290_v39 = vsel %vm6280_vm4, %v6276_v19, 1326507024  ;;  %v8568_v31 = vadd.s32 4294967169, %v6352_v24  ;;  %v6288_v58 = vsel %vm6278_vm5, %v6285_v14, %v6287_v48  ;;  %v6348_v15 = vand.u32 2147483647, %v13290_v59 }
 0x5ce   :  { %vm8563_vm6 = vcmp.lt.s32.totalorder %v8562_v25, 0  ;;  %v6291_v50 = vsel %vm6279_vm3, %v6273_v18, %v6290_v39  ;;  %v13335_v12 = vmul.u32.u64.low %v6293_v53, %v6288_v58  ;;  %v13336_v1 = vmul.u32.u64.high %v6293_v53, %v6288_v58, %v13335_v12 }
 0x5cf   :  { %v6213_v9 = vsel %vm8563_vm6, 0, %v8562_v25  ;;  %v6292_v16 = vsel %vm6278_vm5, %v6289_v44, %v6291_v50  ;;  %v6284_v2 = vsel %vm6278_vm5, %v6281_v60, %v6283_v55  ;;  %v13341_v62 = vand.u32 3, %v6128_v27 }
 0x5d0   :  { %v6214_v23 = vsub.s32 32, %v6213_v9  ;;  %v6215_v51 = vshll.u32 %v13314_v5, %v6213_v9  ;;  %v6218_v3 = vsub.s32 4294967266, %v6213_v9  ;;  %v6358_v43 = vadd.s32 1, %v8568_v31 }
 0x5d1   :  { %v13343_v45 = vmul.u32.u64.low %v6293_v53, %v6292_v16  ;;  %v13344_v7 = vmul.u32.u64.high %v6293_v53, %v6292_v16, %v13343_v45  ;;  %v6300_v61 = vmul.u32 %v6293_v53, %v6284_v2  ;;  %v6303_v8 = vadd.s32 1, %v13336_v1 }
 0x5d2   :  { %v6216_v63 = vshrl.u32 %v6198_v26, %v6214_v23  ;;  %v6219_v29 = vadd.s32 127, %v6218_v3  ;;  %v6355_v13 = vand.u32 8388607, %v6348_v15  ;;  %vm6359_vm7 = vcmp.gt.s32.totalorder %v6358_v43, 0 }
 0x5d3   :  { %v6360_v17 = vsel %vm6359_vm7, %v6358_v43, 0  ;;  %vm6137_vm8 = vcmp.eq.s32.totalorder %v13341_v62, 2  ;;  %vm6144_vm9 = vcmp.lt.s32.totalorder %v13181_v37, 0  ;;  %vm6302_vm10 = vc.u32 %v13344_v7, %v13335_v12 }
 0x5d4   :  { %v9205_v35 = vpop.eup %9204  ;;  %v6217_v40 = vor.u32 %v6216_v63, %v6215_v51  ;;  %v6220_v20 = vshll.u32 %v6219_v29, 23  ;;  %vm13355_vm11 = vcmp.le.f32.partialorder %v6142_v54, 0.7853982  ;;  %v6304_v42 = vsel %vm6302_vm10, %v6303_v8, %v13336_v1 }
 0x5d5   :  { %v6138_v5 = vxor.u32 2147483648, %v9205_v35  ;;  %v9207_v27 = vpop.eup %9206  ;;  %vm6133_vm12 = vcmp.lt.s32.totalorder %v13341_v62, 2  ;;  %vm6134_vm13 = vcmp.eq.s32.totalorder %v13341_v62, 0  ;;  %v6305_v41 = vadd.s32 %v6304_v42, %v6300_v61 }
 0x5d6   :  { %v6221_v52 = vor.u32 4788187, %v6220_v20  ;;  %v6224_v56 = vcvt.s32.f32 %v6217_v40  ;;  %v6362_v57 = vand.u32 31, %v6360_v17  ;;  %v6135_v22 = vxor.u32 2147483648, %v9207_v27 }
 0x5d7   :  { %v6139_v47 = vsel %vm6137_vm8, %v6138_v5, %v9207_v27  ;;  %v6356_v10 = vor.u32 8388608, %v6355_v13  ;;  %v6306_v18 = vadd.s32 536870912, %v6305_v41  ;;  %v6361_v49 = vshrl.u32 %v6360_v17, 5 }
 0x5d8   :  { %v6222_v24 = vand.u32 2147483647, %v6221_v52  ;;  %v6363_v54 = vsub.s32 32, %v6362_v57  ;;  %v6365_v11 = vshll.u32 %v9337_v30, %v6362_v57  ;;  %v6368_v19 = vshll.u32 %v9338_v32, %v6362_v57 }
 0x5d9   :  { %v6371_v33 = vshll.u32 %v9339_v34, %v6362_v57  ;;  %v6374_v14 = vshll.u32 %v9340_v36, %v6362_v57  ;;  %v13366_v25 = vshrl.u32 %v6306_v18, 30  ;;  %v6377_v44 = vshll.u32 %v9341_v38, %v6362_v57 }
 0x5da   :  { %v6225_v53 = vmul.f32 %v6224_v56, %v6222_v24  ;;  %v6366_v60 = vshrl.u32 %v9338_v32, %v6363_v54  ;;  %v6369_v4 = vshrl.u32 %v9339_v34, %v6363_v54  ;;  %v6372_v48 = vshrl.u32 %v9340_v36, %v6363_v54 }
 0x5db   :  { %v6375_v39 = vshrl.u32 %v9341_v38, %v6363_v54  ;;  %v6378_v31 = vshrl.u32 %v9342_v46, %v6363_v54  ;;  %v6136_v58 = vsel %vm6134_vm13, %v9205_v35, %v6135_v22  ;;  %v6308_v50 = vshll.u32 %v13366_v25, 30 }
 0x5dc   :  { %v6226_v55 = vxor.u32 2147483648, %v6225_v53  ;;  %v6367_v9 = vor.u32 %v6366_v60, %v6365_v11  ;;  %vm6380_vm14 = vcmp.lt.s32.totalorder %v6361_v49, 1  ;;  %v6370_v1 = vor.u32 %v6369_v4, %v6368_v19 }
 0x5dd   :  { %v6373_v23 = vor.u32 %v6372_v48, %v6371_v33  ;;  %v6376_v51 = vor.u32 %v6375_v39, %v6374_v14  ;;  %v6309_v2 = vsub.s32 %v6305_v41, %v6308_v50  ;;  %v6364_v45 = vshrl.u32 %v9337_v30, %v6363_v54 }
 0x5de   :  { %v6227_v16 = vsel %vm6144_vm9, %v6226_v55, %v6225_v53  ;;  %vm6383_vm15 = vcmp.lt.s32.totalorder %v6361_v49, 4  ;;  %vm6131_vm0 = vweird.f32 %v13114_v0  ;;  %v6379_v43 = vor.u32 %v6378_v31, %v6377_v44 }
 0x5df   :  { %v6230_v3 = vsel %vm13355_vm11, %v13181_v37, %v6227_v16  ;;  %v6385_v35 = vsel %vm6383_vm15, %v6373_v23, 2102212464  ;;  %v6140_v63 = vsel %vm6133_vm12, %v6136_v58, %v6139_v47  ;;  %v6311_v29 = vsub.s32 0, %v6309_v2 }
 0x5e0   :  { %9208 = vcosq.f32 %v6230_v3  ;;  %vm6382_vm1 = vcmp.lt.s32.totalorder %v6361_v49, 3  ;;  %vm6381_vm2 = vcmp.lt.s32.totalorder %v6361_v49, 2  ;;  %v6388_v61 = vsel %vm6380_vm14, %v6367_v9, %v6370_v1 }
 0x5e1   :  { %9210 = vsinq.f32 %v6230_v3  ;;  %v6389_v8 = vsel %vm6383_vm15, %v6376_v51, 920167782  ;;  %v6396_v13 = vshll.u32 %v6356_v10, 8  ;;  %v8565_v5 = vmin.u32 %v6311_v29, %v6309_v2 }
 0x5e2   :  { %v6384_v40 = vsel %vm6380_vm14, %v6364_v45, %v6367_v9  ;;  %v6386_v20 = vsel %vm6382_vm1, %v6370_v1, %v6385_v35  ;;  %v6392_v17 = vsel %vm6380_vm14, %v6370_v1, %v6373_v23  ;;  %v13393_v27 = vsel %vm6131_vm0, nan, %v6140_v63 }
 0x5e3   :  { %v6228_v62 = vsub.s32 4, %v13292_v21  ;;  %v6390_v52 = vsel %vm6382_vm1, %v6373_v23, %v6389_v8  ;;  %v6393_v56 = vsel %vm6383_vm15, %v6379_v43, 1326507024  ;;  %v6313_v42 = vclz %v8565_v5 }
 0x5e4   :  { %v6391_v41 = vsel %vm6381_vm2, %v6388_v61, %v6390_v52  ;;  %v6394_v57 = vsel %vm6382_vm1, %v6376_v51, %v6393_v56  ;;  %v6387_v22 = vsel %vm6381_vm2, %v6384_v40, %v6386_v20  ;;  %v6454_v11 = vand.u32 2139095040, %v13393_v27 }
 0x5e5   :  { %v6395_v47 = vsel %vm6381_vm2, %v6392_v17, %v6394_v57  ;;  %v13400_v24 = vmul.u32.u64.low %v6396_v13, %v6391_v41  ;;  %v13401_v10 = vmul.u32.u64.high %v6396_v13, %v6391_v41, %v13400_v24  ;;  %v8566_v18 = vadd.s32 4294967294, %v6313_v42 }
 0x5e6   :  { %v13403_v0 = vmul.u32.u64.low %v6396_v13, %v6395_v47  ;;  %v13404_v54 = vmul.u32.u64.high %v6396_v13, %v6395_v47, %v13403_v0  ;;  %v6229_v53 = vsel %vm6144_vm9, %v6228_v62, %v13292_v21  ;;  %v6301_v19 = vadd.s32 %v13335_v12, %v13344_v7 }
 0x5e7   :  { %vm8567_vm3 = vcmp.lt.s32.totalorder %v8566_v18, 0  ;;  %v6455_v33 = vshrl.u32 %v6454_v11, 23  ;;  %v6403_v14 = vmul.u32 %v6396_v13, %v6387_v22  ;;  %v6406_v60 = vadd.s32 1, %v13401_v10 }
 0x5e8   :  { %v6316_v49 = vsel %vm8567_vm3, 0, %v8566_v18  ;;  %v6231_v4 = vsel %vm13355_vm11, 0, %v6229_v53  ;;  %vm6405_vm4 = vc.u32 %v13404_v54, %v13400_v24  ;;  %v6451_v39 = vand.u32 2147483647, %v13393_v27 }
 0x5e9   :  { %v6317_v44 = vsub.s32 32, %v6316_v49  ;;  %v6318_v55 = vshll.u32 %v6309_v2, %v6316_v49  ;;  %v6321_v48 = vsub.s32 4294967266, %v6316_v49  ;;  %v8572_v21 = vadd.s32 4294967169, %v6455_v33 }
 0x5ea   :  { %v6407_v7 = vsel %vm6405_vm4, %v6406_v60, %v13401_v10  ;;  %v6235_v9 = vand.u32 3, %v6231_v4  ;;  %vm6247_vm5 = vcmp.lt.s32.totalorder %v13255_v6, 0  ;;  %v6458_v2 = vand.u32 8388607, %v6451_v39 }
 0x5eb   :  { %v6319_v58 = vshrl.u32 %v6301_v19, %v6317_v44  ;;  %v6322_v12 = vadd.s32 127, %v6321_v48  ;;  %v6408_v16 = vadd.s32 %v6407_v7, %v6403_v14  ;;  %v6461_v1 = vadd.s32 1, %v8572_v21 }
 0x5ec   :  { %vm6237_vm7 = vcmp.eq.s32.totalorder %v6235_v9, 0  ;;  %vm6240_vm8 = vcmp.eq.s32.totalorder %v6235_v9, 2  ;;  %vm6236_vm9 = vcmp.lt.s32.totalorder %v6235_v9, 2  ;;  %vm13425_vm10 = vcmp.le.f32.partialorder %v6245_v28, 0.7853982 }
 0x5ed   :  { %v9209_v31 = vpop.eup %9208  ;;  %v6320_v26 = vor.u32 %v6319_v58, %v6318_v55  ;;  %v6323_v23 = vshll.u32 %v6322_v12, 23  ;;  %v6409_v3 = vadd.s32 536870912, %v6408_v16  ;;  %vm6462_vm6 = vcmp.gt.s32.totalorder %v6461_v1, 0 }
 0x5ee   :  { %v9211_v50 = vpop.eup %9210  ;;  %v6241_v51 = vxor.u32 2147483648, %v9209_v31  ;;  %v6463_v63 = vsel %vm6462_vm6, %v6461_v1, 0  ;;  %v6331_v5 = vsub.s32 4, %v13366_v25  ;;  %v13431_v40 = vadd.s32 %v13400_v24, %v13404_v54 }
 0x5ef   :  { %v6238_v45 = vxor.u32 2147483648, %v9211_v50  ;;  %v6324_v43 = vor.u32 4788187, %v6323_v23  ;;  %v6327_v35 = vcvt.s32.f32 %v6320_v26  ;;  %v13421_v29 = vshrl.u32 %v6409_v3, 30 }
 0x5f0   :  { %v6465_v61 = vand.u32 31, %v6463_v63  ;;  %v6459_v17 = vor.u32 8388608, %v6458_v2  ;;  %vm6234_vm11 = vweird.f32 %v13181_v37  ;;  %v6242_v56 = vsel %vm6240_vm8, %v6241_v51, %v9211_v50 }
 0x5f1   :  { %v6325_v13 = vand.u32 2147483647, %v6324_v43  ;;  %v6411_v20 = vshll.u32 %v13421_v29, 30  ;;  %v6239_v52 = vsel %vm6237_vm7, %v9209_v31, %v6238_v45  ;;  %v6464_v11 = vshrl.u32 %v6463_v63, 5 }
 0x5f2   :  { %v6466_v62 = vsub.s32 32, %v6465_v61  ;;  %v6468_v28 = vshll.u32 %v9337_v30, %v6465_v61  ;;  %v6471_v22 = vshll.u32 %v9338_v32, %v6465_v61  ;;  %v6474_v47 = vshll.u32 %v9339_v34, %v6465_v61 }
 0x5f3   :  { %v6328_v42 = vmul.f32 %v6327_v35, %v6325_v13  ;;  %v13436_v41 = vsub.s32 %v6408_v16, %v6411_v20  ;;  %v6477_v0 = vshll.u32 %v9340_v36, %v6465_v61  ;;  %v13446_v19 = vshll.u32 %v6459_v17, 8 }
 0x5f4   :  { %v6469_v57 = vshrl.u32 %v9338_v32, %v6466_v62  ;;  %v6472_v10 = vshrl.u32 %v9339_v34, %v6466_v62  ;;  %v6475_v18 = vshrl.u32 %v9340_v36, %v6466_v62  ;;  %v6478_v53 = vshrl.u32 %v9341_v38, %v6466_v62 }
 0x5f5   :  { %v6329_v24 = vxor.u32 2147483648, %v6328_v42  ;;  %v6414_v54 = vsub.s32 0, %v13436_v41  ;;  %v6243_v33 = vsel %vm6236_vm9, %v6239_v52, %v6242_v56  ;;  %v6467_v14 = vshrl.u32 %v9337_v30, %v6466_v62 }
 0x5f6   :  { %v6480_v60 = vshll.u32 %v9341_v38, %v6465_v61  ;;  %v6470_v55 = vor.u32 %v6469_v57, %v6468_v28  ;;  %v6473_v48 = vor.u32 %v6472_v10, %v6471_v22  ;;  %v6476_v21 = vor.u32 %v6475_v18, %v6474_v47 }
 0x5f7   :  { %v6330_v49 = vsel %vm6247_vm5, %v6329_v24, %v6328_v42  ;;  %v8569_v44 = vmin.u32 %v6414_v54, %v13436_v41  ;;  %v6479_v31 = vor.u32 %v6478_v53, %v6477_v0  ;;  %v6481_v58 = vshrl.u32 %v9342_v46, %v6466_v62 }
 0x5f8   :  { %v6333_v4 = vsel %vm13425_vm10, %v13255_v6, %v6330_v49  ;;  %vm6483_vm12 = vcmp.lt.s32.totalorder %v6464_v11, 1  ;;  %vm6484_vm13 = vcmp.lt.s32.totalorder %v6464_v11, 2  ;;  %vm6485_vm14 = vcmp.lt.s32.totalorder %v6464_v11, 3 }
 0x5f9   :  { %9212 = vcosq.f32 %v6333_v4  ;;  %v6416_v12 = vclz %v8569_v44  ;;  %v6482_v7 = vor.u32 %v6481_v58, %v6480_v60  ;;  %vm6486_vm15 = vcmp.lt.s32.totalorder %v6464_v11, 4 }
 0x5fa   :  { %9214 = vsinq.f32 %v6333_v4  ;;  %v6487_v50 = vsel %vm6483_vm12, %v6467_v14, %v6470_v55  ;;  %v6488_v16 = vsel %vm6486_vm15, %v6476_v21, 2102212464  ;;  %v6491_v1 = vsel %vm6483_vm12, %v6470_v55, %v6473_v48 }
 0x5fb   :  { %v8570_v9 = vadd.s32 4294967294, %v6416_v12  ;;  %v6492_v26 = vsel %vm6486_vm15, %v6479_v31, 920167782  ;;  %v6489_v23 = vsel %vm6485_vm14, %v6473_v48, %v6488_v16  ;;  %v6495_v3 = vsel %vm6483_vm12, %v6473_v48, %v6476_v21 }
 0x5fc   :  { %v6493_v51 = vsel %vm6485_vm14, %v6476_v21, %v6492_v26  ;;  %v6496_v2 = vsel %vm6486_vm15, %v6482_v7, 1326507024  ;;  %v13460_v45 = vsel %vm6234_vm11, nan, %v6243_v33  ;;  %v6490_v37 = vsel %vm6484_vm13, %v6487_v50, %v6489_v23 }
 0x5fd   :  { %vm8571_vm0 = vcmp.lt.s32.totalorder %v8570_v9, 0  ;;  %v6494_v43 = vsel %vm6484_vm13, %v6491_v1, %v6493_v51  ;;  %v6497_v35 = vsel %vm6485_vm14, %v6479_v31, %v6496_v2  ;;  %v6332_v56 = vsel %vm6247_vm5, %v6331_v5, %v13366_v25 }
 0x5fe   :  { %v6419_v63 = vsel %vm8571_vm0, 0, %v8570_v9  ;;  %v6498_v61 = vsel %vm6484_vm13, %v6495_v3, %v6497_v35  ;;  %v13465_v13 = vmul.u32.u64.low %v13446_v19, %v6494_v43  ;;  %v13466_v20 = vmul.u32.u64.high %v13446_v19, %v6494_v43, %v13465_v13 }
 0x5ff   :  { %v6420_v17 = vsub.s32 32, %v6419_v63  ;;  %v6421_v62 = vshll.u32 %v13436_v41, %v6419_v63  ;;  %v6424_v52 = vsub.s32 4294967266, %v6419_v63  ;;  %v6557_v47 = vand.u32 2139095040, %v13460_v45 }
 0x600   :  { %v13475_v42 = vmul.u32.u64.low %v13446_v19, %v6498_v61  ;;  %v13476_v28 = vmul.u32.u64.high %v13446_v19, %v6498_v61, %v13475_v42  ;;  %v6434_v24 = vsub.s32 4, %v13421_v29  ;;  %v6506_v41 = vmul.u32 %v13446_v19, %v6490_v37 }
 0x601   :  { %v6422_v57 = vshrl.u32 %v13431_v40, %v6420_v17  ;;  %v6425_v22 = vadd.s32 127, %v6424_v52  ;;  %v6509_v10 = vadd.s32 1, %v13466_v20  ;;  %v6334_v18 = vsel %vm13425_vm10, 0, %v6332_v56 }
 0x602   :  { %v6558_v5 = vshrl.u32 %v6557_v47, 23  ;;  %vm6350_vm1 = vcmp.lt.s32.totalorder %v13290_v59, 0  ;;  %vm6508_vm2 = vc.u32 %v13476_v28, %v13465_v13  ;;  %v6554_v40 = vand.u32 2147483647, %v13460_v45 }
 0x603   :  { %v6423_v0 = vor.u32 %v6422_v57, %v6421_v62  ;;  %v6426_v25 = vshll.u32 %v6425_v22, 23  ;;  %v6510_v19 = vsel %vm6508_vm2, %v6509_v10, %v13466_v20  ;;  %v6338_v14 = vand.u32 3, %v6334_v18 }
 0x604   :  { %v8576_v33 = vadd.s32 4294967169, %v6558_v5  ;;  %v6435_v8 = vsel %vm6350_vm1, %v6434_v24, %v13421_v29  ;;  %v6511_v60 = vadd.s32 %v6510_v19, %v6506_v41  ;;  %vm13495_vm3 = vcmp.le.f32.partialorder %v6348_v15, 0.7853982 }
 0x605   :  { %v6427_v11 = vor.u32 4788187, %v6426_v25  ;;  %v6430_v53 = vcvt.s32.f32 %v6423_v0  ;;  %v6561_v21 = vand.u32 8388607, %v6554_v40  ;;  %v6437_v12 = vsel %vm13495_vm3, 0, %v6435_v8 }
 0x606   :  { %v9213_v54 = vpop.eup %9212  ;;  %v6564_v44 = vadd.s32 1, %v8576_v33  ;;  %v6512_v48 = vadd.s32 536870912, %v6511_v60  ;;  %vm6343_vm5 = vcmp.eq.s32.totalorder %v6338_v14, 2  ;;  %vm6340_vm6 = vcmp.eq.s32.totalorder %v6338_v14, 0 }
 0x607   :  { %v9215_v49 = vpop.eup %9214  ;;  %v6428_v4 = vand.u32 2147483647, %v6427_v11  ;;  %v6344_v31 = vxor.u32 2147483648, %v9213_v54  ;;  %vm6337_vm7 = vweird.f32 %v13255_v6  ;;  %vm6339_vm8 = vcmp.lt.s32.totalorder %v6338_v14, 2 }
 0x608   :  { %vm6565_vm4 = vcmp.gt.s32.totalorder %v6564_v44, 0  ;;  %v6341_v29 = vxor.u32 2147483648, %v9215_v49  ;;  %v13503_v7 = vshrl.u32 %v6512_v48, 30  ;;  %v13506_v16 = vand.u32 3, %v6437_v12 }
 0x609   :  { %v6431_v58 = vmul.f32 %v6430_v53, %v6428_v4  ;;  %v6566_v50 = vsel %vm6565_vm4, %v6564_v44, 0  ;;  %v6562_v26 = vor.u32 8388608, %v6561_v21  ;;  %v6345_v23 = vsel %vm6343_vm5, %v6344_v31, %v9215_v49 }
 0x60a   :  { %v6568_v9 = vand.u32 31, %v6566_v50  ;;  %v6514_v1 = vshll.u32 %v13503_v7, 30  ;;  %v6342_v43 = vsel %vm6340_vm6, %v9213_v54, %v6341_v29  ;;  %v6567_v61 = vshrl.u32 %v6566_v50, 5 }
 0x60b   :  { %v6432_v15 = vxor.u32 2147483648, %v6431_v58  ;;  %v6346_v24 = vsel %vm6339_vm8, %v6342_v43, %v6345_v23  ;;  %v6507_v41 = vadd.s32 %v13465_v13, %v13476_v28  ;;  %v6602_v18 = vshll.u32 %v6562_v26, 8 }
 0x60c   :  { %v6569_v3 = vsub.s32 32, %v6568_v9  ;;  %v6571_v2 = vshll.u32 %v9337_v30, %v6568_v9  ;;  %v13515_v63 = vsub.s32 %v6511_v60, %v6514_v1  ;;  %v6574_v17 = vshll.u32 %v9338_v32, %v6568_v9 }
 0x60d   :  { %v6433_v51 = vsel %vm6350_vm1, %v6432_v15, %v6431_v58  ;;  %v6577_v62 = vshll.u32 %v9339_v34, %v6568_v9  ;;  %v6580_v22 = vshll.u32 %v9340_v36, %v6568_v9  ;;  %v6583_v54 = vshll.u32 %v9341_v38, %v6568_v9 }
 0x60e   :  { %v6436_v35 = vsel %vm13495_vm3, %v13290_v59, %v6433_v51  ;;  %v6572_v20 = vshrl.u32 %v9338_v32, %v6569_v3  ;;  %v6517_v52 = vsub.s32 0, %v13515_v63  ;;  %v6570_v37 = vshrl.u32 %v9337_v30, %v6569_v3 }
 0x60f   :  { %9216 = vcosq.f32 %v6436_v35  ;;  %v6575_v56 = vshrl.u32 %v9339_v34, %v6569_v3  ;;  %v6578_v57 = vshrl.u32 %v9340_v36, %v6569_v3  ;;  %v6581_v47 = vshrl.u32 %v9341_v38, %v6569_v3 }
 0x610   :  { %9218 = vsinq.f32 %v6436_v35  ;;  %v6573_v42 = vor.u32 %v6572_v20, %v6571_v2  ;;  %v8573_v10 = vmin.u32 %v6517_v52, %v13515_v63  ;;  %v6584_v53 = vshrl.u32 %v9342_v46, %v6569_v3 }
 0x611   :  { %v6576_v0 = vor.u32 %v6575_v56, %v6574_v17  ;;  %v6579_v25 = vor.u32 %v6578_v57, %v6577_v62  ;;  %v6582_v5 = vor.u32 %v6581_v47, %v6580_v22  ;;  %vm6586_vm9 = vcmp.lt.s32.totalorder %v6567_v61, 1 }
 0x612   :  { %v6519_v11 = vclz %v8573_v10  ;;  %vm6587_vm10 = vcmp.lt.s32.totalorder %v6567_v61, 2  ;;  %vm6588_vm11 = vcmp.lt.s32.totalorder %v6567_v61, 3  ;;  %vm6589_vm12 = vcmp.lt.s32.totalorder %v6567_v61, 4 }
 0x613   :  { %v6590_v19 = vsel %vm6586_vm9, %v6570_v37, %v6573_v42  ;;  %v6594_v33 = vsel %vm6586_vm9, %v6573_v42, %v6576_v0  ;;  %v6585_v14 = vor.u32 %v6584_v53, %v6583_v54  ;;  %v6591_v13 = vsel %vm6589_vm12, %v6579_v25, 2102212464 }
 0x614   :  { %v8574_v49 = vadd.s32 4294967294, %v6519_v11  ;;  %v6595_v28 = vsel %vm6589_vm12, %v6582_v5, 920167782  ;;  %v13534_v8 = vsel %vm6337_vm7, nan, %v6346_v24  ;;  %v6592_v60 = vsel %vm6588_vm11, %v6576_v0, %v6591_v13 }
 0x615   :  { %v6596_v4 = vsel %vm6588_vm11, %v6579_v25, %v6595_v28  ;;  %v6598_v44 = vsel %vm6586_vm9, %v6576_v0, %v6579_v25  ;;  %v6593_v55 = vsel %vm6587_vm10, %v6590_v19, %v6592_v60  ;;  %v6599_v21 = vsel %vm6589_vm12, %v6585_v14, 1326507024 }
 0x616   :  { %vm8575_vm13 = vcmp.lt.s32.totalorder %v8574_v49, 0  ;;  %v6597_v48 = vsel %vm6587_vm10, %v6594_v33, %v6596_v4  ;;  %v6600_v58 = vsel %vm6588_vm11, %v6582_v5, %v6599_v21  ;;  %v6660_v23 = vand.u32 2139095040, %v13534_v8 }
 0x617   :  { %v6522_v31 = vsel %vm8575_vm13, 0, %v8574_v49  ;;  %v13541_v12 = vmul.u32.u64.low %v6602_v18, %v6597_v48  ;;  %v13542_v29 = vmul.u32.u64.high %v6602_v18, %v6597_v48, %v13541_v12  ;;  %v6601_v9 = vsel %vm6587_vm10, %v6598_v44, %v6600_v58 }
 0x618   :  { %v6523_v6 = vsub.s32 32, %v6522_v31  ;;  %v6524_v50 = vshll.u32 %v13515_v63, %v6522_v31  ;;  %v6527_v15 = vsub.s32 4294967266, %v6522_v31  ;;  %vm6443_vm14 = vcmp.eq.s32.totalorder %v13506_v16, 0 }
 0x619   :  { %v13547_v1 = vmul.u32.u64.low %v6602_v18, %v6601_v9  ;;  %v13548_v26 = vmul.u32.u64.high %v6602_v18, %v6601_v9, %v13547_v1  ;;  %vm6446_vm15 = vcmp.eq.s32.totalorder %v13506_v16, 2  ;;  %v6609_v20 = vmul.u32 %v6602_v18, %v6593_v55 }
 0x61a   :  { %v6525_v3 = vshrl.u32 %v6507_v41, %v6523_v6  ;;  %v6528_v2 = vadd.s32 127, %v6527_v15  ;;  %v6612_v63 = vadd.s32 1, %v13542_v29  ;;  %v6661_v17 = vshrl.u32 %v6660_v23, 23 }
 0x61b   :  { %vm6442_vm0 = vcmp.lt.s32.totalorder %v13506_v16, 2  ;;  %v6537_v56 = vsub.s32 4, %v13503_v7  ;;  %vm6611_vm1 = vc.u32 %v13548_v26, %v13541_v12  ;;  %vm6440_vm2 = vweird.f32 %v13290_v59 }
 0x61c   :  { %v9217_v51 = vpop.eup %9216  ;;  %v6526_v62 = vor.u32 %v6525_v3, %v6524_v50  ;;  %v6529_v52 = vshll.u32 %v6528_v2, 23  ;;  %v8580_v42 = vadd.s32 4294967169, %v6661_v17  ;;  %v6613_v24 = vsel %vm6611_vm1, %v6612_v63, %v13542_v29 }
 0x61d   :  { %v9219_v43 = vpop.eup %9218  ;;  %v6447_v35 = vxor.u32 2147483648, %v9217_v51  ;;  %v6614_v41 = vadd.s32 %v6613_v24, %v6609_v20  ;;  %vm6453_vm3 = vcmp.lt.s32.totalorder %v13393_v27, 0  ;;  %v6657_v5 = vand.u32 2147483647, %v13534_v8 }
 0x61e   :  { %v6444_v61 = vxor.u32 2147483648, %v9219_v43  ;;  %v6530_v22 = vor.u32 4788187, %v6529_v52  ;;  %v6533_v47 = vcvt.s32.f32 %v6526_v62  ;;  %v6667_v10 = vadd.s32 1, %v8580_v42 }
 0x61f   :  { %v6448_v37 = vsel %vm6446_vm15, %v6447_v35, %v9219_v43  ;;  %v6615_v25 = vadd.s32 536870912, %v6614_v41  ;;  %v13567_v16 = vsel %vm6453_vm3, %v6537_v56, %v13503_v7  ;;  %vm13575_vm5 = vcmp.le.f32.partialorder %v6451_v39, 0.7853982 }
 0x620   :  { %v6445_v57 = vsel %vm6443_vm14, %v9217_v51, %v6444_v61  ;;  %v6531_v0 = vand.u32 2147483647, %v6530_v22  ;;  %vm6668_vm4 = vcmp.gt.s32.totalorder %v6667_v10, 0  ;;  %v6540_v14 = vsel %vm13575_vm5, 0, %v13567_v16 }
 0x621   :  { %v6449_v18 = vsel %vm6442_vm0, %v6445_v57, %v6448_v37  ;;  %v6669_v11 = vsel %vm6668_vm4, %v6667_v10, 0  ;;  %v13571_v19 = vshrl.u32 %v6615_v25, 30  ;;  %v6664_v13 = vand.u32 8388607, %v6657_v5 }
 0x622   :  { %v6534_v54 = vmul.f32 %v6533_v47, %v6531_v0  ;;  %v13569_v53 = vsel %vm6440_vm2, nan, %v6449_v18  ;;  %v6671_v59 = vand.u32 31, %v6669_v11  ;;  %v6670_v21 = vshrl.u32 %v6669_v11, 5 }
 0x623   :  { %v6617_v7 = vshll.u32 %v13571_v19, 30  ;;  %v6763_v44 = vand.u32 2139095040, %v13569_v53  ;;  %v6610_v50 = vadd.s32 %v13541_v12, %v13548_v26  ;;  %v6665_v9 = vor.u32 8388608, %v6664_v13 }
 0x624   :  { %v6535_v49 = vxor.u32 2147483648, %v6534_v54  ;;  %v6672_v28 = vsub.s32 32, %v6671_v59  ;;  %v6674_v4 = vshll.u32 %v9337_v30, %v6671_v59  ;;  %v6677_v39 = vshll.u32 %v9338_v32, %v6671_v59 }
 0x625   :  { %v13593_v48 = vsub.s32 %v6614_v41, %v6617_v7  ;;  %v6680_v31 = vshll.u32 %v9339_v34, %v6671_v59  ;;  %v6683_v6 = vshll.u32 %v9340_v36, %v6671_v59  ;;  %v6686_v2 = vshll.u32 %v9341_v38, %v6671_v59 }
 0x626   :  { %v6536_v60 = vsel %vm6453_vm3, %v6535_v49, %v6534_v54  ;;  %v6675_v58 = vshrl.u32 %v9338_v32, %v6672_v28  ;;  %v6678_v29 = vshrl.u32 %v9339_v34, %v6672_v28  ;;  %v6681_v1 = vshrl.u32 %v9340_v36, %v6672_v28 }
 0x627   :  { %v6539_v55 = vsel %vm13575_vm5, %v13393_v27, %v6536_v60  ;;  %v6620_v15 = vsub.s32 0, %v13593_v48  ;;  %v6684_v3 = vshrl.u32 %v9341_v38, %v6672_v28  ;;  %v6673_v35 = vshrl.u32 %v9337_v30, %v6672_v28 }
 0x628   :  { %9220 = vcosq.f32 %v6539_v55  ;;  %v6676_v23 = vor.u32 %v6675_v58, %v6674_v4  ;;  %v6679_v51 = vor.u32 %v6678_v29, %v6677_v39  ;;  %v6764_v20 = vshrl.u32 %v6763_v44, 23 }
 0x629   :  { %9222 = vsinq.f32 %v6539_v55  ;;  %v8577_v43 = vmin.u32 %v6620_v15, %v13593_v48  ;;  %v6682_v63 = vor.u32 %v6681_v1, %v6680_v31  ;;  %v6685_v17 = vor.u32 %v6684_v3, %v6683_v6 }
 0x62a   :  { %v6687_v12 = vshrl.u32 %v9342_v46, %v6672_v28  ;;  %vm6689_vm6 = vcmp.lt.s32.totalorder %v6670_v21, 1  ;;  %vm6691_vm7 = vcmp.lt.s32.totalorder %v6670_v21, 3  ;;  %vm6692_vm8 = vcmp.lt.s32.totalorder %v6670_v21, 4 }
 0x62b   :  { %v6622_v26 = vclz %v8577_v43  ;;  %v6705_v61 = vshll.u32 %v6665_v9, 8  ;;  %vm6690_vm9 = vcmp.lt.s32.totalorder %v6670_v21, 2  ;;  %v6694_v52 = vsel %vm6692_vm8, %v6682_v63, 2102212464 }
 0x62c   :  { %v6688_v62 = vor.u32 %v6687_v12, %v6686_v2  ;;  %v6697_v37 = vsel %vm6689_vm6, %v6676_v23, %v6679_v51  ;;  %v6693_v42 = vsel %vm6689_vm6, %v6673_v35, %v6676_v23  ;;  %v6698_v57 = vsel %vm6692_vm8, %v6685_v17, 920167782 }
 0x62d   :  { %v8578_v56 = vadd.s32 4294967294, %v6622_v26  ;;  %v6701_v22 = vsel %vm6689_vm6, %v6679_v51, %v6682_v63  ;;  %v6695_v47 = vsel %vm6691_vm7, %v6679_v51, %v6694_v52  ;;  %v6699_v24 = vsel %vm6691_vm7, %v6682_v63, %v6698_v57 }
 0x62e   :  { %v6702_v41 = vsel %vm6692_vm8, %v6688_v62, 1326507024  ;;  %v8584_v10 = vadd.s32 4294967169, %v6764_v20  ;;  %v6700_v18 = vsel %vm6690_vm9, %v6697_v37, %v6699_v24  ;;  %v6760_v25 = vand.u32 2147483647, %v13569_v53 }
 0x62f   :  { %vm8579_vm10 = vcmp.lt.s32.totalorder %v8578_v56, 0  ;;  %v6703_v0 = vsel %vm6691_vm7, %v6685_v17, %v6702_v41  ;;  %v13614_v11 = vmul.u32.u64.low %v6705_v61, %v6700_v18  ;;  %v13615_v59 = vmul.u32.u64.high %v6705_v61, %v6700_v18, %v13614_v11 }
 0x630   :  { %v6625_v54 = vsel %vm8579_vm10, 0, %v8578_v56  ;;  %v6704_v16 = vsel %vm6690_vm9, %v6701_v22, %v6703_v0  ;;  %v6696_v13 = vsel %vm6690_vm9, %v6693_v42, %v6695_v47  ;;  %v13620_v28 = vand.u32 3, %v6540_v14 }
 0x631   :  { %v6626_v33 = vsub.s32 32, %v6625_v54  ;;  %v6627_v49 = vshll.u32 %v13593_v48, %v6625_v54  ;;  %v6630_v7 = vsub.s32 4294967266, %v6625_v54  ;;  %v6770_v39 = vadd.s32 1, %v8584_v10 }
 0x632   :  { %v13622_v60 = vmul.u32.u64.low %v6705_v61, %v6704_v16  ;;  %v13623_v4 = vmul.u32.u64.high %v6705_v61, %v6704_v16, %v13622_v60  ;;  %v6712_v58 = vmul.u32 %v6705_v61, %v6696_v13  ;;  %v6715_v29 = vadd.s32 1, %v13615_v59 }
 0x633   :  { %v6628_v55 = vshrl.u32 %v6610_v50, %v6626_v33  ;;  %v6631_v31 = vadd.s32 127, %v6630_v7  ;;  %v6767_v6 = vand.u32 8388607, %v6760_v25  ;;  %vm6771_vm11 = vcmp.gt.s32.totalorder %v6770_v39, 0 }
 0x634   :  { %v6772_v9 = vsel %vm6771_vm11, %v6770_v39, 0  ;;  %vm6549_vm12 = vcmp.eq.s32.totalorder %v13620_v28, 2  ;;  %vm6556_vm13 = vcmp.lt.s32.totalorder %v13460_v45, 0  ;;  %vm6714_vm14 = vc.u32 %v13623_v4, %v13614_v11 }
 0x635   :  { %v9221_v44 = vpop.eup %9220  ;;  %v6629_v15 = vor.u32 %v6628_v55, %v6627_v49  ;;  %v6632_v21 = vshll.u32 %v6631_v31, 23  ;;  %vm13634_vm15 = vcmp.le.f32.partialorder %v6554_v40, 0.7853982  ;;  %v6716_v51 = vsel %vm6714_vm14, %v6715_v29, %v13615_v59 }
 0x636   :  { %v6550_v48 = vxor.u32 2147483648, %v9221_v44  ;;  %v9223_v14 = vpop.eup %9222  ;;  %vm6545_vm0 = vcmp.lt.s32.totalorder %v13620_v28, 2  ;;  %vm6546_vm1 = vcmp.eq.s32.totalorder %v13620_v28, 0  ;;  %v6717_v3 = vadd.s32 %v6716_v51, %v6712_v58 }
 0x637   :  { %v6633_v1 = vor.u32 4788187, %v6632_v21  ;;  %v6636_v23 = vcvt.s32.f32 %v6629_v15  ;;  %v6774_v2 = vand.u32 31, %v6772_v9  ;;  %v6547_v43 = vxor.u32 2147483648, %v9223_v14 }
 0x638   :  { %v6551_v35 = vsel %vm6549_vm12, %v6550_v48, %v9223_v14  ;;  %v6768_v63 = vor.u32 8388608, %v6767_v6  ;;  %v6718_v17 = vadd.s32 536870912, %v6717_v3  ;;  %v6773_v12 = vshrl.u32 %v6772_v9, 5 }
 0x639   :  { %v6634_v20 = vand.u32 2147483647, %v6633_v1  ;;  %v6775_v40 = vsub.s32 32, %v6774_v2  ;;  %v6777_v26 = vshll.u32 %v9337_v30, %v6774_v2  ;;  %v6780_v62 = vshll.u32 %v9338_v32, %v6774_v2 }
 0x63a   :  { %v6783_v52 = vshll.u32 %v9339_v34, %v6774_v2  ;;  %v6786_v37 = vshll.u32 %v9340_v36, %v6774_v2  ;;  %v13645_v56 = vshrl.u32 %v6718_v17, 30  ;;  %v6789_v22 = vshll.u32 %v9341_v38, %v6774_v2 }
 0x63b   :  { %v6637_v61 = vmul.f32 %v6636_v23, %v6634_v20  ;;  %v6778_v42 = vshrl.u32 %v9338_v32, %v6775_v40  ;;  %v6781_v57 = vshrl.u32 %v9339_v34, %v6775_v40  ;;  %v6784_v24 = vshrl.u32 %v9340_v36, %v6775_v40 }
 0x63c   :  { %v6787_v41 = vshrl.u32 %v9341_v38, %v6775_v40  ;;  %v6790_v10 = vshrl.u32 %v9342_v46, %v6775_v40  ;;  %v6548_v18 = vsel %vm6546_vm1, %v9221_v44, %v6547_v43  ;;  %v6720_v0 = vshll.u32 %v13645_v56, 30 }
 0x63d   :  { %v6638_v47 = vxor.u32 2147483648, %v6637_v61  ;;  %v6779_v54 = vor.u32 %v6778_v42, %v6777_v26  ;;  %vm6792_vm2 = vcmp.lt.s32.totalorder %v6773_v12, 1  ;;  %v6782_v59 = vor.u32 %v6781_v57, %v6780_v62 }
 0x63e   :  { %v6785_v33 = vor.u32 %v6784_v24, %v6783_v52  ;;  %v6788_v49 = vor.u32 %v6787_v41, %v6786_v37  ;;  %v6721_v13 = vsub.s32 %v6717_v3, %v6720_v0  ;;  %v6776_v60 = vshrl.u32 %v9337_v30, %v6775_v40 }
 0x63f   :  { %v6639_v16 = vsel %vm6556_vm13, %v6638_v47, %v6637_v61  ;;  %vm6795_vm3 = vcmp.lt.s32.totalorder %v6773_v12, 4  ;;  %vm6543_vm4 = vweird.f32 %v13393_v27  ;;  %v6791_v39 = vor.u32 %v6790_v10, %v6789_v22 }
 0x640   :  { %v6642_v7 = vsel %vm13634_vm15, %v13460_v45, %v6639_v16  ;;  %v6797_v44 = vsel %vm6795_vm3, %v6785_v33, 2102212464  ;;  %v6552_v55 = vsel %vm6545_vm0, %v6548_v18, %v6551_v35  ;;  %v6723_v31 = vsub.s32 0, %v6721_v13 }
 0x641   :  { %9224 = vcosq.f32 %v6642_v7  ;;  %vm6794_vm5 = vcmp.lt.s32.totalorder %v6773_v12, 3  ;;  %vm6793_vm6 = vcmp.lt.s32.totalorder %v6773_v12, 2  ;;  %v6800_v58 = vsel %vm6792_vm2, %v6779_v54, %v6782_v59 }
 0x642   :  { %9226 = vsinq.f32 %v6642_v7  ;;  %v6801_v29 = vsel %vm6795_vm3, %v6788_v49, 920167782  ;;  %v6808_v6 = vshll.u32 %v6768_v63, 8  ;;  %v8581_v48 = vmin.u32 %v6723_v31, %v6721_v13 }
 0x643   :  { %v6796_v15 = vsel %vm6792_vm2, %v6776_v60, %v6779_v54  ;;  %v6798_v21 = vsel %vm6794_vm5, %v6782_v59, %v6797_v44  ;;  %v6804_v9 = vsel %vm6792_vm2, %v6782_v59, %v6785_v33  ;;  %v13672_v14 = vsel %vm6543_vm4, nan, %v6552_v55 }
 0x644   :  { %v6640_v28 = vsub.s32 4, %v13571_v19  ;;  %v6802_v1 = vsel %vm6794_vm5, %v6785_v33, %v6801_v29  ;;  %v6805_v23 = vsel %vm6795_vm3, %v6791_v39, 1326507024  ;;  %v6725_v51 = vclz %v8581_v48 }
 0x645   :  { %v6803_v3 = vsel %vm6793_vm6, %v6800_v58, %v6802_v1  ;;  %v6806_v2 = vsel %vm6794_vm5, %v6788_v49, %v6805_v23  ;;  %v6799_v43 = vsel %vm6793_vm6, %v6796_v15, %v6798_v21  ;;  %v6866_v26 = vand.u32 2139095040, %v13672_v14 }
 0x646   :  { %v6807_v35 = vsel %vm6793_vm6, %v6804_v9, %v6806_v2  ;;  %v13679_v20 = vmul.u32.u64.low %v6808_v6, %v6803_v3  ;;  %v13680_v63 = vmul.u32.u64.high %v6808_v6, %v6803_v3, %v13679_v20  ;;  %v8582_v17 = vadd.s32 4294967294, %v6725_v51 }
 0x647   :  { %v13682_v27 = vmul.u32.u64.low %v6808_v6, %v6807_v35  ;;  %v13683_v40 = vmul.u32.u64.high %v6808_v6, %v6807_v35, %v13682_v27  ;;  %v6641_v61 = vsel %vm6556_vm13, %v6640_v28, %v13571_v19  ;;  %v6713_v62 = vadd.s32 %v13614_v11, %v13623_v4 }
 0x648   :  { %vm8583_vm7 = vcmp.lt.s32.totalorder %v8582_v17, 0  ;;  %v6867_v52 = vshrl.u32 %v6866_v26, 23  ;;  %v6815_v37 = vmul.u32 %v6808_v6, %v6799_v43  ;;  %v6818_v42 = vadd.s32 1, %v13680_v63 }
 0x649   :  { %v6728_v12 = vsel %vm8583_vm7, 0, %v8582_v17  ;;  %v6643_v57 = vsel %vm13634_vm15, 0, %v6641_v61  ;;  %vm6817_vm8 = vc.u32 %v13683_v40, %v13679_v20  ;;  %v6863_v41 = vand.u32 2147483647, %v13672_v14 }
 0x64a   :  { %v6729_v22 = vsub.s32 32, %v6728_v12  ;;  %v6730_v47 = vshll.u32 %v6721_v13, %v6728_v12  ;;  %v6733_v24 = vsub.s32 4294967266, %v6728_v12  ;;  %v8588_v19 = vadd.s32 4294967169, %v6867_v52 }
 0x64b   :  { %v6819_v4 = vsel %vm6817_vm8, %v6818_v42, %v13680_v63  ;;  %v6647_v54 = vand.u32 3, %v6643_v57  ;;  %vm6659_vm9 = vcmp.lt.s32.totalorder %v13534_v8, 0  ;;  %v6870_v13 = vand.u32 8388607, %v6863_v41 }
 0x64c   :  { %v6731_v18 = vshrl.u32 %v6713_v62, %v6729_v22  ;;  %v6734_v11 = vadd.s32 127, %v6733_v24  ;;  %v6820_v16 = vadd.s32 %v6819_v4, %v6815_v37  ;;  %v6873_v59 = vadd.s32 1, %v8588_v19 }
 0x64d   :  { %vm6649_vm11 = vcmp.eq.s32.totalorder %v6647_v54, 0  ;;  %vm6652_vm12 = vcmp.eq.s32.totalorder %v6647_v54, 2  ;;  %vm6648_vm13 = vcmp.lt.s32.totalorder %v6647_v54, 2  ;;  %vm13704_vm14 = vcmp.le.f32.partialorder %v6657_v5, 0.7853982 }
 0x64e   :  { %v9225_v10 = vpop.eup %9224  ;;  %v6732_v50 = vor.u32 %v6731_v18, %v6730_v47  ;;  %v6735_v33 = vshll.u32 %v6734_v11, 23  ;;  %v6821_v7 = vadd.s32 536870912, %v6820_v16  ;;  %vm6874_vm10 = vcmp.gt.s32.totalorder %v6873_v59, 0 }
 0x64f   :  { %v9227_v0 = vpop.eup %9226  ;;  %v6653_v49 = vxor.u32 2147483648, %v9225_v10  ;;  %v6875_v55 = vsel %vm6874_vm10, %v6873_v59, 0  ;;  %v6743_v48 = vsub.s32 4, %v13645_v56  ;;  %v13710_v15 = vadd.s32 %v13679_v20, %v13683_v40 }
 0x650   :  { %v6650_v60 = vxor.u32 2147483648, %v9227_v0  ;;  %v6736_v39 = vor.u32 4788187, %v6735_v33  ;;  %v6739_v44 = vcvt.s32.f32 %v6732_v50  ;;  %v13700_v31 = vshrl.u32 %v6821_v7, 30 }
 0x651   :  { %v6877_v58 = vand.u32 31, %v6875_v55  ;;  %v6871_v9 = vor.u32 8388608, %v6870_v13  ;;  %vm6646_vm15 = vweird.f32 %v13460_v45  ;;  %v6654_v23 = vsel %vm6652_vm12, %v6653_v49, %v9227_v0 }
 0x652   :  { %v6737_v6 = vand.u32 2147483647, %v6736_v39  ;;  %v6823_v21 = vshll.u32 %v13700_v31, 30  ;;  %v6651_v1 = vsel %vm6649_vm11, %v9225_v10, %v6650_v60  ;;  %v6876_v26 = vshrl.u32 %v6875_v55, 5 }
 0x653   :  { %v6878_v28 = vsub.s32 32, %v6877_v58  ;;  %v6880_v5 = vshll.u32 %v9337_v30, %v6877_v58  ;;  %v6883_v43 = vshll.u32 %v9338_v32, %v6877_v58  ;;  %v6886_v35 = vshll.u32 %v9339_v34, %v6877_v58 }
 0x654   :  { %v6740_v51 = vmul.f32 %v6739_v44, %v6737_v6  ;;  %v13715_v3 = vsub.s32 %v6820_v16, %v6823_v21  ;;  %v6889_v27 = vshll.u32 %v9340_v36, %v6877_v58  ;;  %v13725_v62 = vshll.u32 %v6871_v9, 8 }
 0x655   :  { %v6881_v2 = vshrl.u32 %v9338_v32, %v6878_v28  ;;  %v6884_v63 = vshrl.u32 %v9339_v34, %v6878_v28  ;;  %v6887_v17 = vshrl.u32 %v9340_v36, %v6878_v28  ;;  %v6890_v61 = vshrl.u32 %v9341_v38, %v6878_v28 }
 0x656   :  { %v6741_v20 = vxor.u32 2147483648, %v6740_v51  ;;  %v6826_v40 = vsub.s32 0, %v13715_v3  ;;  %v6655_v52 = vsel %vm6648_vm13, %v6651_v1, %v6654_v23  ;;  %v6879_v37 = vshrl.u32 %v9337_v30, %v6878_v28 }
 0x657   :  { %v6892_v42 = vshll.u32 %v9341_v38, %v6877_v58  ;;  %v6882_v47 = vor.u32 %v6881_v2, %v6880_v5  ;;  %v6885_v24 = vor.u32 %v6884_v63, %v6883_v43  ;;  %v6888_v19 = vor.u32 %v6887_v17, %v6886_v35 }
 0x658   :  { %v6742_v12 = vsel %vm6659_vm9, %v6741_v20, %v6740_v51  ;;  %v8585_v22 = vmin.u32 %v6826_v40, %v13715_v3  ;;  %v6891_v10 = vor.u32 %v6890_v61, %v6889_v27  ;;  %v6893_v18 = vshrl.u32 %v9342_v46, %v6878_v28 }
 0x659   :  { %v6745_v57 = vsel %vm13704_vm14, %v13534_v8, %v6742_v12  ;;  %vm6895_vm0 = vcmp.lt.s32.totalorder %v6876_v26, 1  ;;  %vm6896_vm1 = vcmp.lt.s32.totalorder %v6876_v26, 2  ;;  %vm6897_vm2 = vcmp.lt.s32.totalorder %v6876_v26, 3 }
 0x65a   :  { %9228 = vcosq.f32 %v6745_v57  ;;  %v6828_v11 = vclz %v8585_v22  ;;  %v6894_v4 = vor.u32 %v6893_v18, %v6892_v42  ;;  %vm6898_vm3 = vcmp.lt.s32.totalorder %v6876_v26, 4 }
 0x65b   :  { %9230 = vsinq.f32 %v6745_v57  ;;  %v6899_v0 = vsel %vm6895_vm0, %v6879_v37, %v6882_v47  ;;  %v6900_v16 = vsel %vm6898_vm3, %v6888_v19, 2102212464  ;;  %v6903_v59 = vsel %vm6895_vm0, %v6882_v47, %v6885_v24 }
 0x65c   :  { %v8586_v54 = vadd.s32 4294967294, %v6828_v11  ;;  %v6904_v50 = vsel %vm6898_vm3, %v6891_v10, 920167782  ;;  %v6901_v33 = vsel %vm6897_vm2, %v6885_v24, %v6900_v16  ;;  %v6907_v7 = vsel %vm6895_vm0, %v6885_v24, %v6888_v19 }
 0x65d   :  { %v6905_v49 = vsel %vm6897_vm2, %v6888_v19, %v6904_v50  ;;  %v6908_v13 = vsel %vm6898_vm3, %v6894_v4, 1326507024  ;;  %v13739_v60 = vsel %vm6646_vm15, nan, %v6655_v52  ;;  %v6902_v45 = vsel %vm6896_vm1, %v6899_v0, %v6901_v33 }
 0x65e   :  { %vm8587_vm4 = vcmp.lt.s32.totalorder %v8586_v54, 0  ;;  %v6906_v39 = vsel %vm6896_vm1, %v6903_v59, %v6905_v49  ;;  %v6909_v44 = vsel %vm6897_vm2, %v6891_v10, %v6908_v13  ;;  %v6744_v23 = vsel %vm6659_vm9, %v6743_v48, %v13645_v56 }
 0x65f   :  { %v6831_v55 = vsel %vm8587_vm4, 0, %v8586_v54  ;;  %v6910_v58 = vsel %vm6896_vm1, %v6907_v7, %v6909_v44  ;;  %v13744_v6 = vmul.u32.u64.low %v13725_v62, %v6906_v39  ;;  %v13745_v21 = vmul.u32.u64.high %v13725_v62, %v6906_v39, %v13744_v6 }
 0x660   :  { %v6832_v9 = vsub.s32 32, %v6831_v55  ;;  %v6833_v28 = vshll.u32 %v13715_v3, %v6831_v55  ;;  %v6836_v1 = vsub.s32 4294967266, %v6831_v55  ;;  %v6969_v35 = vand.u32 2139095040, %v13739_v60 }
 0x661   :  { %v13754_v51 = vmul.u32.u64.low %v13725_v62, %v6910_v58  ;;  %v13755_v5 = vmul.u32.u64.high %v13725_v62, %v6910_v58, %v13754_v51  ;;  %v6846_v20 = vsub.s32 4, %v13700_v31  ;;  %v6918_v3 = vmul.u32 %v13725_v62, %v6902_v45 }
 0x662   :  { %v6834_v2 = vshrl.u32 %v13710_v15, %v6832_v9  ;;  %v6837_v43 = vadd.s32 127, %v6836_v1  ;;  %v6921_v63 = vadd.s32 1, %v13745_v21  ;;  %v6746_v17 = vsel %vm13704_vm14, 0, %v6744_v23 }
 0x663   :  { %v6970_v48 = vshrl.u32 %v6969_v35, 23  ;;  %vm6762_vm5 = vcmp.lt.s32.totalorder %v13569_v53, 0  ;;  %vm6920_vm6 = vc.u32 %v13755_v5, %v13744_v6  ;;  %v6966_v15 = vand.u32 2147483647, %v13739_v60 }
 0x664   :  { %v6835_v27 = vor.u32 %v6834_v2, %v6833_v28  ;;  %v6838_v56 = vshll.u32 %v6837_v43, 23  ;;  %v6922_v62 = vsel %vm6920_vm6, %v6921_v63, %v13745_v21  ;;  %v6750_v37 = vand.u32 3, %v6746_v17 }
 0x665   :  { %v8592_v52 = vadd.s32 4294967169, %v6970_v48  ;;  %v6847_v29 = vsel %vm6762_vm5, %v6846_v20, %v13700_v31  ;;  %v6923_v42 = vadd.s32 %v6922_v62, %v6918_v3  ;;  %vm13774_vm7 = vcmp.le.f32.partialorder %v6760_v25, 0.7853982 }
 0x666   :  { %v6839_v26 = vor.u32 4788187, %v6838_v56  ;;  %v6842_v61 = vcvt.s32.f32 %v6835_v27  ;;  %v6973_v19 = vand.u32 8388607, %v6966_v15  ;;  %v6849_v11 = vsel %vm13774_vm7, 0, %v6847_v29 }
 0x667   :  { %v9229_v40 = vpop.eup %9228  ;;  %v6976_v22 = vadd.s32 1, %v8592_v52  ;;  %v6924_v24 = vadd.s32 536870912, %v6923_v42  ;;  %vm6755_vm9 = vcmp.eq.s32.totalorder %v6750_v37, 2  ;;  %vm6752_vm10 = vcmp.eq.s32.totalorder %v6750_v37, 0 }
 0x668   :  { %v9231_v12 = vpop.eup %9230  ;;  %v6840_v57 = vand.u32 2147483647, %v6839_v26  ;;  %v6756_v10 = vxor.u32 2147483648, %v9229_v40  ;;  %vm6749_vm11 = vweird.f32 %v13534_v8  ;;  %vm6751_vm12 = vcmp.lt.s32.totalorder %v6750_v37, 2 }
 0x669   :  { %vm6977_vm8 = vcmp.gt.s32.totalorder %v6976_v22, 0  ;;  %v6753_v31 = vxor.u32 2147483648, %v9231_v12  ;;  %v13782_v4 = vshrl.u32 %v6924_v24, 30  ;;  %v13785_v16 = vand.u32 3, %v6849_v11 }
 0x66a   :  { %v6843_v18 = vmul.f32 %v6842_v61, %v6840_v57  ;;  %v6978_v0 = vsel %vm6977_vm8, %v6976_v22, 0  ;;  %v6974_v50 = vor.u32 8388608, %v6973_v19  ;;  %v6757_v33 = vsel %vm6755_vm9, %v6756_v10, %v9231_v12 }
 0x66b   :  { %v6980_v54 = vand.u32 31, %v6978_v0  ;;  %v6926_v59 = vshll.u32 %v13782_v4, 30  ;;  %v6754_v39 = vsel %vm6752_vm10, %v9229_v40, %v6753_v31  ;;  %v6979_v58 = vshrl.u32 %v6978_v0, 5 }
 0x66c   :  { %v6844_v25 = vxor.u32 2147483648, %v6843_v18  ;;  %v6758_v20 = vsel %vm6751_vm12, %v6754_v39, %v6757_v33  ;;  %v6919_v3 = vadd.s32 %v13744_v6, %v13755_v5  ;;  %v7014_v17 = vshll.u32 %v6974_v50, 8 }
 0x66d   :  { %v6981_v7 = vsub.s32 32, %v6980_v54  ;;  %v6983_v13 = vshll.u32 %v9337_v30, %v6980_v54  ;;  %v13794_v55 = vsub.s32 %v6923_v42, %v6926_v59  ;;  %v6986_v9 = vshll.u32 %v9338_v32, %v6980_v54 }
 0x66e   :  { %v6845_v49 = vsel %vm6762_vm5, %v6844_v25, %v6843_v18  ;;  %v6989_v28 = vshll.u32 %v9339_v34, %v6980_v54  ;;  %v6992_v43 = vshll.u32 %v9340_v36, %v6980_v54  ;;  %v6995_v40 = vshll.u32 %v9341_v38, %v6980_v54 }
 0x66f   :  { %v6848_v44 = vsel %vm13774_vm7, %v13569_v53, %v6845_v49  ;;  %v6984_v21 = vshrl.u32 %v9338_v32, %v6981_v7  ;;  %v6929_v1 = vsub.s32 0, %v13794_v55  ;;  %v6982_v45 = vshrl.u32 %v9337_v30, %v6981_v7 }
 0x670   :  { %9232 = vcosq.f32 %v6848_v44  ;;  %v6987_v23 = vshrl.u32 %v9339_v34, %v6981_v7  ;;  %v6990_v2 = vshrl.u32 %v9340_v36, %v6981_v7  ;;  %v6993_v35 = vshrl.u32 %v9341_v38, %v6981_v7 }
 0x671   :  { %9234 = vsinq.f32 %v6848_v44  ;;  %v6985_v51 = vor.u32 %v6984_v21, %v6983_v13  ;;  %v8589_v63 = vmin.u32 %v6929_v1, %v13794_v55  ;;  %v6996_v61 = vshrl.u32 %v9342_v46, %v6981_v7 }
 0x672   :  { %v6988_v27 = vor.u32 %v6987_v23, %v6986_v9  ;;  %v6991_v56 = vor.u32 %v6990_v2, %v6989_v28  ;;  %v6994_v48 = vor.u32 %v6993_v35, %v6992_v43  ;;  %vm6998_vm13 = vcmp.lt.s32.totalorder %v6979_v58, 1 }
 0x673   :  { %v6931_v26 = vclz %v8589_v63  ;;  %vm6999_vm14 = vcmp.lt.s32.totalorder %v6979_v58, 2  ;;  %vm7000_vm15 = vcmp.lt.s32.totalorder %v6979_v58, 3  ;;  %vm7001_vm0 = vcmp.lt.s32.totalorder %v6979_v58, 4 }
 0x674   :  { %v7002_v62 = vsel %vm6998_vm13, %v6982_v45, %v6985_v51  ;;  %v7006_v52 = vsel %vm6998_vm13, %v6985_v51, %v6988_v27  ;;  %v6997_v37 = vor.u32 %v6996_v61, %v6995_v40  ;;  %v7003_v6 = vsel %vm7001_vm0, %v6991_v56, 2102212464 }
 0x675   :  { %v8590_v12 = vadd.s32 4294967294, %v6931_v26  ;;  %v7007_v5 = vsel %vm7001_vm0, %v6994_v48, 920167782  ;;  %v13813_v29 = vsel %vm6749_vm11, nan, %v6758_v20  ;;  %v7004_v42 = vsel %vm7000_vm15, %v6988_v27, %v7003_v6 }
 0x676   :  { %v7008_v57 = vsel %vm7000_vm15, %v6991_v56, %v7007_v5  ;;  %v7010_v22 = vsel %vm6998_vm13, %v6988_v27, %v6991_v56  ;;  %v7005_v47 = vsel %vm6999_vm14, %v7002_v62, %v7004_v42  ;;  %v7011_v19 = vsel %vm7001_vm0, %v6997_v37, 1326507024 }
 0x677   :  { %vm8591_vm1 = vcmp.lt.s32.totalorder %v8590_v12, 0  ;;  %v7009_v24 = vsel %vm6999_vm14, %v7006_v52, %v7008_v57  ;;  %v7012_v18 = vsel %vm7000_vm15, %v6994_v48, %v7011_v19  ;;  %v7072_v33 = vand.u32 2139095040, %v13813_v29 }
 0x678   :  { %v6934_v10 = vsel %vm8591_vm1, 0, %v8590_v12  ;;  %v13820_v11 = vmul.u32.u64.low %v7014_v17, %v7009_v24  ;;  %v13821_v31 = vmul.u32.u64.high %v7014_v17, %v7009_v24, %v13820_v11  ;;  %v7013_v54 = vsel %vm6999_vm14, %v7010_v22, %v7012_v18 }
 0x679   :  { %v6935_v8 = vsub.s32 32, %v6934_v10  ;;  %v6936_v0 = vshll.u32 %v13794_v55, %v6934_v10  ;;  %v6939_v25 = vsub.s32 4294967266, %v6934_v10  ;;  %vm6855_vm2 = vcmp.eq.s32.totalorder %v13785_v16, 0 }
 0x67a   :  { %v13826_v59 = vmul.u32.u64.low %v7014_v17, %v7013_v54  ;;  %v13827_v50 = vmul.u32.u64.high %v7014_v17, %v7013_v54, %v13826_v59  ;;  %vm6858_vm3 = vcmp.eq.s32.totalorder %v13785_v16, 2  ;;  %v7021_v21 = vmul.u32 %v7014_v17, %v7005_v47 }
 0x67b   :  { %v6937_v7 = vshrl.u32 %v6919_v3, %v6935_v8  ;;  %v6940_v13 = vadd.s32 127, %v6939_v25  ;;  %v7024_v55 = vadd.s32 1, %v13821_v31  ;;  %v7073_v9 = vshrl.u32 %v7072_v33, 23 }
 0x67c   :  { %vm6854_vm4 = vcmp.lt.s32.totalorder %v13785_v16, 2  ;;  %v6949_v23 = vsub.s32 4, %v13782_v4  ;;  %vm7023_vm5 = vc.u32 %v13827_v50, %v13820_v11  ;;  %vm6852_vm6 = vweird.f32 %v13569_v53 }
 0x67d   :  { %v9233_v49 = vpop.eup %9232  ;;  %v6938_v28 = vor.u32 %v6937_v7, %v6936_v0  ;;  %v6941_v1 = vshll.u32 %v6940_v13, 23  ;;  %v8596_v51 = vadd.s32 4294967169, %v7073_v9  ;;  %v7025_v20 = vsel %vm7023_vm5, %v7024_v55, %v13821_v31 }
 0x67e   :  { %v9235_v39 = vpop.eup %9234  ;;  %v6859_v44 = vxor.u32 2147483648, %v9233_v49  ;;  %v7026_v3 = vadd.s32 %v7025_v20, %v7021_v21  ;;  %vm6865_vm7 = vcmp.lt.s32.totalorder %v13672_v14, 0  ;;  %v7069_v48 = vand.u32 2147483647, %v13813_v29 }
 0x67f   :  { %v6856_v58 = vxor.u32 2147483648, %v9235_v39  ;;  %v6942_v43 = vor.u32 4788187, %v6941_v1  ;;  %v6945_v35 = vcvt.s32.f32 %v6938_v28  ;;  %v7079_v63 = vadd.s32 1, %v8596_v51 }
 0x680   :  { %v6860_v45 = vsel %vm6858_vm3, %v6859_v44, %v9235_v39  ;;  %v7027_v56 = vadd.s32 536870912, %v7026_v3  ;;  %v13846_v16 = vsel %vm6865_vm7, %v6949_v23, %v13782_v4  ;;  %vm13854_vm9 = vcmp.le.f32.partialorder %v6863_v41, 0.7853982 }
 0x681   :  { %v6857_v2 = vsel %vm6855_vm2, %v9233_v49, %v6856_v58  ;;  %v6943_v27 = vand.u32 2147483647, %v6942_v43  ;;  %vm7080_vm8 = vcmp.gt.s32.totalorder %v7079_v63, 0  ;;  %v6952_v37 = vsel %vm13854_vm9, 0, %v13846_v16 }
 0x682   :  { %v6861_v17 = vsel %vm6854_vm4, %v6857_v2, %v6860_v45  ;;  %v7081_v26 = vsel %vm7080_vm8, %v7079_v63, 0  ;;  %v13850_v62 = vshrl.u32 %v7027_v56, 30  ;;  %v7076_v6 = vand.u32 8388607, %v7069_v48 }
 0x683   :  { %v6946_v40 = vmul.f32 %v6945_v35, %v6943_v27  ;;  %v13848_v61 = vsel %vm6852_vm6, nan, %v6861_v17  ;;  %v7083_v53 = vand.u32 31, %v7081_v26  ;;  %v7082_v19 = vshrl.u32 %v7081_v26, 5 }
 0x684   :  { %v7029_v4 = vshll.u32 %v13850_v62, 30  ;;  %v7175_v22 = vand.u32 2139095040, %v13848_v61  ;;  %v7022_v0 = vadd.s32 %v13820_v11, %v13827_v50  ;;  %v7077_v54 = vor.u32 8388608, %v7076_v6 }
 0x685   :  { %v6947_v12 = vxor.u32 2147483648, %v6946_v40  ;;  %v7084_v5 = vsub.s32 32, %v7083_v53  ;;  %v7086_v57 = vshll.u32 %v9337_v30, %v7083_v53  ;;  %v7089_v41 = vshll.u32 %v9338_v32, %v7083_v53 }
 0x686   :  { %v13872_v24 = vsub.s32 %v7026_v3, %v7029_v4  ;;  %v7092_v10 = vshll.u32 %v9339_v34, %v7083_v53  ;;  %v7095_v8 = vshll.u32 %v9340_v36, %v7083_v53  ;;  %v7098_v13 = vshll.u32 %v9341_v38, %v7083_v53 }
 0x687   :  { %v6948_v42 = vsel %vm6865_vm7, %v6947_v12, %v6946_v40  ;;  %v7087_v18 = vshrl.u32 %v9338_v32, %v7084_v5  ;;  %v7090_v31 = vshrl.u32 %v9339_v34, %v7084_v5  ;;  %v7093_v59 = vshrl.u32 %v9340_v36, %v7084_v5 }
 0x688   :  { %v6951_v47 = vsel %vm13854_vm9, %v13672_v14, %v6948_v42  ;;  %v7032_v25 = vsub.s32 0, %v13872_v24  ;;  %v7096_v7 = vshrl.u32 %v9341_v38, %v7084_v5  ;;  %v7085_v44 = vshrl.u32 %v9337_v30, %v7084_v5 }
 0x689   :  { %9236 = vcosq.f32 %v6951_v47  ;;  %v7088_v33 = vor.u32 %v7087_v18, %v7086_v57  ;;  %v7091_v49 = vor.u32 %v7090_v31, %v7089_v41  ;;  %v7176_v21 = vshrl.u32 %v7175_v22, 23 }
 0x68a   :  { %9238 = vsinq.f32 %v6951_v47  ;;  %v8593_v39 = vmin.u32 %v7032_v25, %v13872_v24  ;;  %v7094_v55 = vor.u32 %v7093_v59, %v7092_v10  ;;  %v7097_v9 = vor.u32 %v7096_v7, %v7095_v8 }
 0x68b   :  { %v7099_v11 = vshrl.u32 %v9342_v46, %v7084_v5  ;;  %vm7101_vm10 = vcmp.lt.s32.totalorder %v7082_v19, 1  ;;  %vm7103_vm11 = vcmp.lt.s32.totalorder %v7082_v19, 3  ;;  %vm7104_vm12 = vcmp.lt.s32.totalorder %v7082_v19, 4 }
 0x68c   :  { %v7034_v50 = vclz %v8593_v39  ;;  %v7117_v58 = vshll.u32 %v7077_v54, 8  ;;  %vm7102_vm13 = vcmp.lt.s32.totalorder %v7082_v19, 2  ;;  %v7106_v1 = vsel %vm7104_vm12, %v7094_v55, 2102212464 }
 0x68d   :  { %v7100_v28 = vor.u32 %v7099_v11, %v7098_v13  ;;  %v7109_v45 = vsel %vm7101_vm10, %v7088_v33, %v7091_v49  ;;  %v7105_v51 = vsel %vm7101_vm10, %v7085_v44, %v7088_v33  ;;  %v7110_v2 = vsel %vm7104_vm12, %v7097_v9, 920167782 }
 0x68e   :  { %v8594_v23 = vadd.s32 4294967294, %v7034_v50  ;;  %v7113_v43 = vsel %vm7101_vm10, %v7091_v49, %v7094_v55  ;;  %v7107_v35 = vsel %vm7103_vm11, %v7091_v49, %v7106_v1  ;;  %v7111_v20 = vsel %vm7103_vm11, %v7094_v55, %v7110_v2 }
 0x68f   :  { %v7114_v3 = vsel %vm7104_vm12, %v7100_v28, 1326507024  ;;  %v8600_v63 = vadd.s32 4294967169, %v7176_v21  ;;  %v7112_v17 = vsel %vm7102_vm13, %v7109_v45, %v7111_v20  ;;  %v7172_v56 = vand.u32 2147483647, %v13848_v61 }
 0x690   :  { %vm8595_vm14 = vcmp.lt.s32.totalorder %v8594_v23, 0  ;;  %v7115_v27 = vsel %vm7103_vm11, %v7097_v9, %v7114_v3  ;;  %v13893_v26 = vmul.u32.u64.low %v7117_v58, %v7112_v17  ;;  %v13894_v53 = vmul.u32.u64.high %v7117_v58, %v7112_v17, %v13893_v26 }
 0x691   :  { %v7037_v40 = vsel %vm8595_vm14, 0, %v8594_v23  ;;  %v7116_v16 = vsel %vm7102_vm13, %v7113_v43, %v7115_v27  ;;  %v7108_v6 = vsel %vm7102_vm13, %v7105_v51, %v7107_v35  ;;  %v13899_v5 = vand.u32 3, %v6952_v37 }
 0x692   :  { %v7038_v52 = vsub.s32 32, %v7037_v40  ;;  %v7039_v12 = vshll.u32 %v13872_v24, %v7037_v40  ;;  %v7042_v4 = vsub.s32 4294967266, %v7037_v40  ;;  %v7182_v41 = vadd.s32 1, %v8600_v63 }
 0x693   :  { %v13901_v42 = vmul.u32.u64.low %v7117_v58, %v7116_v16  ;;  %v13902_v57 = vmul.u32.u64.high %v7117_v58, %v7116_v16, %v13901_v42  ;;  %v7124_v18 = vmul.u32 %v7117_v58, %v7108_v6  ;;  %v7127_v31 = vadd.s32 1, %v13894_v53 }
 0x694   :  { %v7040_v47 = vshrl.u32 %v7022_v0, %v7038_v52  ;;  %v7043_v10 = vadd.s32 127, %v7042_v4  ;;  %v7179_v8 = vand.u32 8388607, %v7172_v56  ;;  %vm7183_vm15 = vcmp.gt.s32.totalorder %v7182_v41, 0 }
 0x695   :  { %v7184_v54 = vsel %vm7183_vm15, %v7182_v41, 0  ;;  %vm6961_vm0 = vcmp.eq.s32.totalorder %v13899_v5, 2  ;;  %vm6968_vm1 = vcmp.lt.s32.totalorder %v13739_v60, 0  ;;  %vm7126_vm2 = vc.u32 %v13902_v57, %v13893_v26 }
 0x696   :  { %v9237_v22 = vpop.eup %9236  ;;  %v7041_v25 = vor.u32 %v7040_v47, %v7039_v12  ;;  %v7044_v19 = vshll.u32 %v7043_v10, 23  ;;  %vm13913_vm3 = vcmp.le.f32.partialorder %v6966_v15, 0.7853982  ;;  %v7128_v49 = vsel %vm7126_vm2, %v7127_v31, %v13894_v53 }
 0x697   :  { %v6962_v24 = vxor.u32 2147483648, %v9237_v22  ;;  %v9239_v37 = vpop.eup %9238  ;;  %vm6957_vm4 = vcmp.lt.s32.totalorder %v13899_v5, 2  ;;  %vm6958_vm5 = vcmp.eq.s32.totalorder %v13899_v5, 0  ;;  %v7129_v7 = vadd.s32 %v7128_v49, %v7124_v18 }
 0x698   :  { %v7045_v59 = vor.u32 4788187, %v7044_v19  ;;  %v7048_v33 = vcvt.s32.f32 %v7041_v25  ;;  %v7186_v13 = vand.u32 31, %v7184_v54  ;;  %v6959_v39 = vxor.u32 2147483648, %v9239_v37 }
 0x699   :  { %v6963_v44 = vsel %vm6961_vm0, %v6962_v24, %v9239_v37  ;;  %v7180_v55 = vor.u32 8388608, %v7179_v8  ;;  %v7130_v9 = vadd.s32 536870912, %v7129_v7  ;;  %v7185_v11 = vshrl.u32 %v7184_v54, 5 }
 0x69a   :  { %v7046_v21 = vand.u32 2147483647, %v7045_v59  ;;  %v7187_v15 = vsub.s32 32, %v7186_v13  ;;  %v7189_v50 = vshll.u32 %v9337_v30, %v7186_v13  ;;  %v7192_v28 = vshll.u32 %v9338_v32, %v7186_v13 }
 0x69b   :  { %v7195_v1 = vshll.u32 %v9339_v34, %v7186_v13  ;;  %v7198_v45 = vshll.u32 %v9340_v36, %v7186_v13  ;;  %v13924_v23 = vshrl.u32 %v7130_v9, 30  ;;  %v7201_v43 = vshll.u32 %v9341_v38, %v7186_v13 }
 0x69c   :  { %v7049_v58 = vmul.f32 %v7048_v33, %v7046_v21  ;;  %v7190_v51 = vshrl.u32 %v9338_v32, %v7187_v15  ;;  %v7193_v2 = vshrl.u32 %v9339_v34, %v7187_v15  ;;  %v7196_v20 = vshrl.u32 %v9340_v36, %v7187_v15 }
 0x69d   :  { %v7199_v3 = vshrl.u32 %v9341_v38, %v7187_v15  ;;  %v7202_v63 = vshrl.u32 %v9342_v46, %v7187_v15  ;;  %v6960_v17 = vsel %vm6958_vm5, %v9237_v22, %v6959_v39  ;;  %v7132_v27 = vshll.u32 %v13924_v23, 30 }
 0x69e   :  { %v7050_v35 = vxor.u32 2147483648, %v7049_v58  ;;  %v7191_v40 = vor.u32 %v7190_v51, %v7189_v50  ;;  %vm7204_vm6 = vcmp.lt.s32.totalorder %v7185_v11, 1  ;;  %v7194_v53 = vor.u32 %v7193_v2, %v7192_v28 }
 0x69f   :  { %v7197_v52 = vor.u32 %v7196_v20, %v7195_v1  ;;  %v7200_v12 = vor.u32 %v7199_v3, %v7198_v45  ;;  %v7133_v6 = vsub.s32 %v7129_v7, %v7132_v27  ;;  %v7188_v42 = vshrl.u32 %v9337_v30, %v7187_v15 }
 0x6a0   :  { %v7051_v16 = vsel %vm6968_vm1, %v7050_v35, %v7049_v58  ;;  %vm7207_vm7 = vcmp.lt.s32.totalorder %v7185_v11, 4  ;;  %vm6955_vm8 = vweird.f32 %v13672_v14  ;;  %v7203_v41 = vor.u32 %v7202_v63, %v7201_v43 }
 0x6a1   :  { %v7054_v4 = vsel %vm13913_vm3, %v13739_v60, %v7051_v16  ;;  %v7209_v22 = vsel %vm7207_vm7, %v7197_v52, 2102212464  ;;  %v6964_v47 = vsel %vm6957_vm4, %v6960_v17, %v6963_v44  ;;  %v7135_v10 = vsub.s32 0, %v7133_v6 }
 0x6a2   :  { %9240 = vcosq.f32 %v7054_v4  ;;  %vm7206_vm9 = vcmp.lt.s32.totalorder %v7185_v11, 3  ;;  %vm7205_vm10 = vcmp.lt.s32.totalorder %v7185_v11, 2  ;;  %v7212_v18 = vsel %vm7204_vm6, %v7191_v40, %v7194_v53 }
 0x6a3   :  { %9242 = vsinq.f32 %v7054_v4  ;;  %v7213_v31 = vsel %vm7207_vm7, %v7200_v12, 920167782  ;;  %v7220_v8 = vshll.u32 %v7180_v55, 8  ;;  %v8597_v24 = vmin.u32 %v7135_v10, %v7133_v6 }
 0x6a4   :  { %v7208_v25 = vsel %vm7204_vm6, %v7188_v42, %v7191_v40  ;;  %v7210_v19 = vsel %vm7206_vm9, %v7194_v53, %v7209_v22  ;;  %v7216_v54 = vsel %vm7204_vm6, %v7194_v53, %v7197_v52  ;;  %v13951_v37 = vsel %vm6955_vm8, nan, %v6964_v47 }
 0x6a5   :  { %v7052_v5 = vsub.s32 4, %v13850_v62  ;;  %v7214_v59 = vsel %vm7206_vm9, %v7197_v52, %v7213_v31  ;;  %v7217_v33 = vsel %vm7207_vm7, %v7203_v41, 1326507024  ;;  %v7137_v49 = vclz %v8597_v24 }
 0x6a6   :  { %v7215_v7 = vsel %vm7205_vm10, %v7212_v18, %v7214_v59  ;;  %v7218_v13 = vsel %vm7206_vm9, %v7200_v12, %v7217_v33  ;;  %v7211_v39 = vsel %vm7205_vm10, %v7208_v25, %v7210_v19  ;;  %v7278_v50 = vand.u32 2139095040, %v13951_v37 }
 0x6a7   :  { %v7219_v44 = vsel %vm7205_vm10, %v7216_v54, %v7218_v13  ;;  %v13958_v21 = vmul.u32.u64.low %v7220_v8, %v7215_v7  ;;  %v13959_v55 = vmul.u32.u64.high %v7220_v8, %v7215_v7, %v13958_v21  ;;  %v8598_v9 = vadd.s32 4294967294, %v7137_v49 }
 0x6a8   :  { %v13961_v14 = vmul.u32.u64.low %v7220_v8, %v7219_v44  ;;  %v13962_v15 = vmul.u32.u64.high %v7220_v8, %v7219_v44, %v13961_v14  ;;  %v7053_v58 = vsel %vm6968_vm1, %v7052_v5, %v13850_v62  ;;  %v7125_v28 = vadd.s32 %v13893_v26, %v13902_v57 }
 0x6a9   :  { %vm8599_vm11 = vcmp.lt.s32.totalorder %v8598_v9, 0  ;;  %v7279_v1 = vshrl.u32 %v7278_v50, 23  ;;  %v7227_v45 = vmul.u32 %v7220_v8, %v7211_v39  ;;  %v7230_v51 = vadd.s32 1, %v13959_v55 }
 0x6aa   :  { %v7140_v11 = vsel %vm8599_vm11, 0, %v8598_v9  ;;  %v7055_v2 = vsel %vm13913_vm3, 0, %v7053_v58  ;;  %vm7229_vm12 = vc.u32 %v13962_v15, %v13958_v21  ;;  %v7275_v3 = vand.u32 2147483647, %v13951_v37 }
 0x6ab   :  { %v7141_v43 = vsub.s32 32, %v7140_v11  ;;  %v7142_v35 = vshll.u32 %v7133_v6, %v7140_v11  ;;  %v7145_v20 = vsub.s32 4294967266, %v7140_v11  ;;  %v8604_v62 = vadd.s32 4294967169, %v7279_v1 }
 0x6ac   :  { %v7231_v57 = vsel %vm7229_vm12, %v7230_v51, %v13959_v55  ;;  %v7059_v40 = vand.u32 3, %v7055_v2  ;;  %vm7071_vm13 = vcmp.lt.s32.totalorder %v13813_v29, 0  ;;  %v7282_v6 = vand.u32 8388607, %v7275_v3 }
 0x6ad   :  { %v7143_v17 = vshrl.u32 %v7125_v28, %v7141_v43  ;;  %v7146_v26 = vadd.s32 127, %v7145_v20  ;;  %v7232_v16 = vadd.s32 %v7231_v57, %v7227_v45  ;;  %v7285_v53 = vadd.s32 1, %v8604_v62 }
 0x6ae   :  { %vm7061_vm15 = vcmp.eq.s32.totalorder %v7059_v40, 0  ;;  %vm7064_vm0 = vcmp.eq.s32.totalorder %v7059_v40, 2  ;;  %vm7060_vm1 = vcmp.lt.s32.totalorder %v7059_v40, 2  ;;  %vm13983_vm2 = vcmp.le.f32.partialorder %v7069_v48, 0.7853982 }
 0x6af   :  { %v9241_v63 = vpop.eup %9240  ;;  %v7144_v0 = vor.u32 %v7143_v17, %v7142_v35  ;;  %v7147_v52 = vshll.u32 %v7146_v26, 23  ;;  %v7233_v4 = vadd.s32 536870912, %v7232_v16  ;;  %vm7286_vm14 = vcmp.gt.s32.totalorder %v7285_v53, 0 }
 0x6b0   :  { %v9243_v27 = vpop.eup %9242  ;;  %v7065_v12 = vxor.u32 2147483648, %v9241_v63  ;;  %v7287_v47 = vsel %vm7286_vm14, %v7285_v53, 0  ;;  %v7155_v24 = vsub.s32 4, %v13924_v23  ;;  %v13989_v25 = vadd.s32 %v13958_v21, %v13962_v15 }
 0x6b1   :  { %v7062_v42 = vxor.u32 2147483648, %v9243_v27  ;;  %v7148_v41 = vor.u32 4788187, %v7147_v52  ;;  %v7151_v22 = vcvt.s32.f32 %v7144_v0  ;;  %v13979_v10 = vshrl.u32 %v7233_v4, 30 }
 0x6b2   :  { %v7289_v18 = vand.u32 31, %v7287_v47  ;;  %v7283_v54 = vor.u32 8388608, %v7282_v6  ;;  %vm7058_vm3 = vweird.f32 %v13739_v60  ;;  %v7066_v33 = vsel %vm7064_vm0, %v7065_v12, %v9243_v27 }
 0x6b3   :  { %v7149_v8 = vand.u32 2147483647, %v7148_v41  ;;  %v7235_v19 = vshll.u32 %v13979_v10, 30  ;;  %v7063_v59 = vsel %vm7061_vm15, %v9241_v63, %v7062_v42  ;;  %v7288_v50 = vshrl.u32 %v7287_v47, 5 }
 0x6b4   :  { %v7290_v5 = vsub.s32 32, %v7289_v18  ;;  %v7292_v48 = vshll.u32 %v9337_v30, %v7289_v18  ;;  %v7295_v39 = vshll.u32 %v9338_v32, %v7289_v18  ;;  %v7298_v44 = vshll.u32 %v9339_v34, %v7289_v18 }
 0x6b5   :  { %v7152_v49 = vmul.f32 %v7151_v22, %v7149_v8  ;;  %v13994_v7 = vsub.s32 %v7232_v16, %v7235_v19  ;;  %v7301_v14 = vshll.u32 %v9340_v36, %v7289_v18  ;;  %v14004_v28 = vshll.u32 %v7283_v54, 8 }
 0x6b6   :  { %v7293_v13 = vshrl.u32 %v9338_v32, %v7290_v5  ;;  %v7296_v55 = vshrl.u32 %v9339_v34, %v7290_v5  ;;  %v7299_v9 = vshrl.u32 %v9340_v36, %v7290_v5  ;;  %v7302_v58 = vshrl.u32 %v9341_v38, %v7290_v5 }
 0x6b7   :  { %v7153_v21 = vxor.u32 2147483648, %v7152_v49  ;;  %v7238_v15 = vsub.s32 0, %v13994_v7  ;;  %v7067_v1 = vsel %vm7060_vm1, %v7063_v59, %v7066_v33  ;;  %v7291_v45 = vshrl.u32 %v9337_v30, %v7290_v5 }
 0x6b8   :  { %v7304_v51 = vshll.u32 %v9341_v38, %v7289_v18  ;;  %v7294_v35 = vor.u32 %v7293_v13, %v7292_v48  ;;  %v7297_v20 = vor.u32 %v7296_v55, %v7295_v39  ;;  %v7300_v62 = vor.u32 %v7299_v9, %v7298_v44 }
 0x6b9   :  { %v7154_v11 = vsel %vm7071_vm13, %v7153_v21, %v7152_v49  ;;  %v8601_v43 = vmin.u32 %v7238_v15, %v13994_v7  ;;  %v7303_v63 = vor.u32 %v7302_v58, %v7301_v14  ;;  %v7305_v17 = vshrl.u32 %v9342_v46, %v7290_v5 }
 0x6ba   :  { %v7157_v2 = vsel %vm13983_vm2, %v13813_v29, %v7154_v11  ;;  %vm7307_vm4 = vcmp.lt.s32.totalorder %v7288_v50, 1  ;;  %vm7308_vm5 = vcmp.lt.s32.totalorder %v7288_v50, 2  ;;  %vm7309_vm6 = vcmp.lt.s32.totalorder %v7288_v50, 3 }
 0x6bb   :  { %9244 = vcosq.f32 %v7157_v2  ;;  %v7240_v26 = vclz %v8601_v43  ;;  %v7306_v57 = vor.u32 %v7305_v17, %v7304_v51  ;;  %vm7310_vm7 = vcmp.lt.s32.totalorder %v7288_v50, 4 }
 0x6bc   :  { %9246 = vsinq.f32 %v7157_v2  ;;  %v7311_v27 = vsel %vm7307_vm4, %v7291_v45, %v7294_v35  ;;  %v7312_v16 = vsel %vm7310_vm7, %v7300_v62, 2102212464  ;;  %v7315_v53 = vsel %vm7307_vm4, %v7294_v35, %v7297_v20 }
 0x6bd   :  { %v8602_v40 = vadd.s32 4294967294, %v7240_v26  ;;  %v7316_v0 = vsel %vm7310_vm7, %v7303_v63, 920167782  ;;  %v7313_v52 = vsel %vm7309_vm6, %v7297_v20, %v7312_v16  ;;  %v7319_v4 = vsel %vm7307_vm4, %v7297_v20, %v7300_v62 }
 0x6be   :  { %v7317_v12 = vsel %vm7309_vm6, %v7300_v62, %v7316_v0  ;;  %v7320_v6 = vsel %vm7310_vm7, %v7306_v57, 1326507024  ;;  %v14018_v42 = vsel %vm7058_vm3, nan, %v7067_v1  ;;  %v7314_v60 = vsel %vm7308_vm5, %v7311_v27, %v7313_v52 }
 0x6bf   :  { %vm8603_vm8 = vcmp.lt.s32.totalorder %v8602_v40, 0  ;;  %v7318_v41 = vsel %vm7308_vm5, %v7315_v53, %v7317_v12  ;;  %v7321_v22 = vsel %vm7309_vm6, %v7303_v63, %v7320_v6  ;;  %v7156_v33 = vsel %vm7071_vm13, %v7155_v24, %v13924_v23 }
 0x6c0   :  { %v7243_v47 = vsel %vm8603_vm8, 0, %v8602_v40  ;;  %v7322_v18 = vsel %vm7308_vm5, %v7319_v4, %v7321_v22  ;;  %v14023_v8 = vmul.u32.u64.low %v14004_v28, %v7318_v41  ;;  %v14024_v19 = vmul.u32.u64.high %v14004_v28, %v7318_v41, %v14023_v8 }
 0x6c1   :  { %v7244_v54 = vsub.s32 32, %v7243_v47  ;;  %v7245_v5 = vshll.u32 %v13994_v7, %v7243_v47  ;;  %v7248_v59 = vsub.s32 4294967266, %v7243_v47  ;;  %v7381_v44 = vand.u32 2139095040, %v14018_v42 }
 0x6c2   :  { %v14033_v49 = vmul.u32.u64.low %v14004_v28, %v7322_v18  ;;  %v14034_v48 = vmul.u32.u64.high %v14004_v28, %v7322_v18, %v14033_v49  ;;  %v7258_v21 = vsub.s32 4, %v13979_v10  ;;  %v7330_v7 = vmul.u32 %v14004_v28, %v7314_v60 }
 0x6c3   :  { %v7246_v13 = vshrl.u32 %v13989_v25, %v7244_v54  ;;  %v7249_v39 = vadd.s32 127, %v7248_v59  ;;  %v7333_v55 = vadd.s32 1, %v14024_v19  ;;  %v7158_v9 = vsel %vm13983_vm2, 0, %v7156_v33 }
 0x6c4   :  { %v7382_v24 = vshrl.u32 %v7381_v44, 23  ;;  %vm7174_vm9 = vcmp.lt.s32.totalorder %v13848_v61, 0  ;;  %vm7332_vm10 = vc.u32 %v14034_v48, %v14023_v8  ;;  %v7378_v25 = vand.u32 2147483647, %v14018_v42 }
 0x6c5   :  { %v7247_v14 = vor.u32 %v7246_v13, %v7245_v5  ;;  %v7250_v23 = vshll.u32 %v7249_v39, 23  ;;  %v7334_v28 = vsel %vm7332_vm10, %v7333_v55, %v14024_v19  ;;  %v7162_v45 = vand.u32 3, %v7158_v9 }
 0x6c6   :  { %v8608_v1 = vadd.s32 4294967169, %v7382_v24  ;;  %v7259_v31 = vsel %vm7174_vm9, %v7258_v21, %v13979_v10  ;;  %v7335_v51 = vadd.s32 %v7334_v28, %v7330_v7  ;;  %vm14053_vm11 = vcmp.le.f32.partialorder %v7172_v56, 0.7853982 }
 0x6c7   :  { %v7251_v50 = vor.u32 4788187, %v7250_v23  ;;  %v7254_v58 = vcvt.s32.f32 %v7247_v14  ;;  %v7385_v62 = vand.u32 8388607, %v7378_v25  ;;  %v7261_v26 = vsel %vm14053_vm11, 0, %v7259_v31 }
 0x6c8   :  { %v9245_v15 = vpop.eup %9244  ;;  %v7388_v43 = vadd.s32 1, %v8608_v1  ;;  %v7336_v20 = vadd.s32 536870912, %v7335_v51  ;;  %vm7167_vm13 = vcmp.eq.s32.totalorder %v7162_v45, 2  ;;  %vm7164_vm14 = vcmp.eq.s32.totalorder %v7162_v45, 0 }
 0x6c9   :  { %v9247_v11 = vpop.eup %9246  ;;  %v7252_v2 = vand.u32 2147483647, %v7251_v50  ;;  %v7168_v63 = vxor.u32 2147483648, %v9245_v15  ;;  %vm7161_vm15 = vweird.f32 %v13813_v29  ;;  %vm7163_vm0 = vcmp.lt.s32.totalorder %v7162_v45, 2 }
 0x6ca   :  { %vm7389_vm12 = vcmp.gt.s32.totalorder %v7388_v43, 0  ;;  %v7165_v10 = vxor.u32 2147483648, %v9247_v11  ;;  %v14061_v57 = vshrl.u32 %v7336_v20, 30  ;;  %v14064_v16 = vand.u32 3, %v7261_v26 }
 0x6cb   :  { %v7255_v17 = vmul.f32 %v7254_v58, %v7252_v2  ;;  %v7390_v27 = vsel %vm7389_vm12, %v7388_v43, 0  ;;  %v7386_v0 = vor.u32 8388608, %v7385_v62  ;;  %v7169_v52 = vsel %vm7167_vm13, %v7168_v63, %v9247_v11 }
 0x6cc   :  { %v7392_v40 = vand.u32 31, %v7390_v27  ;;  %v7338_v53 = vshll.u32 %v14061_v57, 30  ;;  %v7166_v41 = vsel %vm7164_vm14, %v9245_v15, %v7165_v10  ;;  %v7391_v18 = vshrl.u32 %v7390_v27, 5 }
 0x6cd   :  { %v7256_v56 = vxor.u32 2147483648, %v7255_v17  ;;  %v7170_v21 = vsel %vm7163_vm0, %v7166_v41, %v7169_v52  ;;  %v7331_v7 = vadd.s32 %v14023_v8, %v14034_v48  ;;  %v7426_v9 = vshll.u32 %v7386_v0, 8 }
 0x6ce   :  { %v7393_v4 = vsub.s32 32, %v7392_v40  ;;  %v7395_v6 = vshll.u32 %v9337_v30, %v7392_v40  ;;  %v14073_v47 = vsub.s32 %v7335_v51, %v7338_v53  ;;  %v7398_v54 = vshll.u32 %v9338_v32, %v7392_v40 }
 0x6cf   :  { %v7257_v12 = vsel %vm7174_vm9, %v7256_v56, %v7255_v17  ;;  %v7401_v5 = vshll.u32 %v9339_v34, %v7392_v40  ;;  %v7404_v39 = vshll.u32 %v9340_v36, %v7392_v40  ;;  %v7407_v15 = vshll.u32 %v9341_v38, %v7392_v40 }
 0x6d0   :  { %v7260_v22 = vsel %vm14053_vm11, %v13848_v61, %v7257_v12  ;;  %v7396_v19 = vshrl.u32 %v9338_v32, %v7393_v4  ;;  %v7341_v59 = vsub.s32 0, %v14073_v47  ;;  %v7394_v60 = vshrl.u32 %v9337_v30, %v7393_v4 }
 0x6d1   :  { %9248 = vcosq.f32 %v7260_v22  ;;  %v7399_v33 = vshrl.u32 %v9339_v34, %v7393_v4  ;;  %v7402_v13 = vshrl.u32 %v9340_v36, %v7393_v4  ;;  %v7405_v44 = vshrl.u32 %v9341_v38, %v7393_v4 }
 0x6d2   :  { %9250 = vsinq.f32 %v7260_v22  ;;  %v7397_v49 = vor.u32 %v7396_v19, %v7395_v6  ;;  %v8605_v55 = vmin.u32 %v7341_v59, %v14073_v47  ;;  %v7408_v58 = vshrl.u32 %v9342_v46, %v7393_v4 }
 0x6d3   :  { %v7400_v14 = vor.u32 %v7399_v33, %v7398_v54  ;;  %v7403_v23 = vor.u32 %v7402_v13, %v7401_v5  ;;  %v7406_v24 = vor.u32 %v7405_v44, %v7404_v39  ;;  %vm7410_vm1 = vcmp.lt.s32.totalorder %v7391_v18, 1 }
 0x6d4   :  { %v7343_v50 = vclz %v8605_v55  ;;  %vm7411_vm2 = vcmp.lt.s32.totalorder %v7391_v18, 2  ;;  %vm7412_vm3 = vcmp.lt.s32.totalorder %v7391_v18, 3  ;;  %vm7413_vm4 = vcmp.lt.s32.totalorder %v7391_v18, 4 }
 0x6d5   :  { %v7414_v28 = vsel %vm7410_vm1, %v7394_v60, %v7397_v49  ;;  %v7418_v1 = vsel %vm7410_vm1, %v7397_v49, %v7400_v14  ;;  %v7409_v45 = vor.u32 %v7408_v58, %v7407_v15  ;;  %v7415_v8 = vsel %vm7413_vm4, %v7403_v23, 2102212464 }
 0x6d6   :  { %v8606_v11 = vadd.s32 4294967294, %v7343_v50  ;;  %v7419_v48 = vsel %vm7413_vm4, %v7406_v24, 920167782  ;;  %v14092_v31 = vsel %vm7161_vm15, nan, %v7170_v21  ;;  %v7416_v51 = vsel %vm7412_vm3, %v7400_v14, %v7415_v8 }
 0x6d7   :  { %v7420_v2 = vsel %vm7412_vm3, %v7403_v23, %v7419_v48  ;;  %v7422_v43 = vsel %vm7410_vm1, %v7400_v14, %v7403_v23  ;;  %v7417_v35 = vsel %vm7411_vm2, %v7414_v28, %v7416_v51  ;;  %v7423_v62 = vsel %vm7413_vm4, %v7409_v45, 1326507024 }
 0x6d8   :  { %vm8607_vm5 = vcmp.lt.s32.totalorder %v8606_v11, 0  ;;  %v7421_v20 = vsel %vm7411_vm2, %v7418_v1, %v7420_v2  ;;  %v7424_v17 = vsel %vm7412_vm3, %v7406_v24, %v7423_v62  ;;  %v7484_v52 = vand.u32 2139095040, %v14092_v31 }
 0x6d9   :  { %v7346_v63 = vsel %vm8607_vm5, 0, %v8606_v11  ;;  %v14099_v26 = vmul.u32.u64.low %v7426_v9, %v7421_v20  ;;  %v14100_v10 = vmul.u32.u64.high %v7426_v9, %v7421_v20, %v14099_v26  ;;  %v7425_v40 = vsel %vm7411_vm2, %v7422_v43, %v7424_v17 }
 0x6da   :  { %v7347_v29 = vsub.s32 32, %v7346_v63  ;;  %v7348_v27 = vshll.u32 %v14073_v47, %v7346_v63  ;;  %v7351_v56 = vsub.s32 4294967266, %v7346_v63  ;;  %vm7267_vm6 = vcmp.eq.s32.totalorder %v14064_v16, 0 }
 0x6db   :  { %v14105_v53 = vmul.u32.u64.low %v7426_v9, %v7425_v40  ;;  %v14106_v0 = vmul.u32.u64.high %v7426_v9, %v7425_v40, %v14105_v53  ;;  %vm7270_vm7 = vcmp.eq.s32.totalorder %v14064_v16, 2  ;;  %v7433_v19 = vmul.u32 %v7426_v9, %v7417_v35 }
 0x6dc   :  { %v7349_v4 = vshrl.u32 %v7331_v7, %v7347_v29  ;;  %v7352_v6 = vadd.s32 127, %v7351_v56  ;;  %v7436_v47 = vadd.s32 1, %v14100_v10  ;;  %v7485_v54 = vshrl.u32 %v7484_v52, 23 }
 0x6dd   :  { %vm7266_vm8 = vcmp.lt.s32.totalorder %v14064_v16, 2  ;;  %v7361_v33 = vsub.s32 4, %v14061_v57  ;;  %vm7435_vm9 = vc.u32 %v14106_v0, %v14099_v26  ;;  %vm7264_vm10 = vweird.f32 %v13848_v61 }
 0x6de   :  { %v9249_v12 = vpop.eup %9248  ;;  %v7350_v5 = vor.u32 %v7349_v4, %v7348_v27  ;;  %v7353_v59 = vshll.u32 %v7352_v6, 23  ;;  %v8612_v49 = vadd.s32 4294967169, %v7485_v54  ;;  %v7437_v21 = vsel %vm7435_vm9, %v7436_v47, %v14100_v10 }
 0x6df   :  { %v9251_v41 = vpop.eup %9250  ;;  %v7271_v22 = vxor.u32 2147483648, %v9249_v12  ;;  %v7438_v7 = vadd.s32 %v7437_v21, %v7433_v19  ;;  %vm7277_vm11 = vcmp.lt.s32.totalorder %v13951_v37, 0  ;;  %v7481_v24 = vand.u32 2147483647, %v14092_v31 }
 0x6e0   :  { %v7268_v18 = vxor.u32 2147483648, %v9251_v41  ;;  %v7354_v39 = vor.u32 4788187, %v7353_v59  ;;  %v7357_v44 = vcvt.s32.f32 %v7350_v5  ;;  %v7491_v55 = vadd.s32 1, %v8612_v49 }
 0x6e1   :  { %v7272_v60 = vsel %vm7270_vm7, %v7271_v22, %v9251_v41  ;;  %v7439_v23 = vadd.s32 536870912, %v7438_v7  ;;  %v14125_v16 = vsel %vm7277_vm11, %v7361_v33, %v14061_v57  ;;  %vm14133_vm13 = vcmp.le.f32.partialorder %v7275_v3, 0.7853982 }
 0x6e2   :  { %v7269_v13 = vsel %vm7267_vm6, %v9249_v12, %v7268_v18  ;;  %v7355_v14 = vand.u32 2147483647, %v7354_v39  ;;  %vm7492_vm12 = vcmp.gt.s32.totalorder %v7491_v55, 0  ;;  %v7364_v45 = vsel %vm14133_vm13, 0, %v14125_v16 }
 0x6e3   :  { %v7273_v9 = vsel %vm7266_vm8, %v7269_v13, %v7272_v60  ;;  %v7493_v50 = vsel %vm7492_vm12, %v7491_v55, 0  ;;  %v14129_v28 = vshrl.u32 %v7439_v23, 30  ;;  %v7488_v8 = vand.u32 8388607, %v7481_v24 }
 0x6e4   :  { %v7358_v15 = vmul.f32 %v7357_v44, %v7355_v14  ;;  %v14127_v58 = vsel %vm7264_vm10, nan, %v7273_v9  ;;  %v7495_v61 = vand.u32 31, %v7493_v50  ;;  %v7494_v62 = vshrl.u32 %v7493_v50, 5 }
 0x6e5   :  { %v7441_v57 = vshll.u32 %v14129_v28, 30  ;;  %v7587_v43 = vand.u32 2139095040, %v14127_v58  ;;  %v7434_v27 = vadd.s32 %v14099_v26, %v14106_v0  ;;  %v7489_v40 = vor.u32 8388608, %v7488_v8 }
 0x6e6   :  { %v7359_v11 = vxor.u32 2147483648, %v7358_v15  ;;  %v7496_v48 = vsub.s32 32, %v7495_v61  ;;  %v7498_v2 = vshll.u32 %v9337_v30, %v7495_v61  ;;  %v7501_v3 = vshll.u32 %v9338_v32, %v7495_v61 }
 0x6e7   :  { %v14151_v20 = vsub.s32 %v7438_v7, %v7441_v57  ;;  %v7504_v63 = vshll.u32 %v9339_v34, %v7495_v61  ;;  %v7507_v29 = vshll.u32 %v9340_v36, %v7495_v61  ;;  %v7510_v6 = vshll.u32 %v9341_v38, %v7495_v61 }
 0x6e8   :  { %v7360_v51 = vsel %vm7277_vm11, %v7359_v11, %v7358_v15  ;;  %v7499_v17 = vshrl.u32 %v9338_v32, %v7496_v48  ;;  %v7502_v10 = vshrl.u32 %v9339_v34, %v7496_v48  ;;  %v7505_v53 = vshrl.u32 %v9340_v36, %v7496_v48 }
 0x6e9   :  { %v7363_v35 = vsel %vm14133_vm13, %v13951_v37, %v7360_v51  ;;  %v7444_v56 = vsub.s32 0, %v14151_v20  ;;  %v7508_v4 = vshrl.u32 %v9341_v38, %v7496_v48  ;;  %v7497_v22 = vshrl.u32 %v9337_v30, %v7496_v48 }
 0x6ea   :  { %9252 = vcosq.f32 %v7363_v35  ;;  %v7500_v52 = vor.u32 %v7499_v17, %v7498_v2  ;;  %v7503_v12 = vor.u32 %v7502_v10, %v7501_v3  ;;  %v7588_v19 = vshrl.u32 %v7587_v43, 23 }
 0x6eb   :  { %9254 = vsinq.f32 %v7363_v35  ;;  %v8609_v41 = vmin.u32 %v7444_v56, %v14151_v20  ;;  %v7506_v47 = vor.u32 %v7505_v53, %v7504_v63  ;;  %v7509_v54 = vor.u32 %v7508_v4, %v7507_v29 }
 0x6ec   :  { %v7511_v26 = vshrl.u32 %v9342_v46, %v7496_v48  ;;  %vm7513_vm14 = vcmp.lt.s32.totalorder %v7494_v62, 1  ;;  %vm7515_vm15 = vcmp.lt.s32.totalorder %v7494_v62, 3  ;;  %vm7516_vm0 = vcmp.lt.s32.totalorder %v7494_v62, 4 }
 0x6ed   :  { %v7446_v0 = vclz %v8609_v41  ;;  %v7529_v18 = vshll.u32 %v7489_v40, 8  ;;  %vm7514_vm1 = vcmp.lt.s32.totalorder %v7494_v62, 2  ;;  %v7518_v59 = vsel %vm7516_vm0, %v7506_v47, 2102212464 }
 0x6ee   :  { %v7512_v5 = vor.u32 %v7511_v26, %v7510_v6  ;;  %v7521_v60 = vsel %vm7513_vm14, %v7500_v52, %v7503_v12  ;;  %v7517_v49 = vsel %vm7513_vm14, %v7497_v22, %v7500_v52  ;;  %v7522_v13 = vsel %vm7516_vm0, %v7509_v54, 920167782 }
 0x6ef   :  { %v8610_v33 = vadd.s32 4294967294, %v7446_v0  ;;  %v7525_v39 = vsel %vm7513_vm14, %v7503_v12, %v7506_v47  ;;  %v7519_v44 = vsel %vm7515_vm15, %v7503_v12, %v7518_v59  ;;  %v7523_v21 = vsel %vm7515_vm15, %v7506_v47, %v7522_v13 }
 0x6f0   :  { %v7526_v7 = vsel %vm7516_vm0, %v7512_v5, 1326507024  ;;  %v8616_v55 = vadd.s32 4294967169, %v7588_v19  ;;  %v7524_v9 = vsel %vm7514_vm1, %v7521_v60, %v7523_v21  ;;  %v7584_v23 = vand.u32 2147483647, %v14127_v58 }
 0x6f1   :  { %vm8611_vm2 = vcmp.lt.s32.totalorder %v8610_v33, 0  ;;  %v7527_v14 = vsel %vm7515_vm15, %v7509_v54, %v7526_v7  ;;  %v14172_v50 = vmul.u32.u64.low %v7529_v18, %v7524_v9  ;;  %v14173_v61 = vmul.u32.u64.high %v7529_v18, %v7524_v9, %v14172_v50 }
 0x6f2   :  { %v7449_v15 = vsel %vm8611_vm2, 0, %v8610_v33  ;;  %v7528_v16 = vsel %vm7514_vm1, %v7525_v39, %v7527_v14  ;;  %v7520_v8 = vsel %vm7514_vm1, %v7517_v49, %v7519_v44  ;;  %v14178_v48 = vand.u32 3, %v7364_v45 }
 0x6f3   :  { %v7450_v1 = vsub.s32 32, %v7449_v15  ;;  %v7451_v11 = vshll.u32 %v14151_v20, %v7449_v15  ;;  %v7454_v57 = vsub.s32 4294967266, %v7449_v15  ;;  %v7594_v3 = vadd.s32 1, %v8616_v55 }
 0x6f4   :  { %v14180_v51 = vmul.u32.u64.low %v7529_v18, %v7528_v16  ;;  %v14181_v2 = vmul.u32.u64.high %v7529_v18, %v7528_v16, %v14180_v51  ;;  %v7536_v17 = vmul.u32 %v7529_v18, %v7520_v8  ;;  %v7539_v10 = vadd.s32 1, %v14173_v61 }
 0x6f5   :  { %v7452_v35 = vshrl.u32 %v7434_v27, %v7450_v1  ;;  %v7455_v63 = vadd.s32 127, %v7454_v57  ;;  %v7591_v29 = vand.u32 8388607, %v7584_v23  ;;  %vm7595_vm3 = vcmp.gt.s32.totalorder %v7594_v3, 0 }
 0x6f6   :  { %v7596_v40 = vsel %vm7595_vm3, %v7594_v3, 0  ;;  %vm7373_vm4 = vcmp.eq.s32.totalorder %v14178_v48, 2  ;;  %vm7380_vm5 = vcmp.lt.s32.totalorder %v14018_v42, 0  ;;  %vm7538_vm6 = vc.u32 %v14181_v2, %v14172_v50 }
 0x6f7   :  { %v9253_v43 = vpop.eup %9252  ;;  %v7453_v56 = vor.u32 %v7452_v35, %v7451_v11  ;;  %v7456_v62 = vshll.u32 %v7455_v63, 23  ;;  %vm14192_vm7 = vcmp.le.f32.partialorder %v7378_v25, 0.7853982  ;;  %v7540_v12 = vsel %vm7538_vm6, %v7539_v10, %v14173_v61 }
 0x6f8   :  { %v7374_v20 = vxor.u32 2147483648, %v9253_v43  ;;  %v9255_v45 = vpop.eup %9254  ;;  %vm7369_vm8 = vcmp.lt.s32.totalorder %v14178_v48, 2  ;;  %vm7370_vm9 = vcmp.eq.s32.totalorder %v14178_v48, 0  ;;  %v7541_v4 = vadd.s32 %v7540_v12, %v7536_v17 }
 0x6f9   :  { %v7457_v53 = vor.u32 4788187, %v7456_v62  ;;  %v7460_v52 = vcvt.s32.f32 %v7453_v56  ;;  %v7598_v6 = vand.u32 31, %v7596_v40  ;;  %v7371_v41 = vxor.u32 2147483648, %v9255_v45 }
 0x6fa   :  { %v7375_v22 = vsel %vm7373_vm4, %v7374_v20, %v9255_v45  ;;  %v7592_v47 = vor.u32 8388608, %v7591_v29  ;;  %v7542_v54 = vadd.s32 536870912, %v7541_v4  ;;  %v7597_v26 = vshrl.u32 %v7596_v40, 5 }
 0x6fb   :  { %v7458_v19 = vand.u32 2147483647, %v7457_v53  ;;  %v7599_v25 = vsub.s32 32, %v7598_v6  ;;  %v7601_v0 = vshll.u32 %v9337_v30, %v7598_v6  ;;  %v7604_v5 = vshll.u32 %v9338_v32, %v7598_v6 }
 0x6fc   :  { %v7607_v59 = vshll.u32 %v9339_v34, %v7598_v6  ;;  %v7610_v60 = vshll.u32 %v9340_v36, %v7598_v6  ;;  %v14203_v33 = vshrl.u32 %v7542_v54, 30  ;;  %v7613_v39 = vshll.u32 %v9341_v38, %v7598_v6 }
 0x6fd   :  { %v7461_v18 = vmul.f32 %v7460_v52, %v7458_v19  ;;  %v7602_v49 = vshrl.u32 %v9338_v32, %v7599_v25  ;;  %v7605_v13 = vshrl.u32 %v9339_v34, %v7599_v25  ;;  %v7608_v21 = vshrl.u32 %v9340_v36, %v7599_v25 }
 0x6fe   :  { %v7611_v7 = vshrl.u32 %v9341_v38, %v7599_v25  ;;  %v7614_v55 = vshrl.u32 %v9342_v46, %v7599_v25  ;;  %v7372_v9 = vsel %vm7370_vm9, %v9253_v43, %v7371_v41  ;;  %v7544_v14 = vshll.u32 %v14203_v33, 30 }
 0x6ff   :  { %v7462_v44 = vxor.u32 2147483648, %v7461_v18  ;;  %v7603_v15 = vor.u32 %v7602_v49, %v7601_v0  ;;  %vm7616_vm10 = vcmp.lt.s32.totalorder %v7597_v26, 1  ;;  %v7606_v61 = vor.u32 %v7605_v13, %v7604_v5 }
 0x700   :  { %v7609_v1 = vor.u32 %v7608_v21, %v7607_v59  ;;  %v7612_v11 = vor.u32 %v7611_v7, %v7610_v60  ;;  %v7545_v8 = vsub.s32 %v7541_v4, %v7544_v14  ;;  %v7600_v51 = vshrl.u32 %v9337_v30, %v7599_v25 }
 0x701   :  { %v7463_v16 = vsel %vm7380_vm5, %v7462_v44, %v7461_v18  ;;  %vm7619_vm11 = vcmp.lt.s32.totalorder %v7597_v26, 4  ;;  %vm7367_vm12 = vweird.f32 %v13951_v37  ;;  %v7615_v3 = vor.u32 %v7614_v55, %v7613_v39 }
 0x702   :  { %v7466_v57 = vsel %vm14192_vm7, %v14018_v42, %v7463_v16  ;;  %v7621_v43 = vsel %vm7619_vm11, %v7609_v1, 2102212464  ;;  %v7376_v35 = vsel %vm7369_vm8, %v7372_v9, %v7375_v22  ;;  %v7547_v63 = vsub.s32 0, %v7545_v8 }
 0x703   :  { %9256 = vcosq.f32 %v7466_v57  ;;  %vm7618_vm13 = vcmp.lt.s32.totalorder %v7597_v26, 3  ;;  %vm7617_vm14 = vcmp.lt.s32.totalorder %v7597_v26, 2  ;;  %v7624_v17 = vsel %vm7616_vm10, %v7603_v15, %v7606_v61 }
 0x704   :  { %9258 = vsinq.f32 %v7466_v57  ;;  %v7625_v10 = vsel %vm7619_vm11, %v7612_v11, 920167782  ;;  %v7632_v29 = vshll.u32 %v7592_v47, 8  ;;  %v8613_v20 = vmin.u32 %v7547_v63, %v7545_v8 }
 0x705   :  { %v7620_v56 = vsel %vm7616_vm10, %v7600_v51, %v7603_v15  ;;  %v7622_v62 = vsel %vm7618_vm13, %v7606_v61, %v7621_v43  ;;  %v7628_v40 = vsel %vm7616_vm10, %v7606_v61, %v7609_v1  ;;  %v14230_v45 = vsel %vm7367_vm12, nan, %v7376_v35 }
 0x706   :  { %v7464_v48 = vsub.s32 4, %v14129_v28  ;;  %v7626_v53 = vsel %vm7618_vm13, %v7609_v1, %v7625_v10  ;;  %v7629_v52 = vsel %vm7619_vm11, %v7615_v3, 1326507024  ;;  %v7549_v12 = vclz %v8613_v20 }
 0x707   :  { %v7627_v4 = vsel %vm7617_vm14, %v7624_v17, %v7626_v53  ;;  %v7630_v6 = vsel %vm7618_vm13, %v7612_v11, %v7629_v52  ;;  %v7623_v41 = vsel %vm7617_vm14, %v7620_v56, %v7622_v62  ;;  %v7690_v0 = vand.u32 2139095040, %v14230_v45 }
 0x708   :  { %v7631_v22 = vsel %vm7617_vm14, %v7628_v40, %v7630_v6  ;;  %v14237_v19 = vmul.u32.u64.low %v7632_v29, %v7627_v4  ;;  %v14238_v47 = vmul.u32.u64.high %v7632_v29, %v7627_v4, %v14237_v19  ;;  %v8614_v54 = vadd.s32 4294967294, %v7549_v12 }
 0x709   :  { %v14240_v37 = vmul.u32.u64.low %v7632_v29, %v7631_v22  ;;  %v14241_v25 = vmul.u32.u64.high %v7632_v29, %v7631_v22, %v14240_v37  ;;  %v7465_v18 = vsel %vm7380_vm5, %v7464_v48, %v14129_v28  ;;  %v7537_v5 = vadd.s32 %v14172_v50, %v14181_v2 }
 0x70a   :  { %vm8615_vm15 = vcmp.lt.s32.totalorder %v8614_v54, 0  ;;  %v7691_v59 = vshrl.u32 %v7690_v0, 23  ;;  %v7639_v60 = vmul.u32 %v7632_v29, %v7623_v41  ;;  %v7642_v49 = vadd.s32 1, %v14238_v47 }
 0x70b   :  { %v7552_v26 = vsel %vm8615_vm15, 0, %v8614_v54  ;;  %v7467_v13 = vsel %vm14192_vm7, 0, %v7465_v18  ;;  %vm7641_vm0 = vc.u32 %v14241_v25, %v14237_v19  ;;  %v7687_v7 = vand.u32 2147483647, %v14230_v45 }
 0x70c   :  { %v7553_v39 = vsub.s32 32, %v7552_v26  ;;  %v7554_v44 = vshll.u32 %v7545_v8, %v7552_v26  ;;  %v7557_v21 = vsub.s32 4294967266, %v7552_v26  ;;  %v8620_v28 = vadd.s32 4294967169, %v7691_v59 }
 0x70d   :  { %v7643_v2 = vsel %vm7641_vm0, %v7642_v49, %v14238_v47  ;;  %v7471_v15 = vand.u32 3, %v7467_v13  ;;  %vm7483_vm1 = vcmp.lt.s32.totalorder %v14092_v31, 0  ;;  %v7694_v8 = vand.u32 8388607, %v7687_v7 }
 0x70e   :  { %v7555_v9 = vshrl.u32 %v7537_v5, %v7553_v39  ;;  %v7558_v50 = vadd.s32 127, %v7557_v21  ;;  %v7644_v16 = vadd.s32 %v7643_v2, %v7639_v60  ;;  %v7697_v61 = vadd.s32 1, %v8620_v28 }
 0x70f   :  { %vm7473_vm3 = vcmp.eq.s32.totalorder %v7471_v15, 0  ;;  %vm7476_vm4 = vcmp.eq.s32.totalorder %v7471_v15, 2  ;;  %vm7472_vm5 = vcmp.lt.s32.totalorder %v7471_v15, 2  ;;  %vm14262_vm6 = vcmp.le.f32.partialorder %v7481_v24, 0.7853982 }
 0x710   :  { %v9257_v55 = vpop.eup %9256  ;;  %v7556_v27 = vor.u32 %v7555_v9, %v7554_v44  ;;  %v7559_v1 = vshll.u32 %v7558_v50, 23  ;;  %v7645_v57 = vadd.s32 536870912, %v7644_v16  ;;  %vm7698_vm2 = vcmp.gt.s32.totalorder %v7697_v61, 0 }
 0x711   :  { %v9259_v14 = vpop.eup %9258  ;;  %v7477_v11 = vxor.u32 2147483648, %v9257_v55  ;;  %v7699_v35 = vsel %vm7698_vm2, %v7697_v61, 0  ;;  %v7567_v20 = vsub.s32 4, %v14203_v33  ;;  %v14268_v56 = vadd.s32 %v14237_v19, %v14241_v25 }
 0x712   :  { %v7474_v51 = vxor.u32 2147483648, %v9259_v14  ;;  %v7560_v3 = vor.u32 4788187, %v7559_v1  ;;  %v7563_v43 = vcvt.s32.f32 %v7556_v27  ;;  %v14258_v63 = vshrl.u32 %v7645_v57, 30 }
 0x713   :  { %v7701_v17 = vand.u32 31, %v7699_v35  ;;  %v7695_v40 = vor.u32 8388608, %v7694_v8  ;;  %vm7470_vm7 = vweird.f32 %v14018_v42  ;;  %v7478_v52 = vsel %vm7476_vm4, %v7477_v11, %v9259_v14 }
 0x714   :  { %v7561_v29 = vand.u32 2147483647, %v7560_v3  ;;  %v7647_v62 = vshll.u32 %v14258_v63, 30  ;;  %v7475_v53 = vsel %vm7473_vm3, %v9257_v55, %v7474_v51  ;;  %v7700_v0 = vshrl.u32 %v7699_v35, 5 }
 0x715   :  { %v7702_v48 = vsub.s32 32, %v7701_v17  ;;  %v7704_v24 = vshll.u32 %v9337_v30, %v7701_v17  ;;  %v7707_v41 = vshll.u32 %v9338_v32, %v7701_v17  ;;  %v7710_v22 = vshll.u32 %v9339_v34, %v7701_v17 }
 0x716   :  { %v7564_v12 = vmul.f32 %v7563_v43, %v7561_v29  ;;  %v14273_v4 = vsub.s32 %v7644_v16, %v7647_v62  ;;  %v7713_v37 = vshll.u32 %v9340_v36, %v7701_v17  ;;  %v14283_v5 = vshll.u32 %v7695_v40, 8 }
 0x717   :  { %v7705_v6 = vshrl.u32 %v9338_v32, %v7702_v48  ;;  %v7708_v47 = vshrl.u32 %v9339_v34, %v7702_v48  ;;  %v7711_v54 = vshrl.u32 %v9340_v36, %v7702_v48  ;;  %v7714_v18 = vshrl.u32 %v9341_v38, %v7702_v48 }
 0x718   :  { %v7565_v19 = vxor.u32 2147483648, %v7564_v12  ;;  %v7650_v25 = vsub.s32 0, %v14273_v4  ;;  %v7479_v59 = vsel %vm7472_vm5, %v7475_v53, %v7478_v52  ;;  %v7703_v60 = vshrl.u32 %v9337_v30, %v7702_v48 }
 0x719   :  { %v7716_v49 = vshll.u32 %v9341_v38, %v7701_v17  ;;  %v7706_v44 = vor.u32 %v7705_v6, %v7704_v24  ;;  %v7709_v21 = vor.u32 %v7708_v47, %v7707_v41  ;;  %v7712_v28 = vor.u32 %v7711_v54, %v7710_v22 }
 0x71a   :  { %v7566_v26 = vsel %vm7483_vm1, %v7565_v19, %v7564_v12  ;;  %v8617_v39 = vmin.u32 %v7650_v25, %v14273_v4  ;;  %v7715_v55 = vor.u32 %v7714_v18, %v7713_v37  ;;  %v7717_v9 = vshrl.u32 %v9342_v46, %v7702_v48 }
 0x71b   :  { %v7569_v13 = vsel %vm14262_vm6, %v14092_v31, %v7566_v26  ;;  %vm7719_vm8 = vcmp.lt.s32.totalorder %v7700_v0, 1  ;;  %vm7720_vm9 = vcmp.lt.s32.totalorder %v7700_v0, 2  ;;  %vm7721_vm10 = vcmp.lt.s32.totalorder %v7700_v0, 3 }
 0x71c   :  { %9260 = vcosq.f32 %v7569_v13  ;;  %v7652_v50 = vclz %v8617_v39  ;;  %v7718_v2 = vor.u32 %v7717_v9, %v7716_v49  ;;  %vm7722_vm11 = vcmp.lt.s32.totalorder %v7700_v0, 4 }
 0x71d   :  { %9262 = vsinq.f32 %v7569_v13  ;;  %v7723_v14 = vsel %vm7719_vm8, %v7703_v60, %v7706_v44  ;;  %v7724_v16 = vsel %vm7722_vm11, %v7712_v28, 2102212464  ;;  %v7727_v61 = vsel %vm7719_vm8, %v7706_v44, %v7709_v21 }
 0x71e   :  { %v8618_v15 = vadd.s32 4294967294, %v7652_v50  ;;  %v7728_v27 = vsel %vm7722_vm11, %v7715_v55, 920167782  ;;  %v7725_v1 = vsel %vm7721_vm10, %v7709_v21, %v7724_v16  ;;  %v7731_v57 = vsel %vm7719_vm8, %v7709_v21, %v7712_v28 }
 0x71f   :  { %v7729_v11 = vsel %vm7721_vm10, %v7712_v28, %v7728_v27  ;;  %v7732_v8 = vsel %vm7722_vm11, %v7718_v2, 1326507024  ;;  %v14297_v51 = vsel %vm7470_vm7, nan, %v7479_v59  ;;  %v7726_v42 = vsel %vm7720_vm9, %v7723_v14, %v7725_v1 }
 0x720   :  { %vm8619_vm12 = vcmp.lt.s32.totalorder %v8618_v15, 0  ;;  %v7730_v3 = vsel %vm7720_vm9, %v7727_v61, %v7729_v11  ;;  %v7733_v43 = vsel %vm7721_vm10, %v7715_v55, %v7732_v8  ;;  %v7568_v52 = vsel %vm7483_vm1, %v7567_v20, %v14203_v33 }
 0x721   :  { %v7655_v35 = vsel %vm8619_vm12, 0, %v8618_v15  ;;  %v7734_v17 = vsel %vm7720_vm9, %v7731_v57, %v7733_v43  ;;  %v14302_v29 = vmul.u32.u64.low %v14283_v5, %v7730_v3  ;;  %v14303_v62 = vmul.u32.u64.high %v14283_v5, %v7730_v3, %v14302_v29 }
 0x722   :  { %v7656_v40 = vsub.s32 32, %v7655_v35  ;;  %v7657_v48 = vshll.u32 %v14273_v4, %v7655_v35  ;;  %v7660_v53 = vsub.s32 4294967266, %v7655_v35  ;;  %v7793_v22 = vand.u32 2139095040, %v14297_v51 }
 0x723   :  { %v14312_v12 = vmul.u32.u64.low %v14283_v5, %v7734_v17  ;;  %v14313_v24 = vmul.u32.u64.high %v14283_v5, %v7734_v17, %v14312_v12  ;;  %v7670_v19 = vsub.s32 4, %v14258_v63  ;;  %v7742_v4 = vmul.u32 %v14283_v5, %v7726_v42 }
 0x724   :  { %v7658_v6 = vshrl.u32 %v14268_v56, %v7656_v40  ;;  %v7661_v41 = vadd.s32 127, %v7660_v53  ;;  %v7745_v47 = vadd.s32 1, %v14303_v62  ;;  %v7570_v54 = vsel %vm14262_vm6, 0, %v7568_v52 }
 0x725   :  { %v7794_v20 = vshrl.u32 %v7793_v22, 23  ;;  %vm7586_vm13 = vcmp.lt.s32.totalorder %v14127_v58, 0  ;;  %vm7744_vm14 = vc.u32 %v14313_v24, %v14302_v29  ;;  %v7790_v56 = vand.u32 2147483647, %v14297_v51 }
 0x726   :  { %v7659_v37 = vor.u32 %v7658_v6, %v7657_v48  ;;  %v7662_v33 = vshll.u32 %v7661_v41, 23  ;;  %v7746_v5 = vsel %vm7744_vm14, %v7745_v47, %v14303_v62  ;;  %v7574_v60 = vand.u32 3, %v7570_v54 }
 0x727   :  { %v8624_v59 = vadd.s32 4294967169, %v7794_v20  ;;  %v7671_v10 = vsel %vm7586_vm13, %v7670_v19, %v14258_v63  ;;  %v7747_v49 = vadd.s32 %v7746_v5, %v7742_v4  ;;  %vm14332_vm15 = vcmp.le.f32.partialorder %v7584_v23, 0.7853982 }
 0x728   :  { %v7663_v0 = vor.u32 4788187, %v7662_v33  ;;  %v7666_v18 = vcvt.s32.f32 %v7659_v37  ;;  %v7797_v28 = vand.u32 8388607, %v7790_v56  ;;  %v7673_v50 = vsel %vm14332_vm15, 0, %v7671_v10 }
 0x729   :  { %v9261_v25 = vpop.eup %9260  ;;  %v7800_v39 = vadd.s32 1, %v8624_v59  ;;  %v7748_v21 = vadd.s32 536870912, %v7747_v49  ;;  %vm7579_vm1 = vcmp.eq.s32.totalorder %v7574_v60, 2  ;;  %vm7576_vm2 = vcmp.eq.s32.totalorder %v7574_v60, 0 }
 0x72a   :  { %v9263_v26 = vpop.eup %9262  ;;  %v7664_v13 = vand.u32 2147483647, %v7663_v0  ;;  %v7580_v55 = vxor.u32 2147483648, %v9261_v25  ;;  %vm7573_vm3 = vweird.f32 %v14092_v31  ;;  %vm7575_vm4 = vcmp.lt.s32.totalorder %v7574_v60, 2 }
 0x72b   :  { %vm7801_vm0 = vcmp.gt.s32.totalorder %v7800_v39, 0  ;;  %v7577_v63 = vxor.u32 2147483648, %v9263_v26  ;;  %v14340_v2 = vshrl.u32 %v7748_v21, 30  ;;  %v14343_v16 = vand.u32 3, %v7673_v50 }
 0x72c   :  { %v7667_v9 = vmul.f32 %v7666_v18, %v7664_v13  ;;  %v7802_v14 = vsel %vm7801_vm0, %v7800_v39, 0  ;;  %v7798_v27 = vor.u32 8388608, %v7797_v28  ;;  %v7581_v1 = vsel %vm7579_vm1, %v7580_v55, %v9263_v26 }
 0x72d   :  { %v7804_v15 = vand.u32 31, %v7802_v14  ;;  %v7750_v61 = vshll.u32 %v14340_v2, 30  ;;  %v7578_v3 = vsel %vm7576_vm2, %v9261_v25, %v7577_v63  ;;  %v7803_v17 = vshrl.u32 %v7802_v14, 5 }
 0x72e   :  { %v7668_v23 = vxor.u32 2147483648, %v7667_v9  ;;  %v7582_v19 = vsel %vm7575_vm4, %v7578_v3, %v7581_v1  ;;  %v7743_v4 = vadd.s32 %v14302_v29, %v14313_v24  ;;  %v7838_v54 = vshll.u32 %v7798_v27, 8 }
 0x72f   :  { %v7805_v57 = vsub.s32 32, %v7804_v15  ;;  %v7807_v8 = vshll.u32 %v9337_v30, %v7804_v15  ;;  %v14352_v35 = vsub.s32 %v7747_v49, %v7750_v61  ;;  %v7810_v40 = vshll.u32 %v9338_v32, %v7804_v15 }
 0x730   :  { %v7669_v11 = vsel %vm7586_vm13, %v7668_v23, %v7667_v9  ;;  %v7813_v48 = vshll.u32 %v9339_v34, %v7804_v15  ;;  %v7816_v41 = vshll.u32 %v9340_v36, %v7804_v15  ;;  %v7819_v25 = vshll.u32 %v9341_v38, %v7804_v15 }
 0x731   :  { %v7672_v43 = vsel %vm14332_vm15, %v14127_v58, %v7669_v11  ;;  %v7808_v62 = vshrl.u32 %v9338_v32, %v7805_v57  ;;  %v7753_v53 = vsub.s32 0, %v14352_v35  ;;  %v7806_v42 = vshrl.u32 %v9337_v30, %v7805_v57 }
 0x732   :  { %9264 = vcosq.f32 %v7672_v43  ;;  %v7811_v52 = vshrl.u32 %v9339_v34, %v7805_v57  ;;  %v7814_v6 = vshrl.u32 %v9340_v36, %v7805_v57  ;;  %v7817_v22 = vshrl.u32 %v9341_v38, %v7805_v57 }
 0x733   :  { %9266 = vsinq.f32 %v7672_v43  ;;  %v7809_v12 = vor.u32 %v7808_v62, %v7807_v8  ;;  %v8621_v47 = vmin.u32 %v7753_v53, %v14352_v35  ;;  %v7820_v18 = vshrl.u32 %v9342_v46, %v7805_v57 }
 0x734   :  { %v7812_v37 = vor.u32 %v7811_v52, %v7810_v40  ;;  %v7815_v33 = vor.u32 %v7814_v6, %v7813_v48  ;;  %v7818_v20 = vor.u32 %v7817_v22, %v7816_v41  ;;  %vm7822_vm5 = vcmp.lt.s32.totalorder %v7803_v17, 1 }
 0x735   :  { %v7755_v0 = vclz %v8621_v47  ;;  %vm7823_vm6 = vcmp.lt.s32.totalorder %v7803_v17, 2  ;;  %vm7824_vm7 = vcmp.lt.s32.totalorder %v7803_v17, 3  ;;  %vm7825_vm8 = vcmp.lt.s32.totalorder %v7803_v17, 4 }
 0x736   :  { %v7826_v5 = vsel %vm7822_vm5, %v7806_v42, %v7809_v12  ;;  %v7830_v59 = vsel %vm7822_vm5, %v7809_v12, %v7812_v37  ;;  %v7821_v60 = vor.u32 %v7820_v18, %v7819_v25  ;;  %v7827_v29 = vsel %vm7825_vm8, %v7815_v33, 2102212464 }
 0x737   :  { %v8622_v26 = vadd.s32 4294967294, %v7755_v0  ;;  %v7831_v24 = vsel %vm7825_vm8, %v7818_v20, 920167782  ;;  %v14371_v10 = vsel %vm7573_vm3, nan, %v7582_v19  ;;  %v7828_v49 = vsel %vm7824_vm7, %v7812_v37, %v7827_v29 }
 0x738   :  { %v7832_v13 = vsel %vm7824_vm7, %v7815_v33, %v7831_v24  ;;  %v7834_v39 = vsel %vm7822_vm5, %v7812_v37, %v7815_v33  ;;  %v7829_v44 = vsel %vm7823_vm6, %v7826_v5, %v7828_v49  ;;  %v7835_v28 = vsel %vm7825_vm8, %v7821_v60, 1326507024 }
 0x739   :  { %vm8623_vm9 = vcmp.lt.s32.totalorder %v8622_v26, 0  ;;  %v7833_v21 = vsel %vm7823_vm6, %v7830_v59, %v7832_v13  ;;  %v7836_v9 = vsel %vm7824_vm7, %v7818_v20, %v7835_v28  ;;  %v7896_v1 = vand.u32 2139095040, %v14371_v10 }
 0x73a   :  { %v7758_v55 = vsel %vm8623_vm9, 0, %v8622_v26  ;;  %v14378_v50 = vmul.u32.u64.low %v7838_v54, %v7833_v21  ;;  %v14379_v63 = vmul.u32.u64.high %v7838_v54, %v7833_v21, %v14378_v50  ;;  %v7837_v15 = vsel %vm7823_vm6, %v7834_v39, %v7836_v9 }
 0x73b   :  { %v7759_v31 = vsub.s32 32, %v7758_v55  ;;  %v7760_v14 = vshll.u32 %v14352_v35, %v7758_v55  ;;  %v7763_v23 = vsub.s32 4294967266, %v7758_v55  ;;  %vm7679_vm10 = vcmp.eq.s32.totalorder %v14343_v16, 0 }
 0x73c   :  { %v14384_v61 = vmul.u32.u64.low %v7838_v54, %v7837_v15  ;;  %v14385_v27 = vmul.u32.u64.high %v7838_v54, %v7837_v15, %v14384_v61  ;;  %vm7682_vm11 = vcmp.eq.s32.totalorder %v14343_v16, 2  ;;  %v7845_v62 = vmul.u32 %v7838_v54, %v7829_v44 }
 0x73d   :  { %v7761_v57 = vshrl.u32 %v7743_v4, %v7759_v31  ;;  %v7764_v8 = vadd.s32 127, %v7763_v23  ;;  %v7848_v35 = vadd.s32 1, %v14379_v63  ;;  %v7897_v40 = vshrl.u32 %v7896_v1, 23 }
 0x73e   :  { %vm7678_vm12 = vcmp.lt.s32.totalorder %v14343_v16, 2  ;;  %v7773_v52 = vsub.s32 4, %v14340_v2  ;;  %vm7847_vm13 = vc.u32 %v14385_v27, %v14378_v50  ;;  %vm7676_vm14 = vweird.f32 %v14127_v58 }
 0x73f   :  { %v9265_v11 = vpop.eup %9264  ;;  %v7762_v48 = vor.u32 %v7761_v57, %v7760_v14  ;;  %v7765_v53 = vshll.u32 %v7764_v8, 23  ;;  %v8628_v12 = vadd.s32 4294967169, %v7897_v40  ;;  %v7849_v19 = vsel %vm7847_vm13, %v7848_v35, %v14379_v63 }
 0x740   :  { %v9267_v3 = vpop.eup %9266  ;;  %v7683_v43 = vxor.u32 2147483648, %v9265_v11  ;;  %v7850_v4 = vadd.s32 %v7849_v19, %v7845_v62  ;;  %vm7689_vm15 = vcmp.lt.s32.totalorder %v14230_v45, 0  ;;  %v7893_v20 = vand.u32 2147483647, %v14371_v10 }
 0x741   :  { %v7680_v17 = vxor.u32 2147483648, %v9267_v3  ;;  %v7766_v41 = vor.u32 4788187, %v7765_v53  ;;  %v7769_v22 = vcvt.s32.f32 %v7762_v48  ;;  %v7903_v47 = vadd.s32 1, %v8628_v12 }
 0x742   :  { %v7684_v42 = vsel %vm7682_vm11, %v7683_v43, %v9267_v3  ;;  %v7851_v33 = vadd.s32 536870912, %v7850_v4  ;;  %v14404_v16 = vsel %vm7689_vm15, %v7773_v52, %v14340_v2  ;;  %vm14412_vm1 = vcmp.le.f32.partialorder %v7687_v7, 0.7853982 }
 0x743   :  { %v7681_v6 = vsel %vm7679_vm10, %v9265_v11, %v7680_v17  ;;  %v7767_v37 = vand.u32 2147483647, %v7766_v41  ;;  %vm7904_vm0 = vcmp.gt.s32.totalorder %v7903_v47, 0  ;;  %v7776_v60 = vsel %vm14412_vm1, 0, %v14404_v16 }
 0x744   :  { %v7685_v54 = vsel %vm7678_vm12, %v7681_v6, %v7684_v42  ;;  %v7905_v0 = vsel %vm7904_vm0, %v7903_v47, 0  ;;  %v14408_v5 = vshrl.u32 %v7851_v33, 30  ;;  %v7900_v29 = vand.u32 8388607, %v7893_v20 }
 0x745   :  { %v7770_v25 = vmul.f32 %v7769_v22, %v7767_v37  ;;  %v14406_v18 = vsel %vm7676_vm14, nan, %v7685_v54  ;;  %v7907_v58 = vand.u32 31, %v7905_v0  ;;  %v7906_v28 = vshrl.u32 %v7905_v0, 5 }
 0x746   :  { %v7853_v2 = vshll.u32 %v14408_v5, 30  ;;  %v7999_v39 = vand.u32 2139095040, %v14406_v18  ;;  %v7846_v14 = vadd.s32 %v14378_v50, %v14385_v27  ;;  %v7901_v15 = vor.u32 8388608, %v7900_v29 }
 0x747   :  { %v7771_v26 = vxor.u32 2147483648, %v7770_v25  ;;  %v7908_v24 = vsub.s32 32, %v7907_v58  ;;  %v7910_v13 = vshll.u32 %v9337_v30, %v7907_v58  ;;  %v7913_v7 = vshll.u32 %v9338_v32, %v7907_v58 }
 0x748   :  { %v14430_v21 = vsub.s32 %v7850_v4, %v7853_v2  ;;  %v7916_v55 = vshll.u32 %v9339_v34, %v7907_v58  ;;  %v7919_v31 = vshll.u32 %v9340_v36, %v7907_v58  ;;  %v7922_v8 = vshll.u32 %v9341_v38, %v7907_v58 }
 0x749   :  { %v7772_v49 = vsel %vm7689_vm15, %v7771_v26, %v7770_v25  ;;  %v7911_v9 = vshrl.u32 %v9338_v32, %v7908_v24  ;;  %v7914_v63 = vshrl.u32 %v9339_v34, %v7908_v24  ;;  %v7917_v61 = vshrl.u32 %v9340_v36, %v7908_v24 }
 0x74a   :  { %v7775_v44 = vsel %vm14412_vm1, %v14230_v45, %v7772_v49  ;;  %v7856_v23 = vsub.s32 0, %v14430_v21  ;;  %v7920_v57 = vshrl.u32 %v9341_v38, %v7908_v24  ;;  %v7909_v43 = vshrl.u32 %v9337_v30, %v7908_v24 }
 0x74b   :  { %9268 = vcosq.f32 %v7775_v44  ;;  %v7912_v1 = vor.u32 %v7911_v9, %v7910_v13  ;;  %v7915_v11 = vor.u32 %v7914_v63, %v7913_v7  ;;  %v8000_v62 = vshrl.u32 %v7999_v39, 23 }
 0x74c   :  { %9270 = vsinq.f32 %v7775_v44  ;;  %v8625_v3 = vmin.u32 %v7856_v23, %v14430_v21  ;;  %v7918_v35 = vor.u32 %v7917_v61, %v7916_v55  ;;  %v7921_v40 = vor.u32 %v7920_v57, %v7919_v31 }
 0x74d   :  { %v7923_v50 = vshrl.u32 %v9342_v46, %v7908_v24  ;;  %vm7925_vm2 = vcmp.lt.s32.totalorder %v7906_v28, 1  ;;  %vm7927_vm3 = vcmp.lt.s32.totalorder %v7906_v28, 3  ;;  %vm7928_vm4 = vcmp.lt.s32.totalorder %v7906_v28, 4 }
 0x74e   :  { %v7858_v27 = vclz %v8625_v3  ;;  %v7941_v17 = vshll.u32 %v7901_v15, 8  ;;  %vm7926_vm5 = vcmp.lt.s32.totalorder %v7906_v28, 2  ;;  %v7930_v53 = vsel %vm7928_vm4, %v7918_v35, 2102212464 }
 0x74f   :  { %v7924_v48 = vor.u32 %v7923_v50, %v7922_v8  ;;  %v7933_v42 = vsel %vm7925_vm2, %v7912_v1, %v7915_v11  ;;  %v7929_v12 = vsel %vm7925_vm2, %v7909_v43, %v7912_v1  ;;  %v7934_v6 = vsel %vm7928_vm4, %v7921_v40, 920167782 }
 0x750   :  { %v8626_v52 = vadd.s32 4294967294, %v7858_v27  ;;  %v7937_v41 = vsel %vm7925_vm2, %v7915_v11, %v7918_v35  ;;  %v7931_v22 = vsel %vm7927_vm3, %v7915_v11, %v7930_v53  ;;  %v7935_v19 = vsel %vm7927_vm3, %v7918_v35, %v7934_v6 }
 0x751   :  { %v7938_v4 = vsel %vm7928_vm4, %v7924_v48, 1326507024  ;;  %v8632_v47 = vadd.s32 4294967169, %v8000_v62  ;;  %v7936_v54 = vsel %vm7926_vm5, %v7933_v42, %v7935_v19  ;;  %v7996_v33 = vand.u32 2147483647, %v14406_v18 }
 0x752   :  { %vm8627_vm6 = vcmp.lt.s32.totalorder %v8626_v52, 0  ;;  %v7939_v37 = vsel %vm7927_vm3, %v7921_v40, %v7938_v4  ;;  %v14451_v0 = vmul.u32.u64.low %v7941_v17, %v7936_v54  ;;  %v14452_v58 = vmul.u32.u64.high %v7941_v17, %v7936_v54, %v14451_v0 }
 0x753   :  { %v7861_v25 = vsel %vm8627_vm6, 0, %v8626_v52  ;;  %v7940_v16 = vsel %vm7926_vm5, %v7937_v41, %v7939_v37  ;;  %v7932_v29 = vsel %vm7926_vm5, %v7929_v12, %v7931_v22  ;;  %v14457_v24 = vand.u32 3, %v7776_v60 }
 0x754   :  { %v7862_v59 = vsub.s32 32, %v7861_v25  ;;  %v7863_v26 = vshll.u32 %v14430_v21, %v7861_v25  ;;  %v7866_v2 = vsub.s32 4294967266, %v7861_v25  ;;  %v8006_v7 = vadd.s32 1, %v8632_v47 }
 0x755   :  { %v14459_v49 = vmul.u32.u64.low %v7941_v17, %v7940_v16  ;;  %v14460_v13 = vmul.u32.u64.high %v7941_v17, %v7940_v16, %v14459_v49  ;;  %v7948_v9 = vmul.u32 %v7941_v17, %v7932_v29  ;;  %v7951_v63 = vadd.s32 1, %v14452_v58 }
 0x756   :  { %v7864_v44 = vshrl.u32 %v7846_v14, %v7862_v59  ;;  %v7867_v55 = vadd.s32 127, %v7866_v2  ;;  %v8003_v31 = vand.u32 8388607, %v7996_v33  ;;  %vm8007_vm7 = vcmp.gt.s32.totalorder %v8006_v7, 0 }
 0x757   :  { %v8008_v15 = vsel %vm8007_vm7, %v8006_v7, 0  ;;  %vm7785_vm8 = vcmp.eq.s32.totalorder %v14457_v24, 2  ;;  %vm7792_vm9 = vcmp.lt.s32.totalorder %v14297_v51, 0  ;;  %vm7950_vm10 = vc.u32 %v14460_v13, %v14451_v0 }
 0x758   :  { %v9269_v39 = vpop.eup %9268  ;;  %v7865_v23 = vor.u32 %v7864_v44, %v7863_v26  ;;  %v7868_v28 = vshll.u32 %v7867_v55, 23  ;;  %vm14471_vm11 = vcmp.le.f32.partialorder %v7790_v56, 0.7853982  ;;  %v7952_v11 = vsel %vm7950_vm10, %v7951_v63, %v14452_v58 }
 0x759   :  { %v7786_v21 = vxor.u32 2147483648, %v9269_v39  ;;  %v9271_v60 = vpop.eup %9270  ;;  %vm7781_vm12 = vcmp.lt.s32.totalorder %v14457_v24, 2  ;;  %vm7782_vm13 = vcmp.eq.s32.totalorder %v14457_v24, 0  ;;  %v7953_v57 = vadd.s32 %v7952_v11, %v7948_v9 }
 0x75a   :  { %v7869_v61 = vor.u32 4788187, %v7868_v28  ;;  %v7872_v1 = vcvt.s32.f32 %v7865_v23  ;;  %v8010_v8 = vand.u32 31, %v8008_v15  ;;  %v7783_v3 = vxor.u32 2147483648, %v9271_v60 }
 0x75b   :  { %v7787_v43 = vsel %vm7785_vm8, %v7786_v21, %v9271_v60  ;;  %v8004_v35 = vor.u32 8388608, %v8003_v31  ;;  %vm7779_vm14 = vweird.f32 %v14230_v45  ;;  %v7954_v56 = vadd.s32 536870912, %v7953_v57 }
 0x75c   :  { %v7870_v62 = vand.u32 2147483647, %v7869_v61  ;;  %v8009_v40 = vshrl.u32 %v8008_v15, 5  ;;  %v8011_v50 = vsub.s32 32, %v8010_v8  ;;  %v8013_v27 = vshll.u32 %v9337_v30, %v8010_v8 }
 0x75d   :  { %v8016_v48 = vshll.u32 %v9338_v32, %v8010_v8  ;;  %v8019_v53 = vshll.u32 %v9339_v34, %v8010_v8  ;;  %v8022_v42 = vshll.u32 %v9340_v36, %v8010_v8  ;;  %v14483_v52 = vshrl.u32 %v7954_v56, 30 }
 0x75e   :  { %v7873_v17 = vmul.f32 %v7872_v1, %v7870_v62  ;;  %v8014_v12 = vshrl.u32 %v9338_v32, %v8011_v50  ;;  %v8017_v6 = vshrl.u32 %v9339_v34, %v8011_v50  ;;  %v8025_v41 = vshll.u32 %v9341_v38, %v8010_v8 }
 0x75f   :  { %v8020_v19 = vshrl.u32 %v9340_v36, %v8011_v50  ;;  %v8023_v4 = vshrl.u32 %v9341_v38, %v8011_v50  ;;  %v8026_v47 = vshrl.u32 %v9342_v46, %v8011_v50  ;;  %v7784_v54 = vsel %vm7782_vm13, %v9269_v39, %v7783_v3 }
 0x760   :  { %v7874_v22 = vxor.u32 2147483648, %v7873_v17  ;;  %v7956_v37 = vshll.u32 %v14483_v52, 30  ;;  %v8015_v25 = vor.u32 %v8014_v12, %v8013_v27  ;;  %vm8028_vm15 = vcmp.lt.s32.totalorder %v8009_v40, 1 }
 0x761   :  { %v8018_v58 = vor.u32 %v8017_v6, %v8016_v48  ;;  %v8021_v59 = vor.u32 %v8020_v19, %v8019_v53  ;;  %v8024_v26 = vor.u32 %v8023_v4, %v8022_v42  ;;  %v8012_v49 = vshrl.u32 %v9337_v30, %v8011_v50 }
 0x762   :  { %v7875_v16 = vsel %vm7792_vm9, %v7874_v22, %v7873_v17  ;;  %v7957_v29 = vsub.s32 %v7953_v57, %v7956_v37  ;;  %vm8031_vm0 = vcmp.lt.s32.totalorder %v8009_v40, 4  ;;  %v7876_v7 = vsub.s32 4, %v14408_v5 }
 0x763   :  { %v7878_v2 = vsel %vm14471_vm11, %v14297_v51, %v7875_v16  ;;  %v8027_v39 = vor.u32 %v8026_v47, %v8025_v41  ;;  %v8033_v44 = vsel %vm8031_vm0, %v8021_v59, 2102212464  ;;  %v7788_v55 = vsel %vm7781_vm12, %v7784_v54, %v7787_v43 }
 0x764   :  { %9272 = vcosq.f32 %v7878_v2  ;;  %v7959_v9 = vsub.s32 0, %v7957_v29  ;;  %vm8030_vm1 = vcmp.lt.s32.totalorder %v8009_v40, 3  ;;  %vm8029_vm2 = vcmp.lt.s32.totalorder %v8009_v40, 2 }
 0x765   :  { %9274 = vsinq.f32 %v7878_v2  ;;  %v8036_v63 = vsel %vm8028_vm15, %v8015_v25, %v8018_v58  ;;  %v8037_v31 = vsel %vm8031_vm0, %v8024_v26, 920167782  ;;  %v8044_v21 = vshll.u32 %v8004_v35, 8 }
 0x766   :  { %v8629_v23 = vmin.u32 %v7959_v9, %v7957_v29  ;;  %v8032_v28 = vsel %vm8028_vm15, %v8012_v49, %v8015_v25  ;;  %v8034_v15 = vsel %vm8030_vm1, %v8018_v58, %v8033_v44  ;;  %v8040_v60 = vsel %vm8028_vm15, %v8018_v58, %v8021_v59 }
 0x767   :  { %v14510_v61 = vsel %vm7779_vm14, nan, %v7788_v55  ;;  %v8038_v24 = vsel %vm8030_vm1, %v8021_v59, %v8037_v31  ;;  %v8041_v1 = vsel %vm8031_vm0, %v8027_v39, 1326507024  ;;  %v7877_v11 = vsel %vm7792_vm9, %v7876_v7, %v14408_v5 }
 0x768   :  { %v7961_v57 = vclz %v8629_v23  ;;  %v8039_v8 = vsel %vm8029_vm2, %v8036_v63, %v8038_v24  ;;  %v8042_v3 = vsel %vm8030_vm1, %v8024_v26, %v8041_v1  ;;  %v8035_v43 = vsel %vm8029_vm2, %v8032_v28, %v8034_v15 }
 0x769   :  { %v8043_v62 = vsel %vm8029_vm2, %v8040_v60, %v8042_v3  ;;  %v14519_v35 = vmul.u32.u64.low %v8044_v21, %v8039_v8  ;;  %v14520_v56 = vmul.u32.u64.high %v8044_v21, %v8039_v8, %v14519_v35  ;;  %v8102_v17 = vand.u32 2139095040, %v14510_v61 }
 0x76a   :  { %v8630_v45 = vadd.s32 4294967294, %v7961_v57  ;;  %v14522_v50 = vmul.u32.u64.low %v8044_v21, %v8043_v62  ;;  %v14523_v27 = vmul.u32.u64.high %v8044_v21, %v8043_v62, %v14522_v50  ;;  %v7949_v5 = vadd.s32 %v14451_v0, %v14460_v13 }
 0x76b   :  { %v8103_v48 = vshrl.u32 %v8102_v17, 23  ;;  %v7879_v53 = vsel %vm14471_vm11, 0, %v7877_v11  ;;  %v8051_v40 = vmul.u32 %v8044_v21, %v8035_v43  ;;  %v8054_v12 = vadd.s32 1, %v14520_v56 }
 0x76c   :  { %vm8631_vm3 = vcmp.lt.s32.totalorder %v8630_v45, 0  ;;  %v7979_v19 = vsub.s32 4, %v14483_v52  ;;  %vm8053_vm4 = vc.u32 %v14523_v27, %v14519_v35  ;;  %v8099_v4 = vand.u32 2147483647, %v14510_v61 }
 0x76d   :  { %v7964_v42 = vsel %vm8631_vm3, 0, %v8630_v45  ;;  %v8636_v47 = vadd.s32 4294967169, %v8103_v48  ;;  %v8055_v14 = vsel %vm8053_vm4, %v8054_v12, %v14520_v56  ;;  %v7883_v25 = vand.u32 3, %v7879_v53 }
 0x76e   :  { %v7965_v6 = vsub.s32 32, %v7964_v42  ;;  %v7966_v41 = vshll.u32 %v7957_v29, %v7964_v42  ;;  %v7969_v22 = vsub.s32 4294967266, %v7964_v42  ;;  %vm7895_vm5 = vcmp.lt.s32.totalorder %v14371_v10, 0 }
 0x76f   :  { %v8056_v16 = vadd.s32 %v8055_v14, %v8051_v40  ;;  %v8109_v58 = vadd.s32 1, %v8636_v47  ;;  %vm14538_vm6 = vcmp.le.f32.partialorder %v7893_v20, 0.7853982  ;;  %v14545_v29 = vsel %vm7895_vm5, %v7979_v19, %v14483_v52 }
 0x770   :  { %v7967_v13 = vshrl.u32 %v7949_v5, %v7965_v6  ;;  %v7970_v54 = vadd.s32 127, %v7969_v22  ;;  %v8106_v39 = vand.u32 8388607, %v8099_v4  ;;  %vm7885_vm8 = vcmp.eq.s32.totalorder %v7883_v25, 0 }
 0x771   :  { %v9273_v0 = vpop.eup %9272  ;;  %v8057_v7 = vadd.s32 536870912, %v8056_v16  ;;  %vm8110_vm7 = vcmp.gt.s32.totalorder %v8109_v58, 0  ;;  %vm7888_vm9 = vcmp.eq.s32.totalorder %v7883_v25, 2  ;;  %vm7884_vm10 = vcmp.lt.s32.totalorder %v7883_v25, 2 }
 0x772   :  { %v9275_v37 = vpop.eup %9274  ;;  %v7968_v26 = vor.u32 %v7967_v13, %v7966_v41  ;;  %v7971_v2 = vshll.u32 %v7970_v54, 23  ;;  %v7889_v49 = vxor.u32 2147483648, %v9273_v0  ;;  %v8111_v20 = vsel %vm8110_vm7, %v8109_v58, 0 }
 0x773   :  { %v7886_v44 = vxor.u32 2147483648, %v9275_v37  ;;  %v14549_v63 = vshrl.u32 %v8057_v7, 30  ;;  %v8113_v31 = vand.u32 31, %v8111_v20  ;;  %v7982_v52 = vsel %vm14538_vm6, 0, %v14545_v29 }
 0x774   :  { %v7972_v55 = vor.u32 4788187, %v7971_v2  ;;  %v7975_v9 = vcvt.s32.f32 %v7968_v26  ;;  %v14555_v23 = vadd.s32 %v14519_v35, %v14523_v27  ;;  %v8107_v15 = vor.u32 8388608, %v8106_v39 }
 0x775   :  { %v8059_v28 = vshll.u32 %v14549_v63, 30  ;;  %v8114_v60 = vsub.s32 32, %v8113_v31  ;;  %vm7882_vm11 = vweird.f32 %v14297_v51  ;;  %v7887_v24 = vsel %vm7885_vm8, %v9273_v0, %v7886_v44 }
 0x776   :  { %v7973_v21 = vand.u32 2147483647, %v7972_v55  ;;  %v7890_v1 = vsel %vm7888_vm9, %v7889_v49, %v9275_v37  ;;  %v8116_v57 = vshll.u32 %v9337_v30, %v8113_v31  ;;  %v8119_v43 = vshll.u32 %v9338_v32, %v8113_v31 }
 0x777   :  { %v8060_v8 = vsub.s32 %v8056_v16, %v8059_v28  ;;  %v8117_v3 = vshrl.u32 %v9338_v32, %v8114_v60  ;;  %v8122_v62 = vshll.u32 %v9339_v34, %v8113_v31  ;;  %v8120_v56 = vshrl.u32 %v9339_v34, %v8114_v60 }
 0x778   :  { %v7976_v11 = vmul.f32 %v7975_v9, %v7973_v21  ;;  %v8123_v45 = vshrl.u32 %v9340_v36, %v8114_v60  ;;  %v8125_v50 = vshll.u32 %v9340_v36, %v8113_v31  ;;  %v8112_v17 = vshrl.u32 %v8111_v20, 5 }
 0x779   :  { %v8062_v27 = vsub.s32 0, %v8060_v8  ;;  %v8126_v5 = vshrl.u32 %v9341_v38, %v8114_v60  ;;  %v14567_v48 = vshll.u32 %v8107_v15, 8  ;;  %v7891_v53 = vsel %vm7884_vm10, %v7887_v24, %v7890_v1 }
 0x77a   :  { %v7977_v35 = vxor.u32 2147483648, %v7976_v11  ;;  %v8115_v40 = vshrl.u32 %v9337_v30, %v8114_v60  ;;  %v8128_v12 = vshll.u32 %v9341_v38, %v8113_v31  ;;  %v8118_v22 = vor.u32 %v8117_v3, %v8116_v57 }
 0x77b   :  { %v8633_v41 = vmin.u32 %v8062_v27, %v8060_v8  ;;  %v8121_v19 = vor.u32 %v8120_v56, %v8119_v43  ;;  %v8124_v47 = vor.u32 %v8123_v45, %v8122_v62  ;;  %v8127_v0 = vor.u32 %v8126_v5, %v8125_v50 }
 0x77c   :  { %v7978_v42 = vsel %vm7895_vm5, %v7977_v35, %v7976_v11  ;;  %v8129_v13 = vshrl.u32 %v9342_v46, %v8114_v60  ;;  %vm8131_vm12 = vcmp.lt.s32.totalorder %v8112_v17, 1  ;;  %vm8132_vm13 = vcmp.lt.s32.totalorder %v8112_v17, 2 }
 0x77d   :  { %v7981_v6 = vsel %vm14538_vm6, %v14371_v10, %v7978_v42  ;;  %v8064_v54 = vclz %v8633_v41  ;;  %vm8133_vm14 = vcmp.lt.s32.totalorder %v8112_v17, 3  ;;  %vm8134_vm15 = vcmp.lt.s32.totalorder %v8112_v17, 4 }
 0x77e   :  { %9276 = vcosq.f32 %v7981_v6  ;;  %v8130_v14 = vor.u32 %v8129_v13, %v8128_v12  ;;  %v8135_v37 = vsel %vm8131_vm12, %v8115_v40, %v8118_v22  ;;  %v8136_v16 = vsel %vm8134_vm15, %v8124_v47, 2102212464 }
 0x77f   :  { %9278 = vsinq.f32 %v7981_v6  ;;  %v8634_v25 = vadd.s32 4294967294, %v8064_v54  ;;  %v8139_v58 = vsel %vm8131_vm12, %v8118_v22, %v8121_v19  ;;  %v8140_v59 = vsel %vm8134_vm15, %v8127_v0, 920167782 }
 0x780   :  { %v8137_v26 = vsel %vm8133_vm14, %v8121_v19, %v8136_v16  ;;  %v8141_v2 = vsel %vm8133_vm14, %v8124_v47, %v8140_v59  ;;  %v8143_v29 = vsel %vm8131_vm12, %v8121_v19, %v8124_v47  ;;  %v8144_v49 = vsel %vm8134_vm15, %v8130_v14, 1326507024 }
 0x781   :  { %v14580_v7 = vsel %vm7882_vm11, nan, %v7891_v53  ;;  %vm8635_vm0 = vcmp.lt.s32.totalorder %v8634_v25, 0  ;;  %v8142_v39 = vsel %vm8132_vm13, %v8139_v58, %v8141_v2  ;;  %v8145_v44 = vsel %vm8133_vm14, %v8127_v0, %v8144_v49 }
 0x782   :  { %v8067_v55 = vsel %vm8635_vm0, 0, %v8634_v25  ;;  %v8146_v9 = vsel %vm8132_vm13, %v8143_v29, %v8145_v44  ;;  %v14585_v20 = vmul.u32.u64.low %v14567_v48, %v8142_v39  ;;  %v14586_v31 = vmul.u32.u64.high %v14567_v48, %v8142_v39, %v14585_v20 }
 0x783   :  { %v8068_v21 = vsub.s32 32, %v8067_v55  ;;  %v8069_v28 = vshll.u32 %v8060_v8, %v8067_v55  ;;  %v8072_v15 = vsub.s32 4294967266, %v8067_v55  ;;  %v8138_v60 = vsel %vm8132_vm13, %v8135_v37, %v8137_v26 }
 0x784   :  { %v7986_v51 = vand.u32 3, %v7982_v52  ;;  %v14591_v24 = vmul.u32.u64.low %v14567_v48, %v8146_v9  ;;  %v14592_v1 = vmul.u32.u64.high %v14567_v48, %v8146_v9, %v14591_v24  ;;  %v8205_v3 = vand.u32 2139095040, %v14580_v7 }
 0x785   :  { %v8070_v11 = vshrl.u32 %v14555_v23, %v8068_v21  ;;  %v8073_v57 = vadd.s32 127, %v8072_v15  ;;  %v8154_v43 = vmul.u32 %v14567_v48, %v8138_v60  ;;  %v8157_v62 = vadd.s32 1, %v14586_v31 }
 0x786   :  { %v8206_v8 = vshrl.u32 %v8205_v3, 23  ;;  %vm7991_vm1 = vcmp.eq.s32.totalorder %v7986_v51, 2  ;;  %v8082_v45 = vsub.s32 4, %v14549_v63  ;;  %vm8156_vm2 = vc.u32 %v14592_v1, %v14585_v20 }
 0x787   :  { %v8071_v35 = vor.u32 %v8070_v11, %v8069_v28  ;;  %v8074_v56 = vshll.u32 %v8073_v57, 23  ;;  %v8158_v23 = vsel %vm8156_vm2, %v8157_v62, %v14586_v31  ;;  %vm7988_vm3 = vcmp.eq.s32.totalorder %v7986_v51, 0 }
 0x788   :  { %v8640_v17 = vadd.s32 4294967169, %v8206_v8  ;;  %v8159_v53 = vadd.s32 %v8158_v23, %v8154_v43  ;;  %v8202_v42 = vand.u32 2147483647, %v14580_v7  ;;  %vm7987_vm4 = vcmp.lt.s32.totalorder %v7986_v51, 2 }
 0x789   :  { %v8075_v50 = vor.u32 4788187, %v8074_v56  ;;  %v8078_v27 = vcvt.s32.f32 %v8071_v35  ;;  %vm7985_vm5 = vweird.f32 %v14371_v10  ;;  %vm7998_vm6 = vcmp.lt.s32.totalorder %v14406_v18, 0 }
 0x78a   :  { %v8212_v6 = vadd.s32 1, %v8640_v17  ;;  %v8160_v22 = vadd.s32 536870912, %v8159_v53  ;;  %v8083_v0 = vsel %vm7998_vm6, %v8082_v45, %v14549_v63  ;;  %v8209_v14 = vand.u32 8388607, %v8202_v42 }
 0x78b   :  { %v9277_v52 = vpop.eup %9276  ;;  %v8076_v12 = vand.u32 2147483647, %v8075_v50  ;;  %vm14615_vm8 = vcmp.le.f32.partialorder %v7996_v33, 0.7853982  ;;  %v8155_v23 = vadd.s32 %v14585_v20, %v14592_v1 }
 0x78c   :  { %v9279_v5 = vpop.eup %9278  ;;  %v7992_v48 = vxor.u32 2147483648, %v9277_v52  ;;  %vm8213_vm7 = vcmp.gt.s32.totalorder %v8212_v6, 0  ;;  %v14609_v54 = vshrl.u32 %v8160_v22, 30  ;;  %v8085_v26 = vsel %vm14615_vm8, 0, %v8083_v0 }
 0x78d   :  { %v7989_v40 = vxor.u32 2147483648, %v9279_v5  ;;  %v8079_v47 = vmul.f32 %v8078_v27, %v8076_v12  ;;  %v8214_v37 = vsel %vm8213_vm7, %v8212_v6, 0  ;;  %v8210_v39 = vor.u32 8388608, %v8209_v14 }
 0x78e   :  { %v7993_v41 = vsel %vm7991_vm1, %v7992_v48, %v9279_v5  ;;  %v8216_v58 = vand.u32 31, %v8214_v37  ;;  %v8162_v59 = vshll.u32 %v14609_v54, 30  ;;  %v8215_v44 = vshrl.u32 %v8214_v37, 5 }
 0x78f   :  { %v7990_v19 = vsel %vm7988_vm3, %v9277_v52, %v7989_v40  ;;  %v8080_v16 = vxor.u32 2147483648, %v8079_v47  ;;  %v8089_v57 = vand.u32 3, %v8085_v26  ;;  %vm8088_vm1 = vweird.f32 %v14406_v18 }
 0x790   :  { %v7994_v13 = vsel %vm7987_vm4, %v7990_v19, %v7993_v41  ;;  %v8217_v2 = vsub.s32 32, %v8216_v58  ;;  %v8219_v29 = vshll.u32 %v9337_v30, %v8216_v58  ;;  %v14628_v49 = vsub.s32 %v8159_v53, %v8162_v59 }
 0x791   :  { %v7995_v10 = vsel %vm7985_vm5, nan, %v7994_v13  ;;  %v8081_v63 = vsel %vm7998_vm6, %v8080_v16, %v8079_v47  ;;  %v8222_v9 = vshll.u32 %v9338_v32, %v8216_v58  ;;  %v8225_v31 = vshll.u32 %v9339_v34, %v8216_v58 }
 0x792   :  { %8305 = vst [vmem:[#allocation5] sm:$0xff] %v7995_v10  ;;  %v8084_v33 = vsel %vm14615_vm8, %v14406_v18, %v8081_v63  ;;  %v8220_v55 = vshrl.u32 %v9338_v32, %v8217_v2  ;;  %v8165_v21 = vsub.s32 0, %v14628_v49  ;;  %v8218_v28 = vshrl.u32 %v9337_v30, %v8217_v2 }
 0x793   :  { %9280 = vcosq.f32 %v8084_v33  ;;  %v8223_v15 = vshrl.u32 %v9339_v34, %v8217_v2  ;;  %v8226_v51 = vshrl.u32 %v9340_v36, %v8217_v2  ;;  %v8228_v24 = vshll.u32 %v9340_v36, %v8216_v58 }
 0x794   :  { %9282 = vsinq.f32 %v8084_v33  ;;  %v8221_v60 = vor.u32 %v8220_v55, %v8219_v29  ;;  %v8229_v11 = vshrl.u32 %v9341_v38, %v8217_v2  ;;  %v8637_v3 = vmin.u32 %v8165_v21, %v14628_v49 }
 0x795   :  { %v8250_v32 = vshll.u32 %v8210_v39, 8  ;;  %v8224_v43 = vor.u32 %v8223_v15, %v8222_v9  ;;  %v8227_v62 = vor.u32 %v8226_v51, %v8225_v31  ;;  %v8231_v56 = vshll.u32 %v9341_v38, %v8216_v58 }
 0x796   :  { %v8230_v35 = vor.u32 %v8229_v11, %v8228_v24  ;;  %v8167_v8 = vclz %v8637_v3  ;;  %v8232_v30 = vshrl.u32 %v9342_v46, %v8217_v2  ;;  %vm8234_vm9 = vcmp.lt.s32.totalorder %v8215_v44, 1 }
 0x797   :  { %vm8235_vm10 = vcmp.lt.s32.totalorder %v8215_v44, 2  ;;  %vm8236_vm11 = vcmp.lt.s32.totalorder %v8215_v44, 3  ;;  %vm8237_vm12 = vcmp.lt.s32.totalorder %v8215_v44, 4  ;;  %v8238_v34 = vsel %vm8234_vm9, %v8218_v28, %v8221_v60 }
 0x798   :  { %v8242_v36 = vsel %vm8234_vm9, %v8221_v60, %v8224_v43  ;;  %v8638_v45 = vadd.s32 4294967294, %v8167_v8  ;;  %v8233_v52 = vor.u32 %v8232_v30, %v8231_v56  ;;  %v8239_v50 = vsel %vm8237_vm12, %v8227_v62, 2102212464 }
 0x799   :  { %v8243_v27 = vsel %vm8237_vm12, %v8230_v35, 920167782  ;;  %v8240_v17 = vsel %vm8236_vm11, %v8224_v43, %v8239_v50  ;;  %v8246_v5 = vsel %vm8234_vm9, %v8224_v43, %v8227_v62  ;;  %vm8094_vm14 = vcmp.eq.s32.totalorder %v8089_v57, 2 }
 0x79a   :  { %v8244_v38 = vsel %vm8236_vm11, %v8227_v62, %v8243_v27  ;;  %vm8639_vm13 = vcmp.lt.s32.totalorder %v8638_v45, 0  ;;  %v8241_v46 = vsel %vm8235_vm10, %v8238_v34, %v8240_v17  ;;  %v8247_v53 = vsel %vm8237_vm12, %v8233_v52, 1326507024 }
 0x79b   :  { %v8245_v48 = vsel %vm8235_vm10, %v8242_v36, %v8244_v38  ;;  %v8170_v40 = vsel %vm8639_vm13, 0, %v8638_v45  ;;  %v8248_v12 = vsel %vm8236_vm11, %v8230_v35, %v8247_v53  ;;  %vm8091_vm15 = vcmp.eq.s32.totalorder %v8089_v57, 0 }
 0x79c   :  { %v14649_v6 = vmul.u32.u64.low %v8250_v32, %v8245_v48  ;;  %v14650_v41 = vmul.u32.u64.high %v8250_v32, %v8245_v48, %v14649_v6  ;;  %v8171_v22 = vsub.s32 32, %v8170_v40  ;;  %v8172_v20 = vshll.u32 %v14628_v49, %v8170_v40 }
 0x79d   :  { %v8175_v1 = vsub.s32 4294967266, %v8170_v40  ;;  %v8249_v19 = vsel %vm8235_vm10, %v8246_v5, %v8248_v12  ;;  %v8257_v16 = vmul.u32 %v8250_v32, %v8241_v46  ;;  %vm8090_vm0 = vcmp.lt.s32.totalorder %v8089_v57, 2 }
 0x79e   :  { %v14654_v47 = vmul.u32.u64.low %v8250_v32, %v8249_v19  ;;  %v14655_v0 = vmul.u32.u64.high %v8250_v32, %v8249_v19, %v14654_v47  ;;  %v8173_v14 = vshrl.u32 %v8155_v23, %v8171_v22  ;;  %v8260_v58 = vadd.s32 1, %v14650_v41 }
 0x79f   :  { %v8176_v37 = vadd.s32 127, %v8175_v1  ;;  %vm8101_vm3 = vcmp.lt.s32.totalorder %v14510_v61, 0  ;;  %vm8100_vm4 = vcmp.le.f32.partialorder %v8099_v4, 0.7853982  ;;  %v8185_v24 = vsub.s32 4, %v14609_v54 }
 0x7a0   :  { %v9281_v13 = vpop.eup %9280  ;;  %v8174_v63 = vor.u32 %v8173_v14, %v8172_v20  ;;  %vm8259_vm2 = vc.u32 %v14655_v0, %v14649_v6  ;;  %v8258_v4 = vadd.s32 %v14649_v6, %v14655_v0  ;;  %vm8191_vm9 = vweird.f32 %v14510_v61 }
 0x7a1   :  { %v9283_v10 = vpop.eup %9282  ;;  %v8095_v25 = vxor.u32 2147483648, %v9281_v13  ;;  %v8177_v26 = vshll.u32 %v8176_v37, 23  ;;  %v8261_v39 = vsel %vm8259_vm2, %v8260_v58, %v14650_v41  ;;  %v8186_v32 = vsel %vm8101_vm3, %v8185_v24, %v14609_v54 }
 0x7a2   :  { %v8092_v59 = vxor.u32 2147483648, %v9283_v10  ;;  %v8181_v49 = vcvt.s32.f32 %v8174_v63  ;;  %v8262_v55 = vadd.s32 %v8261_v39, %v8257_v16  ;;  %v8188_v35 = vsel %vm8100_vm4, 0, %v8186_v32 }
 0x7a3   :  { %v8096_v2 = vsel %vm8094_vm14, %v8095_v25, %v9283_v10  ;;  %v8178_v33 = vor.u32 4788187, %v8177_v26  ;;  %v8192_v8 = vand.u32 3, %v8188_v35  ;;  %vm8204_vm10 = vcmp.lt.s32.totalorder %v14580_v7, 0 }
 0x7a4   :  { %v8093_v29 = vsel %vm8091_vm15, %v9281_v13, %v8092_v59  ;;  %v8263_v21 = vadd.s32 536870912, %v8262_v55  ;;  %vm8203_vm11 = vcmp.le.f32.partialorder %v8202_v42, 0.7853982  ;;  %vm8294_vm15 = vweird.f32 %v14580_v7 }
 0x7a5   :  { %v8097_v44 = vsel %vm8090_vm0, %v8093_v29, %v8096_v2  ;;  %v8179_v31 = vand.u32 2147483647, %v8178_v33  ;;  %vm8197_vm6 = vcmp.eq.s32.totalorder %v8192_v8, 2  ;;  %vm8194_vm7 = vcmp.eq.s32.totalorder %v8192_v8, 0 }
 0x7a6   :  { %v8098_v9 = vsel %vm8088_vm1, nan, %v8097_v44  ;;  %v8264_v15 = vshrl.u32 %v8263_v21, 30  ;;  %vm8193_vm8 = vcmp.lt.s32.totalorder %v8192_v8, 2 }
 0x7a7   :  { %8306 = vst [vmem:[#allocation5 + $0x8] sm:$0xff] %v8098_v9  ;;  %v8182_v28 = vmul.f32 %v8181_v49, %v8179_v31 }
 0x7a8   :  { %v8265_v60 = vshll.u32 %v8264_v15, 30  ;;  %v8288_v19 = vsub.s32 4, %v8264_v15 }
 0x7a9   :  { %v8183_v18 = vxor.u32 2147483648, %v8182_v28 }
 0x7aa   :  { %v8266_v57 = vsub.s32 %v8262_v55, %v8265_v60 }
 0x7ab   :  { %v8184_v51 = vsel %vm8101_vm3, %v8183_v18, %v8182_v28 }
 0x7ac   :  { %v8187_v11 = vsel %vm8100_vm4, %v14510_v61, %v8184_v51  ;;  %v8268_v3 = vsub.s32 0, %v8266_v57  ;;  %v8289_v61 = vsel %vm8204_vm10, %v8288_v19, %v8264_v15 }
 0x7ad   :  { %9284 = vcosq.f32 %v8187_v11  ;;  %v8291_v0 = vsel %vm8203_vm11, 0, %v8289_v61 }
 0x7ae   :  { %9286 = vsinq.f32 %v8187_v11  ;;  %v8641_v43 = vmin.u32 %v8268_v3, %v8266_v57  ;;  %v8295_v13 = vand.u32 3, %v8291_v0 }
 0x7b0   :  { %v8270_v62 = vclz %v8641_v43  ;;  %vm8300_vm12 = vcmp.eq.s32.totalorder %v8295_v13, 2  ;;  %vm8297_vm13 = vcmp.eq.s32.totalorder %v8295_v13, 0  ;;  %vm8296_vm14 = vcmp.lt.s32.totalorder %v8295_v13, 2 }
 0x7b2   :  { %v8642_v56 = vadd.s32 4294967294, %v8270_v62 }
 0x7b4   :  { %vm8643_vm5 = vcmp.lt.s32.totalorder %v8642_v56, 0 }
 0x7b5   :  { %v8273_v30 = vsel %vm8643_vm5, 0, %v8642_v56 }
 0x7b6   :  { %v8274_v34 = vsub.s32 32, %v8273_v30  ;;  %v8275_v36 = vshll.u32 %v8266_v57, %v8273_v30  ;;  %v8278_v45 = vsub.s32 4294967266, %v8273_v30 }
 0x7b8   :  { %v8276_v50 = vshrl.u32 %v8258_v4, %v8274_v34  ;;  %v8279_v27 = vadd.s32 127, %v8278_v45 }
 0x7ba   :  { %v9285_v52 = vpop.eup %9284  ;;  %v8277_v38 = vor.u32 %v8276_v50, %v8275_v36  ;;  %v8280_v5 = vshll.u32 %v8279_v27, 23 }
 0x7bb   :  { %v9287_v23 = vpop.eup %9286  ;;  %v8198_v17 = vxor.u32 2147483648, %v9285_v52 }
 0x7bc   :  { %v8195_v54 = vxor.u32 2147483648, %v9287_v23  ;;  %v8281_v53 = vor.u32 4788187, %v8280_v5  ;;  %v8284_v40 = vcvt.s32.f32 %v8277_v38 }
 0x7bd   :  { %v8199_v46 = vsel %vm8197_vm6, %v8198_v17, %v9287_v23 }
 0x7be   :  { %v8196_v48 = vsel %vm8194_vm7, %v9285_v52, %v8195_v54  ;;  %v8282_v41 = vand.u32 2147483647, %v8281_v53 }
 0x7bf   :  { %v8200_v12 = vsel %vm8193_vm8, %v8196_v48, %v8199_v46 }
 0x7c0   :  { %v8201_v6 = vsel %vm8191_vm9, nan, %v8200_v12  ;;  %v8285_v22 = vmul.f32 %v8284_v40, %v8282_v41 }
 0x7c1   :  { %8307 = vst [vmem:[#allocation5 + $0x10] sm:$0xff] %v8201_v6 }
 0x7c2   :  { %v8286_v20 = vxor.u32 2147483648, %v8285_v22 }
 0x7c4   :  { %v8287_v1 = vsel %vm8204_vm10, %v8286_v20, %v8285_v22 }
 0x7c5   :  { %v8290_v47 = vsel %vm8203_vm11, %v14580_v7, %v8287_v1 }
 0x7c6   :  { %9288 = vcosq.f32 %v8290_v47 }
 0x7c7   :  { %9290 = vsinq.f32 %v8290_v47 }
 0x7d3   :  { %v9289_v14 = vpop.eup %9288 }
 0x7d4   :  { %v9291_v37 = vpop.eup %9290  ;;  %v8301_v10 = vxor.u32 2147483648, %v9289_v14 }
 0x7d5   :  { %v8298_v25 = vxor.u32 2147483648, %v9291_v37 }
 0x7d6   :  { %v8302_v42 = vsel %vm8300_vm12, %v8301_v10, %v9291_v37 }
 0x7d7   :  { %v8299_v16 = vsel %vm8297_vm13, %v9289_v14, %v8298_v25 }
 0x7d8   :  { %v8303_v58 = vsel %vm8296_vm14, %v8299_v16, %v8302_v42 }
 0x7d9   :  { %v8304_v59 = vsel %vm8294_vm15, nan, %v8303_v58 }
 0x7da   :  { %8308 = vst [vmem:[#allocation5 + $0x18] sm:$0xff] %v8304_v59 }
 0x7db   :  { %9323 = shalt.err (!%p9320_p9)
}
 0x7dc   :  { %8318 = dma.vmem_to_hbm [thread:$0]  %s8316_s11, 512, %s14678_s1, [#allocation4]  }
 0x7dd   :  { %9334 = dma.done.wait [#allocation4], 512  }
 0x7de   :  { %9335 = vsyncadd [#allocation4], 4294966784 }
 0x7df   :  { %8322 = vsyncpa [#allocation3], 1 }
 0x7e0   :  { %8323 = vsyncpa [#allocation4], 1 }

</bundles_post_ra>
